<compile_context>
chip_gen: v5e
topology: v5e:2x2
jax: 0.10.0
libtpu: 0.0.40
codegen_flags: <defaults>
</compile_context>

<pallas_src>
import jax
import jax.numpy as jnp
from jax.experimental import pallas as pl
from jax.experimental.pallas import tpu as pltpu

_LANES = 128


def _round_up(x, m):
    return ((x + m - 1) // m) * m


def _tile_rows(m, cap=1024):
    """Row tile (multiple of 8, <= cap) and the padded row count it implies."""
    tm = min(cap, _round_up(m, 8))
    return tm, _round_up(m, tm)


# ----------------------------------------------------------------------------
# Pallas kernels
# ----------------------------------------------------------------------------
def _conv_relu_kernel(a_ref, w_ref, b_ref, o_ref):
    # a: (tm, Kp) bf16, w: (Kp, Cp) bf16, b: (1, Cp) f32, o: (tm, Cp).
    acc = jnp.dot(a_ref[...], w_ref[...], preferred_element_type=jnp.float32)
    o_ref[...] = jnp.maximum(acc + b_ref[...], 0.0).astype(o_ref.dtype)


def _conv_relu_pool_kernel(a_ref, w_ref, b_ref, o_ref):
    # a: (4, tm, Kp) -- the 4 corners of every 2x2 pooling window.
    # One matmul over all corners (single MXU weight push / drain), then
    # max over the corner axis; relu(max_c(x_c@W)+b) == max_c relu(x_c@W+b).
    four, tm, kp = a_ref.shape
    cp = w_ref.shape[1]
    w = w_ref[...]
    if tm % 8 == 0:                       # layout-trivial leading-dim merge
        s = jnp.dot(a_ref[...].reshape(four * tm, kp), w,
                    preferred_element_type=jnp.float32)
        s = jnp.max(s.reshape(four, tm, cp), axis=0)
    else:                                 # tiny-M fallback (no clean merge)
        s = jnp.dot(a_ref[0], w, preferred_element_type=jnp.float32)
        for c in range(1, four):
            s = jnp.maximum(s, jnp.dot(a_ref[c], w,
                                       preferred_element_type=jnp.float32))
    o_ref[...] = jnp.maximum(s + b_ref[...], 0.0).astype(o_ref.dtype)


def _tail_kernel(a3_ref, w3_ref, b3_ref, w4_ref, b4_ref, w5_ref, b5_ref,
                 o_ref, h3_ref):
    """Fused conv3(5x5,s2,p2)+ReLU+pool2 -> conv4(3x3)+ReLU -> conv5(3x3)+ReLU+pool2.

    Valid when conv3's pooled output is 2x2 spatial; conv4/conv5 are applied
    as precomputed 'big matrices' over the flattened 2x2 map, so all
    intermediates live in VMEM / vregs.
      a3: (4 corners, 4*N, Kp3) bf16, rows ordered (pixel q, batch n)
      w3: (Kp3, 128) bf16      b3: (1, 128)  f32
      w4: (4, 128, 512) bf16   b4: (1, 512)  f32   (per-input-pixel blocks)
      w5: (512, 512)  bf16     b5: (1, 512)  f32
      o : (N, 128) f32 (first 64 channels real)
      h3: (4*N, 128) bf16 VMEM scratch
    """
    four, m3, kp3 = a3_ref.shape
    n = m3 // 4
    cp = w3_ref.shape[1]
    w3 = w3_ref[...]

    # ---- conv3 + ReLU + 2x2 maxpool (corner max fused into the epilogue) ----
    if m3 % 8 == 0:
        s = jnp.dot(a3_ref[...].reshape(four * m3, kp3), w3,
                    preferred_element_type=jnp.float32)
        s = jnp.max(s.reshape(four, m3, cp), axis=0)
    else:
        s = jnp.dot(a3_ref[0], w3, preferred_element_type=jnp.float32)
        for c in range(1, four):
            s = jnp.maximum(s, jnp.dot(a3_ref[c], w3,
                                       preferred_element_type=jnp.float32))
    h3_ref[...] = jnp.maximum(s + b3_ref[...], 0.0).astype(h3_ref.dtype)

    # ---- conv4 (3x3, pad 1, on the 2x2 map) + ReLU ----
    # h4[n, p*128+cout] = relu( sum_q h3[(q,n)] @ W4[q->p] + b4 )
    acc4 = jnp.zeros((n, 4 * cp), jnp.float32)
    for q in range(4):
        hq = h3_ref[pl.ds(q * n, n), :]                      # (n, 128) bf16
        acc4 = acc4 + jnp.dot(hq, w4_ref[q],
                              preferred_element_type=jnp.float32)
    h4 = jnp.maximum(acc4 + b4_ref[...], 0.0).astype(jnp.bfloat16)   # (n, 512)

    # ---- conv5 + ReLU + 2x2 maxpool (max over the 4 pixel column blocks) ----
    y5 = jnp.dot(h4, w5_ref[...], preferred_element_type=jnp.float32)
    y5 = jnp.maximum(y5 + b5_ref[...], 0.0)                          # (n, 512)
    p = jnp.maximum(jnp.maximum(y5[:, 0:cp], y5[:, cp:2 * cp]),
                    jnp.maximum(y5[:, 2 * cp:3 * cp], y5[:, 3 * cp:4 * cp]))
    o_ref[...] = p.astype(o_ref.dtype)                               # (n, 128)


# ----------------------------------------------------------------------------
# im2col glue (plain XLA, all in bf16)
# ----------------------------------------------------------------------------
def _im2col(x, k, stride, pad):
    """x: (N,H,W,C) -> (N,OH,OW,k*k*C); patch flattened (kh, kw, cin)."""
    N, H, W, C = x.shape
    xp = jnp.pad(x, ((0, 0), (pad, pad), (pad, pad), (0, 0)))
    OH = (H + 2 * pad - k) // stride + 1
    OW = (W + 2 * pad - k) // stride + 1
    patches = [xp[:, i:i + stride * OH:stride, j:j + stride * OW:stride, :]
               for i in range(k) for j in range(k)]
    cols = jnp.stack(patches, axis=3)                  # (N,OH,OW,k*k,C)
    return cols.reshape(N, OH, OW, k * k * C), OH, OW


def _im2col_pooled(x, k, stride, pad):
    """im2col for conv(stride) + MaxPool2d(2,2): emits the 4 pooling-corner
    planes directly (stride' = 2*stride with per-corner offsets), so no HBM
    transpose is needed to regroup pooling partners.
    Returns (4, N, PH, PW, k*k*C), PH, PW.  Corner index = 2*dy + dx."""
    N, H, W, C = x.shape
    xp = jnp.pad(x, ((0, 0), (pad, pad), (pad, pad), (0, 0)))
    OH = (H + 2 * pad - k) // stride + 1
    OW = (W + 2 * pad - k) // stride + 1
    PH, PW = OH // 2, OW // 2                          # floor == nn.MaxPool2d(2,2)
    s2 = 2 * stride
    corners = []
    for dy in range(2):
        for dx in range(2):
            oy, ox = stride * dy, stride * dx
            patches = [xp[:, i + oy:i + oy + s2 * PH:s2,
                            j + ox:j + ox + s2 * PW:s2, :]
                       for i in range(k) for j in range(k)]
            c = jnp.stack(patches, axis=3)             # (N,PH,PW,k*k,C)
            corners.append(c.reshape(N, PH, PW, k * k * C))
    return jnp.stack(corners, axis=0), PH, PW


# ----------------------------------------------------------------------------
# Conv layer wrapper (one pallas_call per layer)
# ----------------------------------------------------------------------------
def conv2d_relu(x, w, b, stride, pad, pool, out_dtype=jnp.bfloat16):
    """Conv2d (PyTorch semantics) + ReLU [+ MaxPool2d(2,2)] in one Pallas call.

    x: (N,H,W,Cin) NHWC; w: (Cout,Cin,k,k); b: (Cout,). Returns NHWC out_dtype.
    """
    x = x.astype(jnp.bfloat16)
    N = x.shape[0]
    Cout, Cin, k, _ = w.shape
    K = k * k * Cin
    Kp = _round_up(K, _LANES)        # lane-dense K
    Cp = _round_up(Cout, _LANES)     # lane-dense output (no masked vst)

    w_flat = jnp.transpose(w, (2, 3, 1, 0)).reshape(K, Cout)
    w_flat = jnp.pad(w_flat, ((0, Kp - K), (0, Cp - Cout))).astype(jnp.bfloat16)
    b_pad = jnp.pad(b, (0, Cp - Cout)).reshape(1, Cp).astype(jnp.float32)
    cparams = pltpu.CompilerParams(dimension_semantics=("parallel",))

    if pool:
        a5, PH, PW = _im2col_pooled(x, k, stride, pad)     # (4,N,PH,PW,K)
        M = N * PH * PW
        a = a5.reshape(4, M, K)
        a = jnp.pad(a, ((0, 0), (0, 0), (0, Kp - K)))
        tm, Mp = _tile_rows(M)
        if Mp > M:
            a = jnp.pad(a, ((0, 0), (0, Mp - M), (0, 0)))
        out = pl.pallas_call(
            _conv_relu_pool_kernel,
            out_shape=jax.ShapeDtypeStruct((Mp, Cp), out_dtype),
            grid=(Mp // tm,),
            in_specs=[pl.BlockSpec((4, tm, Kp), lambda i: (0, i, 0)),
                      pl.BlockSpec((Kp, Cp), lambda i: (0, 0)),
                      pl.BlockSpec((1, Cp), lambda i: (0, 0))],
            out_specs=pl.BlockSpec((tm, Cp), lambda i: (i, 0)),
            compiler_params=cparams,
        )(a, w_flat, b_pad)
        return out[:M].reshape(N, PH, PW, Cp)[..., :Cout]

    cols, OH, OW = _im2col(x, k, stride, pad)
    M = N * OH * OW
    a = jnp.pad(cols.reshape(M, K), ((0, 0), (0, Kp - K)))
    tm, Mp = _tile_rows(M)
    if Mp > M:
        a = jnp.pad(a, ((0, Mp - M), (0, 0)))
    out = pl.pallas_call(
        _conv_relu_kernel,
        out_shape=jax.ShapeDtypeStruct((Mp, Cp), out_dtype),
        grid=(Mp // tm,),
        in_specs=[pl.BlockSpec((tm, Kp), lambda i: (i, 0)),
                  pl.BlockSpec((Kp, Cp), lambda i: (0, 0)),
                  pl.BlockSpec((1, Cp), lambda i: (0, 0))],
        out_specs=pl.BlockSpec((tm, Cp), lambda i: (i, 0)),
        compiler_params=cparams,
    )(a, w_flat, b_pad)
    return out[:M].reshape(N, OH, OW, Cp)[..., :Cout]


# ----------------------------------------------------------------------------
# Fused tail (conv3 + conv4 + conv5) for the 2x2 pooled-map case
# ----------------------------------------------------------------------------
def _tiny_conv_matrix(w, cin_pad, cout_pad):
    """3x3 pad-1 conv on a 2x2 spatial map as per-input-pixel matrices.

    w: (Cout,Cin,3,3) -> (4, cin_pad, 4*cout_pad) bf16, where
    out[q][cin, p*cout_pad + cout] = w[cout, cin, u-i+1, v-j+1] with
    (u,v)=divmod(q,2) the input pixel and (i,j)=divmod(p,2) the output pixel.
    """
    Cout, Cin = w.shape[:2]
    qmats = []
    for q in range(4):
        u, v = divmod(q, 2)
        pblocks = []
        for p in range(4):
            i, j = divmod(p, 2)
            di, dj = u - i + 1, v - j + 1
            if 0 <= di <= 2 and 0 <= dj <= 2:
                blk = jnp.transpose(w[:, :, di, dj])          # (Cin, Cout)
                blk = jnp.pad(blk, ((0, cin_pad - Cin), (0, cout_pad - Cout)))
            else:
                blk = jnp.zeros((cin_pad, cout_pad), w.dtype)
            pblocks.append(blk)
        qmats.append(jnp.concatenate(pblocks, axis=1))        # (cin_pad, 4*cout_pad)
    return jnp.stack(qmats, axis=0).astype(jnp.bfloat16)


def _tiny_bias(b, cout_pad):
    bp = jnp.pad(b, (0, cout_pad - b.shape[0]))
    return jnp.tile(bp, 4).reshape(1, 4 * cout_pad).astype(jnp.float32)


def _fused_tail(x, p3, p4, p5):
    """Layers 3..5 in one pallas_call; returns (N, 64) float32."""
    w3, b3 = p3
    w4, b4 = p4
    w5, b5 = p5
    N = x.shape[0]
    C3, Cin3 = w3.shape[0], w3.shape[1]
    K3 = 25 * Cin3
    Kp3 = _round_up(K3, _LANES)
    Cp = _LANES

    a5, PH, PW = _im2col_pooled(x.astype(jnp.bfloat16), 5, 2, 2)
    assert PH == 2 and PW == 2
    # rows pixel-major (q, n): the kernel slices per-pixel batch blocks.
    a3 = jnp.transpose(a5.reshape(4, N, 4, K3), (0, 2, 1, 3)).reshape(4, 4 * N, K3)
    a3 = jnp.pad(a3, ((0, 0), (0, 0), (0, Kp3 - K3)))

    w3m = jnp.transpose(w3, (2, 3, 1, 0)).reshape(K3, C3)
    w3m = jnp.pad(w3m, ((0, Kp3 - K3), (0, Cp - C3))).astype(jnp.bfloat16)
    b3m = jnp.pad(b3, (0, Cp - C3)).reshape(1, Cp).astype(jnp.float32)

    w4m = _tiny_conv_matrix(w4, Cp, Cp)                        # (4,128,512)
    b4m = _tiny_bias(b4, Cp)                                   # (1,512)
    w5m = _tiny_conv_matrix(w5, Cp, Cp).reshape(4 * Cp, 4 * Cp)  # (512,512)
    b5m = _tiny_bias(b5, Cp)                                   # (1,512)

    out = pl.pallas_call(
        _tail_kernel,
        out_shape=jax.ShapeDtypeStruct((N, Cp), jnp.float32),
        grid=(1,),
        in_specs=[
            pl.BlockSpec((4, 4 * N, Kp3), lambda i: (0, 0, 0)),
            pl.BlockSpec((Kp3, Cp), lambda i: (0, 0)),
            pl.BlockSpec((1, Cp), lambda i: (0, 0)),
            pl.BlockSpec((4, Cp, 4 * Cp), lambda i: (0, 0, 0)),
            pl.BlockSpec((1, 4 * Cp), lambda i: (0, 0)),
            pl.BlockSpec((4 * Cp, 4 * Cp), lambda i: (0, 0)),
            pl.BlockSpec((1, 4 * Cp), lambda i: (0, 0)),
        ],
        out_specs=pl.BlockSpec((N, Cp), lambda i: (0, 0)),
        scratch_shapes=[pltpu.VMEM((4 * N, Cp), jnp.bfloat16)],
        compiler_params=pltpu.CompilerParams(
            dimension_semantics=("arbitrary",)),
    )(a3, w3m, b3m, w4m, b4m, w5m, b5m)
    return out[:, :w5.shape[0]]


# ----------------------------------------------------------------------------
# CNNBackbone forward
# ----------------------------------------------------------------------------
_LAYER_CFGS = [
    # (cin, cout, k, stride, pad, maxpool_after)
    (3, 24, 5, 2, 2, True),
    (24, 36, 5, 2, 2, True),
    (36, 48, 5, 2, 2, True),
    (48, 64, 3, 1, 1, False),
    (64, 64, 3, 1, 1, True),
]


def init_params(key):
    """Deterministic PyTorch-default-style (kaiming-uniform-ish) init."""
    params = []
    for idx, (cin, cout, k, _, _, _) in enumerate(_LAYER_CFGS):
        kw, kb = jax.random.split(jax.random.fold_in(key, idx))
        fan_in = cin * k * k
        bound = 1.0 / (fan_in ** 0.5)
        w = jax.random.uniform(kw, (cout, cin, k, k), jnp.float32,
                               minval=-bound, maxval=bound)
        b = jax.random.uniform(kb, (cout,), jnp.float32,
                               minval=-bound, maxval=bound)
        params.append((w, b))
    return params


def cnn_backbone(x_nchw, params):
    """Forward pass of CNNBackbone. Input/output are NCHW like PyTorch."""
    x = jnp.transpose(x_nchw, (0, 2, 3, 1)).astype(jnp.bfloat16)   # NCHW -> NHWC bf16

    # Big layers: one fused conv+relu+pool pallas_call each, bf16 outputs.
    for li in range(2):
        w, b = params[li]
        _, _, _, stride, pad, pool = _LAYER_CFGS[li]
        x = conv2d_relu(x, w, b, stride, pad, pool, out_dtype=jnp.bfloat16)

    # Tiny tail (conv3/conv4/conv5): fused into one VMEM-resident pallas_call
    # whenever conv3's pooled map is 2x2 (true for the PilotNet geometry).
    N, H3, W3, _ = x.shape
    OH3 = (H3 + 4 - 5) // 2 + 1
    OW3 = (W3 + 4 - 5) // 2 + 1
    if OH3 // 2 == 2 and OW3 // 2 == 2 and N <= 128:
        y = _fused_tail(x, params[2], params[3], params[4]).reshape(N, 1, 1, -1)
    else:
        # TODO(synk): generic (non-2x2) tail falls back to per-layer kernels.
        for li in range(2, 5):
            w, b = params[li]
            _, _, _, stride, pad, pool = _LAYER_CFGS[li]
            dt = jnp.float32 if li == 4 else jnp.bfloat16
            x = conv2d_relu(x, w, b, stride, pad, pool, out_dtype=dt)
        y = x
    return jnp.transpose(y, (0, 3, 1, 2)).astype(jnp.float32)       # NHWC -> NCHW


# ----------------------------------------------------------------------------
# Pure-JAX f32 reference (for a loose numerical sanity check)
# ----------------------------------------------------------------------------
def _reference_forward(x_nchw, params):
    x = x_nchw
    for (w, b), (_, _, _, stride, pad, pool) in zip(params, _LAYER_CFGS):
        x = jax.lax.conv_general_dilated(
            x, w, window_strides=(stride, stride),
            padding=((pad, pad), (pad, pad)),
            dimension_numbers=("NCHW", "OIHW", "NCHW"))
        x = jnp.maximum(x + b.reshape(1, -1, 1, 1), 0.0)
        if pool:
            x = jax.lax.reduce_window(x, -jnp.inf, jax.lax.max,
                                      (1, 1, 2, 2), (1, 1, 2, 2), "VALID")
    return x


# ----------------------------------------------------------------------------
if __name__ == "__main__":
    key = jax.random.PRNGKey(0)
    params = init_params(key)

    # Smallest spatial size that survives all 4 MaxPool stages cleanly is 128.
    x = jax.random.normal(jax.random.fold_in(key, 100),
                          (2, 3, 128, 128), dtype=jnp.float32)

    fwd = jax.jit(cnn_backbone)
    out = jax.block_until_ready(fwd(x, params))

    assert out.shape == (2, 64, 1, 1), out.shape
    assert out.dtype == jnp.float32

    ref = jax.block_until_ready(jax.jit(_reference_forward)(x, params))
    max_err = float(jnp.max(jnp.abs(out - ref)))
    # bf16 MXU operands -> loose tolerance vs the f32 reference.
    assert jnp.allclose(out, ref, rtol=0.1, atol=0.15), f"max abs err {max_err}"

    print("KERNEL_OK")
</pallas_src>

<mosaic_0001>
module attributes {stable_mosaic.version = 11 : i64} {
  func.func @_conv_relu_pool_kernel(%arg0: i32, %arg1: memref<4x1024x128xbf16, #tpu.memory_space<vmem>>, %arg2: memref<128x128xbf16, #tpu.memory_space<vmem>>, %arg3: memref<1x128xf32, #tpu.memory_space<vmem>>, %arg4: memref<1024x128xbf16, #tpu.memory_space<vmem>>) attributes {dimension_semantics = [#tpu.dimension_semantics<parallel>], iteration_bounds = array<i64: 2>, scalar_prefetch = 0 : i64, scratch_operands = 0 : i64, tpu.core_type = #tpu.core_type<tc>, window_params = [{transform_indices = @transform_0, window_bounds = array<i64: 4, 1024, 128>}, {pipeline_mode = #tpu.pipeline_mode<synchronous>, transform_indices = @transform_1, window_bounds = array<i64: 128, 128>}, {pipeline_mode = #tpu.pipeline_mode<synchronous>, transform_indices = @transform_2, window_bounds = array<i64: 1, 128>}, {transform_indices = @transform_3, window_bounds = array<i64: 1024, 128>}]} {
    %c0 = arith.constant 0 : index
    %c0_0 = arith.constant 0 : index
    %0 = vector.load %arg2[%c0, %c0_0] : memref<128x128xbf16, #tpu.memory_space<vmem>>, vector<128x128xbf16>
    %c0_1 = arith.constant 0 : index
    %c0_2 = arith.constant 0 : index
    %c0_3 = arith.constant 0 : index
    %1 = vector.load %arg1[%c0_1, %c0_2, %c0_3] : memref<4x1024x128xbf16, #tpu.memory_space<vmem>>, vector<4x1024x128xbf16>
    %2 = vector.shape_cast %1 : vector<4x1024x128xbf16> to vector<4096x128xbf16>
    %cst = arith.constant dense<0.000000e+00> : vector<4096x128xf32>
    %3 = tpu.matmul %2, %0, %cst {dimension_numbers = #tpu.dot_dimension_numbers<[1], [0], [0], [1], [0, 0, 1, 1], [], []>} : vector<4096x128xbf16>, vector<128x128xbf16>, vector<4096x128xf32> -> vector<4096x128xf32>
    %4 = vector.shape_cast %3 : vector<4096x128xf32> to vector<4x1024x128xf32>
    %cst_4 = arith.constant dense<0xFF800000> : vector<1024x128xf32>
    %5 = vector.multi_reduction <maximumf>, %4, %cst_4 [0] : vector<4x1024x128xf32> to vector<1024x128xf32>
    %c0_5 = arith.constant 0 : index
    %c0_6 = arith.constant 0 : index
    %6 = vector.load %arg3[%c0_5, %c0_6] : memref<1x128xf32, #tpu.memory_space<vmem>>, vector<1x128xf32>
    %7 = vector.broadcast %6 : vector<1x128xf32> to vector<1024x128xf32>
    %8 = arith.addf %5, %7 : vector<1024x128xf32>
    %cst_7 = arith.constant 0.000000e+00 : f32
    %9 = vector.broadcast %cst_7 : f32 to vector<1024x128xf32>
    %10 = arith.maximumf %8, %9 : vector<1024x128xf32>
    %11 = arith.truncf %10 : vector<1024x128xf32> to vector<1024x128xbf16>
    %c0_8 = arith.constant 0 : index
    %c0_9 = arith.constant 0 : index
    %12 = vector.load %arg4[%c0_8, %c0_9] : memref<1024x128xbf16, #tpu.memory_space<vmem>>, vector<1024x128xbf16>
    tpu.vector_store %arg4[%c0_8, %c0_9], %11 {strides = array<i32>} : memref<1024x128xbf16, #tpu.memory_space<vmem>>, vector<1024x128xbf16>,
    return
  }
  func.func @transform_0(%arg0: i32) -> (i32, i32, i32) {
    %c0_i32 = arith.constant 0 : i32
    %c0_i32_0 = arith.constant 0 : i32
    %c0_i32_1 = arith.constant 0 : i32
    return %c0_i32, %arg0, %c0_i32_0 : i32, i32, i32
  }
  func.func @transform_1(%arg0: i32) -> (i32, i32) {
    %c0_i32 = arith.constant 0 : i32
    %c0_i32_0 = arith.constant 0 : i32
    %c0_i32_1 = arith.constant 0 : i32
    return %c0_i32, %c0_i32_0 : i32, i32
  }
  func.func @transform_2(%arg0: i32) -> (i32, i32) {
    %c0_i32 = arith.constant 0 : i32
    %c0_i32_0 = arith.constant 0 : i32
    %c0_i32_1 = arith.constant 0 : i32
    return %c0_i32, %c0_i32_0 : i32, i32
  }
  func.func @transform_3(%arg0: i32) -> (i32, i32) {
    %c0_i32 = arith.constant 0 : i32
    %c0_i32_0 = arith.constant 0 : i32
    return %arg0, %c0_i32 : i32, i32
  }
}

module attributes {stable_mosaic.version = 11 : i64} {
  func.func @_conv_relu_pool_kernel(%arg0: i32, %arg1: memref<4x128x640xbf16, #tpu.memory_space<vmem>>, %arg2: memref<640x128xbf16, #tpu.memory_space<vmem>>, %arg3: memref<1x128xf32, #tpu.memory_space<vmem>>, %arg4: memref<128x128xbf16, #tpu.memory_space<vmem>>) attributes {dimension_semantics = [#tpu.dimension_semantics<parallel>], iteration_bounds = array<i64: 1>, scalar_prefetch = 0 : i64, scratch_operands = 0 : i64, tpu.core_type = #tpu.core_type<tc>, window_params = [{transform_indices = @transform_0, window_bounds = array<i64: 4, 128, 640>}, {pipeline_mode = #tpu.pipeline_mode<synchronous>, transform_indices = @transform_1, window_bounds = array<i64: 640, 128>}, {pipeline_mode = #tpu.pipeline_mode<synchronous>, transform_indices = @transform_2, window_bounds = array<i64: 1, 128>}, {transform_indices = @transform_3, window_bounds = array<i64: 128, 128>}]} {
    %c0 = arith.constant 0 : index
    %c0_0 = arith.constant 0 : index
    %0 = vector.load %arg2[%c0, %c0_0] : memref<640x128xbf16, #tpu.memory_space<vmem>>, vector<640x128xbf16>
    %c0_1 = arith.constant 0 : index
    %c0_2 = arith.constant 0 : index
    %c0_3 = arith.constant 0 : index
    %1 = vector.load %arg1[%c0_1, %c0_2, %c0_3] : memref<4x128x640xbf16, #tpu.memory_space<vmem>>, vector<4x128x640xbf16>
    %2 = vector.shape_cast %1 : vector<4x128x640xbf16> to vector<512x640xbf16>
    %cst = arith.constant dense<0.000000e+00> : vector<512x128xf32>
    %3 = tpu.matmul %2, %0, %cst {dimension_numbers = #tpu.dot_dimension_numbers<[1], [0], [0], [1], [0, 0, 1, 1], [], []>} : vector<512x640xbf16>, vector<640x128xbf16>, vector<512x128xf32> -> vector<512x128xf32>
    %4 = vector.shape_cast %3 : vector<512x128xf32> to vector<4x128x128xf32>
    %cst_4 = arith.constant dense<0xFF800000> : vector<128x128xf32>
    %5 = vector.multi_reduction <maximumf>, %4, %cst_4 [0] : vector<4x128x128xf32> to vector<128x128xf32>
    %c0_5 = arith.constant 0 : index
    %c0_6 = arith.constant 0 : index
    %6 = vector.load %arg3[%c0_5, %c0_6] : memref<1x128xf32, #tpu.memory_space<vmem>>, vector<1x128xf32>
    %7 = vector.broadcast %6 : vector<1x128xf32> to vector<128x128xf32>
    %8 = arith.addf %5, %7 : vector<128x128xf32>
    %cst_7 = arith.constant 0.000000e+00 : f32
    %9 = vector.broadcast %cst_7 : f32 to vector<128x128xf32>
    %10 = arith.maximumf %8, %9 : vector<128x128xf32>
    %11 = arith.truncf %10 : vector<128x128xf32> to vector<128x128xbf16>
    %c0_8 = arith.constant 0 : index
    %c0_9 = arith.constant 0 : index
    %12 = vector.load %arg4[%c0_8, %c0_9] : memref<128x128xbf16, #tpu.memory_space<vmem>>, vector<128x128xbf16>
    tpu.vector_store %arg4[%c0_8, %c0_9], %11 {strides = array<i32>} : memref<128x128xbf16, #tpu.memory_space<vmem>>, vector<128x128xbf16>,
    return
  }
  func.func @transform_0(%arg0: i32) -> (i32, i32, i32) {
    %c0_i32 = arith.constant 0 : i32
    %c0_i32_0 = arith.constant 0 : i32
    %c0_i32_1 = arith.constant 0 : i32
    return %c0_i32, %arg0, %c0_i32_0 : i32, i32, i32
  }
  func.func @transform_1(%arg0: i32) -> (i32, i32) {
    %c0_i32 = arith.constant 0 : i32
    %c0_i32_0 = arith.constant 0 : i32
    %c0_i32_1 = arith.constant 0 : i32
    return %c0_i32, %c0_i32_0 : i32, i32
  }
  func.func @transform_2(%arg0: i32) -> (i32, i32) {
    %c0_i32 = arith.constant 0 : i32
    %c0_i32_0 = arith.constant 0 : i32
    %c0_i32_1 = arith.constant 0 : i32
    return %c0_i32, %c0_i32_0 : i32, i32
  }
  func.func @transform_3(%arg0: i32) -> (i32, i32) {
    %c0_i32 = arith.constant 0 : i32
    %c0_i32_0 = arith.constant 0 : i32
    return %arg0, %c0_i32 : i32, i32
  }
}

module attributes {stable_mosaic.version = 11 : i64} {
  func.func @_tail_kernel(%arg0: i32, %arg1: memref<4x8x1024xbf16, #tpu.memory_space<vmem>>, %arg2: memref<1024x128xbf16, #tpu.memory_space<vmem>>, %arg3: memref<1x128xf32, #tpu.memory_space<vmem>>, %arg4: memref<4x128x512xbf16, #tpu.memory_space<vmem>>, %arg5: memref<1x512xf32, #tpu.memory_space<vmem>>, %arg6: memref<512x512xbf16, #tpu.memory_space<vmem>>, %arg7: memref<1x512xf32, #tpu.memory_space<vmem>>, %arg8: memref<2x128xf32, #tpu.memory_space<vmem>>, %arg9: memref<8x128xbf16, #tpu.memory_space<vmem>>) attributes {dimension_semantics = [#tpu.dimension_semantics<arbitrary>], iteration_bounds = array<i64: 1>, scalar_prefetch = 0 : i64, scratch_operands = 1 : i64, tpu.core_type = #tpu.core_type<tc>, window_params = [{pipeline_mode = #tpu.pipeline_mode<synchronous>, transform_indices = @transform_0, window_bounds = array<i64: 4, 8, 1024>}, {pipeline_mode = #tpu.pipeline_mode<synchronous>, transform_indices = @transform_1, window_bounds = array<i64: 1024, 128>}, {pipeline_mode = #tpu.pipeline_mode<synchronous>, transform_indices = @transform_2, window_bounds = array<i64: 1, 128>}, {pipeline_mode = #tpu.pipeline_mode<synchronous>, transform_indices = @transform_3, window_bounds = array<i64: 4, 128, 512>}, {pipeline_mode = #tpu.pipeline_mode<synchronous>, transform_indices = @transform_4, window_bounds = array<i64: 1, 512>}, {pipeline_mode = #tpu.pipeline_mode<synchronous>, transform_indices = @transform_5, window_bounds = array<i64: 512, 512>}, {pipeline_mode = #tpu.pipeline_mode<synchronous>, transform_indices = @transform_6, window_bounds = array<i64: 1, 512>}, {pipeline_mode = #tpu.pipeline_mode<synchronous>, transform_indices = @transform_7, window_bounds = array<i64: 2, 128>}]} {
    %c0 = arith.constant 0 : index
    %c0_0 = arith.constant 0 : index
    %0 = vector.load %arg2[%c0, %c0_0] : memref<1024x128xbf16, #tpu.memory_space<vmem>>, vector<1024x128xbf16>
    %c0_1 = arith.constant 0 : index
    %c0_2 = arith.constant 0 : index
    %c0_3 = arith.constant 0 : index
    %1 = vector.load %arg1[%c0_1, %c0_2, %c0_3] : memref<4x8x1024xbf16, #tpu.memory_space<vmem>>, vector<4x8x1024xbf16>
    %2 = vector.shape_cast %1 : vector<4x8x1024xbf16> to vector<32x1024xbf16>
    %cst = arith.constant dense<0.000000e+00> : vector<32x128xf32>
    %3 = tpu.matmul %2, %0, %cst {dimension_numbers = #tpu.dot_dimension_numbers<[1], [0], [0], [1], [0, 0, 1, 1], [], []>} : vector<32x1024xbf16>, vector<1024x128xbf16>, vector<32x128xf32> -> vector<32x128xf32>
    %4 = vector.shape_cast %3 : vector<32x128xf32> to vector<4x8x128xf32>
    %cst_4 = arith.constant dense<0xFF800000> : vector<8x128xf32>
    %5 = vector.multi_reduction <maximumf>, %4, %cst_4 [0] : vector<4x8x128xf32> to vector<8x128xf32>
    %c0_5 = arith.constant 0 : index
    %c0_6 = arith.constant 0 : index
    %6 = vector.load %arg3[%c0_5, %c0_6] : memref<1x128xf32, #tpu.memory_space<vmem>>, vector<1x128xf32>
    %7 = vector.broadcast %6 : vector<1x128xf32> to vector<8x128xf32>
    %8 = arith.addf %5, %7 : vector<8x128xf32>
    %cst_7 = arith.constant 0.000000e+00 : f32
    %9 = vector.broadcast %cst_7 : f32 to vector<8x128xf32>
    %10 = arith.maximumf %8, %9 : vector<8x128xf32>
    %11 = arith.truncf %10 : vector<8x128xf32> to vector<8x128xbf16>
    %c0_8 = arith.constant 0 : index
    %c0_9 = arith.constant 0 : index
    %12 = vector.load %arg9[%c0_8, %c0_9] : memref<8x128xbf16, #tpu.memory_space<vmem>>, vector<8x128xbf16>
    tpu.vector_store %arg9[%c0_8, %c0_9], %11 {strides = array<i32>} : memref<8x128xbf16, #tpu.memory_space<vmem>>, vector<8x128xbf16>,
    %cst_10 = arith.constant 0.000000e+00 : f32
    %13 = vector.broadcast %cst_10 : f32 to vector<2x512xf32>
    %c0_11 = arith.constant 0 : index
    %c0_12 = arith.constant 0 : index
    %14 = vector.load %arg9[%c0_11, %c0_12] : memref<8x128xbf16, #tpu.memory_space<vmem>>, vector<2x128xbf16>
    %c0_13 = arith.constant 0 : index
    %c0_14 = arith.constant 0 : index
    %c0_15 = arith.constant 0 : index
    %15 = vector.load %arg4[%c0_13, %c0_14, %c0_15] : memref<4x128x512xbf16, #tpu.memory_space<vmem>>, vector<1x128x512xbf16>
    %16 = vector.shape_cast %15 : vector<1x128x512xbf16> to vector<128x512xbf16>
    %cst_16 = arith.constant dense<0.000000e+00> : vector<2x512xf32>
    %17 = tpu.matmul %14, %16, %cst_16 {dimension_numbers = #tpu.dot_dimension_numbers<[1], [0], [0], [1], [0, 0, 1, 1], [], []>} : vector<2x128xbf16>, vector<128x512xbf16>, vector<2x512xf32> -> vector<2x512xf32>
    %18 = arith.addf %13, %17 : vector<2x512xf32>
    %c2 = arith.constant 2 : index
    %c0_17 = arith.constant 0 : index
    %19 = vector.load %arg9[%c2, %c0_17] : memref<8x128xbf16, #tpu.memory_space<vmem>>, vector<2x128xbf16>
    %c1 = arith.constant 1 : index
    %c0_18 = arith.constant 0 : index
    %c0_19 = arith.constant 0 : index
    %20 = vector.load %arg4[%c1, %c0_18, %c0_19] : memref<4x128x512xbf16, #tpu.memory_space<vmem>>, vector<1x128x512xbf16>
    %21 = vector.shape_cast %20 : vector<1x128x512xbf16> to vector<128x512xbf16>
    %cst_20 = arith.constant dense<0.000000e+00> : vector<2x512xf32>
    %22 = tpu.matmul %19, %21, %cst_20 {dimension_numbers = #tpu.dot_dimension_numbers<[1], [0], [0], [1], [0, 0, 1, 1], [], []>} : vector<2x128xbf16>, vector<128x512xbf16>, vector<2x512xf32> -> vector<2x512xf32>
    %23 = arith.addf %18, %22 : vector<2x512xf32>
    %c4 = arith.constant 4 : index
    %c0_21 = arith.constant 0 : index
    %24 = vector.load %arg9[%c4, %c0_21] : memref<8x128xbf16, #tpu.memory_space<vmem>>, vector<2x128xbf16>
    %c2_22 = arith.constant 2 : index
    %c0_23 = arith.constant 0 : index
    %c0_24 = arith.constant 0 : index
    %25 = vector.load %arg4[%c2_22, %c0_23, %c0_24] : memref<4x128x512xbf16, #tpu.memory_space<vmem>>, vector<1x128x512xbf16>
    %26 = vector.shape_cast %25 : vector<1x128x512xbf16> to vector<128x512xbf16>
    %cst_25 = arith.constant dense<0.000000e+00> : vector<2x512xf32>
    %27 = tpu.matmul %24, %26, %cst_25 {dimension_numbers = #tpu.dot_dimension_numbers<[1], [0], [0], [1], [0, 0, 1, 1], [], []>} : vector<2x128xbf16>, vector<128x512xbf16>, vector<2x512xf32> -> vector<2x512xf32>
    %28 = arith.addf %23, %27 : vector<2x512xf32>
    %c6 = arith.constant 6 : index
    %c0_26 = arith.constant 0 : index
    %29 = vector.load %arg9[%c6, %c0_26] : memref<8x128xbf16, #tpu.memory_space<vmem>>, vector<2x128xbf16>
    %c3 = arith.constant 3 : index
    %c0_27 = arith.constant 0 : index
    %c0_28 = arith.constant 0 : index
    %30 = vector.load %arg4[%c3, %c0_27, %c0_28] : memref<4x128x512xbf16, #tpu.memory_space<vmem>>, vector<1x128x512xbf16>
    %31 = vector.shape_cast %30 : vector<1x128x512xbf16> to vector<128x512xbf16>
    %cst_29 = arith.constant dense<0.000000e+00> : vector<2x512xf32>
    %32 = tpu.matmul %29, %31, %cst_29 {dimension_numbers = #tpu.dot_dimension_numbers<[1], [0], [0], [1], [0, 0, 1, 1], [], []>} : vector<2x128xbf16>, vector<128x512xbf16>, vector<2x512xf32> -> vector<2x512xf32>
    %33 = arith.addf %28, %32 : vector<2x512xf32>
    %c0_30 = arith.constant 0 : index
    %c0_31 = arith.constant 0 : index
    %34 = vector.load %arg5[%c0_30, %c0_31] : memref<1x512xf32, #tpu.memory_space<vmem>>, vector<1x512xf32>
    %35 = vector.broadcast %34 : vector<1x512xf32> to vector<2x512xf32>
    %36 = arith.addf %33, %35 : vector<2x512xf32>
    %cst_32 = arith.constant 0.000000e+00 : f32
    %37 = vector.broadcast %cst_32 : f32 to vector<2x512xf32>
    %38 = arith.maximumf %36, %37 : vector<2x512xf32>
    %39 = arith.truncf %38 : vector<2x512xf32> to vector<2x512xbf16>
    %c0_33 = arith.constant 0 : index
    %c0_34 = arith.constant 0 : index
    %40 = vector.load %arg6[%c0_33, %c0_34] : memref<512x512xbf16, #tpu.memory_space<vmem>>, vector<512x512xbf16>
    %cst_35 = arith.constant dense<0.000000e+00> : vector<2x512xf32>
    %41 = tpu.matmul %39, %40, %cst_35 {dimension_numbers = #tpu.dot_dimension_numbers<[1], [0], [0], [1], [0, 0, 1, 1], [], []>} : vector<2x512xbf16>, vector<512x512xbf16>, vector<2x512xf32> -> vector<2x512xf32>
    %c0_36 = arith.constant 0 : index
    %c0_37 = arith.constant 0 : index
    %42 = vector.load %arg7[%c0_36, %c0_37] : memref<1x512xf32, #tpu.memory_space<vmem>>, vector<1x512xf32>
    %43 = vector.broadcast %42 : vector<1x512xf32> to vector<2x512xf32>
    %44 = arith.addf %41, %43 : vector<2x512xf32>
    %cst_38 = arith.constant 0.000000e+00 : f32
    %45 = vector.broadcast %cst_38 : f32 to vector<2x512xf32>
    %46 = arith.maximumf %44, %45 : vector<2x512xf32>
    %47 = vector.extract_strided_slice %46 {offsets = [0, 0], sizes = [2, 128], strides = [1, 1]} : vector<2x512xf32> to vector<2x128xf32>
    %48 = vector.extract_strided_slice %46 {offsets = [0, 128], sizes = [2, 128], strides = [1, 1]} : vector<2x512xf32> to vector<2x128xf32>
    %49 = arith.maximumf %47, %48 : vector<2x128xf32>
    %50 = vector.extract_strided_slice %46 {offsets = [0, 256], sizes = [2, 128], strides = [1, 1]} : vector<2x512xf32> to vector<2x128xf32>
    %51 = vector.extract_strided_slice %46 {offsets = [0, 384], sizes = [2, 128], strides = [1, 1]} : vector<2x512xf32> to vector<2x128xf32>
    %52 = arith.maximumf %50, %51 : vector<2x128xf32>
    %53 = arith.maximumf %49, %52 : vector<2x128xf32>
    %c0_39 = arith.constant 0 : index
    %c0_40 = arith.constant 0 : index
    %54 = vector.load %arg8[%c0_39, %c0_40] : memref<2x128xf32, #tpu.memory_space<vmem>>, vector<2x128xf32>
    tpu.vector_store %arg8[%c0_39, %c0_40], %53 {strides = array<i32>} : memref<2x128xf32, #tpu.memory_space<vmem>>, vector<2x128xf32>,
    return
  }
  func.func @transform_0(%arg0: i32) -> (i32, i32, i32) {
    %c0_i32 = arith.constant 0 : i32
    %c0_i32_0 = arith.constant 0 : i32
    %c0_i32_1 = arith.constant 0 : i32
    %c0_i32_2 = arith.constant 0 : i32
    return %c0_i32, %c0_i32_0, %c0_i32_1 : i32, i32, i32
  }
  func.func @transform_1(%arg0: i32) -> (i32, i32) {
    %c0_i32 = arith.constant 0 : i32
    %c0_i32_0 = arith.constant 0 : i32
    %c0_i32_1 = arith.constant 0 : i32
    return %c0_i32, %c0_i32_0 : i32, i32
  }
  func.func @transform_2(%arg0: i32) -> (i32, i32) {
    %c0_i32 = arith.constant 0 : i32
    %c0_i32_0 = arith.constant 0 : i32
    %c0_i32_1 = arith.constant 0 : i32
    return %c0_i32, %c0_i32_0 : i32, i32
  }
  func.func @transform_3(%arg0: i32) -> (i32, i32, i32) {
    %c0_i32 = arith.constant 0 : i32
    %c0_i32_0 = arith.constant 0 : i32
    %c0_i32_1 = arith.constant 0 : i32
    %c0_i32_2 = arith.constant 0 : i32
    return %c0_i32, %c0_i32_0, %c0_i32_1 : i32, i32, i32
  }
  func.func @transform_4(%arg0: i32) -> (i32, i32) {
    %c0_i32 = arith.constant 0 : i32
    %c0_i32_0 = arith.constant 0 : i32
    %c0_i32_1 = arith.constant 0 : i32
    return %c0_i32, %c0_i32_0 : i32, i32
  }
  func.func @transform_5(%arg0: i32) -> (i32, i32) {
    %c0_i32 = arith.constant 0 : i32
    %c0_i32_0 = arith.constant 0 : i32
    %c0_i32_1 = arith.constant 0 : i32
    return %c0_i32, %c0_i32_0 : i32, i32
  }
  func.func @transform_6(%arg0: i32) -> (i32, i32) {
    %c0_i32 = arith.constant 0 : i32
    %c0_i32_0 = arith.constant 0 : i32
    %c0_i32_1 = arith.constant 0 : i32
    return %c0_i32, %c0_i32_0 : i32, i32
  }
  func.func @transform_7(%arg0: i32) -> (i32, i32) {
    %c0_i32 = arith.constant 0 : i32
    %c0_i32_0 = arith.constant 0 : i32
    %c0_i32_1 = arith.constant 0 : i32
    return %c0_i32, %c0_i32_0 : i32, i32
  }
}

</mosaic_0001>

<bundles_post_ra>
// kernel: cnn_backbone.3
= control target key start
LH: loop header
LB: loop body
LE: loop exit
PB: predicated region body
PF: predicated region fallthrough
CT: control target
= control target key end

     0   :  { %s10519_s12 = smov 0   ;;  %s10521_s13 = smov 0   ;;  %s11583_s0 = inlined_call_operand.vmem [shape: bf16[4,2048,128], index: 0, kind: input, shape index: {}]   ;;  %s11584_s1 = inlined_call_operand.vmem [shape: bf16[128,128], index: 1, kind: input, shape index: {}]   ;;  %s11585_s2 = inlined_call_operand.vmem [shape: f32[1,128], index: 2, kind: input, shape index: {}]   ;;  %s11586_s3 = inlined_call_operand.vmem [shape: bf16[2048,128], index: 3, kind: output, shape index: {}]  }
   0x1   :  { %s10523_s14 = smov 0  }
   0x2 LB: > { %s8706_s15 = sadd.s32 4294967295, %s10497_s14   ;;  %s10536_s16 = sadd.s32 1, %s10497_s14   ;;  %s10497_s14 = sphi %s10523_s14, %s11589_s14   ;;  %s10493_s13 = sphi %s10521_s13, %s11588_s13   ;;  %s10489_s12 = sphi %s10519_s12, %s11587_s12  }
   0x3   : > { %s17_s17 = ssub.s32 %s10497_s14, %s10536_s16  ;;  %s20_s18 = sadd.s32 1, %s10493_s13 }
   0x4   : > { %p18_p0 = scmp.eq.s32.totalorder %s17_s17, 0  ;;  %p27_p1 = scmp.ne.s32.totalorder %s10493_s13, %s10489_s12 }
   0x5   : > { %p28_p2 = scmp.eq.s32.totalorder %s10497_s14, 0  ;;  %p8709_p4 = scmp.ge.s32.totalorder %s10497_s14, 2 }
   0x6   : > { %s10545_s19 = scalar_select %p18_p0, %s10493_s13, %s20_s18  }
   0x7   : > { %p29_p3 = por %p28_p2, %p27_p1  ;;  %127 = sbr.rel (%p8709_p4) target bundleno = 272 (0x110), region = 24 }
   0xc   : > { %130 = sbr.rel (!%p29_p3) target bundleno = 272 (0x110), region = 28  ;;  %s132_s20 = sand.u32 (%p29_p3), 1, %s10493_s13  }
   0xd   : > { %s9775_s21 = sshll.u32 (%p29_p3), %s10497_s14, 9  ;;  %s8710_s22 = sshll.u32 (%p29_p3), %s132_s20, 11 }
   0xe   : > { %s10553_s25 = scalar_lea.vmem (%p29_p3), %s11583_s0, %s9775_s21  ;;  %s10558_s26 = scalar_lea.vmem (%p29_p3), [#allocation2], %s8710_s22 }
   0xf   : > { %v154_v0 = vld [vmem:[%s10553_s25] sm:$0xff] (%p29_p3)   ;;  %v158_v1 = vld [vmem:[%s10553_s25 + $0x8] sm:$0xff] (%p29_p3)   ;;  %v162_v2 = vld [vmem:[%s10553_s25 + $0x10] sm:$0xff] (%p29_p3)  }
  0x10   : > { %155 = vst [vmem:[%s10558_s26] sm:$0xff] (%p29_p3), %v154_v0   ;;  %v166_v3 = vld [vmem:[%s10553_s25 + $0x18] sm:$0xff] (%p29_p3)   ;;  %v170_v4 = vld [vmem:[%s10553_s25 + $0x20] sm:$0xff] (%p29_p3)   ;;  %v174_v5 = vld [vmem:[%s10553_s25 + $0x28] sm:$0xff] (%p29_p3)  }
  0x11   : > { %159 = vst [vmem:[%s10558_s26 + $0x8] sm:$0xff] %v158_v1   ;;  %v178_v6 = vld [vmem:[%s10553_s25 + $0x30] sm:$0xff]   ;;  %v182_v7 = vld [vmem:[%s10553_s25 + $0x38] sm:$0xff]   ;;  %v186_v8 = vld [vmem:[%s10553_s25 + $0x40] sm:$0xff]  }
  0x12   : > { %163 = vst [vmem:[%s10558_s26 + $0x10] sm:$0xff] %v162_v2   ;;  %v190_v9 = vld [vmem:[%s10553_s25 + $0x48] sm:$0xff]   ;;  %v194_v10 = vld [vmem:[%s10553_s25 + $0x50] sm:$0xff]   ;;  %v198_v11 = vld [vmem:[%s10553_s25 + $0x58] sm:$0xff]  }
  0x13   : > { %167 = vst [vmem:[%s10558_s26 + $0x18] sm:$0xff] %v166_v3   ;;  %v202_v12 = vld [vmem:[%s10553_s25 + $0x60] sm:$0xff]   ;;  %v206_v13 = vld [vmem:[%s10553_s25 + $0x68] sm:$0xff]   ;;  %v210_v14 = vld [vmem:[%s10553_s25 + $0x70] sm:$0xff]  }
  0x14   : > { %171 = vst [vmem:[%s10558_s26 + $0x20] sm:$0xff] %v170_v4   ;;  %v214_v15 = vld [vmem:[%s10553_s25 + $0x78] sm:$0xff]   ;;  %v218_v16 = vld [vmem:[%s10553_s25 + $0x80] sm:$0xff]   ;;  %v222_v17 = vld [vmem:[%s10553_s25 + $0x88] sm:$0xff]  }
  0x15   : > { %175 = vst [vmem:[%s10558_s26 + $0x28] sm:$0xff] %v174_v5   ;;  %v226_v18 = vld [vmem:[%s10553_s25 + $0x90] sm:$0xff]   ;;  %v230_v19 = vld [vmem:[%s10553_s25 + $0x98] sm:$0xff]   ;;  %v234_v20 = vld [vmem:[%s10553_s25 + $0xa0] sm:$0xff]  }
  0x16   : > { %179 = vst [vmem:[%s10558_s26 + $0x30] sm:$0xff] %v178_v6   ;;  %v238_v21 = vld [vmem:[%s10553_s25 + $0xa8] sm:$0xff]   ;;  %v242_v22 = vld [vmem:[%s10553_s25 + $0xb0] sm:$0xff]   ;;  %v246_v23 = vld [vmem:[%s10553_s25 + $0xb8] sm:$0xff]  }
  0x17   : > { %183 = vst [vmem:[%s10558_s26 + $0x38] sm:$0xff] %v182_v7   ;;  %v250_v24 = vld [vmem:[%s10553_s25 + $0xc0] sm:$0xff]   ;;  %v254_v25 = vld [vmem:[%s10553_s25 + $0xc8] sm:$0xff]   ;;  %v258_v26 = vld [vmem:[%s10553_s25 + $0xd0] sm:$0xff]  }
  0x18   : > { %187 = vst [vmem:[%s10558_s26 + $0x40] sm:$0xff] %v186_v8   ;;  %v262_v27 = vld [vmem:[%s10553_s25 + $0xd8] sm:$0xff]   ;;  %v266_v28 = vld [vmem:[%s10553_s25 + $0xe0] sm:$0xff]   ;;  %v270_v29 = vld [vmem:[%s10553_s25 + $0xe8] sm:$0xff]  }
  0x19   : > { %191 = vst [vmem:[%s10558_s26 + $0x48] sm:$0xff] %v190_v9   ;;  %v274_v30 = vld [vmem:[%s10553_s25 + $0xf0] sm:$0xff]   ;;  %v278_v31 = vld [vmem:[%s10553_s25 + $0xf8] sm:$0xff]   ;;  %v282_v32 = vld [vmem:[%s10553_s25 + $0x100] sm:$0xff]  }
  0x1a   : > { %195 = vst [vmem:[%s10558_s26 + $0x50] sm:$0xff] %v194_v10   ;;  %v286_v33 = vld [vmem:[%s10553_s25 + $0x108] sm:$0xff]   ;;  %v290_v34 = vld [vmem:[%s10553_s25 + $0x110] sm:$0xff]   ;;  %v294_v35 = vld [vmem:[%s10553_s25 + $0x118] sm:$0xff]  }
  0x1b   : > { %199 = vst [vmem:[%s10558_s26 + $0x58] sm:$0xff] %v198_v11   ;;  %v298_v36 = vld [vmem:[%s10553_s25 + $0x120] sm:$0xff]   ;;  %v302_v37 = vld [vmem:[%s10553_s25 + $0x128] sm:$0xff]   ;;  %v306_v38 = vld [vmem:[%s10553_s25 + $0x130] sm:$0xff]  }
  0x1c   : > { %203 = vst [vmem:[%s10558_s26 + $0x60] sm:$0xff] %v202_v12   ;;  %v310_v39 = vld [vmem:[%s10553_s25 + $0x138] sm:$0xff]   ;;  %v314_v40 = vld [vmem:[%s10553_s25 + $0x140] sm:$0xff]   ;;  %v318_v41 = vld [vmem:[%s10553_s25 + $0x148] sm:$0xff]  }
  0x1d   : > { %207 = vst [vmem:[%s10558_s26 + $0x68] sm:$0xff] %v206_v13   ;;  %v322_v42 = vld [vmem:[%s10553_s25 + $0x150] sm:$0xff]   ;;  %v326_v43 = vld [vmem:[%s10553_s25 + $0x158] sm:$0xff]   ;;  %v330_v44 = vld [vmem:[%s10553_s25 + $0x160] sm:$0xff]  }
  0x1e   : > { %211 = vst [vmem:[%s10558_s26 + $0x70] sm:$0xff] %v210_v14   ;;  %v334_v45 = vld [vmem:[%s10553_s25 + $0x168] sm:$0xff]   ;;  %v338_v46 = vld [vmem:[%s10553_s25 + $0x170] sm:$0xff]   ;;  %v342_v47 = vld [vmem:[%s10553_s25 + $0x178] sm:$0xff]  }
  0x1f   : > { %215 = vst [vmem:[%s10558_s26 + $0x78] sm:$0xff] %v214_v15   ;;  %v346_v48 = vld [vmem:[%s10553_s25 + $0x180] sm:$0xff]   ;;  %v350_v49 = vld [vmem:[%s10553_s25 + $0x188] sm:$0xff]   ;;  %v354_v50 = vld [vmem:[%s10553_s25 + $0x190] sm:$0xff]  }
  0x20   : > { %219 = vst [vmem:[%s10558_s26 + $0x80] sm:$0xff] %v218_v16   ;;  %v358_v51 = vld [vmem:[%s10553_s25 + $0x198] sm:$0xff]   ;;  %v362_v52 = vld [vmem:[%s10553_s25 + $0x1a0] sm:$0xff]   ;;  %v366_v53 = vld [vmem:[%s10553_s25 + $0x1a8] sm:$0xff]  }
  0x21   : > { %223 = vst [vmem:[%s10558_s26 + $0x88] sm:$0xff] %v222_v17   ;;  %v370_v54 = vld [vmem:[%s10553_s25 + $0x1b0] sm:$0xff]   ;;  %v374_v55 = vld [vmem:[%s10553_s25 + $0x1b8] sm:$0xff]   ;;  %v378_v56 = vld [vmem:[%s10553_s25 + $0x1c0] sm:$0xff]  }
  0x22   : > { %227 = vst [vmem:[%s10558_s26 + $0x90] sm:$0xff] %v226_v18   ;;  %v382_v57 = vld [vmem:[%s10553_s25 + $0x1c8] sm:$0xff]   ;;  %v386_v58 = vld [vmem:[%s10553_s25 + $0x1d0] sm:$0xff]   ;;  %v390_v59 = vld [vmem:[%s10553_s25 + $0x1d8] sm:$0xff]  }
  0x23   : > { %231 = vst [vmem:[%s10558_s26 + $0x98] sm:$0xff] %v230_v19   ;;  %v394_v60 = vld [vmem:[%s10553_s25 + $0x1e0] sm:$0xff]   ;;  %v398_v61 = vld [vmem:[%s10553_s25 + $0x1e8] sm:$0xff]   ;;  %v402_v62 = vld [vmem:[%s10553_s25 + $0x1f0] sm:$0xff]  }
  0x24   : > { %235 = vst [vmem:[%s10558_s26 + $0xa0] sm:$0xff] %v234_v20   ;;  %v406_v63 = vld [vmem:[%s10553_s25 + $0x1f8] sm:$0xff]   ;;  %v410_v0 = vld [vmem:[%s10553_s25 + $0x400] sm:$0xff]   ;;  %v414_v1 = vld [vmem:[%s10553_s25 + $0x408] sm:$0xff]  }
  0x25   : > { %239 = vst [vmem:[%s10558_s26 + $0xa8] sm:$0xff] %v238_v21   ;;  %v418_v2 = vld [vmem:[%s10553_s25 + $0x410] sm:$0xff]   ;;  %v422_v3 = vld [vmem:[%s10553_s25 + $0x418] sm:$0xff]   ;;  %v426_v4 = vld [vmem:[%s10553_s25 + $0x420] sm:$0xff]  }
  0x26   : > { %243 = vst [vmem:[%s10558_s26 + $0xb0] sm:$0xff] %v242_v22   ;;  %v430_v5 = vld [vmem:[%s10553_s25 + $0x428] sm:$0xff]   ;;  %v434_v6 = vld [vmem:[%s10553_s25 + $0x430] sm:$0xff]   ;;  %v438_v7 = vld [vmem:[%s10553_s25 + $0x438] sm:$0xff]  }
  0x27   : > { %247 = vst [vmem:[%s10558_s26 + $0xb8] sm:$0xff] %v246_v23   ;;  %v442_v8 = vld [vmem:[%s10553_s25 + $0x440] sm:$0xff]   ;;  %v446_v9 = vld [vmem:[%s10553_s25 + $0x448] sm:$0xff]   ;;  %v450_v10 = vld [vmem:[%s10553_s25 + $0x450] sm:$0xff]  }
  0x28   : > { %251 = vst [vmem:[%s10558_s26 + $0xc0] sm:$0xff] %v250_v24   ;;  %v454_v11 = vld [vmem:[%s10553_s25 + $0x458] sm:$0xff]   ;;  %v458_v12 = vld [vmem:[%s10553_s25 + $0x460] sm:$0xff]   ;;  %v462_v13 = vld [vmem:[%s10553_s25 + $0x468] sm:$0xff]  }
  0x29   : > { %255 = vst [vmem:[%s10558_s26 + $0xc8] sm:$0xff] %v254_v25   ;;  %v466_v14 = vld [vmem:[%s10553_s25 + $0x470] sm:$0xff]   ;;  %v470_v15 = vld [vmem:[%s10553_s25 + $0x478] sm:$0xff]   ;;  %v474_v16 = vld [vmem:[%s10553_s25 + $0x480] sm:$0xff]  }
  0x2a   : > { %259 = vst [vmem:[%s10558_s26 + $0xd0] sm:$0xff] %v258_v26   ;;  %v478_v17 = vld [vmem:[%s10553_s25 + $0x488] sm:$0xff]   ;;  %v482_v18 = vld [vmem:[%s10553_s25 + $0x490] sm:$0xff]   ;;  %v486_v19 = vld [vmem:[%s10553_s25 + $0x498] sm:$0xff]  }
  0x2b   : > { %263 = vst [vmem:[%s10558_s26 + $0xd8] sm:$0xff] %v262_v27   ;;  %v490_v20 = vld [vmem:[%s10553_s25 + $0x4a0] sm:$0xff]   ;;  %v494_v21 = vld [vmem:[%s10553_s25 + $0x4a8] sm:$0xff]   ;;  %v498_v22 = vld [vmem:[%s10553_s25 + $0x4b0] sm:$0xff]  }
  0x2c   : > { %267 = vst [vmem:[%s10558_s26 + $0xe0] sm:$0xff] %v266_v28   ;;  %v502_v23 = vld [vmem:[%s10553_s25 + $0x4b8] sm:$0xff]   ;;  %v506_v24 = vld [vmem:[%s10553_s25 + $0x4c0] sm:$0xff]   ;;  %v510_v25 = vld [vmem:[%s10553_s25 + $0x4c8] sm:$0xff]  }
  0x2d   : > { %271 = vst [vmem:[%s10558_s26 + $0xe8] sm:$0xff] %v270_v29   ;;  %v514_v26 = vld [vmem:[%s10553_s25 + $0x4d0] sm:$0xff]   ;;  %v518_v27 = vld [vmem:[%s10553_s25 + $0x4d8] sm:$0xff]   ;;  %v522_v28 = vld [vmem:[%s10553_s25 + $0x4e0] sm:$0xff]  }
  0x2e   : > { %275 = vst [vmem:[%s10558_s26 + $0xf0] sm:$0xff] %v274_v30   ;;  %v526_v29 = vld [vmem:[%s10553_s25 + $0x4e8] sm:$0xff]   ;;  %v530_v30 = vld [vmem:[%s10553_s25 + $0x4f0] sm:$0xff]  }
  0x2f   : > { %279 = vst [vmem:[%s10558_s26 + $0xf8] sm:$0xff] %v278_v31   ;;  %v534_v31 = vld [vmem:[%s10553_s25 + $0x4f8] sm:$0xff]  }
  0x30   : > { %283 = vst [vmem:[%s10558_s26 + $0x100] sm:$0xff] %v282_v32   ;;  %v538_v32 = vld [vmem:[%s10553_s25 + $0x500] sm:$0xff]  }
  0x31   : > { %287 = vst [vmem:[%s10558_s26 + $0x108] sm:$0xff] %v286_v33   ;;  %v542_v33 = vld [vmem:[%s10553_s25 + $0x508] sm:$0xff]  }
  0x32   : > { %291 = vst [vmem:[%s10558_s26 + $0x110] sm:$0xff] %v290_v34   ;;  %v546_v34 = vld [vmem:[%s10553_s25 + $0x510] sm:$0xff]  }
  0x33   : > { %295 = vst [vmem:[%s10558_s26 + $0x118] sm:$0xff] %v294_v35   ;;  %v550_v35 = vld [vmem:[%s10553_s25 + $0x518] sm:$0xff]  }
  0x34   : > { %299 = vst [vmem:[%s10558_s26 + $0x120] sm:$0xff] %v298_v36   ;;  %v554_v36 = vld [vmem:[%s10553_s25 + $0x520] sm:$0xff]  }
  0x35   : > { %303 = vst [vmem:[%s10558_s26 + $0x128] sm:$0xff] %v302_v37   ;;  %v558_v37 = vld [vmem:[%s10553_s25 + $0x528] sm:$0xff]  }
  0x36   : > { %307 = vst [vmem:[%s10558_s26 + $0x130] sm:$0xff] %v306_v38   ;;  %v562_v38 = vld [vmem:[%s10553_s25 + $0x530] sm:$0xff]  }
  0x37   : > { %311 = vst [vmem:[%s10558_s26 + $0x138] sm:$0xff] %v310_v39   ;;  %v566_v39 = vld [vmem:[%s10553_s25 + $0x538] sm:$0xff]  }
  0x38   : > { %315 = vst [vmem:[%s10558_s26 + $0x140] sm:$0xff] %v314_v40   ;;  %v570_v40 = vld [vmem:[%s10553_s25 + $0x540] sm:$0xff]  }
  0x39   : > { %319 = vst [vmem:[%s10558_s26 + $0x148] sm:$0xff] %v318_v41   ;;  %v574_v41 = vld [vmem:[%s10553_s25 + $0x548] sm:$0xff]  }
  0x3a   : > { %323 = vst [vmem:[%s10558_s26 + $0x150] sm:$0xff] %v322_v42   ;;  %v578_v42 = vld [vmem:[%s10553_s25 + $0x550] sm:$0xff]  }
  0x3b   : > { %327 = vst [vmem:[%s10558_s26 + $0x158] sm:$0xff] %v326_v43   ;;  %v582_v43 = vld [vmem:[%s10553_s25 + $0x558] sm:$0xff]  }
  0x3c   : > { %331 = vst [vmem:[%s10558_s26 + $0x160] sm:$0xff] %v330_v44   ;;  %v586_v44 = vld [vmem:[%s10553_s25 + $0x560] sm:$0xff]  }
  0x3d   : > { %335 = vst [vmem:[%s10558_s26 + $0x168] sm:$0xff] %v334_v45   ;;  %v590_v45 = vld [vmem:[%s10553_s25 + $0x568] sm:$0xff]  }
  0x3e   : > { %339 = vst [vmem:[%s10558_s26 + $0x170] sm:$0xff] %v338_v46   ;;  %v594_v46 = vld [vmem:[%s10553_s25 + $0x570] sm:$0xff]  }
  0x3f   : > { %343 = vst [vmem:[%s10558_s26 + $0x178] sm:$0xff] %v342_v47   ;;  %v598_v47 = vld [vmem:[%s10553_s25 + $0x578] sm:$0xff]  }
  0x40   : > { %347 = vst [vmem:[%s10558_s26 + $0x180] sm:$0xff] %v346_v48   ;;  %v602_v48 = vld [vmem:[%s10553_s25 + $0x580] sm:$0xff]  }
  0x41   : > { %351 = vst [vmem:[%s10558_s26 + $0x188] sm:$0xff] %v350_v49   ;;  %v606_v49 = vld [vmem:[%s10553_s25 + $0x588] sm:$0xff]  }
  0x42   : > { %355 = vst [vmem:[%s10558_s26 + $0x190] sm:$0xff] %v354_v50   ;;  %v610_v50 = vld [vmem:[%s10553_s25 + $0x590] sm:$0xff]  }
  0x43   : > { %359 = vst [vmem:[%s10558_s26 + $0x198] sm:$0xff] %v358_v51   ;;  %v614_v51 = vld [vmem:[%s10553_s25 + $0x598] sm:$0xff]  }
  0x44   : > { %363 = vst [vmem:[%s10558_s26 + $0x1a0] sm:$0xff] %v362_v52   ;;  %v618_v52 = vld [vmem:[%s10553_s25 + $0x5a0] sm:$0xff]  }
  0x45   : > { %367 = vst [vmem:[%s10558_s26 + $0x1a8] sm:$0xff] %v366_v53   ;;  %v622_v53 = vld [vmem:[%s10553_s25 + $0x5a8] sm:$0xff]  }
  0x46   : > { %371 = vst [vmem:[%s10558_s26 + $0x1b0] sm:$0xff] %v370_v54   ;;  %v626_v54 = vld [vmem:[%s10553_s25 + $0x5b0] sm:$0xff]  }
  0x47   : > { %375 = vst [vmem:[%s10558_s26 + $0x1b8] sm:$0xff] %v374_v55   ;;  %v630_v55 = vld [vmem:[%s10553_s25 + $0x5b8] sm:$0xff]  }
  0x48   : > { %379 = vst [vmem:[%s10558_s26 + $0x1c0] sm:$0xff] %v378_v56   ;;  %v634_v56 = vld [vmem:[%s10553_s25 + $0x5c0] sm:$0xff]  }
  0x49   : > { %383 = vst [vmem:[%s10558_s26 + $0x1c8] sm:$0xff] %v382_v57   ;;  %v638_v57 = vld [vmem:[%s10553_s25 + $0x5c8] sm:$0xff]  }
  0x4a   : > { %387 = vst [vmem:[%s10558_s26 + $0x1d0] sm:$0xff] %v386_v58   ;;  %v642_v58 = vld [vmem:[%s10553_s25 + $0x5d0] sm:$0xff]  }
  0x4b   : > { %391 = vst [vmem:[%s10558_s26 + $0x1d8] sm:$0xff] %v390_v59   ;;  %v646_v59 = vld [vmem:[%s10553_s25 + $0x5d8] sm:$0xff]  }
  0x4c   : > { %395 = vst [vmem:[%s10558_s26 + $0x1e0] sm:$0xff] %v394_v60   ;;  %v650_v60 = vld [vmem:[%s10553_s25 + $0x5e0] sm:$0xff]  }
  0x4d   : > { %399 = vst [vmem:[%s10558_s26 + $0x1e8] sm:$0xff] %v398_v61   ;;  %v654_v61 = vld [vmem:[%s10553_s25 + $0x5e8] sm:$0xff]  }
  0x4e   : > { %403 = vst [vmem:[%s10558_s26 + $0x1f0] sm:$0xff] %v402_v62   ;;  %v658_v62 = vld [vmem:[%s10553_s25 + $0x5f0] sm:$0xff]  }
  0x4f   : > { %407 = vst [vmem:[%s10558_s26 + $0x1f8] sm:$0xff] %v406_v63   ;;  %v662_v63 = vld [vmem:[%s10553_s25 + $0x5f8] sm:$0xff]  }
  0x50   : > { %411 = vst [vmem:[%s10558_s26 + $0x200] sm:$0xff] %v410_v0   ;;  %v666_v0 = vld [vmem:[%s10553_s25 + $0x800] sm:$0xff]  }
  0x51   : > { %415 = vst [vmem:[%s10558_s26 + $0x208] sm:$0xff] %v414_v1   ;;  %v670_v1 = vld [vmem:[%s10553_s25 + $0x808] sm:$0xff]  }
  0x52   : > { %419 = vst [vmem:[%s10558_s26 + $0x210] sm:$0xff] %v418_v2   ;;  %v674_v2 = vld [vmem:[%s10553_s25 + $0x810] sm:$0xff]  }
  0x53   : > { %423 = vst [vmem:[%s10558_s26 + $0x218] sm:$0xff] %v422_v3   ;;  %v678_v3 = vld [vmem:[%s10553_s25 + $0x818] sm:$0xff]  }
  0x54   : > { %427 = vst [vmem:[%s10558_s26 + $0x220] sm:$0xff] %v426_v4   ;;  %v682_v4 = vld [vmem:[%s10553_s25 + $0x820] sm:$0xff]  }
  0x55   : > { %431 = vst [vmem:[%s10558_s26 + $0x228] sm:$0xff] %v430_v5   ;;  %v686_v5 = vld [vmem:[%s10553_s25 + $0x828] sm:$0xff]  }
  0x56   : > { %435 = vst [vmem:[%s10558_s26 + $0x230] sm:$0xff] %v434_v6   ;;  %v690_v6 = vld [vmem:[%s10553_s25 + $0x830] sm:$0xff]  }
  0x57   : > { %439 = vst [vmem:[%s10558_s26 + $0x238] sm:$0xff] %v438_v7   ;;  %v694_v7 = vld [vmem:[%s10553_s25 + $0x838] sm:$0xff]  }
  0x58   : > { %443 = vst [vmem:[%s10558_s26 + $0x240] sm:$0xff] %v442_v8   ;;  %v698_v8 = vld [vmem:[%s10553_s25 + $0x840] sm:$0xff]  }
  0x59   : > { %447 = vst [vmem:[%s10558_s26 + $0x248] sm:$0xff] %v446_v9   ;;  %v702_v9 = vld [vmem:[%s10553_s25 + $0x848] sm:$0xff]  }
  0x5a   : > { %451 = vst [vmem:[%s10558_s26 + $0x250] sm:$0xff] %v450_v10   ;;  %v706_v10 = vld [vmem:[%s10553_s25 + $0x850] sm:$0xff]  }
  0x5b   : > { %455 = vst [vmem:[%s10558_s26 + $0x258] sm:$0xff] %v454_v11   ;;  %v710_v11 = vld [vmem:[%s10553_s25 + $0x858] sm:$0xff]  }
  0x5c   : > { %459 = vst [vmem:[%s10558_s26 + $0x260] sm:$0xff] %v458_v12   ;;  %v714_v12 = vld [vmem:[%s10553_s25 + $0x860] sm:$0xff]  }
  0x5d   : > { %463 = vst [vmem:[%s10558_s26 + $0x268] sm:$0xff] %v462_v13   ;;  %v718_v13 = vld [vmem:[%s10553_s25 + $0x868] sm:$0xff]  }
  0x5e   : > { %467 = vst [vmem:[%s10558_s26 + $0x270] sm:$0xff] %v466_v14   ;;  %v722_v14 = vld [vmem:[%s10553_s25 + $0x870] sm:$0xff]  }
  0x5f   : > { %471 = vst [vmem:[%s10558_s26 + $0x278] sm:$0xff] %v470_v15   ;;  %v726_v15 = vld [vmem:[%s10553_s25 + $0x878] sm:$0xff]  }
  0x60   : > { %475 = vst [vmem:[%s10558_s26 + $0x280] sm:$0xff] %v474_v16   ;;  %v730_v16 = vld [vmem:[%s10553_s25 + $0x880] sm:$0xff]  }
  0x61   : > { %479 = vst [vmem:[%s10558_s26 + $0x288] sm:$0xff] %v478_v17   ;;  %v734_v17 = vld [vmem:[%s10553_s25 + $0x888] sm:$0xff]  }
  0x62   : > { %483 = vst [vmem:[%s10558_s26 + $0x290] sm:$0xff] %v482_v18   ;;  %v738_v18 = vld [vmem:[%s10553_s25 + $0x890] sm:$0xff]  }
  0x63   : > { %487 = vst [vmem:[%s10558_s26 + $0x298] sm:$0xff] %v486_v19   ;;  %v742_v19 = vld [vmem:[%s10553_s25 + $0x898] sm:$0xff]  }
  0x64   : > { %491 = vst [vmem:[%s10558_s26 + $0x2a0] sm:$0xff] %v490_v20   ;;  %v746_v20 = vld [vmem:[%s10553_s25 + $0x8a0] sm:$0xff]  }
  0x65   : > { %495 = vst [vmem:[%s10558_s26 + $0x2a8] sm:$0xff] %v494_v21   ;;  %v750_v21 = vld [vmem:[%s10553_s25 + $0x8a8] sm:$0xff]  }
  0x66   : > { %499 = vst [vmem:[%s10558_s26 + $0x2b0] sm:$0xff] %v498_v22   ;;  %v754_v22 = vld [vmem:[%s10553_s25 + $0x8b0] sm:$0xff]  }
  0x67   : > { %503 = vst [vmem:[%s10558_s26 + $0x2b8] sm:$0xff] %v502_v23   ;;  %v758_v23 = vld [vmem:[%s10553_s25 + $0x8b8] sm:$0xff]  }
  0x68   : > { %507 = vst [vmem:[%s10558_s26 + $0x2c0] sm:$0xff] %v506_v24   ;;  %v762_v24 = vld [vmem:[%s10553_s25 + $0x8c0] sm:$0xff]  }
  0x69   : > { %511 = vst [vmem:[%s10558_s26 + $0x2c8] sm:$0xff] %v510_v25   ;;  %v766_v25 = vld [vmem:[%s10553_s25 + $0x8c8] sm:$0xff]  }
  0x6a   : > { %515 = vst [vmem:[%s10558_s26 + $0x2d0] sm:$0xff] %v514_v26   ;;  %v770_v26 = vld [vmem:[%s10553_s25 + $0x8d0] sm:$0xff]  }
  0x6b   : > { %519 = vst [vmem:[%s10558_s26 + $0x2d8] sm:$0xff] %v518_v27   ;;  %v774_v27 = vld [vmem:[%s10553_s25 + $0x8d8] sm:$0xff]  }
  0x6c   : > { %523 = vst [vmem:[%s10558_s26 + $0x2e0] sm:$0xff] %v522_v28   ;;  %v778_v28 = vld [vmem:[%s10553_s25 + $0x8e0] sm:$0xff]  }
  0x6d   : > { %527 = vst [vmem:[%s10558_s26 + $0x2e8] sm:$0xff] %v526_v29   ;;  %v782_v29 = vld [vmem:[%s10553_s25 + $0x8e8] sm:$0xff]  }
  0x6e   : > { %531 = vst [vmem:[%s10558_s26 + $0x2f0] sm:$0xff] %v530_v30   ;;  %v786_v30 = vld [vmem:[%s10553_s25 + $0x8f0] sm:$0xff]  }
  0x6f   : > { %535 = vst [vmem:[%s10558_s26 + $0x2f8] sm:$0xff] %v534_v31   ;;  %v790_v31 = vld [vmem:[%s10553_s25 + $0x8f8] sm:$0xff]  }
  0x70   : > { %539 = vst [vmem:[%s10558_s26 + $0x300] sm:$0xff] %v538_v32   ;;  %v794_v32 = vld [vmem:[%s10553_s25 + $0x900] sm:$0xff]  }
  0x71   : > { %543 = vst [vmem:[%s10558_s26 + $0x308] sm:$0xff] %v542_v33   ;;  %v798_v33 = vld [vmem:[%s10553_s25 + $0x908] sm:$0xff]  }
  0x72   : > { %547 = vst [vmem:[%s10558_s26 + $0x310] sm:$0xff] %v546_v34   ;;  %v802_v34 = vld [vmem:[%s10553_s25 + $0x910] sm:$0xff]  }
  0x73   : > { %551 = vst [vmem:[%s10558_s26 + $0x318] sm:$0xff] %v550_v35   ;;  %v806_v35 = vld [vmem:[%s10553_s25 + $0x918] sm:$0xff]  }
  0x74   : > { %555 = vst [vmem:[%s10558_s26 + $0x320] sm:$0xff] %v554_v36   ;;  %v810_v36 = vld [vmem:[%s10553_s25 + $0x920] sm:$0xff]  }
  0x75   : > { %559 = vst [vmem:[%s10558_s26 + $0x328] sm:$0xff] %v558_v37   ;;  %v814_v37 = vld [vmem:[%s10553_s25 + $0x928] sm:$0xff]  }
  0x76   : > { %563 = vst [vmem:[%s10558_s26 + $0x330] sm:$0xff] %v562_v38   ;;  %v818_v38 = vld [vmem:[%s10553_s25 + $0x930] sm:$0xff]  }
  0x77   : > { %567 = vst [vmem:[%s10558_s26 + $0x338] sm:$0xff] %v566_v39   ;;  %v822_v39 = vld [vmem:[%s10553_s25 + $0x938] sm:$0xff]  }
  0x78   : > { %571 = vst [vmem:[%s10558_s26 + $0x340] sm:$0xff] %v570_v40   ;;  %v826_v40 = vld [vmem:[%s10553_s25 + $0x940] sm:$0xff]  }
  0x79   : > { %575 = vst [vmem:[%s10558_s26 + $0x348] sm:$0xff] %v574_v41   ;;  %v830_v41 = vld [vmem:[%s10553_s25 + $0x948] sm:$0xff]  }
  0x7a   : > { %579 = vst [vmem:[%s10558_s26 + $0x350] sm:$0xff] %v578_v42   ;;  %v834_v42 = vld [vmem:[%s10553_s25 + $0x950] sm:$0xff]  }
  0x7b   : > { %583 = vst [vmem:[%s10558_s26 + $0x358] sm:$0xff] %v582_v43   ;;  %v838_v43 = vld [vmem:[%s10553_s25 + $0x958] sm:$0xff]  }
  0x7c   : > { %587 = vst [vmem:[%s10558_s26 + $0x360] sm:$0xff] %v586_v44   ;;  %v842_v44 = vld [vmem:[%s10553_s25 + $0x960] sm:$0xff]  }
  0x7d   : > { %591 = vst [vmem:[%s10558_s26 + $0x368] sm:$0xff] %v590_v45   ;;  %v846_v45 = vld [vmem:[%s10553_s25 + $0x968] sm:$0xff]  }
  0x7e   : > { %595 = vst [vmem:[%s10558_s26 + $0x370] sm:$0xff] %v594_v46   ;;  %v850_v46 = vld [vmem:[%s10553_s25 + $0x970] sm:$0xff]  }
  0x7f   : > { %599 = vst [vmem:[%s10558_s26 + $0x378] sm:$0xff] %v598_v47   ;;  %v854_v47 = vld [vmem:[%s10553_s25 + $0x978] sm:$0xff]  }
  0x80   : > { %603 = vst [vmem:[%s10558_s26 + $0x380] sm:$0xff] %v602_v48   ;;  %v858_v48 = vld [vmem:[%s10553_s25 + $0x980] sm:$0xff]  }
  0x81   : > { %607 = vst [vmem:[%s10558_s26 + $0x388] sm:$0xff] %v606_v49   ;;  %v862_v49 = vld [vmem:[%s10553_s25 + $0x988] sm:$0xff]  }
  0x82   : > { %611 = vst [vmem:[%s10558_s26 + $0x390] sm:$0xff] %v610_v50   ;;  %v866_v50 = vld [vmem:[%s10553_s25 + $0x990] sm:$0xff]  }
  0x83   : > { %615 = vst [vmem:[%s10558_s26 + $0x398] sm:$0xff] %v614_v51   ;;  %v870_v51 = vld [vmem:[%s10553_s25 + $0x998] sm:$0xff]  }
  0x84   : > { %619 = vst [vmem:[%s10558_s26 + $0x3a0] sm:$0xff] %v618_v52   ;;  %v874_v52 = vld [vmem:[%s10553_s25 + $0x9a0] sm:$0xff]  }
  0x85   : > { %623 = vst [vmem:[%s10558_s26 + $0x3a8] sm:$0xff] %v622_v53   ;;  %v878_v53 = vld [vmem:[%s10553_s25 + $0x9a8] sm:$0xff]  }
  0x86   : > { %627 = vst [vmem:[%s10558_s26 + $0x3b0] sm:$0xff] %v626_v54   ;;  %v882_v54 = vld [vmem:[%s10553_s25 + $0x9b0] sm:$0xff]  }
  0x87   : > { %631 = vst [vmem:[%s10558_s26 + $0x3b8] sm:$0xff] %v630_v55   ;;  %v886_v55 = vld [vmem:[%s10553_s25 + $0x9b8] sm:$0xff]  }
  0x88   : > { %635 = vst [vmem:[%s10558_s26 + $0x3c0] sm:$0xff] %v634_v56   ;;  %v890_v56 = vld [vmem:[%s10553_s25 + $0x9c0] sm:$0xff]  }
  0x89   : > { %639 = vst [vmem:[%s10558_s26 + $0x3c8] sm:$0xff] %v638_v57   ;;  %v894_v57 = vld [vmem:[%s10553_s25 + $0x9c8] sm:$0xff]  }
  0x8a   : > { %643 = vst [vmem:[%s10558_s26 + $0x3d0] sm:$0xff] %v642_v58   ;;  %v898_v58 = vld [vmem:[%s10553_s25 + $0x9d0] sm:$0xff]  }
  0x8b   : > { %647 = vst [vmem:[%s10558_s26 + $0x3d8] sm:$0xff] %v646_v59   ;;  %v902_v59 = vld [vmem:[%s10553_s25 + $0x9d8] sm:$0xff]  }
  0x8c   : > { %651 = vst [vmem:[%s10558_s26 + $0x3e0] sm:$0xff] %v650_v60   ;;  %v906_v60 = vld [vmem:[%s10553_s25 + $0x9e0] sm:$0xff]  }
  0x8d   : > { %655 = vst [vmem:[%s10558_s26 + $0x3e8] sm:$0xff] %v654_v61   ;;  %v910_v61 = vld [vmem:[%s10553_s25 + $0x9e8] sm:$0xff]  }
  0x8e   : > { %659 = vst [vmem:[%s10558_s26 + $0x3f0] sm:$0xff] %v658_v62   ;;  %v914_v62 = vld [vmem:[%s10553_s25 + $0x9f0] sm:$0xff]  }
  0x8f   : > { %663 = vst [vmem:[%s10558_s26 + $0x3f8] sm:$0xff] %v662_v63   ;;  %v918_v63 = vld [vmem:[%s10553_s25 + $0x9f8] sm:$0xff]  }
  0x90   : > { %667 = vst [vmem:[%s10558_s26 + $0x400] sm:$0xff] %v666_v0   ;;  %v922_v0 = vld [vmem:[%s10553_s25 + $0xc00] sm:$0xff]  }
  0x91   : > { %671 = vst [vmem:[%s10558_s26 + $0x408] sm:$0xff] %v670_v1   ;;  %v926_v1 = vld [vmem:[%s10553_s25 + $0xc08] sm:$0xff]  }
  0x92   : > { %675 = vst [vmem:[%s10558_s26 + $0x410] sm:$0xff] %v674_v2   ;;  %v930_v2 = vld [vmem:[%s10553_s25 + $0xc10] sm:$0xff]  }
  0x93   : > { %679 = vst [vmem:[%s10558_s26 + $0x418] sm:$0xff] %v678_v3   ;;  %v934_v3 = vld [vmem:[%s10553_s25 + $0xc18] sm:$0xff]  }
  0x94   : > { %683 = vst [vmem:[%s10558_s26 + $0x420] sm:$0xff] %v682_v4   ;;  %v938_v4 = vld [vmem:[%s10553_s25 + $0xc20] sm:$0xff]  }
  0x95   : > { %687 = vst [vmem:[%s10558_s26 + $0x428] sm:$0xff] %v686_v5   ;;  %v942_v5 = vld [vmem:[%s10553_s25 + $0xc28] sm:$0xff]  }
  0x96   : > { %691 = vst [vmem:[%s10558_s26 + $0x430] sm:$0xff] %v690_v6   ;;  %v946_v6 = vld [vmem:[%s10553_s25 + $0xc30] sm:$0xff]  }
  0x97   : > { %695 = vst [vmem:[%s10558_s26 + $0x438] sm:$0xff] %v694_v7   ;;  %v950_v7 = vld [vmem:[%s10553_s25 + $0xc38] sm:$0xff]  }
  0x98   : > { %699 = vst [vmem:[%s10558_s26 + $0x440] sm:$0xff] %v698_v8   ;;  %v954_v8 = vld [vmem:[%s10553_s25 + $0xc40] sm:$0xff]  }
  0x99   : > { %703 = vst [vmem:[%s10558_s26 + $0x448] sm:$0xff] %v702_v9   ;;  %v958_v9 = vld [vmem:[%s10553_s25 + $0xc48] sm:$0xff]  }
  0x9a   : > { %707 = vst [vmem:[%s10558_s26 + $0x450] sm:$0xff] %v706_v10   ;;  %v962_v10 = vld [vmem:[%s10553_s25 + $0xc50] sm:$0xff]  }
  0x9b   : > { %711 = vst [vmem:[%s10558_s26 + $0x458] sm:$0xff] %v710_v11   ;;  %v966_v11 = vld [vmem:[%s10553_s25 + $0xc58] sm:$0xff]  }
  0x9c   : > { %715 = vst [vmem:[%s10558_s26 + $0x460] sm:$0xff] %v714_v12   ;;  %v970_v12 = vld [vmem:[%s10553_s25 + $0xc60] sm:$0xff]  }
  0x9d   : > { %719 = vst [vmem:[%s10558_s26 + $0x468] sm:$0xff] %v718_v13   ;;  %v974_v13 = vld [vmem:[%s10553_s25 + $0xc68] sm:$0xff]  }
  0x9e   : > { %723 = vst [vmem:[%s10558_s26 + $0x470] sm:$0xff] %v722_v14   ;;  %v978_v14 = vld [vmem:[%s10553_s25 + $0xc70] sm:$0xff]  }
  0x9f   : > { %727 = vst [vmem:[%s10558_s26 + $0x478] sm:$0xff] %v726_v15   ;;  %v982_v15 = vld [vmem:[%s10553_s25 + $0xc78] sm:$0xff]  }
  0xa0   : > { %731 = vst [vmem:[%s10558_s26 + $0x480] sm:$0xff] %v730_v16   ;;  %v986_v16 = vld [vmem:[%s10553_s25 + $0xc80] sm:$0xff]  }
  0xa1   : > { %735 = vst [vmem:[%s10558_s26 + $0x488] sm:$0xff] %v734_v17   ;;  %v990_v17 = vld [vmem:[%s10553_s25 + $0xc88] sm:$0xff]  }
  0xa2   : > { %739 = vst [vmem:[%s10558_s26 + $0x490] sm:$0xff] %v738_v18   ;;  %v994_v18 = vld [vmem:[%s10553_s25 + $0xc90] sm:$0xff]  }
  0xa3   : > { %743 = vst [vmem:[%s10558_s26 + $0x498] sm:$0xff] %v742_v19   ;;  %v998_v19 = vld [vmem:[%s10553_s25 + $0xc98] sm:$0xff]  }
  0xa4   : > { %747 = vst [vmem:[%s10558_s26 + $0x4a0] sm:$0xff] %v746_v20   ;;  %v1002_v20 = vld [vmem:[%s10553_s25 + $0xca0] sm:$0xff]  }
  0xa5   : > { %751 = vst [vmem:[%s10558_s26 + $0x4a8] sm:$0xff] %v750_v21   ;;  %v1006_v21 = vld [vmem:[%s10553_s25 + $0xca8] sm:$0xff]  }
  0xa6   : > { %755 = vst [vmem:[%s10558_s26 + $0x4b0] sm:$0xff] %v754_v22   ;;  %v1010_v22 = vld [vmem:[%s10553_s25 + $0xcb0] sm:$0xff]  }
  0xa7   : > { %759 = vst [vmem:[%s10558_s26 + $0x4b8] sm:$0xff] %v758_v23   ;;  %v1014_v23 = vld [vmem:[%s10553_s25 + $0xcb8] sm:$0xff]  }
  0xa8   : > { %763 = vst [vmem:[%s10558_s26 + $0x4c0] sm:$0xff] %v762_v24   ;;  %v1018_v24 = vld [vmem:[%s10553_s25 + $0xcc0] sm:$0xff]  }
  0xa9   : > { %767 = vst [vmem:[%s10558_s26 + $0x4c8] sm:$0xff] %v766_v25   ;;  %v1022_v25 = vld [vmem:[%s10553_s25 + $0xcc8] sm:$0xff]  }
  0xaa   : > { %771 = vst [vmem:[%s10558_s26 + $0x4d0] sm:$0xff] %v770_v26   ;;  %v1026_v26 = vld [vmem:[%s10553_s25 + $0xcd0] sm:$0xff]  }
  0xab   : > { %775 = vst [vmem:[%s10558_s26 + $0x4d8] sm:$0xff] %v774_v27   ;;  %v1030_v27 = vld [vmem:[%s10553_s25 + $0xcd8] sm:$0xff]  }
  0xac   : > { %779 = vst [vmem:[%s10558_s26 + $0x4e0] sm:$0xff] %v778_v28   ;;  %v1034_v28 = vld [vmem:[%s10553_s25 + $0xce0] sm:$0xff]  }
  0xad   : > { %783 = vst [vmem:[%s10558_s26 + $0x4e8] sm:$0xff] %v782_v29   ;;  %v1038_v29 = vld [vmem:[%s10553_s25 + $0xce8] sm:$0xff]  }
  0xae   : > { %787 = vst [vmem:[%s10558_s26 + $0x4f0] sm:$0xff] %v786_v30   ;;  %v1042_v30 = vld [vmem:[%s10553_s25 + $0xcf0] sm:$0xff]  }
  0xaf   : > { %791 = vst [vmem:[%s10558_s26 + $0x4f8] sm:$0xff] %v790_v31   ;;  %v1046_v31 = vld [vmem:[%s10553_s25 + $0xcf8] sm:$0xff]  }
  0xb0   : > { %795 = vst [vmem:[%s10558_s26 + $0x500] sm:$0xff] %v794_v32   ;;  %v1050_v32 = vld [vmem:[%s10553_s25 + $0xd00] sm:$0xff]  }
  0xb1   : > { %799 = vst [vmem:[%s10558_s26 + $0x508] sm:$0xff] %v798_v33   ;;  %v1054_v33 = vld [vmem:[%s10553_s25 + $0xd08] sm:$0xff]  }
  0xb2   : > { %803 = vst [vmem:[%s10558_s26 + $0x510] sm:$0xff] %v802_v34   ;;  %v1058_v34 = vld [vmem:[%s10553_s25 + $0xd10] sm:$0xff]  }
  0xb3   : > { %807 = vst [vmem:[%s10558_s26 + $0x518] sm:$0xff] %v806_v35   ;;  %v1062_v35 = vld [vmem:[%s10553_s25 + $0xd18] sm:$0xff]  }
  0xb4   : > { %811 = vst [vmem:[%s10558_s26 + $0x520] sm:$0xff] %v810_v36   ;;  %v1066_v36 = vld [vmem:[%s10553_s25 + $0xd20] sm:$0xff]  }
  0xb5   : > { %815 = vst [vmem:[%s10558_s26 + $0x528] sm:$0xff] %v814_v37   ;;  %v1070_v37 = vld [vmem:[%s10553_s25 + $0xd28] sm:$0xff]  }
  0xb6   : > { %819 = vst [vmem:[%s10558_s26 + $0x530] sm:$0xff] %v818_v38   ;;  %v1074_v38 = vld [vmem:[%s10553_s25 + $0xd30] sm:$0xff]  }
  0xb7   : > { %823 = vst [vmem:[%s10558_s26 + $0x538] sm:$0xff] %v822_v39   ;;  %v1078_v39 = vld [vmem:[%s10553_s25 + $0xd38] sm:$0xff]  }
  0xb8   : > { %827 = vst [vmem:[%s10558_s26 + $0x540] sm:$0xff] %v826_v40   ;;  %v1082_v40 = vld [vmem:[%s10553_s25 + $0xd40] sm:$0xff]  }
  0xb9   : > { %831 = vst [vmem:[%s10558_s26 + $0x548] sm:$0xff] %v830_v41   ;;  %v1086_v41 = vld [vmem:[%s10553_s25 + $0xd48] sm:$0xff]  }
  0xba   : > { %835 = vst [vmem:[%s10558_s26 + $0x550] sm:$0xff] %v834_v42   ;;  %v1090_v42 = vld [vmem:[%s10553_s25 + $0xd50] sm:$0xff]  }
  0xbb   : > { %839 = vst [vmem:[%s10558_s26 + $0x558] sm:$0xff] %v838_v43   ;;  %v1094_v43 = vld [vmem:[%s10553_s25 + $0xd58] sm:$0xff]  }
  0xbc   : > { %843 = vst [vmem:[%s10558_s26 + $0x560] sm:$0xff] %v842_v44   ;;  %v1098_v44 = vld [vmem:[%s10553_s25 + $0xd60] sm:$0xff]  }
  0xbd   : > { %847 = vst [vmem:[%s10558_s26 + $0x568] sm:$0xff] %v846_v45   ;;  %v1102_v45 = vld [vmem:[%s10553_s25 + $0xd68] sm:$0xff]  }
  0xbe   : > { %851 = vst [vmem:[%s10558_s26 + $0x570] sm:$0xff] %v850_v46   ;;  %v1106_v46 = vld [vmem:[%s10553_s25 + $0xd70] sm:$0xff]  }
  0xbf   : > { %855 = vst [vmem:[%s10558_s26 + $0x578] sm:$0xff] %v854_v47   ;;  %v1110_v47 = vld [vmem:[%s10553_s25 + $0xd78] sm:$0xff]  }
  0xc0   : > { %859 = vst [vmem:[%s10558_s26 + $0x580] sm:$0xff] %v858_v48   ;;  %v1114_v48 = vld [vmem:[%s10553_s25 + $0xd80] sm:$0xff]  }
  0xc1   : > { %863 = vst [vmem:[%s10558_s26 + $0x588] sm:$0xff] %v862_v49   ;;  %v1118_v49 = vld [vmem:[%s10553_s25 + $0xd88] sm:$0xff]  }
  0xc2   : > { %867 = vst [vmem:[%s10558_s26 + $0x590] sm:$0xff] %v866_v50   ;;  %v1122_v50 = vld [vmem:[%s10553_s25 + $0xd90] sm:$0xff]  }
  0xc3   : > { %871 = vst [vmem:[%s10558_s26 + $0x598] sm:$0xff] %v870_v51   ;;  %v1126_v51 = vld [vmem:[%s10553_s25 + $0xd98] sm:$0xff]  }
  0xc4   : > { %875 = vst [vmem:[%s10558_s26 + $0x5a0] sm:$0xff] %v874_v52   ;;  %v1130_v52 = vld [vmem:[%s10553_s25 + $0xda0] sm:$0xff]  }
  0xc5   : > { %879 = vst [vmem:[%s10558_s26 + $0x5a8] sm:$0xff] %v878_v53   ;;  %v1134_v53 = vld [vmem:[%s10553_s25 + $0xda8] sm:$0xff]  }
  0xc6   : > { %883 = vst [vmem:[%s10558_s26 + $0x5b0] sm:$0xff] %v882_v54   ;;  %v1138_v54 = vld [vmem:[%s10553_s25 + $0xdb0] sm:$0xff]  }
  0xc7   : > { %887 = vst [vmem:[%s10558_s26 + $0x5b8] sm:$0xff] %v886_v55   ;;  %v1142_v55 = vld [vmem:[%s10553_s25 + $0xdb8] sm:$0xff]  }
  0xc8   : > { %891 = vst [vmem:[%s10558_s26 + $0x5c0] sm:$0xff] %v890_v56   ;;  %v1146_v56 = vld [vmem:[%s10553_s25 + $0xdc0] sm:$0xff]  }
  0xc9   : > { %895 = vst [vmem:[%s10558_s26 + $0x5c8] sm:$0xff] %v894_v57   ;;  %v1150_v57 = vld [vmem:[%s10553_s25 + $0xdc8] sm:$0xff]  }
  0xca   : > { %899 = vst [vmem:[%s10558_s26 + $0x5d0] sm:$0xff] %v898_v58   ;;  %v1154_v58 = vld [vmem:[%s10553_s25 + $0xdd0] sm:$0xff]  }
  0xcb   : > { %903 = vst [vmem:[%s10558_s26 + $0x5d8] sm:$0xff] %v902_v59   ;;  %v1158_v59 = vld [vmem:[%s10553_s25 + $0xdd8] sm:$0xff]  }
  0xcc   : > { %907 = vst [vmem:[%s10558_s26 + $0x5e0] sm:$0xff] %v906_v60   ;;  %v1162_v60 = vld [vmem:[%s10553_s25 + $0xde0] sm:$0xff]  }
  0xcd   : > { %911 = vst [vmem:[%s10558_s26 + $0x5e8] sm:$0xff] %v910_v61   ;;  %v1166_v61 = vld [vmem:[%s10553_s25 + $0xde8] sm:$0xff]  }
  0xce   : > { %915 = vst [vmem:[%s10558_s26 + $0x5f0] sm:$0xff] %v914_v62   ;;  %v1170_v62 = vld [vmem:[%s10553_s25 + $0xdf0] sm:$0xff]  }
  0xcf   : > { %919 = vst [vmem:[%s10558_s26 + $0x5f8] sm:$0xff] %v918_v63   ;;  %v1174_v63 = vld [vmem:[%s10553_s25 + $0xdf8] sm:$0xff]  }
  0xd0   : > { %923 = vst [vmem:[%s10558_s26 + $0x600] sm:$0xff] %v922_v0  }
  0xd1   : > { %927 = vst [vmem:[%s10558_s26 + $0x608] sm:$0xff] %v926_v1  }
  0xd2   : > { %931 = vst [vmem:[%s10558_s26 + $0x610] sm:$0xff] %v930_v2  }
  0xd3   : > { %935 = vst [vmem:[%s10558_s26 + $0x618] sm:$0xff] %v934_v3  }
  0xd4   : > { %939 = vst [vmem:[%s10558_s26 + $0x620] sm:$0xff] %v938_v4  }
  0xd5   : > { %943 = vst [vmem:[%s10558_s26 + $0x628] sm:$0xff] %v942_v5  }
  0xd6   : > { %947 = vst [vmem:[%s10558_s26 + $0x630] sm:$0xff] %v946_v6  }
  0xd7   : > { %951 = vst [vmem:[%s10558_s26 + $0x638] sm:$0xff] %v950_v7  }
  0xd8   : > { %955 = vst [vmem:[%s10558_s26 + $0x640] sm:$0xff] %v954_v8  }
  0xd9   : > { %959 = vst [vmem:[%s10558_s26 + $0x648] sm:$0xff] %v958_v9  }
  0xda   : > { %963 = vst [vmem:[%s10558_s26 + $0x650] sm:$0xff] %v962_v10  }
  0xdb   : > { %967 = vst [vmem:[%s10558_s26 + $0x658] sm:$0xff] %v966_v11  }
  0xdc   : > { %971 = vst [vmem:[%s10558_s26 + $0x660] sm:$0xff] %v970_v12  }
  0xdd   : > { %975 = vst [vmem:[%s10558_s26 + $0x668] sm:$0xff] %v974_v13  }
  0xde   : > { %979 = vst [vmem:[%s10558_s26 + $0x670] sm:$0xff] %v978_v14  }
  0xdf   : > { %983 = vst [vmem:[%s10558_s26 + $0x678] sm:$0xff] %v982_v15  }
  0xe0   : > { %987 = vst [vmem:[%s10558_s26 + $0x680] sm:$0xff] %v986_v16  }
  0xe1   : > { %991 = vst [vmem:[%s10558_s26 + $0x688] sm:$0xff] %v990_v17  }
  0xe2   : > { %995 = vst [vmem:[%s10558_s26 + $0x690] sm:$0xff] %v994_v18  }
  0xe3   : > { %999 = vst [vmem:[%s10558_s26 + $0x698] sm:$0xff] %v998_v19  }
  0xe4   : > { %1003 = vst [vmem:[%s10558_s26 + $0x6a0] sm:$0xff] %v1002_v20  }
  0xe5   : > { %1007 = vst [vmem:[%s10558_s26 + $0x6a8] sm:$0xff] %v1006_v21  }
  0xe6   : > { %1011 = vst [vmem:[%s10558_s26 + $0x6b0] sm:$0xff] %v1010_v22  }
  0xe7   : > { %1015 = vst [vmem:[%s10558_s26 + $0x6b8] sm:$0xff] %v1014_v23  }
  0xe8   : > { %1019 = vst [vmem:[%s10558_s26 + $0x6c0] sm:$0xff] %v1018_v24  }
  0xe9   : > { %1023 = vst [vmem:[%s10558_s26 + $0x6c8] sm:$0xff] %v1022_v25  }
  0xea   : > { %1027 = vst [vmem:[%s10558_s26 + $0x6d0] sm:$0xff] %v1026_v26  }
  0xeb   : > { %1031 = vst [vmem:[%s10558_s26 + $0x6d8] sm:$0xff] %v1030_v27  }
  0xec   : > { %1035 = vst [vmem:[%s10558_s26 + $0x6e0] sm:$0xff] %v1034_v28  }
  0xed   : > { %1039 = vst [vmem:[%s10558_s26 + $0x6e8] sm:$0xff] %v1038_v29  }
  0xee   : > { %1043 = vst [vmem:[%s10558_s26 + $0x6f0] sm:$0xff] %v1042_v30  }
  0xef   : > { %1047 = vst [vmem:[%s10558_s26 + $0x6f8] sm:$0xff] %v1046_v31  }
  0xf0   : > { %1051 = vst [vmem:[%s10558_s26 + $0x700] sm:$0xff] %v1050_v32  }
  0xf1   : > { %1055 = vst [vmem:[%s10558_s26 + $0x708] sm:$0xff] %v1054_v33  }
  0xf2   : > { %1059 = vst [vmem:[%s10558_s26 + $0x710] sm:$0xff] %v1058_v34  }
  0xf3   : > { %1063 = vst [vmem:[%s10558_s26 + $0x718] sm:$0xff] %v1062_v35  }
  0xf4   : > { %1067 = vst [vmem:[%s10558_s26 + $0x720] sm:$0xff] %v1066_v36  }
  0xf5   : > { %1071 = vst [vmem:[%s10558_s26 + $0x728] sm:$0xff] %v1070_v37  }
  0xf6   : > { %1075 = vst [vmem:[%s10558_s26 + $0x730] sm:$0xff] %v1074_v38  }
  0xf7   : > { %1079 = vst [vmem:[%s10558_s26 + $0x738] sm:$0xff] %v1078_v39  }
  0xf8   : > { %1083 = vst [vmem:[%s10558_s26 + $0x740] sm:$0xff] %v1082_v40  }
  0xf9   : > { %1087 = vst [vmem:[%s10558_s26 + $0x748] sm:$0xff] %v1086_v41  }
  0xfa   : > { %1091 = vst [vmem:[%s10558_s26 + $0x750] sm:$0xff] %v1090_v42  }
  0xfb   : > { %1095 = vst [vmem:[%s10558_s26 + $0x758] sm:$0xff] %v1094_v43  }
  0xfc   : > { %1099 = vst [vmem:[%s10558_s26 + $0x760] sm:$0xff] %v1098_v44  }
  0xfd   : > { %1103 = vst [vmem:[%s10558_s26 + $0x768] sm:$0xff] %v1102_v45  }
  0xfe   : > { %1107 = vst [vmem:[%s10558_s26 + $0x770] sm:$0xff] %v1106_v46  }
  0xff   : > { %1111 = vst [vmem:[%s10558_s26 + $0x778] sm:$0xff] %v1110_v47  }
 0x100   : > { %1115 = vst [vmem:[%s10558_s26 + $0x780] sm:$0xff] %v1114_v48  }
 0x101   : > { %1119 = vst [vmem:[%s10558_s26 + $0x788] sm:$0xff] %v1118_v49  }
 0x102   : > { %1123 = vst [vmem:[%s10558_s26 + $0x790] sm:$0xff] %v1122_v50  }
 0x103   : > { %1127 = vst [vmem:[%s10558_s26 + $0x798] sm:$0xff] %v1126_v51  }
 0x104   : > { %1131 = vst [vmem:[%s10558_s26 + $0x7a0] sm:$0xff] %v1130_v52  }
 0x105   : > { %1135 = vst [vmem:[%s10558_s26 + $0x7a8] sm:$0xff] %v1134_v53  }
 0x106   : > { %1139 = vst [vmem:[%s10558_s26 + $0x7b0] sm:$0xff] %v1138_v54  }
 0x107   : > { %1143 = vst [vmem:[%s10558_s26 + $0x7b8] sm:$0xff] %v1142_v55  }
 0x108   : > { %1147 = vst [vmem:[%s10558_s26 + $0x7c0] sm:$0xff] %v1146_v56  }
 0x109   : > { %1151 = vst [vmem:[%s10558_s26 + $0x7c8] sm:$0xff] %v1150_v57  }
 0x10a   : > { %1155 = vst [vmem:[%s10558_s26 + $0x7d0] sm:$0xff] %v1154_v58  }
 0x10b   : > { %1159 = vst [vmem:[%s10558_s26 + $0x7d8] sm:$0xff] %v1158_v59  }
 0x10c   : > { %1163 = vst [vmem:[%s10558_s26 + $0x7e0] sm:$0xff] %v1162_v60  }
 0x10d   : > { %1167 = vst [vmem:[%s10558_s26 + $0x7e8] sm:$0xff] %v1166_v61  }
 0x10e   : > { %1171 = vst [vmem:[%s10558_s26 + $0x7f0] sm:$0xff] %v1170_v62  }
 0x10f   : > { %1175 = vst [vmem:[%s10558_s26 + $0x7f8] sm:$0xff] %v1174_v63  }
 0x110 PF: > { %p8713_p5 = scmp.ge.s32.totalorder %s10497_s14, 1  ;;  %p4298_p6 = scmp.lt.s32.totalorder %s10497_s14, 3 }
 0x112   : > { %p4299_p7 = pnand %p8713_p5, %p4298_p6 }
 0x113   : > { %s4305_s17 = sand.u32 (!%p4299_p7), 1, %s10489_s12   ;;  %s8715_s12 = sshll.u32 (!%p4299_p7), %s8706_s15, 7 }
 0x114   : > { %4302 = sbr.rel (%p4299_p7) target bundleno = 1473 (0x5c1), region = 80  ;;  %s8714_s21 = sshll.u32 (!%p4299_p7), %s4305_s17, 11 }
 0x115   : > { %s11096_s24 = scalar_lea.vmem (!%p4299_p7), [#allocation2], %s8714_s21  ;;  %p4330_p8 = scmp.lt.s32.totalorder (!%p4299_p7), %s8715_s12, 255 }
 0x119   : > { %v9783_v0 = vld [vmem:[%s11584_s1 + $0x38] sm:$0xff]  ;;  %v9782_v1 = vld [vmem:[%s11584_s1 + $0x30] sm:$0xff]  ;;  %v9781_v2 = vld [vmem:[%s11584_s1 + $0x28] sm:$0xff]  ;;  %s11591_s12 = smov (!%p4330_p8, %s8715_s12), 255 }
 0x11a   : > { %6447 = vmatpush.bf16.msra.mxu0 %v9783_v0  ;;  %10423 = vmatpush.bf16.msra.mxu1 %v9783_v0  ;;  %v9780_v3 = vld [vmem:[%s11584_s1 + $0x20] sm:$0xff]  ;;  %v9779_v4 = vld [vmem:[%s11584_s1 + $0x18] sm:$0xff]  ;;  %v9778_v5 = vld [vmem:[%s11584_s1 + $0x10] sm:$0xff]  ;;  %s8716_s14 = sshll.u32 %s11591_s12, 2 }
 0x11b   : > { %10424 = vmatpush.bf16.msra.mxu2 %v9783_v0  ;;  %10425 = vmatpush.bf16.msra.mxu3 %v9783_v0  ;;  %v9777_v6 = vld [vmem:[%s11584_s1 + $0x8] sm:$0xff]  ;;  %v9776_v7 = vld [vmem:[%s11584_s1] sm:$0xff]  ;;  %v9786_v16 = vld [vmem:[%s11096_s24 + $0x10] sm:$0xff]  ;;  %s11150_s28 = scalar_lea.vmem %s11586_s3, %s8716_s14 }
 0x11c   : > { %v9784_v8 = vld [vmem:[%s11096_s24] sm:$0xff]  ;;  %v9785_v12 = vld [vmem:[%s11096_s24 + $0x8] sm:$0xff]  ;;  %v9850_v17 = vld [vmem:[%s11096_s24 + $0x210] sm:$0xff] }
 0x11d   : > { %v9848_v9 = vld [vmem:[%s11096_s24 + $0x200] sm:$0xff]  ;;  %v9849_v13 = vld [vmem:[%s11096_s24 + $0x208] sm:$0xff]  ;;  %v9914_v18 = vld [vmem:[%s11096_s24 + $0x410] sm:$0xff] }
 0x11e   : > { %6448 = vmatpush.bf16.msra.mxu0 %v9782_v1  ;;  %10426 = vmatpush.bf16.msra.mxu1 %v9782_v1  ;;  %v9912_v10 = vld [vmem:[%s11096_s24 + $0x400] sm:$0xff]  ;;  %v9913_v14 = vld [vmem:[%s11096_s24 + $0x408] sm:$0xff]  ;;  %v9978_v19 = vld [vmem:[%s11096_s24 + $0x610] sm:$0xff] }
 0x11f   : > { %10427 = vmatpush.bf16.msra.mxu2 %v9782_v1  ;;  %10428 = vmatpush.bf16.msra.mxu3 %v9782_v1  ;;  %v9976_v11 = vld [vmem:[%s11096_s24 + $0x600] sm:$0xff]  ;;  %v9977_v15 = vld [vmem:[%s11096_s24 + $0x608] sm:$0xff]  ;;  %v9787_v20 = vld [vmem:[%s11096_s24 + $0x18] sm:$0xff] }
 0x120   : > { %v9851_v21 = vld [vmem:[%s11096_s24 + $0x218] sm:$0xff]  ;;  %v9788_v24 = vld [vmem:[%s11096_s24 + $0x20] sm:$0xff]  ;;  %v9789_v28 = vld [vmem:[%s11096_s24 + $0x28] sm:$0xff] }
 0x121   : > { %v9915_v22 = vld [vmem:[%s11096_s24 + $0x418] sm:$0xff]  ;;  %v9852_v25 = vld [vmem:[%s11096_s24 + $0x220] sm:$0xff]  ;;  %v9853_v29 = vld [vmem:[%s11096_s24 + $0x228] sm:$0xff] }
 0x122   : > { %6449 = vmatpush.bf16.msra.mxu0 %v9781_v2  ;;  %10429 = vmatpush.bf16.msra.mxu1 %v9781_v2  ;;  %v9979_v23 = vld [vmem:[%s11096_s24 + $0x618] sm:$0xff]  ;;  %v9916_v26 = vld [vmem:[%s11096_s24 + $0x420] sm:$0xff]  ;;  %v9917_v30 = vld [vmem:[%s11096_s24 + $0x428] sm:$0xff] }
 0x123   : > { %10430 = vmatpush.bf16.msra.mxu2 %v9781_v2  ;;  %10431 = vmatpush.bf16.msra.mxu3 %v9781_v2  ;;  %v9980_v27 = vld [vmem:[%s11096_s24 + $0x620] sm:$0xff]  ;;  %v9981_v31 = vld [vmem:[%s11096_s24 + $0x628] sm:$0xff]  ;;  %v9790_v32 = vld [vmem:[%s11096_s24 + $0x30] sm:$0xff] }
 0x124   : > { %v9854_v33 = vld [vmem:[%s11096_s24 + $0x230] sm:$0xff]  ;;  %v9791_v36 = vld [vmem:[%s11096_s24 + $0x38] sm:$0xff]  ;;  %v9792_v40 = vld [vmem:[%s11096_s24 + $0x40] sm:$0xff] }
 0x125   : > { %v9918_v34 = vld [vmem:[%s11096_s24 + $0x430] sm:$0xff]  ;;  %v9855_v37 = vld [vmem:[%s11096_s24 + $0x238] sm:$0xff]  ;;  %v9856_v41 = vld [vmem:[%s11096_s24 + $0x240] sm:$0xff] }
 0x126   : > { %6450 = vmatpush.bf16.msra.mxu0 %v9780_v3  ;;  %10432 = vmatpush.bf16.msra.mxu1 %v9780_v3  ;;  %v9982_v35 = vld [vmem:[%s11096_s24 + $0x630] sm:$0xff]  ;;  %v9919_v38 = vld [vmem:[%s11096_s24 + $0x438] sm:$0xff]  ;;  %v9920_v44 = vld [vmem:[%s11096_s24 + $0x440] sm:$0xff] }
 0x127   : > { %10433 = vmatpush.bf16.msra.mxu2 %v9780_v3  ;;  %10434 = vmatpush.bf16.msra.mxu3 %v9780_v3  ;;  %v9983_v39 = vld [vmem:[%s11096_s24 + $0x638] sm:$0xff]  ;;  %v9984_v45 = vld [vmem:[%s11096_s24 + $0x640] sm:$0xff]  ;;  %v9793_v57 = vld [vmem:[%s11096_s24 + $0x48] sm:$0xff] }
 0x128   : > { %v11139_v53 = vld [vmem:[%s11585_s2] ss:$0 sm:$0xff]  ;;  %v9857_v58 = vld [vmem:[%s11096_s24 + $0x248] sm:$0xff] }
 0x129   : > { %v9921_v62 = vld [vmem:[%s11096_s24 + $0x448] sm:$0xff] }
 0x12a   : > { %6451 = vmatpush.bf16.msra.mxu0 %v9779_v4  ;;  %10435 = vmatpush.bf16.msra.mxu1 %v9779_v4  ;;  %v9985_v63 = vld [vmem:[%s11096_s24 + $0x648] sm:$0xff] }
 0x12b   : > { %10436 = vmatpush.bf16.msra.mxu2 %v9779_v4  ;;  %10437 = vmatpush.bf16.msra.mxu3 %v9779_v4 }
 0x12e   : > { %6452 = vmatpush.bf16.msra.mxu0 %v9778_v5  ;;  %10438 = vmatpush.bf16.msra.mxu1 %v9778_v5 }
 0x12f   : > { %10439 = vmatpush.bf16.msra.mxu2 %v9778_v5  ;;  %10440 = vmatpush.bf16.msra.mxu3 %v9778_v5 }
 0x132   : > { %6453 = vmatpush.bf16.msra.mxu0 %v9777_v6  ;;  %10441 = vmatpush.bf16.msra.mxu1 %v9777_v6 }
 0x133   : > { %10442 = vmatpush.bf16.msra.mxu2 %v9777_v6  ;;  %10443 = vmatpush.bf16.msra.mxu3 %v9777_v6 }
 0x136   : > { %6454 = vmatpush.bf16.msra.mxu0 %v9776_v7  ;;  %10444 = vmatpush.bf16.msra.mxu1 %v9776_v7 }
 0x137   : > { %10445 = vmatpush.bf16.msra.mxu2 %v9776_v7  ;;  %10446 = vmatpush.bf16.msra.mxu3 %v9776_v7 }
 0x139   : > { %6455 = vmatmul.bf16.vlgmr.msra.gmra.mxu0 %v9784_v8  ;;  %6775 = vmatmul.bf16.vlgmr.msra.gmra.mxu1 %v9848_v9 }
 0x13a   : > { %7095 = vmatmul.bf16.vlgmr.msra.gmra.mxu2 %v9912_v10  ;;  %7415 = vmatmul.bf16.vlgmr.msra.gmra.mxu3 %v9976_v11 }
 0x149   : > { %6460 = vmatmul.bf16.gmra.mxu0 %v9785_v12  ;;  %6780 = vmatmul.bf16.gmra.mxu1 %v9849_v13 }
 0x14a   : > { %7100 = vmatmul.bf16.gmra.mxu2 %v9913_v14  ;;  %7420 = vmatmul.bf16.gmra.mxu3 %v9977_v15 }
 0x159   : > { %6465 = vmatmul.bf16.gmra.mxu0 %v9786_v16  ;;  %6785 = vmatmul.bf16.gmra.mxu1 %v9850_v17  ;;  %v9794_v16 = vld [vmem:[%s11096_s24 + $0x50] sm:$0xff] }
 0x15a   : > { %7105 = vmatmul.bf16.gmra.mxu2 %v9914_v18  ;;  %7425 = vmatmul.bf16.gmra.mxu3 %v9978_v19  ;;  %v9858_v17 = vld [vmem:[%s11096_s24 + $0x250] sm:$0xff] }
 0x169   : > { %6470 = vmatmul.bf16.gmra.mxu0 %v9787_v20  ;;  %6790 = vmatmul.bf16.gmra.mxu1 %v9851_v21  ;;  %v9922_v21 = vld [vmem:[%s11096_s24 + $0x450] sm:$0xff] }
 0x16a   : > { %7110 = vmatmul.bf16.gmra.mxu2 %v9915_v22  ;;  %7430 = vmatmul.bf16.gmra.mxu3 %v9979_v23  ;;  %v9986_v22 = vld [vmem:[%s11096_s24 + $0x650] sm:$0xff] }
 0x179   : > { %6475 = vmatmul.bf16.gmra.mxu0 %v9788_v24  ;;  %6795 = vmatmul.bf16.gmra.mxu1 %v9852_v25 }
 0x17a   : > { %7115 = vmatmul.bf16.gmra.mxu2 %v9916_v26  ;;  %7435 = vmatmul.bf16.gmra.mxu3 %v9980_v27 }
 0x189   : > { %6480 = vmatmul.bf16.gmra.mxu0 %v9789_v28  ;;  %6800 = vmatmul.bf16.gmra.mxu1 %v9853_v29 }
 0x18a   : > { %7120 = vmatmul.bf16.gmra.mxu2 %v9917_v30  ;;  %7440 = vmatmul.bf16.gmra.mxu3 %v9981_v31 }
 0x199   : > { %6485 = vmatmul.bf16.gmra.mxu0 %v9790_v32  ;;  %6805 = vmatmul.bf16.gmra.mxu1 %v9854_v33 }
 0x19a   : > { %7125 = vmatmul.bf16.gmra.mxu2 %v9918_v34  ;;  %7445 = vmatmul.bf16.gmra.mxu3 %v9982_v35 }
 0x1a9   : > { %6490 = vmatmul.bf16.gmra.mxu0 %v9791_v36  ;;  %6810 = vmatmul.bf16.gmra.mxu1 %v9855_v37 }
 0x1aa   : > { %7130 = vmatmul.bf16.gmra.mxu2 %v9919_v38  ;;  %7450 = vmatmul.bf16.gmra.mxu3 %v9983_v39  ;;  %v9795_v39 = vld [vmem:[%s11096_s24 + $0x58] sm:$0xff] }
 0x1b6   : > { %v6456_v42 = vpop.f32.mrf.mxu0  ;;  %v6776_v43 = vpop.f32.mrf.mxu1 }
 0x1b7   : > { %v7736_v46 = vmax.f32 %v6456_v42, %v6776_v43 }
 0x1b9   : > { %6495 = vmatmul.bf16.gmra.mxu0 %v9792_v40  ;;  %6815 = vmatmul.bf16.gmra.mxu1 %v9856_v41  ;;  %v9859_v40 = vld [vmem:[%s11096_s24 + $0x258] sm:$0xff] }
 0x1ba   : > { %7135 = vmatmul.bf16.gmra.mxu2 %v9920_v44  ;;  %7455 = vmatmul.bf16.gmra.mxu3 %v9984_v45  ;;  %v9923_v44 = vld [vmem:[%s11096_s24 + $0x458] sm:$0xff] }
 0x1bb   : > { %v9987_v45 = vld [vmem:[%s11096_s24 + $0x658] sm:$0xff] }
 0x1bd   : > { %v7096_v47 = vpop.f32.mrf.mxu2  ;;  %v7416_v48 = vpop.f32.mrf.mxu3 }
 0x1be   : > { %v6458_v49 = vpop.f32.mrf.mxu0  ;;  %v6778_v50 = vpop.f32.mrf.mxu1  ;;  %v7737_v51 = vmax.f32 %v7736_v46, %v7096_v47 }
 0x1bf   : > { %v7739_v54 = vmax.f32 %v6458_v49, %v6778_v50 }
 0x1c0   : > { %v7738_v52 = vmax.f32 %v7737_v51, %v7416_v48 }
 0x1c2   : > { %v8124_v0 = vadd.f32 %v11139_v53, %v7738_v52 }
 0x1c4   : > { %v8252_v3 = vmax.f32 %v8124_v0, 0.0  ;;  %v9860_v0 = vld [vmem:[%s11096_s24 + $0x260] sm:$0xff] }
 0x1c5   : > { %v7098_v55 = vpop.f32.mrf.mxu2  ;;  %v7418_v56 = vpop.f32.mrf.mxu3 }
 0x1c6   : > { %v7740_v59 = vmax.f32 %v7739_v54, %v7098_v55  ;;  %v6461_v60 = vpop.f32.mrf.mxu0  ;;  %v6781_v61 = vpop.f32.mrf.mxu1 }
 0x1c7   : > { %v7742_v5 = vmax.f32 %v6461_v60, %v6781_v61 }
 0x1c8   : > { %v7741_v1 = vmax.f32 %v7740_v59, %v7418_v56 }
 0x1c9   : > { %6500 = vmatmul.bf16.gmra.mxu0 %v9793_v57  ;;  %6820 = vmatmul.bf16.gmra.mxu1 %v9857_v58 }
 0x1ca   : > { %v8125_v2 = vadd.f32 %v11139_v53, %v7741_v1  ;;  %7140 = vmatmul.bf16.gmra.mxu2 %v9921_v62  ;;  %7460 = vmatmul.bf16.gmra.mxu3 %v9985_v63  ;;  %v9796_v63 = vld [vmem:[%s11096_s24 + $0x60] sm:$0xff] }
 0x1cc   : > { %v8253_v4 = vmax.f32 %v8125_v2, 0.0 }
 0x1cd   : > { %v7101_v6 = vpop.f32.mrf.mxu2  ;;  %v7421_v7 = vpop.f32.mrf.mxu3 }
 0x1ce   : > { %v10043_v8 = vpack.c.bf16 %v8253_v4, %v8252_v3  ;;  %v6463_v9 = vpop.f32.mrf.mxu0  ;;  %v6783_v10 = vpop.f32.mrf.mxu1  ;;  %v7743_v11 = vmax.f32 %v7742_v5, %v7101_v6  ;;  %v9924_v4 = vld [vmem:[%s11096_s24 + $0x460] sm:$0xff] }
 0x1cf   : > { %v7745_v13 = vmax.f32 %v6463_v9, %v6783_v10  ;;  %v9988_v5 = vld [vmem:[%s11096_s24 + $0x660] sm:$0xff] }
 0x1d0   : > { %10044 = vst [vmem:[%s11150_s28] sm:$0xff] %v10043_v8   ;;  %v7744_v12 = vmax.f32 %v7743_v11, %v7421_v7 }
 0x1d2   : > { %v8126_v23 = vadd.f32 %v11139_v53, %v7744_v12 }
 0x1d4   : > { %v8254_v26 = vmax.f32 %v8126_v23, 0.0  ;;  %v9861_v23 = vld [vmem:[%s11096_s24 + $0x268] sm:$0xff] }
 0x1d5   : > { %v7103_v14 = vpop.f32.mrf.mxu2  ;;  %v7423_v15 = vpop.f32.mrf.mxu3 }
 0x1d6   : > { %v7746_v18 = vmax.f32 %v7745_v13, %v7103_v14  ;;  %v6466_v19 = vpop.f32.mrf.mxu0  ;;  %v6786_v20 = vpop.f32.mrf.mxu1 }
 0x1d7   : > { %v7748_v28 = vmax.f32 %v6466_v19, %v6786_v20 }
 0x1d8   : > { %v7747_v24 = vmax.f32 %v7746_v18, %v7423_v15 }
 0x1d9   : > { %6505 = vmatmul.bf16.gmra.mxu0 %v9794_v16  ;;  %6825 = vmatmul.bf16.gmra.mxu1 %v9858_v17 }
 0x1da   : > { %v8127_v25 = vadd.f32 %v11139_v53, %v7747_v24  ;;  %7145 = vmatmul.bf16.gmra.mxu2 %v9922_v21  ;;  %7465 = vmatmul.bf16.gmra.mxu3 %v9986_v22  ;;  %v9797_v22 = vld [vmem:[%s11096_s24 + $0x68] sm:$0xff] }
 0x1dc   : > { %v8255_v27 = vmax.f32 %v8127_v25, 0.0 }
 0x1dd   : > { %v7106_v29 = vpop.f32.mrf.mxu2  ;;  %v7426_v30 = vpop.f32.mrf.mxu3 }
 0x1de   : > { %v10048_v31 = vpack.c.bf16 %v8255_v27, %v8254_v26  ;;  %v6468_v32 = vpop.f32.mrf.mxu0  ;;  %v6788_v33 = vpop.f32.mrf.mxu1  ;;  %v7749_v34 = vmax.f32 %v7748_v28, %v7106_v29  ;;  %v9925_v27 = vld [vmem:[%s11096_s24 + $0x468] sm:$0xff] }
 0x1df   : > { %v7751_v36 = vmax.f32 %v6468_v32, %v6788_v33  ;;  %v9989_v28 = vld [vmem:[%s11096_s24 + $0x668] sm:$0xff] }
 0x1e0   : > { %10360 = vst [vmem:[%s11150_s28 + $0x8] sm:$0xff] %v10048_v31   ;;  %v7750_v35 = vmax.f32 %v7749_v34, %v7426_v30 }
 0x1e2   : > { %v8128_v46 = vadd.f32 %v11139_v53, %v7750_v35 }
 0x1e4   : > { %v8256_v49 = vmax.f32 %v8128_v46, 0.0  ;;  %v9862_v46 = vld [vmem:[%s11096_s24 + $0x270] sm:$0xff] }
 0x1e5   : > { %v7108_v37 = vpop.f32.mrf.mxu2  ;;  %v7428_v38 = vpop.f32.mrf.mxu3 }
 0x1e6   : > { %v7752_v41 = vmax.f32 %v7751_v36, %v7108_v37  ;;  %v6471_v42 = vpop.f32.mrf.mxu0  ;;  %v6791_v43 = vpop.f32.mrf.mxu1 }
 0x1e7   : > { %v7754_v51 = vmax.f32 %v6471_v42, %v6791_v43 }
 0x1e8   : > { %v7753_v47 = vmax.f32 %v7752_v41, %v7428_v38 }
 0x1e9   : > { %6510 = vmatmul.bf16.gmra.mxu0 %v9795_v39  ;;  %6830 = vmatmul.bf16.gmra.mxu1 %v9859_v40 }
 0x1ea   : > { %v8129_v48 = vadd.f32 %v11139_v53, %v7753_v47  ;;  %7150 = vmatmul.bf16.gmra.mxu2 %v9923_v44  ;;  %7470 = vmatmul.bf16.gmra.mxu3 %v9987_v45  ;;  %v9798_v45 = vld [vmem:[%s11096_s24 + $0x70] sm:$0xff] }
 0x1ec   : > { %v8257_v50 = vmax.f32 %v8129_v48, 0.0 }
 0x1ed   : > { %v7111_v52 = vpop.f32.mrf.mxu2  ;;  %v7431_v54 = vpop.f32.mrf.mxu3 }
 0x1ee   : > { %v10053_v55 = vpack.c.bf16 %v8257_v50, %v8256_v49  ;;  %v6473_v56 = vpop.f32.mrf.mxu0  ;;  %v6793_v57 = vpop.f32.mrf.mxu1  ;;  %v7755_v58 = vmax.f32 %v7754_v51, %v7111_v52  ;;  %v9926_v50 = vld [vmem:[%s11096_s24 + $0x470] sm:$0xff] }
 0x1ef   : > { %v7757_v60 = vmax.f32 %v6473_v56, %v6793_v57  ;;  %v9990_v51 = vld [vmem:[%s11096_s24 + $0x670] sm:$0xff] }
 0x1f0   : > { %10361 = vst [vmem:[%s11150_s28 + $0x10] sm:$0xff] %v10053_v55   ;;  %v7756_v59 = vmax.f32 %v7755_v58, %v7431_v54 }
 0x1f2   : > { %v8130_v6 = vadd.f32 %v11139_v53, %v7756_v59 }
 0x1f4   : > { %v8258_v9 = vmax.f32 %v8130_v6, 0.0  ;;  %v9863_v6 = vld [vmem:[%s11096_s24 + $0x278] sm:$0xff] }
 0x1f5   : > { %v7113_v61 = vpop.f32.mrf.mxu2  ;;  %v7433_v62 = vpop.f32.mrf.mxu3 }
 0x1f6   : > { %v7758_v1 = vmax.f32 %v7757_v60, %v7113_v61  ;;  %v6476_v2 = vpop.f32.mrf.mxu0  ;;  %v6796_v3 = vpop.f32.mrf.mxu1 }
 0x1f7   : > { %v7760_v11 = vmax.f32 %v6476_v2, %v6796_v3 }
 0x1f8   : > { %v7759_v7 = vmax.f32 %v7758_v1, %v7433_v62 }
 0x1f9   : > { %6515 = vmatmul.bf16.gmra.mxu0 %v9796_v63  ;;  %6835 = vmatmul.bf16.gmra.mxu1 %v9860_v0 }
 0x1fa   : > { %v8131_v8 = vadd.f32 %v11139_v53, %v7759_v7  ;;  %7155 = vmatmul.bf16.gmra.mxu2 %v9924_v4  ;;  %7475 = vmatmul.bf16.gmra.mxu3 %v9988_v5  ;;  %v9799_v5 = vld [vmem:[%s11096_s24 + $0x78] sm:$0xff] }
 0x1fc   : > { %v8259_v10 = vmax.f32 %v8131_v8, 0.0 }
 0x1fd   : > { %v7116_v12 = vpop.f32.mrf.mxu2  ;;  %v7436_v13 = vpop.f32.mrf.mxu3 }
 0x1fe   : > { %v10058_v14 = vpack.c.bf16 %v8259_v10, %v8258_v9  ;;  %v6478_v15 = vpop.f32.mrf.mxu0  ;;  %v6798_v16 = vpop.f32.mrf.mxu1  ;;  %v7761_v17 = vmax.f32 %v7760_v11, %v7116_v12  ;;  %v9927_v10 = vld [vmem:[%s11096_s24 + $0x478] sm:$0xff] }
 0x1ff   : > { %v7763_v19 = vmax.f32 %v6478_v15, %v6798_v16  ;;  %v9991_v11 = vld [vmem:[%s11096_s24 + $0x678] sm:$0xff] }
 0x200   : > { %10362 = vst [vmem:[%s11150_s28 + $0x18] sm:$0xff] %v10058_v14   ;;  %v7762_v18 = vmax.f32 %v7761_v17, %v7436_v13 }
 0x202   : > { %v8132_v29 = vadd.f32 %v11139_v53, %v7762_v18 }
 0x204   : > { %v8260_v32 = vmax.f32 %v8132_v29, 0.0  ;;  %v9864_v29 = vld [vmem:[%s11096_s24 + $0x280] sm:$0xff] }
 0x205   : > { %v7118_v20 = vpop.f32.mrf.mxu2  ;;  %v7438_v21 = vpop.f32.mrf.mxu3 }
 0x206   : > { %v7764_v24 = vmax.f32 %v7763_v19, %v7118_v20  ;;  %v6481_v25 = vpop.f32.mrf.mxu0  ;;  %v6801_v26 = vpop.f32.mrf.mxu1 }
 0x207   : > { %v7766_v34 = vmax.f32 %v6481_v25, %v6801_v26 }
 0x208   : > { %v7765_v30 = vmax.f32 %v7764_v24, %v7438_v21 }
 0x209   : > { %6520 = vmatmul.bf16.gmra.mxu0 %v9797_v22  ;;  %6840 = vmatmul.bf16.gmra.mxu1 %v9861_v23 }
 0x20a   : > { %v8133_v31 = vadd.f32 %v11139_v53, %v7765_v30  ;;  %7160 = vmatmul.bf16.gmra.mxu2 %v9925_v27  ;;  %7480 = vmatmul.bf16.gmra.mxu3 %v9989_v28  ;;  %v9800_v28 = vld [vmem:[%s11096_s24 + $0x80] sm:$0xff] }
 0x20c   : > { %v8261_v33 = vmax.f32 %v8133_v31, 0.0 }
 0x20d   : > { %v7121_v35 = vpop.f32.mrf.mxu2  ;;  %v7441_v36 = vpop.f32.mrf.mxu3 }
 0x20e   : > { %v10063_v37 = vpack.c.bf16 %v8261_v33, %v8260_v32  ;;  %v6483_v38 = vpop.f32.mrf.mxu0  ;;  %v6803_v39 = vpop.f32.mrf.mxu1  ;;  %v7767_v40 = vmax.f32 %v7766_v34, %v7121_v35  ;;  %v9928_v33 = vld [vmem:[%s11096_s24 + $0x480] sm:$0xff] }
 0x20f   : > { %v7769_v42 = vmax.f32 %v6483_v38, %v6803_v39  ;;  %v9992_v34 = vld [vmem:[%s11096_s24 + $0x680] sm:$0xff] }
 0x210   : > { %10363 = vst [vmem:[%s11150_s28 + $0x20] sm:$0xff] %v10063_v37   ;;  %v7768_v41 = vmax.f32 %v7767_v40, %v7441_v36 }
 0x212   : > { %v8134_v52 = vadd.f32 %v11139_v53, %v7768_v41 }
 0x214   : > { %v8262_v56 = vmax.f32 %v8134_v52, 0.0  ;;  %v9865_v52 = vld [vmem:[%s11096_s24 + $0x288] sm:$0xff] }
 0x215   : > { %v7123_v43 = vpop.f32.mrf.mxu2  ;;  %v7443_v44 = vpop.f32.mrf.mxu3 }
 0x216   : > { %v7770_v47 = vmax.f32 %v7769_v42, %v7123_v43  ;;  %v6486_v48 = vpop.f32.mrf.mxu0  ;;  %v6806_v49 = vpop.f32.mrf.mxu1 }
 0x217   : > { %v7772_v58 = vmax.f32 %v6486_v48, %v6806_v49 }
 0x218   : > { %v7771_v54 = vmax.f32 %v7770_v47, %v7443_v44 }
 0x219   : > { %6525 = vmatmul.bf16.gmra.mxu0 %v9798_v45  ;;  %6845 = vmatmul.bf16.gmra.mxu1 %v9862_v46 }
 0x21a   : > { %v8135_v55 = vadd.f32 %v11139_v53, %v7771_v54  ;;  %7165 = vmatmul.bf16.gmra.mxu2 %v9926_v50  ;;  %7485 = vmatmul.bf16.gmra.mxu3 %v9990_v51  ;;  %v9801_v51 = vld [vmem:[%s11096_s24 + $0x88] sm:$0xff] }
 0x21c   : > { %v8263_v57 = vmax.f32 %v8135_v55, 0.0 }
 0x21d   : > { %v7126_v59 = vpop.f32.mrf.mxu2  ;;  %v7446_v60 = vpop.f32.mrf.mxu3 }
 0x21e   : > { %v10068_v61 = vpack.c.bf16 %v8263_v57, %v8262_v56  ;;  %v6488_v62 = vpop.f32.mrf.mxu0  ;;  %v6808_v63 = vpop.f32.mrf.mxu1  ;;  %v7773_v0 = vmax.f32 %v7772_v58, %v7126_v59  ;;  %v9929_v57 = vld [vmem:[%s11096_s24 + $0x488] sm:$0xff] }
 0x21f   : > { %v7775_v2 = vmax.f32 %v6488_v62, %v6808_v63  ;;  %v9993_v58 = vld [vmem:[%s11096_s24 + $0x688] sm:$0xff] }
 0x220   : > { %10364 = vst [vmem:[%s11150_s28 + $0x28] sm:$0xff] %v10068_v61   ;;  %v7774_v1 = vmax.f32 %v7773_v0, %v7446_v60 }
 0x222   : > { %v8136_v12 = vadd.f32 %v11139_v53, %v7774_v1 }
 0x224   : > { %v8264_v15 = vmax.f32 %v8136_v12, 0.0  ;;  %v9866_v12 = vld [vmem:[%s11096_s24 + $0x290] sm:$0xff] }
 0x225   : > { %v7128_v3 = vpop.f32.mrf.mxu2  ;;  %v7448_v4 = vpop.f32.mrf.mxu3 }
 0x226   : > { %v7776_v7 = vmax.f32 %v7775_v2, %v7128_v3  ;;  %v6491_v8 = vpop.f32.mrf.mxu0  ;;  %v6811_v9 = vpop.f32.mrf.mxu1 }
 0x227   : > { %v7778_v17 = vmax.f32 %v6491_v8, %v6811_v9 }
 0x228   : > { %v7777_v13 = vmax.f32 %v7776_v7, %v7448_v4 }
 0x229   : > { %6530 = vmatmul.bf16.gmra.mxu0 %v9799_v5  ;;  %6850 = vmatmul.bf16.gmra.mxu1 %v9863_v6 }
 0x22a   : > { %v8137_v14 = vadd.f32 %v11139_v53, %v7777_v13  ;;  %7170 = vmatmul.bf16.gmra.mxu2 %v9927_v10  ;;  %7490 = vmatmul.bf16.gmra.mxu3 %v9991_v11  ;;  %v9802_v11 = vld [vmem:[%s11096_s24 + $0x90] sm:$0xff] }
 0x22c   : > { %v8265_v16 = vmax.f32 %v8137_v14, 0.0 }
 0x22d   : > { %v7131_v18 = vpop.f32.mrf.mxu2  ;;  %v7451_v19 = vpop.f32.mrf.mxu3 }
 0x22e   : > { %v10073_v20 = vpack.c.bf16 %v8265_v16, %v8264_v15  ;;  %v6493_v21 = vpop.f32.mrf.mxu0  ;;  %v6813_v22 = vpop.f32.mrf.mxu1  ;;  %v7779_v23 = vmax.f32 %v7778_v17, %v7131_v18  ;;  %v9930_v16 = vld [vmem:[%s11096_s24 + $0x490] sm:$0xff] }
 0x22f   : > { %v7781_v25 = vmax.f32 %v6493_v21, %v6813_v22  ;;  %v9994_v17 = vld [vmem:[%s11096_s24 + $0x690] sm:$0xff] }
 0x230   : > { %10365 = vst [vmem:[%s11150_s28 + $0x30] sm:$0xff] %v10073_v20   ;;  %v7780_v24 = vmax.f32 %v7779_v23, %v7451_v19 }
 0x232   : > { %v8138_v35 = vadd.f32 %v11139_v53, %v7780_v24 }
 0x234   : > { %v8266_v38 = vmax.f32 %v8138_v35, 0.0  ;;  %v9867_v35 = vld [vmem:[%s11096_s24 + $0x298] sm:$0xff] }
 0x235   : > { %v7133_v26 = vpop.f32.mrf.mxu2  ;;  %v7453_v27 = vpop.f32.mrf.mxu3 }
 0x236   : > { %v7782_v30 = vmax.f32 %v7781_v25, %v7133_v26  ;;  %v6496_v31 = vpop.f32.mrf.mxu0  ;;  %v6816_v32 = vpop.f32.mrf.mxu1 }
 0x237   : > { %v7784_v40 = vmax.f32 %v6496_v31, %v6816_v32 }
 0x238   : > { %v7783_v36 = vmax.f32 %v7782_v30, %v7453_v27 }
 0x239   : > { %6535 = vmatmul.bf16.gmra.mxu0 %v9800_v28  ;;  %6855 = vmatmul.bf16.gmra.mxu1 %v9864_v29 }
 0x23a   : > { %v8139_v37 = vadd.f32 %v11139_v53, %v7783_v36  ;;  %7175 = vmatmul.bf16.gmra.mxu2 %v9928_v33  ;;  %7495 = vmatmul.bf16.gmra.mxu3 %v9992_v34  ;;  %v9803_v34 = vld [vmem:[%s11096_s24 + $0x98] sm:$0xff] }
 0x23c   : > { %v8267_v39 = vmax.f32 %v8139_v37, 0.0 }
 0x23d   : > { %v7136_v41 = vpop.f32.mrf.mxu2  ;;  %v7456_v42 = vpop.f32.mrf.mxu3 }
 0x23e   : > { %v10078_v43 = vpack.c.bf16 %v8267_v39, %v8266_v38  ;;  %v6498_v44 = vpop.f32.mrf.mxu0  ;;  %v6818_v45 = vpop.f32.mrf.mxu1  ;;  %v7785_v46 = vmax.f32 %v7784_v40, %v7136_v41  ;;  %v9931_v39 = vld [vmem:[%s11096_s24 + $0x498] sm:$0xff] }
 0x23f   : > { %v7787_v48 = vmax.f32 %v6498_v44, %v6818_v45  ;;  %v9995_v40 = vld [vmem:[%s11096_s24 + $0x698] sm:$0xff] }
 0x240   : > { %10366 = vst [vmem:[%s11150_s28 + $0x38] sm:$0xff] %v10078_v43   ;;  %v7786_v47 = vmax.f32 %v7785_v46, %v7456_v42 }
 0x242   : > { %v8140_v59 = vadd.f32 %v11139_v53, %v7786_v47 }
 0x244   : > { %v8268_v62 = vmax.f32 %v8140_v59, 0.0  ;;  %v9868_v59 = vld [vmem:[%s11096_s24 + $0x2a0] sm:$0xff] }
 0x245   : > { %v7138_v49 = vpop.f32.mrf.mxu2  ;;  %v7458_v50 = vpop.f32.mrf.mxu3 }
 0x246   : > { %v7788_v54 = vmax.f32 %v7787_v48, %v7138_v49  ;;  %v6501_v55 = vpop.f32.mrf.mxu0  ;;  %v6821_v56 = vpop.f32.mrf.mxu1 }
 0x247   : > { %v7790_v0 = vmax.f32 %v6501_v55, %v6821_v56 }
 0x248   : > { %v7789_v60 = vmax.f32 %v7788_v54, %v7458_v50 }
 0x249   : > { %6540 = vmatmul.bf16.gmra.mxu0 %v9801_v51  ;;  %6860 = vmatmul.bf16.gmra.mxu1 %v9865_v52 }
 0x24a   : > { %v8141_v61 = vadd.f32 %v11139_v53, %v7789_v60  ;;  %7180 = vmatmul.bf16.gmra.mxu2 %v9929_v57  ;;  %7500 = vmatmul.bf16.gmra.mxu3 %v9993_v58  ;;  %v9804_v58 = vld [vmem:[%s11096_s24 + $0xa0] sm:$0xff] }
 0x24c   : > { %v8269_v63 = vmax.f32 %v8141_v61, 0.0 }
 0x24d   : > { %v7141_v1 = vpop.f32.mrf.mxu2  ;;  %v7461_v2 = vpop.f32.mrf.mxu3 }
 0x24e   : > { %v10083_v3 = vpack.c.bf16 %v8269_v63, %v8268_v62  ;;  %v6503_v4 = vpop.f32.mrf.mxu0  ;;  %v6823_v5 = vpop.f32.mrf.mxu1  ;;  %v7791_v6 = vmax.f32 %v7790_v0, %v7141_v1  ;;  %v9932_v63 = vld [vmem:[%s11096_s24 + $0x4a0] sm:$0xff] }
 0x24f   : > { %v7793_v8 = vmax.f32 %v6503_v4, %v6823_v5  ;;  %v9996_v0 = vld [vmem:[%s11096_s24 + $0x6a0] sm:$0xff] }
 0x250   : > { %10367 = vst [vmem:[%s11150_s28 + $0x40] sm:$0xff] %v10083_v3   ;;  %v7792_v7 = vmax.f32 %v7791_v6, %v7461_v2 }
 0x252   : > { %v8142_v18 = vadd.f32 %v11139_v53, %v7792_v7 }
 0x254   : > { %v8270_v21 = vmax.f32 %v8142_v18, 0.0  ;;  %v9869_v18 = vld [vmem:[%s11096_s24 + $0x2a8] sm:$0xff] }
 0x255   : > { %v7143_v9 = vpop.f32.mrf.mxu2  ;;  %v7463_v10 = vpop.f32.mrf.mxu3 }
 0x256   : > { %v7794_v13 = vmax.f32 %v7793_v8, %v7143_v9  ;;  %v6506_v14 = vpop.f32.mrf.mxu0  ;;  %v6826_v15 = vpop.f32.mrf.mxu1 }
 0x257   : > { %v7796_v23 = vmax.f32 %v6506_v14, %v6826_v15 }
 0x258   : > { %v7795_v19 = vmax.f32 %v7794_v13, %v7463_v10 }
 0x259   : > { %6545 = vmatmul.bf16.gmra.mxu0 %v9802_v11  ;;  %6865 = vmatmul.bf16.gmra.mxu1 %v9866_v12 }
 0x25a   : > { %v8143_v20 = vadd.f32 %v11139_v53, %v7795_v19  ;;  %7185 = vmatmul.bf16.gmra.mxu2 %v9930_v16  ;;  %7505 = vmatmul.bf16.gmra.mxu3 %v9994_v17  ;;  %v9805_v17 = vld [vmem:[%s11096_s24 + $0xa8] sm:$0xff] }
 0x25c   : > { %v8271_v22 = vmax.f32 %v8143_v20, 0.0 }
 0x25d   : > { %v7146_v24 = vpop.f32.mrf.mxu2  ;;  %v7466_v25 = vpop.f32.mrf.mxu3 }
 0x25e   : > { %v10088_v26 = vpack.c.bf16 %v8271_v22, %v8270_v21  ;;  %v6508_v27 = vpop.f32.mrf.mxu0  ;;  %v6828_v28 = vpop.f32.mrf.mxu1  ;;  %v7797_v29 = vmax.f32 %v7796_v23, %v7146_v24  ;;  %v9933_v22 = vld [vmem:[%s11096_s24 + $0x4a8] sm:$0xff] }
 0x25f   : > { %v7799_v31 = vmax.f32 %v6508_v27, %v6828_v28  ;;  %v9997_v23 = vld [vmem:[%s11096_s24 + $0x6a8] sm:$0xff] }
 0x260   : > { %10368 = vst [vmem:[%s11150_s28 + $0x48] sm:$0xff] %v10088_v26   ;;  %v7798_v30 = vmax.f32 %v7797_v29, %v7466_v25 }
 0x262   : > { %v8144_v41 = vadd.f32 %v11139_v53, %v7798_v30 }
 0x264   : > { %v8272_v44 = vmax.f32 %v8144_v41, 0.0  ;;  %v9870_v41 = vld [vmem:[%s11096_s24 + $0x2b0] sm:$0xff] }
 0x265   : > { %v7148_v32 = vpop.f32.mrf.mxu2  ;;  %v7468_v33 = vpop.f32.mrf.mxu3 }
 0x266   : > { %v7800_v36 = vmax.f32 %v7799_v31, %v7148_v32  ;;  %v6511_v37 = vpop.f32.mrf.mxu0  ;;  %v6831_v38 = vpop.f32.mrf.mxu1 }
 0x267   : > { %v7802_v46 = vmax.f32 %v6511_v37, %v6831_v38 }
 0x268   : > { %v7801_v42 = vmax.f32 %v7800_v36, %v7468_v33 }
 0x269   : > { %6550 = vmatmul.bf16.gmra.mxu0 %v9803_v34  ;;  %6870 = vmatmul.bf16.gmra.mxu1 %v9867_v35 }
 0x26a   : > { %v8145_v43 = vadd.f32 %v11139_v53, %v7801_v42  ;;  %7190 = vmatmul.bf16.gmra.mxu2 %v9931_v39  ;;  %7510 = vmatmul.bf16.gmra.mxu3 %v9995_v40  ;;  %v9806_v40 = vld [vmem:[%s11096_s24 + $0xb0] sm:$0xff] }
 0x26c   : > { %v8273_v45 = vmax.f32 %v8145_v43, 0.0 }
 0x26d   : > { %v7151_v47 = vpop.f32.mrf.mxu2  ;;  %v7471_v48 = vpop.f32.mrf.mxu3 }
 0x26e   : > { %v10093_v49 = vpack.c.bf16 %v8273_v45, %v8272_v44  ;;  %v6513_v50 = vpop.f32.mrf.mxu0  ;;  %v6833_v51 = vpop.f32.mrf.mxu1  ;;  %v7803_v52 = vmax.f32 %v7802_v46, %v7151_v47  ;;  %v9934_v45 = vld [vmem:[%s11096_s24 + $0x4b0] sm:$0xff] }
 0x26f   : > { %v7805_v55 = vmax.f32 %v6513_v50, %v6833_v51  ;;  %v9998_v46 = vld [vmem:[%s11096_s24 + $0x6b0] sm:$0xff] }
 0x270   : > { %10369 = vst [vmem:[%s11150_s28 + $0x50] sm:$0xff] %v10093_v49   ;;  %v7804_v54 = vmax.f32 %v7803_v52, %v7471_v48 }
 0x272   : > { %v8146_v1 = vadd.f32 %v11139_v53, %v7804_v54 }
 0x274   : > { %v8274_v4 = vmax.f32 %v8146_v1, 0.0  ;;  %v9871_v1 = vld [vmem:[%s11096_s24 + $0x2b8] sm:$0xff] }
 0x275   : > { %v7153_v56 = vpop.f32.mrf.mxu2  ;;  %v7473_v57 = vpop.f32.mrf.mxu3 }
 0x276   : > { %v7806_v60 = vmax.f32 %v7805_v55, %v7153_v56  ;;  %v6516_v61 = vpop.f32.mrf.mxu0  ;;  %v6836_v62 = vpop.f32.mrf.mxu1 }
 0x277   : > { %v7808_v6 = vmax.f32 %v6516_v61, %v6836_v62 }
 0x278   : > { %v7807_v2 = vmax.f32 %v7806_v60, %v7473_v57 }
 0x279   : > { %6555 = vmatmul.bf16.gmra.mxu0 %v9804_v58  ;;  %6875 = vmatmul.bf16.gmra.mxu1 %v9868_v59 }
 0x27a   : > { %v8147_v3 = vadd.f32 %v11139_v53, %v7807_v2  ;;  %7195 = vmatmul.bf16.gmra.mxu2 %v9932_v63  ;;  %7515 = vmatmul.bf16.gmra.mxu3 %v9996_v0  ;;  %v9807_v0 = vld [vmem:[%s11096_s24 + $0xb8] sm:$0xff] }
 0x27c   : > { %v8275_v5 = vmax.f32 %v8147_v3, 0.0 }
 0x27d   : > { %v7156_v7 = vpop.f32.mrf.mxu2  ;;  %v7476_v8 = vpop.f32.mrf.mxu3 }
 0x27e   : > { %v10098_v9 = vpack.c.bf16 %v8275_v5, %v8274_v4  ;;  %v6518_v10 = vpop.f32.mrf.mxu0  ;;  %v6838_v11 = vpop.f32.mrf.mxu1  ;;  %v7809_v12 = vmax.f32 %v7808_v6, %v7156_v7  ;;  %v9935_v5 = vld [vmem:[%s11096_s24 + $0x4b8] sm:$0xff] }
 0x27f   : > { %v7811_v14 = vmax.f32 %v6518_v10, %v6838_v11  ;;  %v9999_v6 = vld [vmem:[%s11096_s24 + $0x6b8] sm:$0xff] }
 0x280   : > { %10370 = vst [vmem:[%s11150_s28 + $0x58] sm:$0xff] %v10098_v9   ;;  %v7810_v13 = vmax.f32 %v7809_v12, %v7476_v8 }
 0x282   : > { %v8148_v24 = vadd.f32 %v11139_v53, %v7810_v13 }
 0x284   : > { %v8276_v27 = vmax.f32 %v8148_v24, 0.0  ;;  %v9872_v24 = vld [vmem:[%s11096_s24 + $0x2c0] sm:$0xff] }
 0x285   : > { %v7158_v15 = vpop.f32.mrf.mxu2  ;;  %v7478_v16 = vpop.f32.mrf.mxu3 }
 0x286   : > { %v7812_v19 = vmax.f32 %v7811_v14, %v7158_v15  ;;  %v6521_v20 = vpop.f32.mrf.mxu0  ;;  %v6841_v21 = vpop.f32.mrf.mxu1 }
 0x287   : > { %v7814_v29 = vmax.f32 %v6521_v20, %v6841_v21 }
 0x288   : > { %v7813_v25 = vmax.f32 %v7812_v19, %v7478_v16 }
 0x289   : > { %6560 = vmatmul.bf16.gmra.mxu0 %v9805_v17  ;;  %6880 = vmatmul.bf16.gmra.mxu1 %v9869_v18 }
 0x28a   : > { %v8149_v26 = vadd.f32 %v11139_v53, %v7813_v25  ;;  %7200 = vmatmul.bf16.gmra.mxu2 %v9933_v22  ;;  %7520 = vmatmul.bf16.gmra.mxu3 %v9997_v23  ;;  %v9808_v23 = vld [vmem:[%s11096_s24 + $0xc0] sm:$0xff] }
 0x28c   : > { %v8277_v28 = vmax.f32 %v8149_v26, 0.0 }
 0x28d   : > { %v7161_v30 = vpop.f32.mrf.mxu2  ;;  %v7481_v31 = vpop.f32.mrf.mxu3 }
 0x28e   : > { %v10103_v32 = vpack.c.bf16 %v8277_v28, %v8276_v27  ;;  %v6523_v33 = vpop.f32.mrf.mxu0  ;;  %v6843_v34 = vpop.f32.mrf.mxu1  ;;  %v7815_v35 = vmax.f32 %v7814_v29, %v7161_v30  ;;  %v9936_v28 = vld [vmem:[%s11096_s24 + $0x4c0] sm:$0xff] }
 0x28f   : > { %v7817_v37 = vmax.f32 %v6523_v33, %v6843_v34  ;;  %v10000_v29 = vld [vmem:[%s11096_s24 + $0x6c0] sm:$0xff] }
 0x290   : > { %10371 = vst [vmem:[%s11150_s28 + $0x60] sm:$0xff] %v10103_v32   ;;  %v7816_v36 = vmax.f32 %v7815_v35, %v7481_v31 }
 0x292   : > { %v8150_v47 = vadd.f32 %v11139_v53, %v7816_v36 }
 0x294   : > { %v8278_v50 = vmax.f32 %v8150_v47, 0.0  ;;  %v9873_v47 = vld [vmem:[%s11096_s24 + $0x2c8] sm:$0xff] }
 0x295   : > { %v7163_v38 = vpop.f32.mrf.mxu2  ;;  %v7483_v39 = vpop.f32.mrf.mxu3 }
 0x296   : > { %v7818_v42 = vmax.f32 %v7817_v37, %v7163_v38  ;;  %v6526_v43 = vpop.f32.mrf.mxu0  ;;  %v6846_v44 = vpop.f32.mrf.mxu1 }
 0x297   : > { %v7820_v52 = vmax.f32 %v6526_v43, %v6846_v44 }
 0x298   : > { %v7819_v48 = vmax.f32 %v7818_v42, %v7483_v39 }
 0x299   : > { %6565 = vmatmul.bf16.gmra.mxu0 %v9806_v40  ;;  %6885 = vmatmul.bf16.gmra.mxu1 %v9870_v41 }
 0x29a   : > { %v8151_v49 = vadd.f32 %v11139_v53, %v7819_v48  ;;  %7205 = vmatmul.bf16.gmra.mxu2 %v9934_v45  ;;  %7525 = vmatmul.bf16.gmra.mxu3 %v9998_v46  ;;  %v9809_v46 = vld [vmem:[%s11096_s24 + $0xc8] sm:$0xff] }
 0x29c   : > { %v8279_v51 = vmax.f32 %v8151_v49, 0.0 }
 0x29d   : > { %v7166_v54 = vpop.f32.mrf.mxu2  ;;  %v7486_v55 = vpop.f32.mrf.mxu3 }
 0x29e   : > { %v10108_v56 = vpack.c.bf16 %v8279_v51, %v8278_v50  ;;  %v6528_v57 = vpop.f32.mrf.mxu0  ;;  %v6848_v58 = vpop.f32.mrf.mxu1  ;;  %v7821_v59 = vmax.f32 %v7820_v52, %v7166_v54  ;;  %v9937_v51 = vld [vmem:[%s11096_s24 + $0x4c8] sm:$0xff] }
 0x29f   : > { %v7823_v61 = vmax.f32 %v6528_v57, %v6848_v58  ;;  %v10001_v52 = vld [vmem:[%s11096_s24 + $0x6c8] sm:$0xff] }
 0x2a0   : > { %10372 = vst [vmem:[%s11150_s28 + $0x68] sm:$0xff] %v10108_v56   ;;  %v7822_v60 = vmax.f32 %v7821_v59, %v7486_v55 }
 0x2a2   : > { %v8152_v7 = vadd.f32 %v11139_v53, %v7822_v60 }
 0x2a4   : > { %v8280_v10 = vmax.f32 %v8152_v7, 0.0  ;;  %v9874_v7 = vld [vmem:[%s11096_s24 + $0x2d0] sm:$0xff] }
 0x2a5   : > { %v7168_v62 = vpop.f32.mrf.mxu2  ;;  %v7488_v63 = vpop.f32.mrf.mxu3 }
 0x2a6   : > { %v7824_v2 = vmax.f32 %v7823_v61, %v7168_v62  ;;  %v6531_v3 = vpop.f32.mrf.mxu0  ;;  %v6851_v4 = vpop.f32.mrf.mxu1 }
 0x2a7   : > { %v7826_v12 = vmax.f32 %v6531_v3, %v6851_v4 }
 0x2a8   : > { %v7825_v8 = vmax.f32 %v7824_v2, %v7488_v63 }
 0x2a9   : > { %6570 = vmatmul.bf16.gmra.mxu0 %v9807_v0  ;;  %6890 = vmatmul.bf16.gmra.mxu1 %v9871_v1 }
 0x2aa   : > { %v8153_v9 = vadd.f32 %v11139_v53, %v7825_v8  ;;  %7210 = vmatmul.bf16.gmra.mxu2 %v9935_v5  ;;  %7530 = vmatmul.bf16.gmra.mxu3 %v9999_v6  ;;  %v9810_v6 = vld [vmem:[%s11096_s24 + $0xd0] sm:$0xff] }
 0x2ac   : > { %v8281_v11 = vmax.f32 %v8153_v9, 0.0 }
 0x2ad   : > { %v7171_v13 = vpop.f32.mrf.mxu2  ;;  %v7491_v14 = vpop.f32.mrf.mxu3 }
 0x2ae   : > { %v10113_v15 = vpack.c.bf16 %v8281_v11, %v8280_v10  ;;  %v6533_v16 = vpop.f32.mrf.mxu0  ;;  %v6853_v17 = vpop.f32.mrf.mxu1  ;;  %v7827_v18 = vmax.f32 %v7826_v12, %v7171_v13  ;;  %v9938_v11 = vld [vmem:[%s11096_s24 + $0x4d0] sm:$0xff] }
 0x2af   : > { %v7829_v20 = vmax.f32 %v6533_v16, %v6853_v17  ;;  %v10002_v12 = vld [vmem:[%s11096_s24 + $0x6d0] sm:$0xff] }
 0x2b0   : > { %10373 = vst [vmem:[%s11150_s28 + $0x70] sm:$0xff] %v10113_v15   ;;  %v7828_v19 = vmax.f32 %v7827_v18, %v7491_v14 }
 0x2b2   : > { %v8154_v30 = vadd.f32 %v11139_v53, %v7828_v19 }
 0x2b4   : > { %v8282_v33 = vmax.f32 %v8154_v30, 0.0 }
 0x2b5   : > { %v7173_v21 = vpop.f32.mrf.mxu2  ;;  %v7493_v22 = vpop.f32.mrf.mxu3 }
 0x2b6   : > { %v7830_v25 = vmax.f32 %v7829_v20, %v7173_v21  ;;  %v6536_v26 = vpop.f32.mrf.mxu0  ;;  %v6856_v27 = vpop.f32.mrf.mxu1 }
 0x2b7   : > { %v7832_v35 = vmax.f32 %v6536_v26, %v6856_v27 }
 0x2b8   : > { %v7831_v31 = vmax.f32 %v7830_v25, %v7493_v22 }
 0x2b9   : > { %6575 = vmatmul.bf16.gmra.mxu0 %v9808_v23  ;;  %6895 = vmatmul.bf16.gmra.mxu1 %v9872_v24 }
 0x2ba   : > { %v8155_v32 = vadd.f32 %v11139_v53, %v7831_v31  ;;  %7215 = vmatmul.bf16.gmra.mxu2 %v9936_v28  ;;  %7535 = vmatmul.bf16.gmra.mxu3 %v10000_v29  ;;  %v9811_v28 = vld [vmem:[%s11096_s24 + $0xd8] sm:$0xff] }
 0x2bb   : > { %v9875_v29 = vld [vmem:[%s11096_s24 + $0x2d8] sm:$0xff] }
 0x2bc   : > { %v8283_v34 = vmax.f32 %v8155_v32, 0.0 }
 0x2bd   : > { %v7176_v36 = vpop.f32.mrf.mxu2  ;;  %v7496_v37 = vpop.f32.mrf.mxu3 }
 0x2be   : > { %v10118_v38 = vpack.c.bf16 %v8283_v34, %v8282_v33  ;;  %v6538_v39 = vpop.f32.mrf.mxu0  ;;  %v6858_v40 = vpop.f32.mrf.mxu1  ;;  %v7833_v41 = vmax.f32 %v7832_v35, %v7176_v36  ;;  %v9939_v33 = vld [vmem:[%s11096_s24 + $0x4d8] sm:$0xff]  ;;  %v11279_v35 = vld [vmem:[%s11585_s2] ss:$0 sm:$0xff] }
 0x2bf   : > { %v7835_v43 = vmax.f32 %v6538_v39, %v6858_v40  ;;  %v10003_v34 = vld [vmem:[%s11096_s24 + $0x6d8] sm:$0xff] }
 0x2c0   : > { %10374 = vst [vmem:[%s11150_s28 + $0x78] sm:$0xff] %v10118_v38   ;;  %v7834_v42 = vmax.f32 %v7833_v41, %v7496_v37 }
 0x2c2   : > { %v8156_v54 = vadd.f32 %v11139_v53, %v7834_v42 }
 0x2c4   : > { %v8284_v57 = vmax.f32 %v8156_v54, 0.0  ;;  %v9876_v54 = vld [vmem:[%s11096_s24 + $0x2e0] sm:$0xff] }
 0x2c5   : > { %v7178_v44 = vpop.f32.mrf.mxu2  ;;  %v7498_v45 = vpop.f32.mrf.mxu3 }
 0x2c6   : > { %v7836_v48 = vmax.f32 %v7835_v43, %v7178_v44  ;;  %v6541_v49 = vpop.f32.mrf.mxu0  ;;  %v6861_v50 = vpop.f32.mrf.mxu1 }
 0x2c7   : > { %v7838_v59 = vmax.f32 %v6541_v49, %v6861_v50 }
 0x2c8   : > { %v7837_v55 = vmax.f32 %v7836_v48, %v7498_v45 }
 0x2c9   : > { %6580 = vmatmul.bf16.gmra.mxu0 %v9809_v46  ;;  %6900 = vmatmul.bf16.gmra.mxu1 %v9873_v47 }
 0x2ca   : > { %v8157_v56 = vadd.f32 %v11139_v53, %v7837_v55  ;;  %7220 = vmatmul.bf16.gmra.mxu2 %v9937_v51  ;;  %7540 = vmatmul.bf16.gmra.mxu3 %v10001_v52  ;;  %v9812_v52 = vld [vmem:[%s11096_s24 + $0xe0] sm:$0xff] }
 0x2cc   : > { %v8285_v58 = vmax.f32 %v8157_v56, 0.0 }
 0x2cd   : > { %v7181_v60 = vpop.f32.mrf.mxu2  ;;  %v7501_v61 = vpop.f32.mrf.mxu3 }
 0x2ce   : > { %v10123_v62 = vpack.c.bf16 %v8285_v58, %v8284_v57  ;;  %v6543_v63 = vpop.f32.mrf.mxu0  ;;  %v6863_v0 = vpop.f32.mrf.mxu1  ;;  %v7839_v1 = vmax.f32 %v7838_v59, %v7181_v60  ;;  %v9940_v58 = vld [vmem:[%s11096_s24 + $0x4e0] sm:$0xff] }
 0x2cf   : > { %v7841_v3 = vmax.f32 %v6543_v63, %v6863_v0  ;;  %v10004_v59 = vld [vmem:[%s11096_s24 + $0x6e0] sm:$0xff] }
 0x2d0   : > { %10375 = vst [vmem:[%s11150_s28 + $0x80] sm:$0xff] %v10123_v62   ;;  %v7840_v2 = vmax.f32 %v7839_v1, %v7501_v61 }
 0x2d2   : > { %v8158_v13 = vadd.f32 %v11139_v53, %v7840_v2 }
 0x2d4   : > { %v8286_v16 = vmax.f32 %v8158_v13, 0.0  ;;  %v9877_v13 = vld [vmem:[%s11096_s24 + $0x2e8] sm:$0xff] }
 0x2d5   : > { %v7183_v4 = vpop.f32.mrf.mxu2  ;;  %v7503_v5 = vpop.f32.mrf.mxu3 }
 0x2d6   : > { %v7842_v8 = vmax.f32 %v7841_v3, %v7183_v4  ;;  %v6546_v9 = vpop.f32.mrf.mxu0  ;;  %v6866_v10 = vpop.f32.mrf.mxu1 }
 0x2d7   : > { %v7844_v18 = vmax.f32 %v6546_v9, %v6866_v10 }
 0x2d8   : > { %v7843_v14 = vmax.f32 %v7842_v8, %v7503_v5 }
 0x2d9   : > { %6585 = vmatmul.bf16.gmra.mxu0 %v9810_v6  ;;  %6905 = vmatmul.bf16.gmra.mxu1 %v9874_v7 }
 0x2da   : > { %v8159_v15 = vadd.f32 %v11139_v53, %v7843_v14  ;;  %7225 = vmatmul.bf16.gmra.mxu2 %v9938_v11  ;;  %7545 = vmatmul.bf16.gmra.mxu3 %v10002_v12  ;;  %v9813_v12 = vld [vmem:[%s11096_s24 + $0xe8] sm:$0xff] }
 0x2dc   : > { %v8287_v17 = vmax.f32 %v8159_v15, 0.0 }
 0x2dd   : > { %v7186_v19 = vpop.f32.mrf.mxu2  ;;  %v7506_v20 = vpop.f32.mrf.mxu3 }
 0x2de   : > { %v10128_v21 = vpack.c.bf16 %v8287_v17, %v8286_v16  ;;  %v6548_v22 = vpop.f32.mrf.mxu0  ;;  %v6868_v23 = vpop.f32.mrf.mxu1  ;;  %v7845_v24 = vmax.f32 %v7844_v18, %v7186_v19  ;;  %v9941_v17 = vld [vmem:[%s11096_s24 + $0x4e8] sm:$0xff] }
 0x2df   : > { %v7847_v26 = vmax.f32 %v6548_v22, %v6868_v23  ;;  %v10005_v18 = vld [vmem:[%s11096_s24 + $0x6e8] sm:$0xff] }
 0x2e0   : > { %10376 = vst [vmem:[%s11150_s28 + $0x88] sm:$0xff] %v10128_v21   ;;  %v7846_v25 = vmax.f32 %v7845_v24, %v7506_v20 }
 0x2e2   : > { %v8160_v36 = vadd.f32 %v11279_v35, %v7846_v25 }
 0x2e4   : > { %v8288_v39 = vmax.f32 %v8160_v36, 0.0  ;;  %v9878_v36 = vld [vmem:[%s11096_s24 + $0x2f0] sm:$0xff] }
 0x2e5   : > { %v7188_v27 = vpop.f32.mrf.mxu2  ;;  %v7508_v53 = vpop.f32.mrf.mxu3 }
 0x2e6   : > { %v7848_v30 = vmax.f32 %v7847_v26, %v7188_v27  ;;  %v6551_v31 = vpop.f32.mrf.mxu0  ;;  %v6871_v32 = vpop.f32.mrf.mxu1 }
 0x2e7   : > { %v7850_v41 = vmax.f32 %v6551_v31, %v6871_v32 }
 0x2e8   : > { %v7849_v37 = vmax.f32 %v7848_v30, %v7508_v53 }
 0x2e9   : > { %6590 = vmatmul.bf16.gmra.mxu0 %v9811_v28  ;;  %6910 = vmatmul.bf16.gmra.mxu1 %v9875_v29 }
 0x2ea   : > { %v8161_v38 = vadd.f32 %v11279_v35, %v7849_v37  ;;  %7230 = vmatmul.bf16.gmra.mxu2 %v9939_v33  ;;  %7550 = vmatmul.bf16.gmra.mxu3 %v10003_v34  ;;  %v9814_v34 = vld [vmem:[%s11096_s24 + $0xf0] sm:$0xff] }
 0x2ec   : > { %v8289_v40 = vmax.f32 %v8161_v38, 0.0 }
 0x2ed   : > { %v7191_v42 = vpop.f32.mrf.mxu2  ;;  %v7511_v43 = vpop.f32.mrf.mxu3 }
 0x2ee   : > { %v10133_v44 = vpack.c.bf16 %v8289_v40, %v8288_v39  ;;  %v6553_v45 = vpop.f32.mrf.mxu0  ;;  %v6873_v46 = vpop.f32.mrf.mxu1  ;;  %v7851_v47 = vmax.f32 %v7850_v41, %v7191_v42  ;;  %v9942_v40 = vld [vmem:[%s11096_s24 + $0x4f0] sm:$0xff] }
 0x2ef   : > { %v7853_v49 = vmax.f32 %v6553_v45, %v6873_v46  ;;  %v10006_v41 = vld [vmem:[%s11096_s24 + $0x6f0] sm:$0xff] }
 0x2f0   : > { %10377 = vst [vmem:[%s11150_s28 + $0x90] sm:$0xff] %v10133_v44   ;;  %v7852_v48 = vmax.f32 %v7851_v47, %v7511_v43 }
 0x2f2   : > { %v8162_v60 = vadd.f32 %v11279_v35, %v7852_v48 }
 0x2f4   : > { %v8290_v63 = vmax.f32 %v8162_v60, 0.0  ;;  %v9879_v60 = vld [vmem:[%s11096_s24 + $0x2f8] sm:$0xff] }
 0x2f5   : > { %v7193_v50 = vpop.f32.mrf.mxu2  ;;  %v7513_v51 = vpop.f32.mrf.mxu3 }
 0x2f6   : > { %v7854_v55 = vmax.f32 %v7853_v49, %v7193_v50  ;;  %v6556_v56 = vpop.f32.mrf.mxu0  ;;  %v6876_v57 = vpop.f32.mrf.mxu1 }
 0x2f7   : > { %v7856_v1 = vmax.f32 %v6556_v56, %v6876_v57 }
 0x2f8   : > { %v7855_v61 = vmax.f32 %v7854_v55, %v7513_v51 }
 0x2f9   : > { %6595 = vmatmul.bf16.gmra.mxu0 %v9812_v52  ;;  %6915 = vmatmul.bf16.gmra.mxu1 %v9876_v54 }
 0x2fa   : > { %v8163_v62 = vadd.f32 %v11279_v35, %v7855_v61  ;;  %7235 = vmatmul.bf16.gmra.mxu2 %v9940_v58  ;;  %7555 = vmatmul.bf16.gmra.mxu3 %v10004_v59  ;;  %v9815_v59 = vld [vmem:[%s11096_s24 + $0xf8] sm:$0xff] }
 0x2fc   : > { %v8291_v0 = vmax.f32 %v8163_v62, 0.0 }
 0x2fd   : > { %v7196_v2 = vpop.f32.mrf.mxu2  ;;  %v7516_v3 = vpop.f32.mrf.mxu3 }
 0x2fe   : > { %v10138_v4 = vpack.c.bf16 %v8291_v0, %v8290_v63  ;;  %v6558_v5 = vpop.f32.mrf.mxu0  ;;  %v6878_v6 = vpop.f32.mrf.mxu1  ;;  %v7857_v7 = vmax.f32 %v7856_v1, %v7196_v2  ;;  %v9943_v0 = vld [vmem:[%s11096_s24 + $0x4f8] sm:$0xff] }
 0x2ff   : > { %v7859_v9 = vmax.f32 %v6558_v5, %v6878_v6  ;;  %v10007_v1 = vld [vmem:[%s11096_s24 + $0x6f8] sm:$0xff] }
 0x300   : > { %10378 = vst [vmem:[%s11150_s28 + $0x98] sm:$0xff] %v10138_v4   ;;  %v7858_v8 = vmax.f32 %v7857_v7, %v7516_v3 }
 0x302   : > { %v8164_v19 = vadd.f32 %v11279_v35, %v7858_v8 }
 0x304   : > { %v8292_v22 = vmax.f32 %v8164_v19, 0.0  ;;  %v9880_v19 = vld [vmem:[%s11096_s24 + $0x300] sm:$0xff] }
 0x305   : > { %v7198_v10 = vpop.f32.mrf.mxu2  ;;  %v7518_v11 = vpop.f32.mrf.mxu3 }
 0x306   : > { %v7860_v14 = vmax.f32 %v7859_v9, %v7198_v10  ;;  %v6561_v15 = vpop.f32.mrf.mxu0  ;;  %v6881_v16 = vpop.f32.mrf.mxu1 }
 0x307   : > { %v7862_v24 = vmax.f32 %v6561_v15, %v6881_v16 }
 0x308   : > { %v7861_v20 = vmax.f32 %v7860_v14, %v7518_v11 }
 0x309   : > { %6600 = vmatmul.bf16.gmra.mxu0 %v9813_v12  ;;  %6920 = vmatmul.bf16.gmra.mxu1 %v9877_v13 }
 0x30a   : > { %v8165_v21 = vadd.f32 %v11279_v35, %v7861_v20  ;;  %7240 = vmatmul.bf16.gmra.mxu2 %v9941_v17  ;;  %7560 = vmatmul.bf16.gmra.mxu3 %v10005_v18  ;;  %v9816_v18 = vld [vmem:[%s11096_s24 + $0x100] sm:$0xff] }
 0x30c   : > { %v8293_v23 = vmax.f32 %v8165_v21, 0.0 }
 0x30d   : > { %v7201_v25 = vpop.f32.mrf.mxu2  ;;  %v7521_v26 = vpop.f32.mrf.mxu3 }
 0x30e   : > { %v10143_v27 = vpack.c.bf16 %v8293_v23, %v8292_v22  ;;  %v6563_v53 = vpop.f32.mrf.mxu0  ;;  %v6883_v28 = vpop.f32.mrf.mxu1  ;;  %v7863_v29 = vmax.f32 %v7862_v24, %v7201_v25  ;;  %v9944_v23 = vld [vmem:[%s11096_s24 + $0x500] sm:$0xff] }
 0x30f   : > { %v7865_v31 = vmax.f32 %v6563_v53, %v6883_v28  ;;  %v10008_v24 = vld [vmem:[%s11096_s24 + $0x700] sm:$0xff] }
 0x310   : > { %10379 = vst [vmem:[%s11150_s28 + $0xa0] sm:$0xff] %v10143_v27   ;;  %v7864_v30 = vmax.f32 %v7863_v29, %v7521_v26 }
 0x312   : > { %v8166_v42 = vadd.f32 %v11279_v35, %v7864_v30 }
 0x314   : > { %v8294_v45 = vmax.f32 %v8166_v42, 0.0  ;;  %v9881_v42 = vld [vmem:[%s11096_s24 + $0x308] sm:$0xff] }
 0x315   : > { %v7203_v32 = vpop.f32.mrf.mxu2  ;;  %v7523_v33 = vpop.f32.mrf.mxu3 }
 0x316   : > { %v7866_v37 = vmax.f32 %v7865_v31, %v7203_v32  ;;  %v6566_v38 = vpop.f32.mrf.mxu0  ;;  %v6886_v39 = vpop.f32.mrf.mxu1 }
 0x317   : > { %v7868_v47 = vmax.f32 %v6566_v38, %v6886_v39 }
 0x318   : > { %v7867_v43 = vmax.f32 %v7866_v37, %v7523_v33 }
 0x319   : > { %6605 = vmatmul.bf16.gmra.mxu0 %v9814_v34  ;;  %6925 = vmatmul.bf16.gmra.mxu1 %v9878_v36 }
 0x31a   : > { %v8167_v44 = vadd.f32 %v11279_v35, %v7867_v43  ;;  %7245 = vmatmul.bf16.gmra.mxu2 %v9942_v40  ;;  %7565 = vmatmul.bf16.gmra.mxu3 %v10006_v41  ;;  %v9817_v41 = vld [vmem:[%s11096_s24 + $0x108] sm:$0xff] }
 0x31c   : > { %v8295_v46 = vmax.f32 %v8167_v44, 0.0 }
 0x31d   : > { %v7206_v48 = vpop.f32.mrf.mxu2  ;;  %v7526_v49 = vpop.f32.mrf.mxu3 }
 0x31e   : > { %v10148_v50 = vpack.c.bf16 %v8295_v46, %v8294_v45  ;;  %v6568_v51 = vpop.f32.mrf.mxu0  ;;  %v6888_v52 = vpop.f32.mrf.mxu1  ;;  %v7869_v54 = vmax.f32 %v7868_v47, %v7206_v48  ;;  %v9945_v46 = vld [vmem:[%s11096_s24 + $0x508] sm:$0xff] }
 0x31f   : > { %v7871_v56 = vmax.f32 %v6568_v51, %v6888_v52  ;;  %v10009_v47 = vld [vmem:[%s11096_s24 + $0x708] sm:$0xff] }
 0x320   : > { %10380 = vst [vmem:[%s11150_s28 + $0xa8] sm:$0xff] %v10148_v50   ;;  %v7870_v55 = vmax.f32 %v7869_v54, %v7526_v49 }
 0x322   : > { %v8168_v2 = vadd.f32 %v11279_v35, %v7870_v55 }
 0x324   : > { %v8296_v5 = vmax.f32 %v8168_v2, 0.0  ;;  %v9882_v2 = vld [vmem:[%s11096_s24 + $0x310] sm:$0xff] }
 0x325   : > { %v7208_v57 = vpop.f32.mrf.mxu2  ;;  %v7528_v58 = vpop.f32.mrf.mxu3 }
 0x326   : > { %v7872_v61 = vmax.f32 %v7871_v56, %v7208_v57  ;;  %v6571_v62 = vpop.f32.mrf.mxu0  ;;  %v6891_v63 = vpop.f32.mrf.mxu1 }
 0x327   : > { %v7874_v7 = vmax.f32 %v6571_v62, %v6891_v63 }
 0x328   : > { %v7873_v3 = vmax.f32 %v7872_v61, %v7528_v58 }
 0x329   : > { %6610 = vmatmul.bf16.gmra.mxu0 %v9815_v59  ;;  %6930 = vmatmul.bf16.gmra.mxu1 %v9879_v60 }
 0x32a   : > { %v8169_v4 = vadd.f32 %v11279_v35, %v7873_v3  ;;  %7250 = vmatmul.bf16.gmra.mxu2 %v9943_v0  ;;  %7570 = vmatmul.bf16.gmra.mxu3 %v10007_v1  ;;  %v9818_v1 = vld [vmem:[%s11096_s24 + $0x110] sm:$0xff] }
 0x32c   : > { %v8297_v6 = vmax.f32 %v8169_v4, 0.0 }
 0x32d   : > { %v7211_v8 = vpop.f32.mrf.mxu2  ;;  %v7531_v9 = vpop.f32.mrf.mxu3 }
 0x32e   : > { %v10153_v10 = vpack.c.bf16 %v8297_v6, %v8296_v5  ;;  %v6573_v11 = vpop.f32.mrf.mxu0  ;;  %v6893_v12 = vpop.f32.mrf.mxu1  ;;  %v7875_v13 = vmax.f32 %v7874_v7, %v7211_v8  ;;  %v9946_v6 = vld [vmem:[%s11096_s24 + $0x510] sm:$0xff] }
 0x32f   : > { %v7877_v15 = vmax.f32 %v6573_v11, %v6893_v12  ;;  %v10010_v7 = vld [vmem:[%s11096_s24 + $0x710] sm:$0xff] }
 0x330   : > { %10381 = vst [vmem:[%s11150_s28 + $0xb0] sm:$0xff] %v10153_v10   ;;  %v7876_v14 = vmax.f32 %v7875_v13, %v7531_v9 }
 0x332   : > { %v8170_v25 = vadd.f32 %v11279_v35, %v7876_v14 }
 0x334   : > { %v8298_v53 = vmax.f32 %v8170_v25, 0.0  ;;  %v9883_v25 = vld [vmem:[%s11096_s24 + $0x318] sm:$0xff] }
 0x335   : > { %v7213_v16 = vpop.f32.mrf.mxu2  ;;  %v7533_v17 = vpop.f32.mrf.mxu3 }
 0x336   : > { %v7878_v20 = vmax.f32 %v7877_v15, %v7213_v16  ;;  %v6576_v21 = vpop.f32.mrf.mxu0  ;;  %v6896_v22 = vpop.f32.mrf.mxu1 }
 0x337   : > { %v7880_v29 = vmax.f32 %v6576_v21, %v6896_v22 }
 0x338   : > { %v7879_v26 = vmax.f32 %v7878_v20, %v7533_v17 }
 0x339   : > { %6615 = vmatmul.bf16.gmra.mxu0 %v9816_v18  ;;  %6935 = vmatmul.bf16.gmra.mxu1 %v9880_v19 }
 0x33a   : > { %v8171_v27 = vadd.f32 %v11279_v35, %v7879_v26  ;;  %7255 = vmatmul.bf16.gmra.mxu2 %v9944_v23  ;;  %7575 = vmatmul.bf16.gmra.mxu3 %v10008_v24  ;;  %v9819_v24 = vld [vmem:[%s11096_s24 + $0x118] sm:$0xff] }
 0x33c   : > { %v8299_v28 = vmax.f32 %v8171_v27, 0.0 }
 0x33d   : > { %v7216_v30 = vpop.f32.mrf.mxu2  ;;  %v7536_v31 = vpop.f32.mrf.mxu3 }
 0x33e   : > { %v10158_v32 = vpack.c.bf16 %v8299_v28, %v8298_v53  ;;  %v6578_v33 = vpop.f32.mrf.mxu0  ;;  %v6898_v34 = vpop.f32.mrf.mxu1  ;;  %v7881_v36 = vmax.f32 %v7880_v29, %v7216_v30  ;;  %v9947_v28 = vld [vmem:[%s11096_s24 + $0x518] sm:$0xff] }
 0x33f   : > { %v7883_v38 = vmax.f32 %v6578_v33, %v6898_v34  ;;  %v10011_v29 = vld [vmem:[%s11096_s24 + $0x718] sm:$0xff] }
 0x340   : > { %10382 = vst [vmem:[%s11150_s28 + $0xb8] sm:$0xff] %v10158_v32   ;;  %v7882_v37 = vmax.f32 %v7881_v36, %v7536_v31 }
 0x342   : > { %v8172_v48 = vadd.f32 %v11279_v35, %v7882_v37 }
 0x344   : > { %v8300_v51 = vmax.f32 %v8172_v48, 0.0  ;;  %v9884_v48 = vld [vmem:[%s11096_s24 + $0x320] sm:$0xff] }
 0x345   : > { %v7218_v39 = vpop.f32.mrf.mxu2  ;;  %v7538_v40 = vpop.f32.mrf.mxu3 }
 0x346   : > { %v7884_v43 = vmax.f32 %v7883_v38, %v7218_v39  ;;  %v6581_v44 = vpop.f32.mrf.mxu0  ;;  %v6901_v45 = vpop.f32.mrf.mxu1 }
 0x347   : > { %v7886_v54 = vmax.f32 %v6581_v44, %v6901_v45 }
 0x348   : > { %v7885_v49 = vmax.f32 %v7884_v43, %v7538_v40 }
 0x349   : > { %6620 = vmatmul.bf16.gmra.mxu0 %v9817_v41  ;;  %6940 = vmatmul.bf16.gmra.mxu1 %v9881_v42 }
 0x34a   : > { %v8173_v50 = vadd.f32 %v11279_v35, %v7885_v49  ;;  %7260 = vmatmul.bf16.gmra.mxu2 %v9945_v46  ;;  %7580 = vmatmul.bf16.gmra.mxu3 %v10009_v47  ;;  %v9820_v47 = vld [vmem:[%s11096_s24 + $0x120] sm:$0xff] }
 0x34c   : > { %v8301_v52 = vmax.f32 %v8173_v50, 0.0 }
 0x34d   : > { %v7221_v55 = vpop.f32.mrf.mxu2  ;;  %v7541_v56 = vpop.f32.mrf.mxu3 }
 0x34e   : > { %v10163_v57 = vpack.c.bf16 %v8301_v52, %v8300_v51  ;;  %v6583_v58 = vpop.f32.mrf.mxu0  ;;  %v6903_v59 = vpop.f32.mrf.mxu1  ;;  %v7887_v60 = vmax.f32 %v7886_v54, %v7221_v55  ;;  %v9948_v52 = vld [vmem:[%s11096_s24 + $0x520] sm:$0xff] }
 0x34f   : > { %v7889_v62 = vmax.f32 %v6583_v58, %v6903_v59  ;;  %v10012_v54 = vld [vmem:[%s11096_s24 + $0x720] sm:$0xff] }
 0x350   : > { %10383 = vst [vmem:[%s11150_s28 + $0xc0] sm:$0xff] %v10163_v57   ;;  %v7888_v61 = vmax.f32 %v7887_v60, %v7541_v56 }
 0x352   : > { %v8174_v8 = vadd.f32 %v11279_v35, %v7888_v61 }
 0x354   : > { %v8302_v11 = vmax.f32 %v8174_v8, 0.0  ;;  %v9885_v8 = vld [vmem:[%s11096_s24 + $0x328] sm:$0xff] }
 0x355   : > { %v7223_v63 = vpop.f32.mrf.mxu2  ;;  %v7543_v0 = vpop.f32.mrf.mxu3 }
 0x356   : > { %v7890_v3 = vmax.f32 %v7889_v62, %v7223_v63  ;;  %v6586_v4 = vpop.f32.mrf.mxu0  ;;  %v6906_v5 = vpop.f32.mrf.mxu1 }
 0x357   : > { %v7892_v13 = vmax.f32 %v6586_v4, %v6906_v5 }
 0x358   : > { %v7891_v9 = vmax.f32 %v7890_v3, %v7543_v0 }
 0x359   : > { %6625 = vmatmul.bf16.gmra.mxu0 %v9818_v1  ;;  %6945 = vmatmul.bf16.gmra.mxu1 %v9882_v2 }
 0x35a   : > { %v8175_v10 = vadd.f32 %v11279_v35, %v7891_v9  ;;  %7265 = vmatmul.bf16.gmra.mxu2 %v9946_v6  ;;  %7585 = vmatmul.bf16.gmra.mxu3 %v10010_v7  ;;  %v9821_v7 = vld [vmem:[%s11096_s24 + $0x128] sm:$0xff] }
 0x35c   : > { %v8303_v12 = vmax.f32 %v8175_v10, 0.0 }
 0x35d   : > { %v7226_v14 = vpop.f32.mrf.mxu2  ;;  %v7546_v15 = vpop.f32.mrf.mxu3 }
 0x35e   : > { %v10168_v16 = vpack.c.bf16 %v8303_v12, %v8302_v11  ;;  %v6588_v17 = vpop.f32.mrf.mxu0  ;;  %v6908_v18 = vpop.f32.mrf.mxu1  ;;  %v7893_v19 = vmax.f32 %v7892_v13, %v7226_v14  ;;  %v9949_v12 = vld [vmem:[%s11096_s24 + $0x528] sm:$0xff] }
 0x35f   : > { %v7895_v21 = vmax.f32 %v6588_v17, %v6908_v18  ;;  %v10013_v13 = vld [vmem:[%s11096_s24 + $0x728] sm:$0xff] }
 0x360   : > { %10384 = vst [vmem:[%s11150_s28 + $0xc8] sm:$0xff] %v10168_v16   ;;  %v7894_v20 = vmax.f32 %v7893_v19, %v7546_v15 }
 0x362   : > { %v8176_v30 = vadd.f32 %v11279_v35, %v7894_v20 }
 0x364   : > { %v8304_v33 = vmax.f32 %v8176_v30, 0.0  ;;  %v9886_v30 = vld [vmem:[%s11096_s24 + $0x330] sm:$0xff] }
 0x365   : > { %v7228_v22 = vpop.f32.mrf.mxu2  ;;  %v7548_v23 = vpop.f32.mrf.mxu3 }
 0x366   : > { %v7896_v26 = vmax.f32 %v7895_v21, %v7228_v22  ;;  %v6591_v27 = vpop.f32.mrf.mxu0  ;;  %v6911_v53 = vpop.f32.mrf.mxu1 }
 0x367   : > { %v7898_v36 = vmax.f32 %v6591_v27, %v6911_v53 }
 0x368   : > { %v7897_v31 = vmax.f32 %v7896_v26, %v7548_v23 }
 0x369   : > { %6630 = vmatmul.bf16.gmra.mxu0 %v9819_v24  ;;  %6950 = vmatmul.bf16.gmra.mxu1 %v9883_v25 }
 0x36a   : > { %v8177_v32 = vadd.f32 %v11279_v35, %v7897_v31  ;;  %7270 = vmatmul.bf16.gmra.mxu2 %v9947_v28  ;;  %7590 = vmatmul.bf16.gmra.mxu3 %v10011_v29  ;;  %v9822_v29 = vld [vmem:[%s11096_s24 + $0x130] sm:$0xff] }
 0x36c   : > { %v8305_v34 = vmax.f32 %v8177_v32, 0.0 }
 0x36d   : > { %v7231_v37 = vpop.f32.mrf.mxu2  ;;  %v7551_v38 = vpop.f32.mrf.mxu3 }
 0x36e   : > { %v10173_v39 = vpack.c.bf16 %v8305_v34, %v8304_v33  ;;  %v6593_v40 = vpop.f32.mrf.mxu0  ;;  %v6913_v41 = vpop.f32.mrf.mxu1  ;;  %v7899_v42 = vmax.f32 %v7898_v36, %v7231_v37  ;;  %v9950_v34 = vld [vmem:[%s11096_s24 + $0x530] sm:$0xff] }
 0x36f   : > { %v7901_v44 = vmax.f32 %v6593_v40, %v6913_v41  ;;  %v10014_v36 = vld [vmem:[%s11096_s24 + $0x730] sm:$0xff] }
 0x370   : > { %10385 = vst [vmem:[%s11150_s28 + $0xd0] sm:$0xff] %v10173_v39   ;;  %v7900_v43 = vmax.f32 %v7899_v42, %v7551_v38 }
 0x372   : > { %v8178_v55 = vadd.f32 %v11279_v35, %v7900_v43 }
 0x374   : > { %v8306_v58 = vmax.f32 %v8178_v55, 0.0  ;;  %v9887_v55 = vld [vmem:[%s11096_s24 + $0x338] sm:$0xff] }
 0x375   : > { %v7233_v45 = vpop.f32.mrf.mxu2  ;;  %v7553_v46 = vpop.f32.mrf.mxu3 }
 0x376   : > { %v7902_v49 = vmax.f32 %v7901_v44, %v7233_v45  ;;  %v6596_v50 = vpop.f32.mrf.mxu0  ;;  %v6916_v51 = vpop.f32.mrf.mxu1 }
 0x377   : > { %v7904_v60 = vmax.f32 %v6596_v50, %v6916_v51 }
 0x378   : > { %v7903_v56 = vmax.f32 %v7902_v49, %v7553_v46 }
 0x379   : > { %6635 = vmatmul.bf16.gmra.mxu0 %v9820_v47  ;;  %6955 = vmatmul.bf16.gmra.mxu1 %v9884_v48 }
 0x37a   : > { %v8179_v57 = vadd.f32 %v11279_v35, %v7903_v56  ;;  %7275 = vmatmul.bf16.gmra.mxu2 %v9948_v52  ;;  %7595 = vmatmul.bf16.gmra.mxu3 %v10012_v54  ;;  %v9823_v54 = vld [vmem:[%s11096_s24 + $0x138] sm:$0xff] }
 0x37c   : > { %v8307_v59 = vmax.f32 %v8179_v57, 0.0 }
 0x37d   : > { %v7236_v61 = vpop.f32.mrf.mxu2  ;;  %v7556_v62 = vpop.f32.mrf.mxu3 }
 0x37e   : > { %v10178_v63 = vpack.c.bf16 %v8307_v59, %v8306_v58  ;;  %v6598_v0 = vpop.f32.mrf.mxu0  ;;  %v6918_v1 = vpop.f32.mrf.mxu1  ;;  %v7905_v2 = vmax.f32 %v7904_v60, %v7236_v61  ;;  %v9951_v59 = vld [vmem:[%s11096_s24 + $0x538] sm:$0xff] }
 0x37f   : > { %v7907_v4 = vmax.f32 %v6598_v0, %v6918_v1  ;;  %v10015_v60 = vld [vmem:[%s11096_s24 + $0x738] sm:$0xff] }
 0x380   : > { %10386 = vst [vmem:[%s11150_s28 + $0xd8] sm:$0xff] %v10178_v63   ;;  %v7906_v3 = vmax.f32 %v7905_v2, %v7556_v62 }
 0x382   : > { %v8180_v14 = vadd.f32 %v11279_v35, %v7906_v3 }
 0x384   : > { %v8308_v17 = vmax.f32 %v8180_v14, 0.0  ;;  %v9888_v14 = vld [vmem:[%s11096_s24 + $0x340] sm:$0xff] }
 0x385   : > { %v7238_v5 = vpop.f32.mrf.mxu2  ;;  %v7558_v6 = vpop.f32.mrf.mxu3 }
 0x386   : > { %v7908_v9 = vmax.f32 %v7907_v4, %v7238_v5  ;;  %v6601_v10 = vpop.f32.mrf.mxu0  ;;  %v6921_v11 = vpop.f32.mrf.mxu1 }
 0x387   : > { %v7910_v19 = vmax.f32 %v6601_v10, %v6921_v11 }
 0x388   : > { %v7909_v15 = vmax.f32 %v7908_v9, %v7558_v6 }
 0x389   : > { %6640 = vmatmul.bf16.gmra.mxu0 %v9821_v7  ;;  %6960 = vmatmul.bf16.gmra.mxu1 %v9885_v8 }
 0x38a   : > { %v8181_v16 = vadd.f32 %v11279_v35, %v7909_v15  ;;  %7280 = vmatmul.bf16.gmra.mxu2 %v9949_v12  ;;  %7600 = vmatmul.bf16.gmra.mxu3 %v10013_v13  ;;  %v9824_v13 = vld [vmem:[%s11096_s24 + $0x140] sm:$0xff] }
 0x38c   : > { %v8309_v18 = vmax.f32 %v8181_v16, 0.0 }
 0x38d   : > { %v7241_v20 = vpop.f32.mrf.mxu2  ;;  %v7561_v21 = vpop.f32.mrf.mxu3 }
 0x38e   : > { %v10183_v22 = vpack.c.bf16 %v8309_v18, %v8308_v17  ;;  %v6603_v23 = vpop.f32.mrf.mxu0  ;;  %v6923_v24 = vpop.f32.mrf.mxu1  ;;  %v7911_v25 = vmax.f32 %v7910_v19, %v7241_v20  ;;  %v9952_v18 = vld [vmem:[%s11096_s24 + $0x540] sm:$0xff] }
 0x38f   : > { %v7913_v27 = vmax.f32 %v6603_v23, %v6923_v24  ;;  %v10016_v19 = vld [vmem:[%s11096_s24 + $0x740] sm:$0xff] }
 0x390   : > { %10387 = vst [vmem:[%s11150_s28 + $0xe0] sm:$0xff] %v10183_v22   ;;  %v7912_v26 = vmax.f32 %v7911_v25, %v7561_v21 }
 0x392   : > { %v8182_v37 = vadd.f32 %v11279_v35, %v7912_v26 }
 0x394   : > { %v8310_v40 = vmax.f32 %v8182_v37, 0.0  ;;  %v9889_v37 = vld [vmem:[%s11096_s24 + $0x348] sm:$0xff] }
 0x395   : > { %v7243_v53 = vpop.f32.mrf.mxu2  ;;  %v7563_v28 = vpop.f32.mrf.mxu3 }
 0x396   : > { %v7914_v31 = vmax.f32 %v7913_v27, %v7243_v53  ;;  %v6606_v32 = vpop.f32.mrf.mxu0  ;;  %v6926_v33 = vpop.f32.mrf.mxu1 }
 0x397   : > { %v7916_v42 = vmax.f32 %v6606_v32, %v6926_v33 }
 0x398   : > { %v7915_v38 = vmax.f32 %v7914_v31, %v7563_v28 }
 0x399   : > { %6645 = vmatmul.bf16.gmra.mxu0 %v9822_v29  ;;  %6965 = vmatmul.bf16.gmra.mxu1 %v9886_v30 }
 0x39a   : > { %v8183_v39 = vadd.f32 %v11279_v35, %v7915_v38  ;;  %7285 = vmatmul.bf16.gmra.mxu2 %v9950_v34  ;;  %7605 = vmatmul.bf16.gmra.mxu3 %v10014_v36  ;;  %v9825_v36 = vld [vmem:[%s11096_s24 + $0x148] sm:$0xff] }
 0x39c   : > { %v8311_v41 = vmax.f32 %v8183_v39, 0.0 }
 0x39d   : > { %v7246_v43 = vpop.f32.mrf.mxu2  ;;  %v7566_v44 = vpop.f32.mrf.mxu3 }
 0x39e   : > { %v10188_v45 = vpack.c.bf16 %v8311_v41, %v8310_v40  ;;  %v6608_v46 = vpop.f32.mrf.mxu0  ;;  %v6928_v47 = vpop.f32.mrf.mxu1  ;;  %v7917_v48 = vmax.f32 %v7916_v42, %v7246_v43  ;;  %v9953_v41 = vld [vmem:[%s11096_s24 + $0x548] sm:$0xff] }
 0x39f   : > { %v7919_v50 = vmax.f32 %v6608_v46, %v6928_v47  ;;  %v10017_v42 = vld [vmem:[%s11096_s24 + $0x748] sm:$0xff] }
 0x3a0   : > { %10388 = vst [vmem:[%s11150_s28 + $0xe8] sm:$0xff] %v10188_v45   ;;  %v7918_v49 = vmax.f32 %v7917_v48, %v7566_v44 }
 0x3a2   : > { %v8184_v61 = vadd.f32 %v11279_v35, %v7918_v49 }
 0x3a4   : > { %v8312_v0 = vmax.f32 %v8184_v61, 0.0  ;;  %v9890_v61 = vld [vmem:[%s11096_s24 + $0x350] sm:$0xff] }
 0x3a5   : > { %v7248_v51 = vpop.f32.mrf.mxu2  ;;  %v7568_v52 = vpop.f32.mrf.mxu3 }
 0x3a6   : > { %v7920_v56 = vmax.f32 %v7919_v50, %v7248_v51  ;;  %v6611_v57 = vpop.f32.mrf.mxu0  ;;  %v6931_v58 = vpop.f32.mrf.mxu1 }
 0x3a7   : > { %v7922_v2 = vmax.f32 %v6611_v57, %v6931_v58 }
 0x3a8   : > { %v7921_v62 = vmax.f32 %v7920_v56, %v7568_v52 }
 0x3a9   : > { %6650 = vmatmul.bf16.gmra.mxu0 %v9823_v54  ;;  %6970 = vmatmul.bf16.gmra.mxu1 %v9887_v55 }
 0x3aa   : > { %v8185_v63 = vadd.f32 %v11279_v35, %v7921_v62  ;;  %7290 = vmatmul.bf16.gmra.mxu2 %v9951_v59  ;;  %7610 = vmatmul.bf16.gmra.mxu3 %v10015_v60  ;;  %v9826_v60 = vld [vmem:[%s11096_s24 + $0x150] sm:$0xff] }
 0x3ac   : > { %v8313_v1 = vmax.f32 %v8185_v63, 0.0 }
 0x3ad   : > { %v7251_v3 = vpop.f32.mrf.mxu2  ;;  %v7571_v4 = vpop.f32.mrf.mxu3 }
 0x3ae   : > { %v10193_v5 = vpack.c.bf16 %v8313_v1, %v8312_v0  ;;  %v6613_v6 = vpop.f32.mrf.mxu0  ;;  %v6933_v7 = vpop.f32.mrf.mxu1  ;;  %v7923_v8 = vmax.f32 %v7922_v2, %v7251_v3  ;;  %v9954_v1 = vld [vmem:[%s11096_s24 + $0x550] sm:$0xff] }
 0x3af   : > { %v7925_v10 = vmax.f32 %v6613_v6, %v6933_v7  ;;  %v10018_v2 = vld [vmem:[%s11096_s24 + $0x750] sm:$0xff] }
 0x3b0   : > { %10389 = vst [vmem:[%s11150_s28 + $0xf0] sm:$0xff] %v10193_v5   ;;  %v7924_v9 = vmax.f32 %v7923_v8, %v7571_v4 }
 0x3b2   : > { %v8186_v20 = vadd.f32 %v11279_v35, %v7924_v9 }
 0x3b4   : > { %v8314_v23 = vmax.f32 %v8186_v20, 0.0  ;;  %v9891_v20 = vld [vmem:[%s11096_s24 + $0x358] sm:$0xff] }
 0x3b5   : > { %v7253_v11 = vpop.f32.mrf.mxu2  ;;  %v7573_v12 = vpop.f32.mrf.mxu3 }
 0x3b6   : > { %v7926_v15 = vmax.f32 %v7925_v10, %v7253_v11  ;;  %v6616_v16 = vpop.f32.mrf.mxu0  ;;  %v6936_v17 = vpop.f32.mrf.mxu1 }
 0x3b7   : > { %v7928_v25 = vmax.f32 %v6616_v16, %v6936_v17 }
 0x3b8   : > { %v7927_v21 = vmax.f32 %v7926_v15, %v7573_v12 }
 0x3b9   : > { %6655 = vmatmul.bf16.gmra.mxu0 %v9824_v13  ;;  %6975 = vmatmul.bf16.gmra.mxu1 %v9888_v14 }
 0x3ba   : > { %v8187_v22 = vadd.f32 %v11279_v35, %v7927_v21  ;;  %7295 = vmatmul.bf16.gmra.mxu2 %v9952_v18  ;;  %7615 = vmatmul.bf16.gmra.mxu3 %v10016_v19  ;;  %v9827_v19 = vld [vmem:[%s11096_s24 + $0x158] sm:$0xff] }
 0x3bc   : > { %v8315_v24 = vmax.f32 %v8187_v22, 0.0 }
 0x3bd   : > { %v7256_v26 = vpop.f32.mrf.mxu2  ;;  %v7576_v27 = vpop.f32.mrf.mxu3 }
 0x3be   : > { %v10198_v53 = vpack.c.bf16 %v8315_v24, %v8314_v23  ;;  %v6618_v28 = vpop.f32.mrf.mxu0  ;;  %v6938_v29 = vpop.f32.mrf.mxu1  ;;  %v7929_v30 = vmax.f32 %v7928_v25, %v7256_v26  ;;  %v9955_v24 = vld [vmem:[%s11096_s24 + $0x558] sm:$0xff] }
 0x3bf   : > { %v7931_v32 = vmax.f32 %v6618_v28, %v6938_v29  ;;  %v10019_v25 = vld [vmem:[%s11096_s24 + $0x758] sm:$0xff] }
 0x3c0   : > { %10390 = vst [vmem:[%s11150_s28 + $0xf8] sm:$0xff] %v10198_v53   ;;  %v7930_v31 = vmax.f32 %v7929_v30, %v7576_v27 }
 0x3c2   : > { %v8188_v43 = vadd.f32 %v11279_v35, %v7930_v31 }
 0x3c4   : > { %v8316_v46 = vmax.f32 %v8188_v43, 0.0  ;;  %v9892_v43 = vld [vmem:[%s11096_s24 + $0x360] sm:$0xff] }
 0x3c5   : > { %v7258_v33 = vpop.f32.mrf.mxu2  ;;  %v7578_v34 = vpop.f32.mrf.mxu3 }
 0x3c6   : > { %v7932_v38 = vmax.f32 %v7931_v32, %v7258_v33  ;;  %v6621_v39 = vpop.f32.mrf.mxu0  ;;  %v6941_v40 = vpop.f32.mrf.mxu1 }
 0x3c7   : > { %v7934_v48 = vmax.f32 %v6621_v39, %v6941_v40 }
 0x3c8   : > { %v7933_v44 = vmax.f32 %v7932_v38, %v7578_v34 }
 0x3c9   : > { %6660 = vmatmul.bf16.gmra.mxu0 %v9825_v36  ;;  %6980 = vmatmul.bf16.gmra.mxu1 %v9889_v37 }
 0x3ca   : > { %v8189_v45 = vadd.f32 %v11279_v35, %v7933_v44  ;;  %7300 = vmatmul.bf16.gmra.mxu2 %v9953_v41  ;;  %7620 = vmatmul.bf16.gmra.mxu3 %v10017_v42  ;;  %v9828_v42 = vld [vmem:[%s11096_s24 + $0x160] sm:$0xff] }
 0x3cc   : > { %v8317_v47 = vmax.f32 %v8189_v45, 0.0 }
 0x3cd   : > { %v7261_v49 = vpop.f32.mrf.mxu2  ;;  %v7581_v50 = vpop.f32.mrf.mxu3 }
 0x3ce   : > { %v10203_v51 = vpack.c.bf16 %v8317_v47, %v8316_v46  ;;  %v6623_v52 = vpop.f32.mrf.mxu0  ;;  %v6943_v54 = vpop.f32.mrf.mxu1  ;;  %v7935_v55 = vmax.f32 %v7934_v48, %v7261_v49  ;;  %v9956_v47 = vld [vmem:[%s11096_s24 + $0x560] sm:$0xff] }
 0x3cf   : > { %v7937_v57 = vmax.f32 %v6623_v52, %v6943_v54  ;;  %v10020_v48 = vld [vmem:[%s11096_s24 + $0x760] sm:$0xff] }
 0x3d0   : > { %10391 = vst [vmem:[%s11150_s28 + $0x100] sm:$0xff] %v10203_v51   ;;  %v7936_v56 = vmax.f32 %v7935_v55, %v7581_v50 }
 0x3d2   : > { %v8190_v3 = vadd.f32 %v11279_v35, %v7936_v56 }
 0x3d4   : > { %v8318_v6 = vmax.f32 %v8190_v3, 0.0  ;;  %v9893_v3 = vld [vmem:[%s11096_s24 + $0x368] sm:$0xff] }
 0x3d5   : > { %v7263_v58 = vpop.f32.mrf.mxu2  ;;  %v7583_v59 = vpop.f32.mrf.mxu3 }
 0x3d6   : > { %v7938_v62 = vmax.f32 %v7937_v57, %v7263_v58  ;;  %v6626_v63 = vpop.f32.mrf.mxu0  ;;  %v6946_v0 = vpop.f32.mrf.mxu1 }
 0x3d7   : > { %v7940_v8 = vmax.f32 %v6626_v63, %v6946_v0 }
 0x3d8   : > { %v7939_v4 = vmax.f32 %v7938_v62, %v7583_v59 }
 0x3d9   : > { %6665 = vmatmul.bf16.gmra.mxu0 %v9826_v60  ;;  %6985 = vmatmul.bf16.gmra.mxu1 %v9890_v61 }
 0x3da   : > { %v8191_v5 = vadd.f32 %v11279_v35, %v7939_v4  ;;  %7305 = vmatmul.bf16.gmra.mxu2 %v9954_v1  ;;  %7625 = vmatmul.bf16.gmra.mxu3 %v10018_v2  ;;  %v9829_v2 = vld [vmem:[%s11096_s24 + $0x168] sm:$0xff] }
 0x3dc   : > { %v8319_v7 = vmax.f32 %v8191_v5, 0.0 }
 0x3dd   : > { %v7266_v9 = vpop.f32.mrf.mxu2  ;;  %v7586_v10 = vpop.f32.mrf.mxu3 }
 0x3de   : > { %v10208_v11 = vpack.c.bf16 %v8319_v7, %v8318_v6  ;;  %v6628_v12 = vpop.f32.mrf.mxu0  ;;  %v6948_v13 = vpop.f32.mrf.mxu1  ;;  %v7941_v14 = vmax.f32 %v7940_v8, %v7266_v9  ;;  %v9957_v7 = vld [vmem:[%s11096_s24 + $0x568] sm:$0xff] }
 0x3df   : > { %v7943_v16 = vmax.f32 %v6628_v12, %v6948_v13  ;;  %v10021_v8 = vld [vmem:[%s11096_s24 + $0x768] sm:$0xff] }
 0x3e0   : > { %10392 = vst [vmem:[%s11150_s28 + $0x108] sm:$0xff] %v10208_v11   ;;  %v7942_v15 = vmax.f32 %v7941_v14, %v7586_v10 }
 0x3e2   : > { %v8192_v26 = vadd.f32 %v11279_v35, %v7942_v15 }
 0x3e4   : > { %v8320_v28 = vmax.f32 %v8192_v26, 0.0 }
 0x3e5   : > { %v7268_v17 = vpop.f32.mrf.mxu2  ;;  %v7588_v18 = vpop.f32.mrf.mxu3 }
 0x3e6   : > { %v7944_v21 = vmax.f32 %v7943_v16, %v7268_v17  ;;  %v6631_v22 = vpop.f32.mrf.mxu0  ;;  %v6951_v23 = vpop.f32.mrf.mxu1 }
 0x3e7   : > { %v7946_v30 = vmax.f32 %v6631_v22, %v6951_v23 }
 0x3e8   : > { %v7945_v27 = vmax.f32 %v7944_v21, %v7588_v18 }
 0x3e9   : > { %6670 = vmatmul.bf16.gmra.mxu0 %v9827_v19  ;;  %6990 = vmatmul.bf16.gmra.mxu1 %v9891_v20 }
 0x3ea   : > { %v8193_v53 = vadd.f32 %v11279_v35, %v7945_v27  ;;  %7310 = vmatmul.bf16.gmra.mxu2 %v9955_v24  ;;  %7630 = vmatmul.bf16.gmra.mxu3 %v10019_v25  ;;  %v9830_v24 = vld [vmem:[%s11096_s24 + $0x170] sm:$0xff] }
 0x3eb   : > { %v9894_v25 = vld [vmem:[%s11096_s24 + $0x370] sm:$0xff] }
 0x3ec   : > { %v8321_v29 = vmax.f32 %v8193_v53, 0.0 }
 0x3ed   : > { %v7271_v31 = vpop.f32.mrf.mxu2  ;;  %v7591_v32 = vpop.f32.mrf.mxu3 }
 0x3ee   : > { %v10213_v33 = vpack.c.bf16 %v8321_v29, %v8320_v28  ;;  %v6633_v34 = vpop.f32.mrf.mxu0  ;;  %v6953_v36 = vpop.f32.mrf.mxu1  ;;  %v7947_v37 = vmax.f32 %v7946_v30, %v7271_v31  ;;  %v9958_v28 = vld [vmem:[%s11096_s24 + $0x570] sm:$0xff]  ;;  %v11417_v30 = vld [vmem:[%s11585_s2] ss:$0 sm:$0xff] }
 0x3ef   : > { %v7949_v39 = vmax.f32 %v6633_v34, %v6953_v36  ;;  %v10022_v29 = vld [vmem:[%s11096_s24 + $0x770] sm:$0xff] }
 0x3f0   : > { %10393 = vst [vmem:[%s11150_s28 + $0x110] sm:$0xff] %v10213_v33   ;;  %v7948_v38 = vmax.f32 %v7947_v37, %v7591_v32 }
 0x3f2   : > { %v8194_v49 = vadd.f32 %v11279_v35, %v7948_v38 }
 0x3f4   : > { %v8322_v52 = vmax.f32 %v8194_v49, 0.0  ;;  %v9895_v49 = vld [vmem:[%s11096_s24 + $0x378] sm:$0xff] }
 0x3f5   : > { %v7273_v40 = vpop.f32.mrf.mxu2  ;;  %v7593_v41 = vpop.f32.mrf.mxu3 }
 0x3f6   : > { %v7950_v44 = vmax.f32 %v7949_v39, %v7273_v40  ;;  %v6636_v45 = vpop.f32.mrf.mxu0  ;;  %v6956_v46 = vpop.f32.mrf.mxu1 }
 0x3f7   : > { %v7952_v55 = vmax.f32 %v6636_v45, %v6956_v46 }
 0x3f8   : > { %v7951_v50 = vmax.f32 %v7950_v44, %v7593_v41 }
 0x3f9   : > { %6675 = vmatmul.bf16.gmra.mxu0 %v9828_v42  ;;  %6995 = vmatmul.bf16.gmra.mxu1 %v9892_v43 }
 0x3fa   : > { %v8195_v51 = vadd.f32 %v11279_v35, %v7951_v50  ;;  %7315 = vmatmul.bf16.gmra.mxu2 %v9956_v47  ;;  %7635 = vmatmul.bf16.gmra.mxu3 %v10020_v48  ;;  %v9831_v48 = vld [vmem:[%s11096_s24 + $0x178] sm:$0xff] }
 0x3fc   : > { %v8323_v54 = vmax.f32 %v8195_v51, 0.0 }
 0x3fd   : > { %v7276_v56 = vpop.f32.mrf.mxu2  ;;  %v7596_v57 = vpop.f32.mrf.mxu3 }
 0x3fe   : > { %v10218_v58 = vpack.c.bf16 %v8323_v54, %v8322_v52  ;;  %v6638_v59 = vpop.f32.mrf.mxu0  ;;  %v6958_v60 = vpop.f32.mrf.mxu1  ;;  %v7953_v61 = vmax.f32 %v7952_v55, %v7276_v56  ;;  %v9959_v54 = vld [vmem:[%s11096_s24 + $0x578] sm:$0xff] }
 0x3ff   : > { %v7955_v63 = vmax.f32 %v6638_v59, %v6958_v60  ;;  %v10023_v55 = vld [vmem:[%s11096_s24 + $0x778] sm:$0xff] }
 0x400   : > { %10394 = vst [vmem:[%s11150_s28 + $0x118] sm:$0xff] %v10218_v58   ;;  %v7954_v62 = vmax.f32 %v7953_v61, %v7596_v57 }
 0x402   : > { %v8196_v9 = vadd.f32 %v11279_v35, %v7954_v62 }
 0x404   : > { %v8324_v12 = vmax.f32 %v8196_v9, 0.0  ;;  %v9896_v9 = vld [vmem:[%s11096_s24 + $0x380] sm:$0xff] }
 0x405   : > { %v7278_v0 = vpop.f32.mrf.mxu2  ;;  %v7598_v1 = vpop.f32.mrf.mxu3 }
 0x406   : > { %v7956_v4 = vmax.f32 %v7955_v63, %v7278_v0  ;;  %v6641_v5 = vpop.f32.mrf.mxu0  ;;  %v6961_v6 = vpop.f32.mrf.mxu1 }
 0x407   : > { %v7958_v14 = vmax.f32 %v6641_v5, %v6961_v6 }
 0x408   : > { %v7957_v10 = vmax.f32 %v7956_v4, %v7598_v1 }
 0x409   : > { %6680 = vmatmul.bf16.gmra.mxu0 %v9829_v2  ;;  %7000 = vmatmul.bf16.gmra.mxu1 %v9893_v3 }
 0x40a   : > { %v8197_v11 = vadd.f32 %v11279_v35, %v7957_v10  ;;  %7320 = vmatmul.bf16.gmra.mxu2 %v9957_v7  ;;  %7640 = vmatmul.bf16.gmra.mxu3 %v10021_v8  ;;  %v9832_v8 = vld [vmem:[%s11096_s24 + $0x180] sm:$0xff] }
 0x40c   : > { %v8325_v13 = vmax.f32 %v8197_v11, 0.0 }
 0x40d   : > { %v7281_v15 = vpop.f32.mrf.mxu2  ;;  %v7601_v16 = vpop.f32.mrf.mxu3 }
 0x40e   : > { %v10223_v17 = vpack.c.bf16 %v8325_v13, %v8324_v12  ;;  %v6643_v18 = vpop.f32.mrf.mxu0  ;;  %v6963_v19 = vpop.f32.mrf.mxu1  ;;  %v7959_v20 = vmax.f32 %v7958_v14, %v7281_v15  ;;  %v9960_v13 = vld [vmem:[%s11096_s24 + $0x580] sm:$0xff] }
 0x40f   : > { %v7961_v22 = vmax.f32 %v6643_v18, %v6963_v19  ;;  %v10024_v14 = vld [vmem:[%s11096_s24 + $0x780] sm:$0xff] }
 0x410   : > { %10395 = vst [vmem:[%s11150_s28 + $0x120] sm:$0xff] %v10223_v17   ;;  %v7960_v21 = vmax.f32 %v7959_v20, %v7601_v16 }
 0x412   : > { %v8198_v31 = vadd.f32 %v11417_v30, %v7960_v21 }
 0x414   : > { %v8326_v34 = vmax.f32 %v8198_v31, 0.0  ;;  %v9897_v31 = vld [vmem:[%s11096_s24 + $0x388] sm:$0xff] }
 0x415   : > { %v7283_v23 = vpop.f32.mrf.mxu2  ;;  %v7603_v35 = vpop.f32.mrf.mxu3 }
 0x416   : > { %v7962_v26 = vmax.f32 %v7961_v22, %v7283_v23  ;;  %v6646_v27 = vpop.f32.mrf.mxu0  ;;  %v6966_v53 = vpop.f32.mrf.mxu1 }
 0x417   : > { %v7964_v37 = vmax.f32 %v6646_v27, %v6966_v53 }
 0x418   : > { %v7963_v32 = vmax.f32 %v7962_v26, %v7603_v35 }
 0x419   : > { %6685 = vmatmul.bf16.gmra.mxu0 %v9830_v24  ;;  %7005 = vmatmul.bf16.gmra.mxu1 %v9894_v25 }
 0x41a   : > { %v8199_v33 = vadd.f32 %v11417_v30, %v7963_v32  ;;  %7325 = vmatmul.bf16.gmra.mxu2 %v9958_v28  ;;  %7645 = vmatmul.bf16.gmra.mxu3 %v10022_v29  ;;  %v9833_v29 = vld [vmem:[%s11096_s24 + $0x188] sm:$0xff] }
 0x41c   : > { %v8327_v36 = vmax.f32 %v8199_v33, 0.0 }
 0x41d   : > { %v7286_v38 = vpop.f32.mrf.mxu2  ;;  %v7606_v39 = vpop.f32.mrf.mxu3 }
 0x41e   : > { %v10228_v40 = vpack.c.bf16 %v8327_v36, %v8326_v34  ;;  %v6648_v41 = vpop.f32.mrf.mxu0  ;;  %v6968_v42 = vpop.f32.mrf.mxu1  ;;  %v7965_v43 = vmax.f32 %v7964_v37, %v7286_v38  ;;  %v9961_v36 = vld [vmem:[%s11096_s24 + $0x588] sm:$0xff] }
 0x41f   : > { %v7967_v45 = vmax.f32 %v6648_v41, %v6968_v42  ;;  %v10025_v37 = vld [vmem:[%s11096_s24 + $0x788] sm:$0xff] }
 0x420   : > { %10396 = vst [vmem:[%s11150_s28 + $0x128] sm:$0xff] %v10228_v40   ;;  %v7966_v44 = vmax.f32 %v7965_v43, %v7606_v39 }
 0x422   : > { %v8200_v56 = vadd.f32 %v11417_v30, %v7966_v44 }
 0x424   : > { %v8328_v59 = vmax.f32 %v8200_v56, 0.0  ;;  %v9898_v56 = vld [vmem:[%s11096_s24 + $0x390] sm:$0xff] }
 0x425   : > { %v7288_v46 = vpop.f32.mrf.mxu2  ;;  %v7608_v47 = vpop.f32.mrf.mxu3 }
 0x426   : > { %v7968_v50 = vmax.f32 %v7967_v45, %v7288_v46  ;;  %v6651_v51 = vpop.f32.mrf.mxu0  ;;  %v6971_v52 = vpop.f32.mrf.mxu1 }
 0x427   : > { %v7970_v61 = vmax.f32 %v6651_v51, %v6971_v52 }
 0x428   : > { %v7969_v57 = vmax.f32 %v7968_v50, %v7608_v47 }
 0x429   : > { %6690 = vmatmul.bf16.gmra.mxu0 %v9831_v48  ;;  %7010 = vmatmul.bf16.gmra.mxu1 %v9895_v49 }
 0x42a   : > { %v8201_v58 = vadd.f32 %v11417_v30, %v7969_v57  ;;  %7330 = vmatmul.bf16.gmra.mxu2 %v9959_v54  ;;  %7650 = vmatmul.bf16.gmra.mxu3 %v10023_v55  ;;  %v9834_v55 = vld [vmem:[%s11096_s24 + $0x190] sm:$0xff] }
 0x42c   : > { %v8329_v60 = vmax.f32 %v8201_v58, 0.0 }
 0x42d   : > { %v7291_v62 = vpop.f32.mrf.mxu2  ;;  %v7611_v63 = vpop.f32.mrf.mxu3 }
 0x42e   : > { %v10233_v0 = vpack.c.bf16 %v8329_v60, %v8328_v59  ;;  %v6653_v1 = vpop.f32.mrf.mxu0  ;;  %v6973_v2 = vpop.f32.mrf.mxu1  ;;  %v7971_v3 = vmax.f32 %v7970_v61, %v7291_v62  ;;  %v9962_v60 = vld [vmem:[%s11096_s24 + $0x590] sm:$0xff] }
 0x42f   : > { %v7973_v5 = vmax.f32 %v6653_v1, %v6973_v2  ;;  %v10026_v61 = vld [vmem:[%s11096_s24 + $0x790] sm:$0xff] }
 0x430   : > { %10397 = vst [vmem:[%s11150_s28 + $0x130] sm:$0xff] %v10233_v0   ;;  %v7972_v4 = vmax.f32 %v7971_v3, %v7611_v63 }
 0x432   : > { %v8202_v15 = vadd.f32 %v11417_v30, %v7972_v4 }
 0x434   : > { %v8330_v18 = vmax.f32 %v8202_v15, 0.0  ;;  %v9899_v15 = vld [vmem:[%s11096_s24 + $0x398] sm:$0xff] }
 0x435   : > { %v7293_v6 = vpop.f32.mrf.mxu2  ;;  %v7613_v7 = vpop.f32.mrf.mxu3 }
 0x436   : > { %v7974_v10 = vmax.f32 %v7973_v5, %v7293_v6  ;;  %v6656_v11 = vpop.f32.mrf.mxu0  ;;  %v6976_v12 = vpop.f32.mrf.mxu1 }
 0x437   : > { %v7976_v20 = vmax.f32 %v6656_v11, %v6976_v12 }
 0x438   : > { %v7975_v16 = vmax.f32 %v7974_v10, %v7613_v7 }
 0x439   : > { %6695 = vmatmul.bf16.gmra.mxu0 %v9832_v8  ;;  %7015 = vmatmul.bf16.gmra.mxu1 %v9896_v9 }
 0x43a   : > { %v8203_v17 = vadd.f32 %v11417_v30, %v7975_v16  ;;  %7335 = vmatmul.bf16.gmra.mxu2 %v9960_v13  ;;  %7655 = vmatmul.bf16.gmra.mxu3 %v10024_v14  ;;  %v9835_v14 = vld [vmem:[%s11096_s24 + $0x198] sm:$0xff] }
 0x43c   : > { %v8331_v19 = vmax.f32 %v8203_v17, 0.0 }
 0x43d   : > { %v7296_v21 = vpop.f32.mrf.mxu2  ;;  %v7616_v22 = vpop.f32.mrf.mxu3 }
 0x43e   : > { %v10238_v23 = vpack.c.bf16 %v8331_v19, %v8330_v18  ;;  %v6658_v35 = vpop.f32.mrf.mxu0  ;;  %v6978_v24 = vpop.f32.mrf.mxu1  ;;  %v7977_v25 = vmax.f32 %v7976_v20, %v7296_v21  ;;  %v9963_v19 = vld [vmem:[%s11096_s24 + $0x598] sm:$0xff] }
 0x43f   : > { %v7979_v27 = vmax.f32 %v6658_v35, %v6978_v24  ;;  %v10027_v20 = vld [vmem:[%s11096_s24 + $0x798] sm:$0xff] }
 0x440   : > { %10398 = vst [vmem:[%s11150_s28 + $0x138] sm:$0xff] %v10238_v23   ;;  %v7978_v26 = vmax.f32 %v7977_v25, %v7616_v22 }
 0x442   : > { %v8204_v38 = vadd.f32 %v11417_v30, %v7978_v26 }
 0x444   : > { %v8332_v41 = vmax.f32 %v8204_v38, 0.0  ;;  %v9900_v38 = vld [vmem:[%s11096_s24 + $0x3a0] sm:$0xff] }
 0x445   : > { %v7298_v53 = vpop.f32.mrf.mxu2  ;;  %v7618_v28 = vpop.f32.mrf.mxu3 }
 0x446   : > { %v7980_v32 = vmax.f32 %v7979_v27, %v7298_v53  ;;  %v6661_v33 = vpop.f32.mrf.mxu0  ;;  %v6981_v34 = vpop.f32.mrf.mxu1 }
 0x447   : > { %v7982_v43 = vmax.f32 %v6661_v33, %v6981_v34 }
 0x448   : > { %v7981_v39 = vmax.f32 %v7980_v32, %v7618_v28 }
 0x449   : > { %6700 = vmatmul.bf16.gmra.mxu0 %v9833_v29  ;;  %7020 = vmatmul.bf16.gmra.mxu1 %v9897_v31 }
 0x44a   : > { %v8205_v40 = vadd.f32 %v11417_v30, %v7981_v39  ;;  %7340 = vmatmul.bf16.gmra.mxu2 %v9961_v36  ;;  %7660 = vmatmul.bf16.gmra.mxu3 %v10025_v37  ;;  %v9836_v37 = vld [vmem:[%s11096_s24 + $0x1a0] sm:$0xff] }
 0x44c   : > { %v8333_v42 = vmax.f32 %v8205_v40, 0.0 }
 0x44d   : > { %v7301_v44 = vpop.f32.mrf.mxu2  ;;  %v7621_v45 = vpop.f32.mrf.mxu3 }
 0x44e   : > { %v10243_v46 = vpack.c.bf16 %v8333_v42, %v8332_v41  ;;  %v6663_v47 = vpop.f32.mrf.mxu0  ;;  %v6983_v48 = vpop.f32.mrf.mxu1  ;;  %v7983_v49 = vmax.f32 %v7982_v43, %v7301_v44  ;;  %v9964_v42 = vld [vmem:[%s11096_s24 + $0x5a0] sm:$0xff] }
 0x44f   : > { %v7985_v51 = vmax.f32 %v6663_v47, %v6983_v48  ;;  %v10028_v43 = vld [vmem:[%s11096_s24 + $0x7a0] sm:$0xff] }
 0x450   : > { %10399 = vst [vmem:[%s11150_s28 + $0x140] sm:$0xff] %v10243_v46   ;;  %v7984_v50 = vmax.f32 %v7983_v49, %v7621_v45 }
 0x452   : > { %v8206_v62 = vadd.f32 %v11417_v30, %v7984_v50 }
 0x454   : > { %v8334_v1 = vmax.f32 %v8206_v62, 0.0  ;;  %v9901_v62 = vld [vmem:[%s11096_s24 + $0x3a8] sm:$0xff] }
 0x455   : > { %v7303_v52 = vpop.f32.mrf.mxu2  ;;  %v7623_v54 = vpop.f32.mrf.mxu3 }
 0x456   : > { %v7986_v57 = vmax.f32 %v7985_v51, %v7303_v52  ;;  %v6666_v58 = vpop.f32.mrf.mxu0  ;;  %v6986_v59 = vpop.f32.mrf.mxu1 }
 0x457   : > { %v7988_v3 = vmax.f32 %v6666_v58, %v6986_v59 }
 0x458   : > { %v7987_v63 = vmax.f32 %v7986_v57, %v7623_v54 }
 0x459   : > { %6705 = vmatmul.bf16.gmra.mxu0 %v9834_v55  ;;  %7025 = vmatmul.bf16.gmra.mxu1 %v9898_v56 }
 0x45a   : > { %v8207_v0 = vadd.f32 %v11417_v30, %v7987_v63  ;;  %7345 = vmatmul.bf16.gmra.mxu2 %v9962_v60  ;;  %7665 = vmatmul.bf16.gmra.mxu3 %v10026_v61  ;;  %v9837_v61 = vld [vmem:[%s11096_s24 + $0x1a8] sm:$0xff] }
 0x45c   : > { %v8335_v2 = vmax.f32 %v8207_v0, 0.0 }
 0x45d   : > { %v7306_v4 = vpop.f32.mrf.mxu2  ;;  %v7626_v5 = vpop.f32.mrf.mxu3 }
 0x45e   : > { %v10248_v6 = vpack.c.bf16 %v8335_v2, %v8334_v1  ;;  %v6668_v7 = vpop.f32.mrf.mxu0  ;;  %v6988_v8 = vpop.f32.mrf.mxu1  ;;  %v7989_v9 = vmax.f32 %v7988_v3, %v7306_v4  ;;  %v9965_v2 = vld [vmem:[%s11096_s24 + $0x5a8] sm:$0xff] }
 0x45f   : > { %v7991_v11 = vmax.f32 %v6668_v7, %v6988_v8  ;;  %v10029_v3 = vld [vmem:[%s11096_s24 + $0x7a8] sm:$0xff] }
 0x460   : > { %10400 = vst [vmem:[%s11150_s28 + $0x148] sm:$0xff] %v10248_v6   ;;  %v7990_v10 = vmax.f32 %v7989_v9, %v7626_v5 }
 0x462   : > { %v8208_v21 = vadd.f32 %v11417_v30, %v7990_v10 }
 0x464   : > { %v8336_v35 = vmax.f32 %v8208_v21, 0.0  ;;  %v9902_v21 = vld [vmem:[%s11096_s24 + $0x3b0] sm:$0xff] }
 0x465   : > { %v7308_v12 = vpop.f32.mrf.mxu2  ;;  %v7628_v13 = vpop.f32.mrf.mxu3 }
 0x466   : > { %v7992_v16 = vmax.f32 %v7991_v11, %v7308_v12  ;;  %v6671_v17 = vpop.f32.mrf.mxu0  ;;  %v6991_v18 = vpop.f32.mrf.mxu1 }
 0x467   : > { %v7994_v25 = vmax.f32 %v6671_v17, %v6991_v18 }
 0x468   : > { %v7993_v22 = vmax.f32 %v7992_v16, %v7628_v13 }
 0x469   : > { %6710 = vmatmul.bf16.gmra.mxu0 %v9835_v14  ;;  %7030 = vmatmul.bf16.gmra.mxu1 %v9899_v15 }
 0x46a   : > { %v8209_v23 = vadd.f32 %v11417_v30, %v7993_v22  ;;  %7350 = vmatmul.bf16.gmra.mxu2 %v9963_v19  ;;  %7670 = vmatmul.bf16.gmra.mxu3 %v10027_v20  ;;  %v9838_v20 = vld [vmem:[%s11096_s24 + $0x1b0] sm:$0xff] }
 0x46c   : > { %v8337_v24 = vmax.f32 %v8209_v23, 0.0 }
 0x46d   : > { %v7311_v26 = vpop.f32.mrf.mxu2  ;;  %v7631_v27 = vpop.f32.mrf.mxu3 }
 0x46e   : > { %v10253_v53 = vpack.c.bf16 %v8337_v24, %v8336_v35  ;;  %v6673_v28 = vpop.f32.mrf.mxu0  ;;  %v6993_v29 = vpop.f32.mrf.mxu1  ;;  %v7995_v31 = vmax.f32 %v7994_v25, %v7311_v26  ;;  %v9966_v24 = vld [vmem:[%s11096_s24 + $0x5b0] sm:$0xff] }
 0x46f   : > { %v7997_v33 = vmax.f32 %v6673_v28, %v6993_v29  ;;  %v10030_v25 = vld [vmem:[%s11096_s24 + $0x7b0] sm:$0xff] }
 0x470   : > { %10401 = vst [vmem:[%s11150_s28 + $0x150] sm:$0xff] %v10253_v53   ;;  %v7996_v32 = vmax.f32 %v7995_v31, %v7631_v27 }
 0x472   : > { %v8210_v44 = vadd.f32 %v11417_v30, %v7996_v32 }
 0x474   : > { %v8338_v47 = vmax.f32 %v8210_v44, 0.0  ;;  %v9903_v44 = vld [vmem:[%s11096_s24 + $0x3b8] sm:$0xff] }
 0x475   : > { %v7313_v34 = vpop.f32.mrf.mxu2  ;;  %v7633_v36 = vpop.f32.mrf.mxu3 }
 0x476   : > { %v7998_v39 = vmax.f32 %v7997_v33, %v7313_v34  ;;  %v6676_v40 = vpop.f32.mrf.mxu0  ;;  %v6996_v41 = vpop.f32.mrf.mxu1 }
 0x477   : > { %v8000_v49 = vmax.f32 %v6676_v40, %v6996_v41 }
 0x478   : > { %v7999_v45 = vmax.f32 %v7998_v39, %v7633_v36 }
 0x479   : > { %6715 = vmatmul.bf16.gmra.mxu0 %v9836_v37  ;;  %7035 = vmatmul.bf16.gmra.mxu1 %v9900_v38 }
 0x47a   : > { %v8211_v46 = vadd.f32 %v11417_v30, %v7999_v45  ;;  %7355 = vmatmul.bf16.gmra.mxu2 %v9964_v42  ;;  %7675 = vmatmul.bf16.gmra.mxu3 %v10028_v43  ;;  %v9839_v43 = vld [vmem:[%s11096_s24 + $0x1b8] sm:$0xff] }
 0x47c   : > { %v8339_v48 = vmax.f32 %v8211_v46, 0.0 }
 0x47d   : > { %v7316_v50 = vpop.f32.mrf.mxu2  ;;  %v7636_v51 = vpop.f32.mrf.mxu3 }
 0x47e   : > { %v10258_v52 = vpack.c.bf16 %v8339_v48, %v8338_v47  ;;  %v6678_v54 = vpop.f32.mrf.mxu0  ;;  %v6998_v55 = vpop.f32.mrf.mxu1  ;;  %v8001_v56 = vmax.f32 %v8000_v49, %v7316_v50  ;;  %v9967_v48 = vld [vmem:[%s11096_s24 + $0x5b8] sm:$0xff] }
 0x47f   : > { %v8003_v58 = vmax.f32 %v6678_v54, %v6998_v55  ;;  %v10031_v49 = vld [vmem:[%s11096_s24 + $0x7b8] sm:$0xff] }
 0x480   : > { %10402 = vst [vmem:[%s11150_s28 + $0x158] sm:$0xff] %v10258_v52   ;;  %v8002_v57 = vmax.f32 %v8001_v56, %v7636_v51 }
 0x482   : > { %v8212_v4 = vadd.f32 %v11417_v30, %v8002_v57 }
 0x484   : > { %v8340_v7 = vmax.f32 %v8212_v4, 0.0  ;;  %v9904_v4 = vld [vmem:[%s11096_s24 + $0x3c0] sm:$0xff] }
 0x485   : > { %v7318_v59 = vpop.f32.mrf.mxu2  ;;  %v7638_v60 = vpop.f32.mrf.mxu3 }
 0x486   : > { %v8004_v63 = vmax.f32 %v8003_v58, %v7318_v59  ;;  %v6681_v0 = vpop.f32.mrf.mxu0  ;;  %v7001_v1 = vpop.f32.mrf.mxu1 }
 0x487   : > { %v8006_v9 = vmax.f32 %v6681_v0, %v7001_v1 }
 0x488   : > { %v8005_v5 = vmax.f32 %v8004_v63, %v7638_v60 }
 0x489   : > { %6720 = vmatmul.bf16.gmra.mxu0 %v9837_v61  ;;  %7040 = vmatmul.bf16.gmra.mxu1 %v9901_v62 }
 0x48a   : > { %v8213_v6 = vadd.f32 %v11417_v30, %v8005_v5  ;;  %7360 = vmatmul.bf16.gmra.mxu2 %v9965_v2  ;;  %7680 = vmatmul.bf16.gmra.mxu3 %v10029_v3  ;;  %v9840_v3 = vld [vmem:[%s11096_s24 + $0x1c0] sm:$0xff] }
 0x48c   : > { %v8341_v8 = vmax.f32 %v8213_v6, 0.0 }
 0x48d   : > { %v7321_v10 = vpop.f32.mrf.mxu2  ;;  %v7641_v11 = vpop.f32.mrf.mxu3 }
 0x48e   : > { %v10263_v12 = vpack.c.bf16 %v8341_v8, %v8340_v7  ;;  %v6683_v13 = vpop.f32.mrf.mxu0  ;;  %v7003_v14 = vpop.f32.mrf.mxu1  ;;  %v8007_v15 = vmax.f32 %v8006_v9, %v7321_v10  ;;  %v9968_v8 = vld [vmem:[%s11096_s24 + $0x5c0] sm:$0xff] }
 0x48f   : > { %v8009_v17 = vmax.f32 %v6683_v13, %v7003_v14  ;;  %v10032_v9 = vld [vmem:[%s11096_s24 + $0x7c0] sm:$0xff] }
 0x490   : > { %10403 = vst [vmem:[%s11150_s28 + $0x160] sm:$0xff] %v10263_v12   ;;  %v8008_v16 = vmax.f32 %v8007_v15, %v7641_v11 }
 0x492   : > { %v8214_v26 = vadd.f32 %v11417_v30, %v8008_v16 }
 0x494   : > { %v8342_v28 = vmax.f32 %v8214_v26, 0.0  ;;  %v9905_v26 = vld [vmem:[%s11096_s24 + $0x3c8] sm:$0xff] }
 0x495   : > { %v7323_v18 = vpop.f32.mrf.mxu2  ;;  %v7643_v19 = vpop.f32.mrf.mxu3 }
 0x496   : > { %v8010_v22 = vmax.f32 %v8009_v17, %v7323_v18  ;;  %v6686_v23 = vpop.f32.mrf.mxu0  ;;  %v7006_v35 = vpop.f32.mrf.mxu1 }
 0x497   : > { %v8012_v31 = vmax.f32 %v6686_v23, %v7006_v35 }
 0x498   : > { %v8011_v27 = vmax.f32 %v8010_v22, %v7643_v19 }
 0x499   : > { %6725 = vmatmul.bf16.gmra.mxu0 %v9838_v20  ;;  %7045 = vmatmul.bf16.gmra.mxu1 %v9902_v21 }
 0x49a   : > { %v8215_v53 = vadd.f32 %v11417_v30, %v8011_v27  ;;  %7365 = vmatmul.bf16.gmra.mxu2 %v9966_v24  ;;  %7685 = vmatmul.bf16.gmra.mxu3 %v10030_v25  ;;  %v9841_v25 = vld [vmem:[%s11096_s24 + $0x1c8] sm:$0xff] }
 0x49c   : > { %v8343_v29 = vmax.f32 %v8215_v53, 0.0 }
 0x49d   : > { %v7326_v32 = vpop.f32.mrf.mxu2  ;;  %v7646_v33 = vpop.f32.mrf.mxu3 }
 0x49e   : > { %v10268_v34 = vpack.c.bf16 %v8343_v29, %v8342_v28  ;;  %v6688_v36 = vpop.f32.mrf.mxu0  ;;  %v7008_v37 = vpop.f32.mrf.mxu1  ;;  %v8013_v38 = vmax.f32 %v8012_v31, %v7326_v32  ;;  %v9969_v29 = vld [vmem:[%s11096_s24 + $0x5c8] sm:$0xff] }
 0x49f   : > { %v8015_v40 = vmax.f32 %v6688_v36, %v7008_v37  ;;  %v10033_v31 = vld [vmem:[%s11096_s24 + $0x7c8] sm:$0xff] }
 0x4a0   : > { %10404 = vst [vmem:[%s11150_s28 + $0x168] sm:$0xff] %v10268_v34   ;;  %v8014_v39 = vmax.f32 %v8013_v38, %v7646_v33 }
 0x4a2   : > { %v8216_v50 = vadd.f32 %v11417_v30, %v8014_v39 }
 0x4a4   : > { %v8344_v54 = vmax.f32 %v8216_v50, 0.0  ;;  %v9906_v50 = vld [vmem:[%s11096_s24 + $0x3d0] sm:$0xff] }
 0x4a5   : > { %v7328_v41 = vpop.f32.mrf.mxu2  ;;  %v7648_v42 = vpop.f32.mrf.mxu3 }
 0x4a6   : > { %v8016_v45 = vmax.f32 %v8015_v40, %v7328_v41  ;;  %v6691_v46 = vpop.f32.mrf.mxu0  ;;  %v7011_v47 = vpop.f32.mrf.mxu1 }
 0x4a7   : > { %v8018_v56 = vmax.f32 %v6691_v46, %v7011_v47 }
 0x4a8   : > { %v8017_v51 = vmax.f32 %v8016_v45, %v7648_v42 }
 0x4a9   : > { %6730 = vmatmul.bf16.gmra.mxu0 %v9839_v43  ;;  %7050 = vmatmul.bf16.gmra.mxu1 %v9903_v44 }
 0x4aa   : > { %v8217_v52 = vadd.f32 %v11417_v30, %v8017_v51  ;;  %7370 = vmatmul.bf16.gmra.mxu2 %v9967_v48  ;;  %7690 = vmatmul.bf16.gmra.mxu3 %v10031_v49  ;;  %v9842_v49 = vld [vmem:[%s11096_s24 + $0x1d0] sm:$0xff] }
 0x4ac   : > { %v8345_v55 = vmax.f32 %v8217_v52, 0.0 }
 0x4ad   : > { %v7331_v57 = vpop.f32.mrf.mxu2  ;;  %v7651_v58 = vpop.f32.mrf.mxu3 }
 0x4ae   : > { %v10273_v59 = vpack.c.bf16 %v8345_v55, %v8344_v54  ;;  %v6693_v60 = vpop.f32.mrf.mxu0  ;;  %v7013_v61 = vpop.f32.mrf.mxu1  ;;  %v8019_v62 = vmax.f32 %v8018_v56, %v7331_v57  ;;  %v9970_v55 = vld [vmem:[%s11096_s24 + $0x5d0] sm:$0xff] }
 0x4af   : > { %v8021_v0 = vmax.f32 %v6693_v60, %v7013_v61  ;;  %v10034_v56 = vld [vmem:[%s11096_s24 + $0x7d0] sm:$0xff] }
 0x4b0   : > { %10405 = vst [vmem:[%s11150_s28 + $0x170] sm:$0xff] %v10273_v59   ;;  %v8020_v63 = vmax.f32 %v8019_v62, %v7651_v58 }
 0x4b2   : > { %v8218_v10 = vadd.f32 %v11417_v30, %v8020_v63 }
 0x4b4   : > { %v8346_v13 = vmax.f32 %v8218_v10, 0.0  ;;  %v9907_v10 = vld [vmem:[%s11096_s24 + $0x3d8] sm:$0xff] }
 0x4b5   : > { %v7333_v1 = vpop.f32.mrf.mxu2  ;;  %v7653_v2 = vpop.f32.mrf.mxu3 }
 0x4b6   : > { %v8022_v5 = vmax.f32 %v8021_v0, %v7333_v1  ;;  %v6696_v6 = vpop.f32.mrf.mxu0  ;;  %v7016_v7 = vpop.f32.mrf.mxu1 }
 0x4b7   : > { %v8024_v15 = vmax.f32 %v6696_v6, %v7016_v7 }
 0x4b8   : > { %v8023_v11 = vmax.f32 %v8022_v5, %v7653_v2 }
 0x4b9   : > { %6735 = vmatmul.bf16.gmra.mxu0 %v9840_v3  ;;  %7055 = vmatmul.bf16.gmra.mxu1 %v9904_v4 }
 0x4ba   : > { %v8219_v12 = vadd.f32 %v11417_v30, %v8023_v11  ;;  %7375 = vmatmul.bf16.gmra.mxu2 %v9968_v8  ;;  %7695 = vmatmul.bf16.gmra.mxu3 %v10032_v9  ;;  %v9843_v9 = vld [vmem:[%s11096_s24 + $0x1d8] sm:$0xff] }
 0x4bc   : > { %v8347_v14 = vmax.f32 %v8219_v12, 0.0 }
 0x4bd   : > { %v7336_v16 = vpop.f32.mrf.mxu2  ;;  %v7656_v17 = vpop.f32.mrf.mxu3 }
 0x4be   : > { %v10278_v18 = vpack.c.bf16 %v8347_v14, %v8346_v13  ;;  %v6698_v19 = vpop.f32.mrf.mxu0  ;;  %v7018_v20 = vpop.f32.mrf.mxu1  ;;  %v8025_v21 = vmax.f32 %v8024_v15, %v7336_v16  ;;  %v9971_v14 = vld [vmem:[%s11096_s24 + $0x5d8] sm:$0xff] }
 0x4bf   : > { %v8027_v23 = vmax.f32 %v6698_v19, %v7018_v20  ;;  %v10035_v15 = vld [vmem:[%s11096_s24 + $0x7d8] sm:$0xff] }
 0x4c0   : > { %10406 = vst [vmem:[%s11150_s28 + $0x178] sm:$0xff] %v10278_v18   ;;  %v8026_v22 = vmax.f32 %v8025_v21, %v7656_v17 }
 0x4c2   : > { %v8220_v32 = vadd.f32 %v11417_v30, %v8026_v22 }
 0x4c4   : > { %v8348_v36 = vmax.f32 %v8220_v32, 0.0  ;;  %v9908_v32 = vld [vmem:[%s11096_s24 + $0x3e0] sm:$0xff] }
 0x4c5   : > { %v7338_v35 = vpop.f32.mrf.mxu2  ;;  %v7658_v24 = vpop.f32.mrf.mxu3 }
 0x4c6   : > { %v8028_v27 = vmax.f32 %v8027_v23, %v7338_v35  ;;  %v6701_v53 = vpop.f32.mrf.mxu0  ;;  %v7021_v28 = vpop.f32.mrf.mxu1 }
 0x4c7   : > { %v8030_v38 = vmax.f32 %v6701_v53, %v7021_v28 }
 0x4c8   : > { %v8029_v33 = vmax.f32 %v8028_v27, %v7658_v24 }
 0x4c9   : > { %6740 = vmatmul.bf16.gmra.mxu0 %v9841_v25  ;;  %7060 = vmatmul.bf16.gmra.mxu1 %v9905_v26 }
 0x4ca   : > { %v8221_v34 = vadd.f32 %v11417_v30, %v8029_v33  ;;  %7380 = vmatmul.bf16.gmra.mxu2 %v9969_v29  ;;  %7700 = vmatmul.bf16.gmra.mxu3 %v10033_v31  ;;  %v9844_v31 = vld [vmem:[%s11096_s24 + $0x1e0] sm:$0xff] }
 0x4cc   : > { %v8349_v37 = vmax.f32 %v8221_v34, 0.0 }
 0x4cd   : > { %v7341_v39 = vpop.f32.mrf.mxu2  ;;  %v7661_v40 = vpop.f32.mrf.mxu3 }
 0x4ce   : > { %v10283_v41 = vpack.c.bf16 %v8349_v37, %v8348_v36  ;;  %v6703_v42 = vpop.f32.mrf.mxu0  ;;  %v7023_v43 = vpop.f32.mrf.mxu1  ;;  %v8031_v44 = vmax.f32 %v8030_v38, %v7341_v39  ;;  %v9972_v37 = vld [vmem:[%s11096_s24 + $0x5e0] sm:$0xff] }
 0x4cf   : > { %v8033_v46 = vmax.f32 %v6703_v42, %v7023_v43  ;;  %v10036_v38 = vld [vmem:[%s11096_s24 + $0x7e0] sm:$0xff] }
 0x4d0   : > { %10407 = vst [vmem:[%s11150_s28 + $0x180] sm:$0xff] %v10283_v41   ;;  %v8032_v45 = vmax.f32 %v8031_v44, %v7661_v40 }
 0x4d2   : > { %v8222_v57 = vadd.f32 %v11417_v30, %v8032_v45 }
 0x4d4   : > { %v8350_v60 = vmax.f32 %v8222_v57, 0.0  ;;  %v9909_v57 = vld [vmem:[%s11096_s24 + $0x3e8] sm:$0xff] }
 0x4d5   : > { %v7343_v47 = vpop.f32.mrf.mxu2  ;;  %v7663_v48 = vpop.f32.mrf.mxu3 }
 0x4d6   : > { %v8034_v51 = vmax.f32 %v8033_v46, %v7343_v47  ;;  %v6706_v52 = vpop.f32.mrf.mxu0  ;;  %v7026_v54 = vpop.f32.mrf.mxu1 }
 0x4d7   : > { %v8036_v62 = vmax.f32 %v6706_v52, %v7026_v54 }
 0x4d8   : > { %v8035_v58 = vmax.f32 %v8034_v51, %v7663_v48 }
 0x4d9   : > { %6745 = vmatmul.bf16.gmra.mxu0 %v9842_v49  ;;  %7065 = vmatmul.bf16.gmra.mxu1 %v9906_v50 }
 0x4da   : > { %v8223_v59 = vadd.f32 %v11417_v30, %v8035_v58  ;;  %7385 = vmatmul.bf16.gmra.mxu2 %v9970_v55  ;;  %7705 = vmatmul.bf16.gmra.mxu3 %v10034_v56  ;;  %v9845_v56 = vld [vmem:[%s11096_s24 + $0x1e8] sm:$0xff] }
 0x4dc   : > { %v8351_v61 = vmax.f32 %v8223_v59, 0.0 }
 0x4dd   : > { %v7346_v63 = vpop.f32.mrf.mxu2  ;;  %v7666_v0 = vpop.f32.mrf.mxu3 }
 0x4de   : > { %v10288_v1 = vpack.c.bf16 %v8351_v61, %v8350_v60  ;;  %v6708_v2 = vpop.f32.mrf.mxu0  ;;  %v7028_v3 = vpop.f32.mrf.mxu1  ;;  %v8037_v4 = vmax.f32 %v8036_v62, %v7346_v63  ;;  %v9973_v61 = vld [vmem:[%s11096_s24 + $0x5e8] sm:$0xff] }
 0x4df   : > { %v8039_v6 = vmax.f32 %v6708_v2, %v7028_v3  ;;  %v10037_v62 = vld [vmem:[%s11096_s24 + $0x7e8] sm:$0xff] }
 0x4e0   : > { %10408 = vst [vmem:[%s11150_s28 + $0x188] sm:$0xff] %v10288_v1   ;;  %v8038_v5 = vmax.f32 %v8037_v4, %v7666_v0 }
 0x4e2   : > { %v8224_v16 = vadd.f32 %v11417_v30, %v8038_v5 }
 0x4e4   : > { %v8352_v19 = vmax.f32 %v8224_v16, 0.0  ;;  %v9910_v16 = vld [vmem:[%s11096_s24 + $0x3f0] sm:$0xff] }
 0x4e5   : > { %v7348_v7 = vpop.f32.mrf.mxu2  ;;  %v7668_v8 = vpop.f32.mrf.mxu3 }
 0x4e6   : > { %v8040_v11 = vmax.f32 %v8039_v6, %v7348_v7  ;;  %v6711_v12 = vpop.f32.mrf.mxu0  ;;  %v7031_v13 = vpop.f32.mrf.mxu1 }
 0x4e7   : > { %v8042_v21 = vmax.f32 %v6711_v12, %v7031_v13 }
 0x4e8   : > { %v8041_v17 = vmax.f32 %v8040_v11, %v7668_v8 }
 0x4e9   : > { %6750 = vmatmul.bf16.gmra.mxu0 %v9843_v9  ;;  %7070 = vmatmul.bf16.gmra.mxu1 %v9907_v10 }
 0x4ea   : > { %v8225_v18 = vadd.f32 %v11417_v30, %v8041_v17  ;;  %7390 = vmatmul.bf16.gmra.mxu2 %v9971_v14  ;;  %7710 = vmatmul.bf16.gmra.mxu3 %v10035_v15  ;;  %v9846_v15 = vld [vmem:[%s11096_s24 + $0x1f0] sm:$0xff] }
 0x4ec   : > { %v8353_v20 = vmax.f32 %v8225_v18, 0.0 }
 0x4ed   : > { %v7351_v22 = vpop.f32.mrf.mxu2  ;;  %v7671_v23 = vpop.f32.mrf.mxu3 }
 0x4ee   : > { %v10293_v35 = vpack.c.bf16 %v8353_v20, %v8352_v19  ;;  %v6713_v24 = vpop.f32.mrf.mxu0  ;;  %v7033_v25 = vpop.f32.mrf.mxu1  ;;  %v8043_v26 = vmax.f32 %v8042_v21, %v7351_v22  ;;  %v9974_v20 = vld [vmem:[%s11096_s24 + $0x5f0] sm:$0xff] }
 0x4ef   : > { %v8045_v53 = vmax.f32 %v6713_v24, %v7033_v25  ;;  %v10038_v21 = vld [vmem:[%s11096_s24 + $0x7f0] sm:$0xff] }
 0x4f0   : > { %10409 = vst [vmem:[%s11150_s28 + $0x190] sm:$0xff] %v10293_v35   ;;  %v8044_v27 = vmax.f32 %v8043_v26, %v7671_v23 }
 0x4f2   : > { %v8226_v39 = vadd.f32 %v11417_v30, %v8044_v27 }
 0x4f4   : > { %v8354_v42 = vmax.f32 %v8226_v39, 0.0  ;;  %v9911_v39 = vld [vmem:[%s11096_s24 + $0x3f8] sm:$0xff] }
 0x4f5   : > { %v7353_v28 = vpop.f32.mrf.mxu2  ;;  %v7673_v29 = vpop.f32.mrf.mxu3 }
 0x4f6   : > { %v8046_v33 = vmax.f32 %v8045_v53, %v7353_v28  ;;  %v6716_v34 = vpop.f32.mrf.mxu0  ;;  %v7036_v36 = vpop.f32.mrf.mxu1 }
 0x4f7   : > { %v8048_v44 = vmax.f32 %v6716_v34, %v7036_v36 }
 0x4f8   : > { %v8047_v40 = vmax.f32 %v8046_v33, %v7673_v29 }
 0x4f9   : > { %6755 = vmatmul.bf16.gmra.mxu0 %v9844_v31  ;;  %7075 = vmatmul.bf16.gmra.mxu1 %v9908_v32 }
 0x4fa   : > { %v8227_v41 = vadd.f32 %v11417_v30, %v8047_v40  ;;  %7395 = vmatmul.bf16.gmra.mxu2 %v9972_v37  ;;  %7715 = vmatmul.bf16.gmra.mxu3 %v10036_v38  ;;  %v9847_v38 = vld [vmem:[%s11096_s24 + $0x1f8] sm:$0xff] }
 0x4fc   : > { %v8355_v43 = vmax.f32 %v8227_v41, 0.0 }
 0x4fd   : > { %v7356_v45 = vpop.f32.mrf.mxu2  ;;  %v7676_v46 = vpop.f32.mrf.mxu3 }
 0x4fe   : > { %v10298_v47 = vpack.c.bf16 %v8355_v43, %v8354_v42  ;;  %v6718_v48 = vpop.f32.mrf.mxu0  ;;  %v7038_v49 = vpop.f32.mrf.mxu1  ;;  %v8049_v50 = vmax.f32 %v8048_v44, %v7356_v45  ;;  %v9975_v43 = vld [vmem:[%s11096_s24 + $0x5f8] sm:$0xff] }
 0x4ff   : > { %v8051_v52 = vmax.f32 %v6718_v48, %v7038_v49  ;;  %v10039_v44 = vld [vmem:[%s11096_s24 + $0x7f8] sm:$0xff] }
 0x500   : > { %10410 = vst [vmem:[%s11150_s28 + $0x198] sm:$0xff] %v10298_v47   ;;  %v8050_v51 = vmax.f32 %v8049_v50, %v7676_v46 }
 0x502   : > { %v8228_v63 = vadd.f32 %v11417_v30, %v8050_v51 }
 0x504   : > { %v8356_v2 = vmax.f32 %v8228_v63, 0.0 }
 0x505   : > { %v7358_v54 = vpop.f32.mrf.mxu2  ;;  %v7678_v55 = vpop.f32.mrf.mxu3 }
 0x506   : > { %v8052_v58 = vmax.f32 %v8051_v52, %v7358_v54  ;;  %v6721_v59 = vpop.f32.mrf.mxu0  ;;  %v7041_v60 = vpop.f32.mrf.mxu1 }
 0x507   : > { %v8054_v4 = vmax.f32 %v6721_v59, %v7041_v60 }
 0x508   : > { %v8053_v0 = vmax.f32 %v8052_v58, %v7678_v55 }
 0x509   : > { %6760 = vmatmul.bf16.gmra.mxu0 %v9845_v56  ;;  %7080 = vmatmul.bf16.gmra.mxu1 %v9909_v57 }
 0x50a   : > { %v8229_v1 = vadd.f32 %v11417_v30, %v8053_v0  ;;  %7400 = vmatmul.bf16.gmra.mxu2 %v9973_v61  ;;  %7720 = vmatmul.bf16.gmra.mxu3 %v10037_v62 }
 0x50c   : > { %v8357_v3 = vmax.f32 %v8229_v1, 0.0 }
 0x50d   : > { %v7361_v5 = vpop.f32.mrf.mxu2  ;;  %v7681_v6 = vpop.f32.mrf.mxu3 }
 0x50e   : > { %v10303_v7 = vpack.c.bf16 %v8357_v3, %v8356_v2  ;;  %v6723_v8 = vpop.f32.mrf.mxu0  ;;  %v7043_v9 = vpop.f32.mrf.mxu1  ;;  %v8055_v10 = vmax.f32 %v8054_v4, %v7361_v5 }
 0x50f   : > { %v8057_v12 = vmax.f32 %v6723_v8, %v7043_v9 }
 0x510   : > { %10411 = vst [vmem:[%s11150_s28 + $0x1a0] sm:$0xff] %v10303_v7   ;;  %v8056_v11 = vmax.f32 %v8055_v10, %v7681_v6 }
 0x512   : > { %v8230_v22 = vadd.f32 %v11417_v30, %v8056_v11 }
 0x514   : > { %v8358_v24 = vmax.f32 %v8230_v22, 0.0 }
 0x515   : > { %v7363_v13 = vpop.f32.mrf.mxu2  ;;  %v7683_v14 = vpop.f32.mrf.mxu3 }
 0x516   : > { %v8058_v17 = vmax.f32 %v8057_v12, %v7363_v13  ;;  %v6726_v18 = vpop.f32.mrf.mxu0  ;;  %v7046_v19 = vpop.f32.mrf.mxu1 }
 0x517   : > { %v8060_v26 = vmax.f32 %v6726_v18, %v7046_v19 }
 0x518   : > { %v8059_v23 = vmax.f32 %v8058_v17, %v7683_v14 }
 0x519   : > { %6765 = vmatmul.bf16.gmra.mxu0 %v9846_v15  ;;  %7085 = vmatmul.bf16.gmra.mxu1 %v9910_v16 }
 0x51a   : > { %v8231_v35 = vadd.f32 %v11417_v30, %v8059_v23  ;;  %7405 = vmatmul.bf16.gmra.mxu2 %v9974_v20  ;;  %7725 = vmatmul.bf16.gmra.mxu3 %v10038_v21 }
 0x51c   : > { %v8359_v25 = vmax.f32 %v8231_v35, 0.0 }
 0x51d   : > { %v7366_v27 = vpop.f32.mrf.mxu2  ;;  %v7686_v53 = vpop.f32.mrf.mxu3 }
 0x51e   : > { %v10308_v28 = vpack.c.bf16 %v8359_v25, %v8358_v24  ;;  %v6728_v29 = vpop.f32.mrf.mxu0  ;;  %v7048_v31 = vpop.f32.mrf.mxu1  ;;  %v8061_v32 = vmax.f32 %v8060_v26, %v7366_v27 }
 0x51f   : > { %v8063_v34 = vmax.f32 %v6728_v29, %v7048_v31 }
 0x520   : > { %10412 = vst [vmem:[%s11150_s28 + $0x1a8] sm:$0xff] %v10308_v28   ;;  %v8062_v33 = vmax.f32 %v8061_v32, %v7686_v53 }
 0x522   : > { %v8232_v45 = vadd.f32 %v11417_v30, %v8062_v33 }
 0x524   : > { %v8360_v48 = vmax.f32 %v8232_v45, 0.0 }
 0x525   : > { %v7368_v36 = vpop.f32.mrf.mxu2  ;;  %v7688_v37 = vpop.f32.mrf.mxu3 }
 0x526   : > { %v8064_v40 = vmax.f32 %v8063_v34, %v7368_v36  ;;  %v6731_v41 = vpop.f32.mrf.mxu0  ;;  %v7051_v42 = vpop.f32.mrf.mxu1 }
 0x527   : > { %v8066_v50 = vmax.f32 %v6731_v41, %v7051_v42 }
 0x528   : > { %v8065_v46 = vmax.f32 %v8064_v40, %v7688_v37 }
 0x529   : > { %6770 = vmatmul.bf16.gmra.mxu0 %v9847_v38  ;;  %7090 = vmatmul.bf16.gmra.mxu1 %v9911_v39 }
 0x52a   : > { %v8233_v47 = vadd.f32 %v11417_v30, %v8065_v46  ;;  %7410 = vmatmul.bf16.gmra.mxu2 %v9975_v43  ;;  %7730 = vmatmul.bf16.gmra.mxu3 %v10039_v44 }
 0x52c   : > { %v8361_v49 = vmax.f32 %v8233_v47, 0.0 }
 0x52d   : > { %v7371_v51 = vpop.f32.mrf.mxu2  ;;  %v7691_v52 = vpop.f32.mrf.mxu3 }
 0x52e   : > { %v10313_v54 = vpack.c.bf16 %v8361_v49, %v8360_v48  ;;  %v6733_v55 = vpop.f32.mrf.mxu0  ;;  %v7053_v56 = vpop.f32.mrf.mxu1  ;;  %v8067_v57 = vmax.f32 %v8066_v50, %v7371_v51 }
 0x52f   : > { %v8069_v59 = vmax.f32 %v6733_v55, %v7053_v56 }
 0x530   : > { %10413 = vst [vmem:[%s11150_s28 + $0x1b0] sm:$0xff] %v10313_v54   ;;  %v8068_v58 = vmax.f32 %v8067_v57, %v7691_v52 }
 0x532   : > { %v8234_v1 = vadd.f32 %v11417_v30, %v8068_v58 }
 0x534   : > { %v8362_v4 = vmax.f32 %v8234_v1, 0.0 }
 0x535   : > { %v7373_v60 = vpop.f32.mrf.mxu2  ;;  %v7693_v61 = vpop.f32.mrf.mxu3 }
 0x536   : > { %v8070_v62 = vmax.f32 %v8069_v59, %v7373_v60  ;;  %v6736_v63 = vpop.f32.mrf.mxu0  ;;  %v7056_v0 = vpop.f32.mrf.mxu1 }
 0x537   : > { %v8072_v6 = vmax.f32 %v6736_v63, %v7056_v0 }
 0x538   : > { %v8071_v2 = vmax.f32 %v8070_v62, %v7693_v61 }
 0x53a   : > { %v8235_v3 = vadd.f32 %v11417_v30, %v8071_v2  ;;  %v11547_v30 = vld [vmem:[%s11585_s2] ss:$0 sm:$0xff] }
 0x53c   : > { %v8363_v5 = vmax.f32 %v8235_v3, 0.0 }
 0x53d   : > { %v7376_v7 = vpop.f32.mrf.mxu2  ;;  %v7696_v8 = vpop.f32.mrf.mxu3 }
 0x53e   : > { %v10318_v9 = vpack.c.bf16 %v8363_v5, %v8362_v4  ;;  %v6738_v10 = vpop.f32.mrf.mxu0  ;;  %v7058_v11 = vpop.f32.mrf.mxu1  ;;  %v8073_v12 = vmax.f32 %v8072_v6, %v7376_v7 }
 0x53f   : > { %v8075_v14 = vmax.f32 %v6738_v10, %v7058_v11 }
 0x540   : > { %10414 = vst [vmem:[%s11150_s28 + $0x1b8] sm:$0xff] %v10318_v9   ;;  %v8074_v13 = vmax.f32 %v8073_v12, %v7696_v8 }
 0x542   : > { %v8236_v20 = vadd.f32 %v11547_v30, %v8074_v13 }
 0x544   : > { %v8364_v23 = vmax.f32 %v8236_v20, 0.0 }
 0x545   : > { %v7378_v15 = vpop.f32.mrf.mxu2  ;;  %v7698_v16 = vpop.f32.mrf.mxu3 }
 0x546   : > { %v8076_v17 = vmax.f32 %v8075_v14, %v7378_v15  ;;  %v6741_v18 = vpop.f32.mrf.mxu0  ;;  %v7061_v19 = vpop.f32.mrf.mxu1 }
 0x547   : > { %v8078_v24 = vmax.f32 %v6741_v18, %v7061_v19 }
 0x548   : > { %v8077_v21 = vmax.f32 %v8076_v17, %v7698_v16 }
 0x54a   : > { %v8237_v22 = vadd.f32 %v11547_v30, %v8077_v21 }
 0x54c   : > { %v8365_v35 = vmax.f32 %v8237_v22, 0.0 }
 0x54d   : > { %v7381_v25 = vpop.f32.mrf.mxu2  ;;  %v7701_v26 = vpop.f32.mrf.mxu3 }
 0x54e   : > { %v10323_v27 = vpack.c.bf16 %v8365_v35, %v8364_v23  ;;  %v6743_v53 = vpop.f32.mrf.mxu0  ;;  %v7063_v28 = vpop.f32.mrf.mxu1  ;;  %v8079_v29 = vmax.f32 %v8078_v24, %v7381_v25 }
 0x54f   : > { %v8081_v32 = vmax.f32 %v6743_v53, %v7063_v28 }
 0x550   : > { %10415 = vst [vmem:[%s11150_s28 + $0x1c0] sm:$0xff] %v10323_v27   ;;  %v8080_v31 = vmax.f32 %v8079_v29, %v7701_v26 }
 0x552   : > { %v8238_v39 = vadd.f32 %v11547_v30, %v8080_v31 }
 0x554   : > { %v8366_v42 = vmax.f32 %v8238_v39, 0.0 }
 0x555   : > { %v7383_v33 = vpop.f32.mrf.mxu2  ;;  %v7703_v34 = vpop.f32.mrf.mxu3 }
 0x556   : > { %v8082_v36 = vmax.f32 %v8081_v32, %v7383_v33  ;;  %v6746_v37 = vpop.f32.mrf.mxu0  ;;  %v7066_v38 = vpop.f32.mrf.mxu1 }
 0x557   : > { %v8084_v44 = vmax.f32 %v6746_v37, %v7066_v38 }
 0x558   : > { %v8083_v40 = vmax.f32 %v8082_v36, %v7703_v34 }
 0x55a   : > { %v8239_v41 = vadd.f32 %v11547_v30, %v8083_v40 }
 0x55c   : > { %v8367_v43 = vmax.f32 %v8239_v41, 0.0 }
 0x55d   : > { %v7386_v45 = vpop.f32.mrf.mxu2  ;;  %v7706_v46 = vpop.f32.mrf.mxu3 }
 0x55e   : > { %v10328_v47 = vpack.c.bf16 %v8367_v43, %v8366_v42  ;;  %v6748_v48 = vpop.f32.mrf.mxu0  ;;  %v7068_v49 = vpop.f32.mrf.mxu1  ;;  %v8085_v50 = vmax.f32 %v8084_v44, %v7386_v45 }
 0x55f   : > { %v8087_v52 = vmax.f32 %v6748_v48, %v7068_v49 }
 0x560   : > { %10416 = vst [vmem:[%s11150_s28 + $0x1c8] sm:$0xff] %v10328_v47   ;;  %v8086_v51 = vmax.f32 %v8085_v50, %v7706_v46 }
 0x562   : > { %v8240_v59 = vadd.f32 %v11547_v30, %v8086_v51 }
 0x564   : > { %v8368_v62 = vmax.f32 %v8240_v59, 0.0 }
 0x565   : > { %v7388_v54 = vpop.f32.mrf.mxu2  ;;  %v7708_v55 = vpop.f32.mrf.mxu3 }
 0x566   : > { %v8088_v56 = vmax.f32 %v8087_v52, %v7388_v54  ;;  %v6751_v57 = vpop.f32.mrf.mxu0  ;;  %v7071_v58 = vpop.f32.mrf.mxu1 }
 0x567   : > { %v8090_v0 = vmax.f32 %v6751_v57, %v7071_v58 }
 0x568   : > { %v8089_v60 = vmax.f32 %v8088_v56, %v7708_v55 }
 0x56a   : > { %v8241_v61 = vadd.f32 %v11547_v30, %v8089_v60 }
 0x56c   : > { %v8369_v63 = vmax.f32 %v8241_v61, 0.0 }
 0x56d   : > { %v7391_v1 = vpop.f32.mrf.mxu2  ;;  %v7711_v2 = vpop.f32.mrf.mxu3 }
 0x56e   : > { %v10333_v3 = vpack.c.bf16 %v8369_v63, %v8368_v62  ;;  %v6753_v4 = vpop.f32.mrf.mxu0  ;;  %v7073_v5 = vpop.f32.mrf.mxu1  ;;  %v8091_v6 = vmax.f32 %v8090_v0, %v7391_v1 }
 0x56f   : > { %v8093_v8 = vmax.f32 %v6753_v4, %v7073_v5 }
 0x570   : > { %10417 = vst [vmem:[%s11150_s28 + $0x1d0] sm:$0xff] %v10333_v3   ;;  %v8092_v7 = vmax.f32 %v8091_v6, %v7711_v2 }
 0x572   : > { %v8242_v14 = vadd.f32 %v11547_v30, %v8092_v7 }
 0x574   : > { %v8370_v17 = vmax.f32 %v8242_v14, 0.0 }
 0x575   : > { %v7393_v9 = vpop.f32.mrf.mxu2  ;;  %v7713_v10 = vpop.f32.mrf.mxu3 }
 0x576   : > { %v8094_v11 = vmax.f32 %v8093_v8, %v7393_v9  ;;  %v6756_v12 = vpop.f32.mrf.mxu0  ;;  %v7076_v13 = vpop.f32.mrf.mxu1 }
 0x577   : > { %v8096_v19 = vmax.f32 %v6756_v12, %v7076_v13 }
 0x578   : > { %v8095_v15 = vmax.f32 %v8094_v11, %v7713_v10 }
 0x57a   : > { %v8243_v16 = vadd.f32 %v11547_v30, %v8095_v15 }
 0x57c   : > { %v8371_v18 = vmax.f32 %v8243_v16, 0.0 }
 0x57d   : > { %v7396_v20 = vpop.f32.mrf.mxu2  ;;  %v7716_v21 = vpop.f32.mrf.mxu3 }
 0x57e   : > { %v10338_v22 = vpack.c.bf16 %v8371_v18, %v8370_v17  ;;  %v6758_v23 = vpop.f32.mrf.mxu0  ;;  %v7078_v35 = vpop.f32.mrf.mxu1  ;;  %v8097_v24 = vmax.f32 %v8096_v19, %v7396_v20 }
 0x57f   : > { %v8099_v26 = vmax.f32 %v6758_v23, %v7078_v35 }
 0x580   : > { %10418 = vst [vmem:[%s11150_s28 + $0x1d8] sm:$0xff] %v10338_v22   ;;  %v8098_v25 = vmax.f32 %v8097_v24, %v7716_v21 }
 0x582   : > { %v8244_v32 = vadd.f32 %v11547_v30, %v8098_v25 }
 0x584   : > { %v8372_v36 = vmax.f32 %v8244_v32, 0.0 }
 0x585   : > { %v7398_v27 = vpop.f32.mrf.mxu2  ;;  %v7718_v53 = vpop.f32.mrf.mxu3 }
 0x586   : > { %v8100_v28 = vmax.f32 %v8099_v26, %v7398_v27  ;;  %v6761_v29 = vpop.f32.mrf.mxu0  ;;  %v7081_v31 = vpop.f32.mrf.mxu1 }
 0x587   : > { %v8102_v38 = vmax.f32 %v6761_v29, %v7081_v31 }
 0x588   : > { %v8101_v33 = vmax.f32 %v8100_v28, %v7718_v53 }
 0x58a   : > { %v8245_v34 = vadd.f32 %v11547_v30, %v8101_v33 }
 0x58c   : > { %v8373_v37 = vmax.f32 %v8245_v34, 0.0 }
 0x58d   : > { %v7401_v39 = vpop.f32.mrf.mxu2  ;;  %v7721_v40 = vpop.f32.mrf.mxu3 }
 0x58e   : > { %v10343_v41 = vpack.c.bf16 %v8373_v37, %v8372_v36  ;;  %v6763_v42 = vpop.f32.mrf.mxu0  ;;  %v7083_v43 = vpop.f32.mrf.mxu1  ;;  %v8103_v44 = vmax.f32 %v8102_v38, %v7401_v39 }
 0x58f   : > { %v8105_v46 = vmax.f32 %v6763_v42, %v7083_v43 }
 0x590   : > { %10419 = vst [vmem:[%s11150_s28 + $0x1e0] sm:$0xff] %v10343_v41   ;;  %v8104_v45 = vmax.f32 %v8103_v44, %v7721_v40 }
 0x592   : > { %v8246_v52 = vadd.f32 %v11547_v30, %v8104_v45 }
 0x594   : > { %v8374_v56 = vmax.f32 %v8246_v52, 0.0 }
 0x595   : > { %v7403_v47 = vpop.f32.mrf.mxu2  ;;  %v7723_v48 = vpop.f32.mrf.mxu3 }
 0x596   : > { %v8106_v49 = vmax.f32 %v8105_v46, %v7403_v47  ;;  %v6766_v50 = vpop.f32.mrf.mxu0  ;;  %v7086_v51 = vpop.f32.mrf.mxu1 }
 0x597   : > { %v8108_v58 = vmax.f32 %v6766_v50, %v7086_v51 }
 0x598   : > { %v8107_v54 = vmax.f32 %v8106_v49, %v7723_v48 }
 0x59a   : > { %v8247_v55 = vadd.f32 %v11547_v30, %v8107_v54 }
 0x59c   : > { %v8375_v57 = vmax.f32 %v8247_v55, 0.0 }
 0x59d   : > { %v7406_v59 = vpop.f32.mrf.mxu2  ;;  %v7726_v60 = vpop.f32.mrf.mxu3 }
 0x59e   : > { %v10348_v61 = vpack.c.bf16 %v8375_v57, %v8374_v56  ;;  %v6768_v62 = vpop.f32.mrf.mxu0  ;;  %v7088_v63 = vpop.f32.mrf.mxu1  ;;  %v8109_v0 = vmax.f32 %v8108_v58, %v7406_v59 }
 0x59f   : > { %v8111_v2 = vmax.f32 %v6768_v62, %v7088_v63 }
 0x5a0   : > { %10420 = vst [vmem:[%s11150_s28 + $0x1e8] sm:$0xff] %v10348_v61   ;;  %v8110_v1 = vmax.f32 %v8109_v0, %v7726_v60 }
 0x5a2   : > { %v8248_v8 = vadd.f32 %v11547_v30, %v8110_v1 }
 0x5a4   : > { %v8376_v11 = vmax.f32 %v8248_v8, 0.0 }
 0x5a5   : > { %v7408_v3 = vpop.f32.mrf.mxu2  ;;  %v7728_v4 = vpop.f32.mrf.mxu3 }
 0x5a6   : > { %v8112_v5 = vmax.f32 %v8111_v2, %v7408_v3  ;;  %v6771_v6 = vpop.f32.mrf.mxu0  ;;  %v7091_v7 = vpop.f32.mrf.mxu1 }
 0x5a7   : > { %v8114_v13 = vmax.f32 %v6771_v6, %v7091_v7 }
 0x5a8   : > { %v8113_v9 = vmax.f32 %v8112_v5, %v7728_v4 }
 0x5aa   : > { %v8249_v10 = vadd.f32 %v11547_v30, %v8113_v9 }
 0x5ac   : > { %v8377_v12 = vmax.f32 %v8249_v10, 0.0 }
 0x5ad   : > { %v7411_v14 = vpop.f32.mrf.mxu2  ;;  %v7731_v15 = vpop.f32.mrf.mxu3 }
 0x5ae   : > { %v10353_v16 = vpack.c.bf16 %v8377_v12, %v8376_v11  ;;  %v8115_v17 = vmax.f32 %v8114_v13, %v7411_v14  ;;  %v6773_v18 = vpop.f32.mrf.mxu0  ;;  %v7093_v19 = vpop.f32.mrf.mxu1 }
 0x5af   : > { %v8117_v21 = vmax.f32 %v6773_v18, %v7093_v19 }
 0x5b0   : > { %10421 = vst [vmem:[%s11150_s28 + $0x1f0] sm:$0xff] %v10353_v16   ;;  %v8116_v20 = vmax.f32 %v8115_v17, %v7731_v15 }
 0x5b2   : > { %v8250_v24 = vadd.f32 %v11547_v30, %v8116_v20 }
 0x5b4   : > { %v8378_v27 = vmax.f32 %v8250_v24, 0.0 }
 0x5b5   : > { %v7413_v22 = vpop.f32.mrf.mxu2  ;;  %v7733_v35 = vpop.f32.mrf.mxu3 }
 0x5b6   : > { %v8118_v23 = vmax.f32 %v8117_v21, %v7413_v22 }
 0x5b8   : > { %v8119_v25 = vmax.f32 %v8118_v23, %v7733_v35 }
 0x5ba   : > { %v8251_v26 = vadd.f32 %v11547_v30, %v8119_v25 }
 0x5bc   : > { %v8379_v53 = vmax.f32 %v8251_v26, 0.0 }
 0x5be   : > { %v10358_v28 = vpack.c.bf16 %v8379_v53, %v8378_v27 }
 0x5c0   : > { %10422 = vst [vmem:[%s11150_s28 + $0x1f8] sm:$0xff] %v10358_v28  }
 0x5c1 PF: > { %p10_p9 = scmp.ge.s32.totalorder %s10536_s16, 4   ;;  %s11587_s12 = smov %s10493_s13 }
 0x5c2   : > { %s11588_s13 = smov %s10545_s19  ;;  %s11589_s14 = smov %s10536_s16 }
 0x5c3   :  { %12 = sbr.rel (!%p10_p9) target bundleno = 2 (0x2), region = 123 }

// kernel: cnn_backbone.4
= control target key start
LH: loop header
LB: loop body
LE: loop exit
PB: predicated region body
PF: predicated region fallthrough
CT: control target
= control target key end

     0   :  { %s4924_s1 = inlined_call_operand.vmem [shape: bf16[640,128], index: 1, kind: input, shape index: {}]   ;;  %s4925_s0 = inlined_call_operand.vmem [shape: bf16[4,128,640], index: 0, kind: input, shape index: {}]   ;;  %s4926_s2 = inlined_call_operand.vmem [shape: f32[1,128], index: 2, kind: input, shape index: {}]   ;;  %s4927_s3 = inlined_call_operand.vmem [shape: bf16[128,128], index: 3, kind: output, shape index: {}]  }
   0x1   :  { %v3130_v0 = vld [vmem:[%s4924_s1 + $0x38] sm:$0xff]  ;;  %v3129_v1 = vld [vmem:[%s4924_s1 + $0x30] sm:$0xff]  ;;  %v3128_v2 = vld [vmem:[%s4924_s1 + $0x28] sm:$0xff] }
   0x2   :  { %3370 = vmatpush.bf16.msra.mxu1 %v3130_v0  ;;  %3371 = vmatpush.bf16.msra.mxu2 %v3130_v0  ;;  %v3127_v3 = vld [vmem:[%s4924_s1 + $0x20] sm:$0xff]  ;;  %v3126_v4 = vld [vmem:[%s4924_s1 + $0x18] sm:$0xff]  ;;  %v3125_v5 = vld [vmem:[%s4924_s1 + $0x10] sm:$0xff] }
   0x3   :  { %3372 = vmatpush.bf16.msra.mxu3 %v3130_v0  ;;  %1358 = vmatpush.bf16.msra.mxu0 %v3130_v0  ;;  %v3124_v6 = vld [vmem:[%s4924_s1 + $0x8] sm:$0xff]  ;;  %v3123_v7 = vld [vmem:[%s4924_s1] sm:$0xff]  ;;  %v3205_v9 = vld [vmem:[%s4925_s0 + $0x150] sm:$0xf0] }
   0x4   :  { %v2485_v8 = vld [vmem:[%s4925_s0 + $0x140] sm:$0xf]  ;;  %v3245_v11 = vld [vmem:[%s4925_s0 + $0x290] sm:$0xf0]  ;;  %v3146_v16 = vld [vmem:[%s4924_s1 + $0xb8] sm:$0xff] }
   0x5   :  { %v2645_v10 = vld [vmem:[%s4925_s0 + $0x280] sm:$0xf]  ;;  %v3285_v13 = vld [vmem:[%s4925_s0 + $0x3d0] sm:$0xf0]  ;;  %v3154_v17 = vld [vmem:[%s4924_s1 + $0xf8] sm:$0xff]  ;;  %v2486_v18 = vor.u32 %v3205_v9, %v2485_v8 }
   0x6   :  { %3373 = vmatpush.bf16.msra.mxu1 %v3129_v1  ;;  %3374 = vmatpush.bf16.msra.mxu2 %v3129_v1  ;;  %v2805_v12 = vld [vmem:[%s4925_s0 + $0x3c0] sm:$0xf]  ;;  %v3165_v15 = vld [vmem:[%s4925_s0 + $0x10] sm:$0xf0]  ;;  %v2646_v19 = vor.u32 %v3245_v11, %v2645_v10  ;;  %v3138_v22 = vld [vmem:[%s4924_s1 + $0x78] sm:$0xff] }
   0x7   :  { %3375 = vmatpush.bf16.msra.mxu3 %v3129_v1  ;;  %1359 = vmatpush.bf16.msra.mxu0 %v3129_v1  ;;  %v2325_v14 = vld [vmem:[%s4925_s0] sm:$0xf]  ;;  %v2806_v20 = vor.u32 %v3285_v13, %v2805_v12  ;;  %v3162_v23 = vld [vmem:[%s4924_s1 + $0x138] sm:$0xff]  ;;  %v3145_v24 = vld [vmem:[%s4924_s1 + $0xb0] sm:$0xff] }
   0x8   :  { %v2326_v21 = vor.u32 %v3165_v15, %v2325_v14  ;;  %v3153_v25 = vld [vmem:[%s4924_s1 + $0xf0] sm:$0xff]  ;;  %v3144_v28 = vld [vmem:[%s4924_s1 + $0xa8] sm:$0xff]  ;;  %v3210_v33 = vld [vmem:[%s4925_s0 + $0x178] sm:$0xf0] }
   0x9   :  { %v3137_v26 = vld [vmem:[%s4924_s1 + $0x70] sm:$0xff]  ;;  %v3152_v29 = vld [vmem:[%s4924_s1 + $0xe8] sm:$0xff]  ;;  %v3250_v35 = vld [vmem:[%s4925_s0 + $0x2b8] sm:$0xf0] }
   0xa   :  { %3376 = vmatpush.bf16.msra.mxu1 %v3128_v2  ;;  %3377 = vmatpush.bf16.msra.mxu2 %v3128_v2  ;;  %v3161_v27 = vld [vmem:[%s4924_s1 + $0x130] sm:$0xff]  ;;  %v3136_v30 = vld [vmem:[%s4924_s1 + $0x68] sm:$0xff]  ;;  %v3290_v37 = vld [vmem:[%s4925_s0 + $0x3f8] sm:$0xf0] }
   0xb   :  { %3378 = vmatpush.bf16.msra.mxu3 %v3128_v2  ;;  %1360 = vmatpush.bf16.msra.mxu0 %v3128_v2  ;;  %v3160_v31 = vld [vmem:[%s4924_s1 + $0x128] sm:$0xff]  ;;  %v3170_v39 = vld [vmem:[%s4925_s0 + $0x38] sm:$0xf0]  ;;  %v3143_v44 = vld [vmem:[%s4924_s1 + $0xa0] sm:$0xff] }
   0xc   :  { %v2505_v32 = vld [vmem:[%s4925_s0 + $0x168] sm:$0xf]  ;;  %v3151_v45 = vld [vmem:[%s4924_s1 + $0xe0] sm:$0xff]  ;;  %v2525_v48 = vld [vmem:[%s4925_s0 + $0x190] sm:$0xf] }
   0xd   :  { %v2665_v34 = vld [vmem:[%s4925_s0 + $0x2a8] sm:$0xf]  ;;  %v2506_v40 = vor.u32 %v3210_v33, %v2505_v32  ;;  %v3135_v46 = vld [vmem:[%s4924_s1 + $0x60] sm:$0xff]  ;;  %v2685_v50 = vld [vmem:[%s4925_s0 + $0x2d0] sm:$0xf] }
   0xe   :  { %3379 = vmatpush.bf16.msra.mxu1 %v3127_v3  ;;  %3380 = vmatpush.bf16.msra.mxu2 %v3127_v3  ;;  %v2825_v36 = vld [vmem:[%s4925_s0 + $0x3e8] sm:$0xf]  ;;  %v2666_v41 = vor.u32 %v3250_v35, %v2665_v34  ;;  %v3159_v47 = vld [vmem:[%s4924_s1 + $0x120] sm:$0xff]  ;;  %v2845_v52 = vld [vmem:[%s4925_s0 + $0x410] sm:$0xf] }
   0xf   :  { %3381 = vmatpush.bf16.msra.mxu3 %v3127_v3  ;;  %1361 = vmatpush.bf16.msra.mxu0 %v3127_v3  ;;  %v2345_v38 = vld [vmem:[%s4925_s0 + $0x28] sm:$0xf]  ;;  %v2826_v42 = vor.u32 %v3290_v37, %v2825_v36  ;;  %v3215_v49 = vld [vmem:[%s4925_s0 + $0x1a0] sm:$0xf0]  ;;  %v2365_v54 = vld [vmem:[%s4925_s0 + $0x50] sm:$0xf] }
  0x10   :  { %v2346_v43 = vor.u32 %v3170_v39, %v2345_v38  ;;  %v3255_v51 = vld [vmem:[%s4925_s0 + $0x2e0] sm:$0xf0]  ;;  %v2526_v56 = vor.u32 %v3215_v49, %v2525_v48  ;;  %v3142_v60 = vld [vmem:[%s4924_s1 + $0x98] sm:$0xff]  ;;  %v3220_v1 = vld [vmem:[%s4925_s0 + $0x1c8] sm:$0xf0] }
  0x11   :  { %v3295_v53 = vld [vmem:[%s4925_s0 + $0x420] sm:$0xf0]  ;;  %v2686_v57 = vor.u32 %v3255_v51, %v2685_v50  ;;  %v3150_v61 = vld [vmem:[%s4924_s1 + $0xd8] sm:$0xff]  ;;  %v3260_v3 = vld [vmem:[%s4925_s0 + $0x308] sm:$0xf0] }
  0x12   :  { %3382 = vmatpush.bf16.msra.mxu1 %v3126_v4  ;;  %3383 = vmatpush.bf16.msra.mxu2 %v3126_v4  ;;  %v3175_v55 = vld [vmem:[%s4925_s0 + $0x60] sm:$0xf0]  ;;  %v2846_v58 = vor.u32 %v3295_v53, %v2845_v52  ;;  %v3134_v62 = vld [vmem:[%s4924_s1 + $0x58] sm:$0xff]  ;;  %v3141_v12 = vld [vmem:[%s4924_s1 + $0x90] sm:$0xff] }
  0x13   :  { %3384 = vmatpush.bf16.msra.mxu3 %v3126_v4  ;;  %1362 = vmatpush.bf16.msra.mxu0 %v3126_v4  ;;  %v2366_v59 = vor.u32 %v3175_v55, %v2365_v54  ;;  %v3158_v63 = vld [vmem:[%s4924_s1 + $0x118] sm:$0xff]  ;;  %v3149_v13 = vld [vmem:[%s4924_s1 + $0xd0] sm:$0xff]  ;;  %v2585_v32 = vld [vmem:[%s4925_s0 + $0x208] sm:$0xf] }
  0x14   :  { %v2545_v0 = vld [vmem:[%s4925_s0 + $0x1b8] sm:$0xf]  ;;  %v3133_v14 = vld [vmem:[%s4924_s1 + $0x50] sm:$0xff]  ;;  %v3230_v33 = vld [vmem:[%s4925_s0 + $0x218] sm:$0xf0] }
  0x15   :  { %v2705_v2 = vld [vmem:[%s4925_s0 + $0x2f8] sm:$0xf]  ;;  %v2546_v8 = vor.u32 %v3220_v1, %v2545_v0  ;;  %v3157_v15 = vld [vmem:[%s4924_s1 + $0x110] sm:$0xff]  ;;  %v2745_v34 = vld [vmem:[%s4925_s0 + $0x348] sm:$0xf] }
  0x16   :  { %3385 = vmatpush.bf16.msra.mxu1 %v3125_v5  ;;  %3386 = vmatpush.bf16.msra.mxu2 %v3125_v5  ;;  %v2865_v4 = vld [vmem:[%s4925_s0 + $0x438] sm:$0xf]  ;;  %v2706_v9 = vor.u32 %v3260_v3, %v2705_v2  ;;  %v3270_v35 = vld [vmem:[%s4925_s0 + $0x358] sm:$0xf0]  ;;  %v2905_v36 = vld [vmem:[%s4925_s0 + $0x488] sm:$0xf] }
  0x17   :  { %3387 = vmatpush.bf16.msra.mxu3 %v3125_v5  ;;  %1363 = vmatpush.bf16.msra.mxu0 %v3125_v5  ;;  %v3300_v5 = vld [vmem:[%s4925_s0 + $0x448] sm:$0xf0]  ;;  %v3310_v37 = vld [vmem:[%s4925_s0 + $0x498] sm:$0xf0]  ;;  %v2425_v38 = vld [vmem:[%s4925_s0 + $0xc8] sm:$0xf] }
  0x18   :  { %v2866_v10 = vor.u32 %v3300_v5, %v2865_v4  ;;  %v3190_v39 = vld [vmem:[%s4925_s0 + $0xd8] sm:$0xf0]  ;;  %v2605_v48 = vld [vmem:[%s4925_s0 + $0x230] sm:$0xf]  ;;  %v3235_v49 = vld [vmem:[%s4925_s0 + $0x240] sm:$0xf0] }
  0x19   :  { %v2765_v50 = vld [vmem:[%s4925_s0 + $0x370] sm:$0xf]  ;;  %v3275_v51 = vld [vmem:[%s4925_s0 + $0x380] sm:$0xf0]  ;;  %v2945_v0 = vld [vmem:[%s4925_s0 + $0x4d8] sm:$0xf] }
  0x1a   :  { %3388 = vmatpush.bf16.msra.mxu1 %v3124_v6  ;;  %3389 = vmatpush.bf16.msra.mxu2 %v3124_v6  ;;  %v2925_v52 = vld [vmem:[%s4925_s0 + $0x4b0] sm:$0xf]  ;;  %v3315_v53 = vld [vmem:[%s4925_s0 + $0x4c0] sm:$0xf0]  ;;  %v3320_v1 = vld [vmem:[%s4925_s0 + $0x4e8] sm:$0xf0] }
  0x1b   :  { %3390 = vmatpush.bf16.msra.mxu3 %v3124_v6  ;;  %1364 = vmatpush.bf16.msra.mxu0 %v3124_v6  ;;  %v2385_v6 = vld [vmem:[%s4925_s0 + $0x78] sm:$0xf]  ;;  %v2445_v54 = vld [vmem:[%s4925_s0 + $0xf0] sm:$0xf]  ;;  %v3195_v55 = vld [vmem:[%s4925_s0 + $0x100] sm:$0xf0] }
  0x1c   :  { %v2465_v2 = vld [vmem:[%s4925_s0 + $0x118] sm:$0xf]  ;;  %v3200_v3 = vld [vmem:[%s4925_s0 + $0x128] sm:$0xf0] }
  0x1e   :  { %3391 = vmatpush.bf16.msra.mxu1 %v3123_v7  ;;  %3392 = vmatpush.bf16.msra.mxu2 %v3123_v7 }
  0x1f   :  { %3393 = vmatpush.bf16.msra.mxu3 %v3123_v7  ;;  %1365 = vmatpush.bf16.msra.mxu0 %v3123_v7  ;;  %v3180_v7 = vld [vmem:[%s4925_s0 + $0x88] sm:$0xf0] }
  0x20   :  { %v2386_v11 = vor.u32 %v3180_v7, %v2385_v6  ;;  %v2946_v6 = vor.u32 %v3320_v1, %v2945_v0  ;;  %v2466_v7 = vor.u32 %v3200_v3, %v2465_v2  ;;  %v3178_v2 = vld [vmem:[%s4925_s0 + $0x7c] sm:$0xf]  ;;  %v2387_v3 = vld [vmem:[%s4925_s0 + $0x8c] sm:$0xf0] }
  0x21   :  { %1406 = vmatmul.bf16.vlgmr.msra.gmra.mxu1 %v2486_v18  ;;  %1446 = vmatmul.bf16.vlgmr.msra.gmra.mxu2 %v2646_v19  ;;  %v2725_v18 = vld [vmem:[%s4925_s0 + $0x320] sm:$0xf]  ;;  %v3265_v19 = vld [vmem:[%s4925_s0 + $0x330] sm:$0xf0] }
  0x22   :  { %1696 = vmatpush.bf16.msrb.mxu2 %v3146_v16  ;;  %1486 = vmatmul.bf16.vlgmr.msra.gmra.mxu3 %v2806_v20  ;;  %v2565_v16 = vld [vmem:[%s4925_s0 + $0x1e0] sm:$0xf] }
  0x23   :  { %1865 = vmatpush.bf16.msrb.mxu3 %v3154_v17  ;;  %1366 = vmatmul.bf16.vlgmr.msra.gmra.mxu0 %v2326_v21  ;;  %v3225_v17 = vld [vmem:[%s4925_s0 + $0x1f0] sm:$0xf0]  ;;  %v2885_v20 = vld [vmem:[%s4925_s0 + $0x460] sm:$0xf] }
  0x24   :  { %1527 = vmatpush.bf16.msrb.mxu1 %v3138_v22  ;;  %2034 = vmatpush.bf16.msrb.mxu0 %v3162_v23  ;;  %v3305_v21 = vld [vmem:[%s4925_s0 + $0x470] sm:$0xf0]  ;;  %v2405_v22 = vld [vmem:[%s4925_s0 + $0xa0] sm:$0xf] }
  0x25   :  { %v3185_v23 = vld [vmem:[%s4925_s0 + $0xb0] sm:$0xf0] }
  0x26   :  { %1697 = vmatpush.bf16.msrb.mxu2 %v3145_v24  ;;  %v2566_v24 = vor.u32 %v3225_v17, %v2565_v16 }
  0x27   :  { %1866 = vmatpush.bf16.msrb.mxu3 %v3153_v25  ;;  %v2726_v25 = vor.u32 %v3265_v19, %v2725_v18 }
  0x28   :  { %1528 = vmatpush.bf16.msrb.mxu1 %v3137_v26  ;;  %2035 = vmatpush.bf16.msrb.mxu0 %v3161_v27  ;;  %v2886_v26 = vor.u32 %v3305_v21, %v2885_v20  ;;  %v2406_v27 = vor.u32 %v3185_v23, %v2405_v22 }
  0x2a   :  { %1698 = vmatpush.bf16.msrb.mxu2 %v3144_v28  ;;  %v3140_v28 = vld [vmem:[%s4924_s1 + $0x88] sm:$0xff] }
  0x2b   :  { %1867 = vmatpush.bf16.msrb.mxu3 %v3152_v29  ;;  %v3148_v29 = vld [vmem:[%s4924_s1 + $0xc8] sm:$0xff] }
  0x2c   :  { %1529 = vmatpush.bf16.msrb.mxu1 %v3136_v30  ;;  %2036 = vmatpush.bf16.msrb.mxu0 %v3160_v31  ;;  %v3132_v30 = vld [vmem:[%s4924_s1 + $0x48] sm:$0xff] }
  0x2d   :  { %v3156_v31 = vld [vmem:[%s4924_s1 + $0x108] sm:$0xff] }
  0x2e   :  { %1699 = vmatpush.bf16.msrb.mxu2 %v3143_v44  ;;  %v3139_v44 = vld [vmem:[%s4924_s1 + $0x80] sm:$0xff] }
  0x2f   :  { %1868 = vmatpush.bf16.msrb.mxu3 %v3151_v45  ;;  %v3147_v45 = vld [vmem:[%s4924_s1 + $0xc0] sm:$0xff] }
  0x30   :  { %1530 = vmatpush.bf16.msrb.mxu1 %v3135_v46  ;;  %2037 = vmatpush.bf16.msrb.mxu0 %v3159_v47  ;;  %v3131_v46 = vld [vmem:[%s4924_s1 + $0x40] sm:$0xff] }
  0x31   :  { %1411 = vmatmul.bf16.gmra.mxu1 %v2506_v40  ;;  %1451 = vmatmul.bf16.gmra.mxu2 %v2666_v41  ;;  %v2586_v40 = vor.u32 %v3230_v33, %v2585_v32  ;;  %v2746_v41 = vor.u32 %v3270_v35, %v2745_v34  ;;  %v3155_v47 = vld [vmem:[%s4924_s1 + $0x100] sm:$0xff]  ;;  %v2361_v32 = vld [vmem:[%s4925_s0 + $0x38] sm:$0xf]  ;;  %v3172_v33 = vld [vmem:[%s4925_s0 + $0x48] sm:$0xf0] }
  0x32   :  { %1491 = vmatmul.bf16.gmra.mxu3 %v2826_v42  ;;  %1700 = vmatpush.bf16.msrb.mxu2 %v3142_v60  ;;  %v2906_v42 = vor.u32 %v3310_v37, %v2905_v36  ;;  %v2625_v60 = vld [vmem:[%s4925_s0 + $0x258] sm:$0xf] }
  0x33   :  { %1371 = vmatmul.bf16.gmra.mxu0 %v2346_v43  ;;  %1869 = vmatpush.bf16.msrb.mxu3 %v3150_v61  ;;  %v2426_v43 = vor.u32 %v3190_v39, %v2425_v38  ;;  %v3240_v61 = vld [vmem:[%s4925_s0 + $0x268] sm:$0xf0] }
  0x34   :  { %1531 = vmatpush.bf16.msrb.mxu1 %v3134_v62  ;;  %2038 = vmatpush.bf16.msrb.mxu0 %v3158_v63  ;;  %v2785_v62 = vld [vmem:[%s4925_s0 + $0x398] sm:$0xf]  ;;  %v3280_v63 = vld [vmem:[%s4925_s0 + $0x3a8] sm:$0xf0]  ;;  %v2626_v4 = vor.u32 %v3240_v61, %v2625_v60 }
  0x35   :  { %v2786_v5 = vor.u32 %v3280_v63, %v2785_v62 }
  0x36   :  { %1701 = vmatpush.bf16.msrb.mxu2 %v3141_v12  ;;  %v3164_v12 = vld [vmem:[%s4925_s0 + $0xc] sm:$0xf] }
  0x37   :  { %1870 = vmatpush.bf16.msrb.mxu3 %v3149_v13  ;;  %v2335_v13 = vld [vmem:[%s4925_s0 + $0x1c] sm:$0xf0] }
  0x38   :  { %1532 = vmatpush.bf16.msrb.mxu1 %v3133_v14  ;;  %2039 = vmatpush.bf16.msrb.mxu0 %v3157_v15  ;;  %v2341_v14 = vld [vmem:[%s4925_s0 + $0x10] sm:$0xf]  ;;  %v3167_v15 = vld [vmem:[%s4925_s0 + $0x20] sm:$0xf0]  ;;  %v2338_v19 = vor.u32 %v3164_v12, %v2335_v13  ;;  %v2390_v12 = vor.u32 %v3178_v2, %v2387_v3 }
  0x39   :  { %v2342_v20 = vor.u32 %v3167_v15, %v2341_v14  ;;  %v2433_v2 = vld [vmem:[%s4925_s0 + $0xd0] sm:$0xf]  ;;  %v3191_v3 = vld [vmem:[%s4925_s0 + $0xe0] sm:$0xf0] }
  0x3a   :  { %1702 = vmatpush.bf16.msrb.mxu2 %v3140_v28  ;;  %v2353_v28 = vld [vmem:[%s4925_s0 + $0x30] sm:$0xf] }
  0x3b   :  { %1871 = vmatpush.bf16.msrb.mxu3 %v3148_v29  ;;  %v3171_v29 = vld [vmem:[%s4925_s0 + $0x40] sm:$0xf0] }
  0x3c   :  { %1533 = vmatpush.bf16.msrb.mxu1 %v3132_v30  ;;  %2040 = vmatpush.bf16.msrb.mxu0 %v3156_v31  ;;  %v3169_v30 = vld [vmem:[%s4925_s0 + $0x34] sm:$0xf]  ;;  %v2355_v31 = vld [vmem:[%s4925_s0 + $0x44] sm:$0xf0]  ;;  %v2354_v37 = vor.u32 %v3171_v29, %v2353_v28  ;;  %v3183_v28 = vld [vmem:[%s4925_s0 + $0xa4] sm:$0xf] }
  0x3d   :  { %v2358_v39 = vor.u32 %v3169_v30, %v2355_v31  ;;  %v2407_v29 = vld [vmem:[%s4925_s0 + $0xb4] sm:$0xf0]  ;;  %v2413_v30 = vld [vmem:[%s4925_s0 + $0xa8] sm:$0xf]  ;;  %v3186_v31 = vld [vmem:[%s4925_s0 + $0xb8] sm:$0xf0] }
  0x3e   :  { %1703 = vmatpush.bf16.msrb.mxu2 %v3139_v44 }
  0x3f   :  { %1872 = vmatpush.bf16.msrb.mxu3 %v3147_v45 }
  0x40   :  { %1534 = vmatpush.bf16.msrb.mxu1 %v3131_v46  ;;  %2041 = vmatpush.bf16.msrb.mxu0 %v3155_v47  ;;  %v3173_v46 = vld [vmem:[%s4925_s0 + $0x54] sm:$0xf]  ;;  %v2367_v47 = vld [vmem:[%s4925_s0 + $0x64] sm:$0xf0] }
  0x41   :  { %1416 = vmatmul.bf16.gmra.mxu1 %v2526_v56  ;;  %1456 = vmatmul.bf16.gmra.mxu2 %v2686_v57  ;;  %v2606_v56 = vor.u32 %v3235_v49, %v2605_v48  ;;  %v2766_v57 = vor.u32 %v3275_v51, %v2765_v50  ;;  %v2373_v48 = vld [vmem:[%s4925_s0 + $0x58] sm:$0xf]  ;;  %v3176_v49 = vld [vmem:[%s4925_s0 + $0x68] sm:$0xf0]  ;;  %v3174_v50 = vld [vmem:[%s4925_s0 + $0x5c] sm:$0xf] }
  0x42   :  { %1496 = vmatmul.bf16.gmra.mxu3 %v2846_v58  ;;  %v2926_v58 = vor.u32 %v3315_v53, %v2925_v52  ;;  %v2375_v51 = vld [vmem:[%s4925_s0 + $0x6c] sm:$0xf0]  ;;  %v2381_v52 = vld [vmem:[%s4925_s0 + $0x60] sm:$0xf]  ;;  %v3177_v53 = vld [vmem:[%s4925_s0 + $0x70] sm:$0xf0] }
  0x43   :  { %1376 = vmatmul.bf16.gmra.mxu0 %v2366_v59  ;;  %v2446_v59 = vor.u32 %v3195_v55, %v2445_v54  ;;  %v2382_v60 = vor.u32 %v3177_v53, %v2381_v52 }
  0x51   :  { %1421 = vmatmul.bf16.gmra.mxu1 %v2546_v8  ;;  %1461 = vmatmul.bf16.gmra.mxu2 %v2706_v9  ;;  %v3163_v8 = vld [vmem:[%s4925_s0 + $0x4] sm:$0xf]  ;;  %v2327_v9 = vld [vmem:[%s4925_s0 + $0x14] sm:$0xf0] }
  0x52   :  { %1501 = vmatmul.bf16.gmra.mxu3 %v2866_v10  ;;  %v2333_v10 = vld [vmem:[%s4925_s0 + $0x8] sm:$0xf]  ;;  %v2330_v16 = vor.u32 %v3163_v8, %v2327_v9  ;;  %v3182_v9 = vld [vmem:[%s4925_s0 + $0x98] sm:$0xf0] }
  0x53   :  { %1381 = vmatmul.bf16.gmra.mxu0 %v2386_v11  ;;  %v3166_v11 = vld [vmem:[%s4925_s0 + $0x18] sm:$0xf0]  ;;  %v2401_v8 = vld [vmem:[%s4925_s0 + $0x88] sm:$0xf] }
  0x54   :  { %v2334_v17 = vor.u32 %v3166_v11, %v2333_v10 }
  0x61   :  { %1426 = vmatmul.bf16.gmra.mxu1 %v2566_v24  ;;  %1466 = vmatmul.bf16.gmra.mxu2 %v2726_v25 }
  0x62   :  { %1506 = vmatmul.bf16.gmra.mxu3 %v2886_v26  ;;  %v3168_v26 = vld [vmem:[%s4925_s0 + $0x2c] sm:$0xf] }
  0x63   :  { %1386 = vmatmul.bf16.gmra.mxu0 %v2406_v27  ;;  %v2347_v27 = vld [vmem:[%s4925_s0 + $0x3c] sm:$0xf0] }
  0x64   :  { %v2350_v36 = vor.u32 %v3168_v26, %v2347_v27 }
  0x71   :  { %1431 = vmatmul.bf16.gmra.mxu1 %v2586_v40  ;;  %1471 = vmatmul.bf16.gmra.mxu2 %v2746_v41  ;;  %v2362_v40 = vor.u32 %v3172_v33, %v2361_v32  ;;  %v3184_v32 = vld [vmem:[%s4925_s0 + $0xac] sm:$0xf]  ;;  %v2415_v33 = vld [vmem:[%s4925_s0 + $0xbc] sm:$0xf0] }
  0x72   :  { %1511 = vmatmul.bf16.gmra.mxu3 %v2906_v42 }
  0x73   :  { %1391 = vmatmul.bf16.gmra.mxu0 %v2426_v43 }
  0x81   :  { %1436 = vmatmul.bf16.gmra.mxu1 %v2606_v56  ;;  %1476 = vmatmul.bf16.gmra.mxu2 %v2766_v57  ;;  %v2370_v56 = vor.u32 %v3173_v46, %v2367_v47  ;;  %v2374_v57 = vor.u32 %v3176_v49, %v2373_v48  ;;  %v2410_v46 = vor.u32 %v3183_v28, %v2407_v29 }
  0x82   :  { %1516 = vmatmul.bf16.gmra.mxu3 %v2926_v58  ;;  %v2414_v47 = vor.u32 %v3186_v31, %v2413_v30  ;;  %v2418_v49 = vor.u32 %v3184_v32, %v2415_v33 }
  0x83   :  { %1396 = vmatmul.bf16.gmra.mxu0 %v2446_v59  ;;  %v2378_v59 = vor.u32 %v3174_v50, %v2375_v51 }
  0x91   :  { %1441 = vmatmul.bf16.gmra.mxu1 %v2626_v4  ;;  %1481 = vmatmul.bf16.gmra.mxu2 %v2786_v5  ;;  %v2393_v4 = vld [vmem:[%s4925_s0 + $0x80] sm:$0xf]  ;;  %v3181_v5 = vld [vmem:[%s4925_s0 + $0x90] sm:$0xf0] }
  0x92   :  { %1521 = vmatmul.bf16.gmra.mxu3 %v2946_v6  ;;  %v3179_v6 = vld [vmem:[%s4925_s0 + $0x84] sm:$0xf]  ;;  %v2394_v13 = vor.u32 %v3181_v5, %v2393_v4  ;;  %v3189_v4 = vld [vmem:[%s4925_s0 + $0xd4] sm:$0xf]  ;;  %v2435_v5 = vld [vmem:[%s4925_s0 + $0xe4] sm:$0xf0] }
  0x93   :  { %1401 = vmatmul.bf16.gmra.mxu0 %v2466_v7  ;;  %v2395_v7 = vld [vmem:[%s4925_s0 + $0x94] sm:$0xf0] }
  0x94   :  { %v2398_v15 = vor.u32 %v3179_v6, %v2395_v7  ;;  %v2441_v6 = vld [vmem:[%s4925_s0 + $0xd8] sm:$0xf]  ;;  %v3192_v7 = vld [vmem:[%s4925_s0 + $0xe8] sm:$0xf0] }
  0x95   :  { %v2442_v28 = vor.u32 %v3192_v7, %v2441_v6 }
  0x9e   :  { %v3751_v18 = vpop.f32.mrf.mxu1 }
  0xa0   :  { %v3753_v21 = vpop.f32.mrf.mxu0 }
  0xa1   :  { %1535 = vmatmul.bf16.vlgmr.msrb.gmra.mxu1 %v2330_v16  ;;  %1704 = vmatmul.bf16.vlgmr.msrb.gmra.mxu2 %v2334_v17  ;;  %v2402_v16 = vor.u32 %v3182_v9, %v2401_v8 }
  0xa2   :  { %1873 = vmatmul.bf16.vlgmr.msrb.gmra.mxu3 %v2338_v19 }
  0xa3   :  { %2042 = vmatmul.bf16.vlgmr.msrb.gmra.mxu0 %v2342_v20 }
  0xa4   :  { %v3755_v22 = vpop.f32.mrf.mxu2 }
  0xa5   :  { %v3757_v23 = vpop.f32.mrf.mxu3 }
  0xa6   :  { %4928 = vst [vmem:[#allocation2_spill] sm:$0xff] %v3757_v23  ;;  %v3759_v24 = vpop.f32.mrf.mxu1 }
  0xa8   :  { %v3761_v25 = vpop.f32.mrf.mxu0 }
  0xac   :  { %v3787_v34 = vpop.f32.mrf.mxu2 }
  0xad   :  { %v3789_v35 = vpop.f32.mrf.mxu3 }
  0xae   :  { %4929 = vst [vmem:[#allocation3_spill] sm:$0xff] %v3789_v35  ;;  %v3791_v38 = vpop.f32.mrf.mxu1 }
  0xb0   :  { %v3793_v41 = vpop.f32.mrf.mxu0 }
  0xb1   :  { %1540 = vmatmul.bf16.gmra.mxu1 %v2350_v36  ;;  %1709 = vmatmul.bf16.gmra.mxu2 %v2354_v37  ;;  %v2421_v36 = vld [vmem:[%s4925_s0 + $0xb0] sm:$0xf]  ;;  %v3187_v37 = vld [vmem:[%s4925_s0 + $0xc0] sm:$0xf0] }
  0xb2   :  { %1878 = vmatmul.bf16.gmra.mxu3 %v2358_v39  ;;  %v2422_v50 = vor.u32 %v3187_v37, %v2421_v36  ;;  %v3193_v36 = vld [vmem:[%s4925_s0 + $0xf4] sm:$0xf]  ;;  %v2447_v37 = vld [vmem:[%s4925_s0 + $0x104] sm:$0xf0] }
  0xb3   :  { %2047 = vmatmul.bf16.gmra.mxu0 %v2362_v40 }
  0xb4   :  { %v3795_v42 = vpop.f32.mrf.mxu2 }
  0xb5   :  { %v3797_v43 = vpop.f32.mrf.mxu3 }
  0xb6   :  { %4930 = vst [vmem:[#allocation4_spill] sm:$0xff] %v3797_v43  ;;  %v3799_v44 = vpop.f32.mrf.mxu1 }
  0xb8   :  { %v3801_v45 = vpop.f32.mrf.mxu0 }
  0xbc   :  { %v3827_v54 = vpop.f32.mrf.mxu2 }
  0xbd   :  { %v3829_v55 = vpop.f32.mrf.mxu3 }
  0xbe   :  { %4931 = vst [vmem:[#allocation5_spill] sm:$0xff] %v3829_v55  ;;  %v3831_v58 = vpop.f32.mrf.mxu1 }
  0xc0   :  { %v3833_v61 = vpop.f32.mrf.mxu0 }
  0xc1   :  { %1545 = vmatmul.bf16.gmra.mxu1 %v2370_v56  ;;  %1714 = vmatmul.bf16.gmra.mxu2 %v2374_v57 }
  0xc2   :  { %1883 = vmatmul.bf16.gmra.mxu3 %v2378_v59  ;;  %v3188_v59 = vld [vmem:[%s4925_s0 + $0xcc] sm:$0xf] }
  0xc3   :  { %2052 = vmatmul.bf16.gmra.mxu0 %v2382_v60  ;;  %v2427_v60 = vld [vmem:[%s4925_s0 + $0xdc] sm:$0xf0] }
  0xc4   :  { %v3835_v62 = vpop.f32.mrf.mxu2 }
  0xc5   :  { %v3837_v63 = vpop.f32.mrf.mxu3 }
  0xc6   :  { %4932 = vst [vmem:[#allocation6_spill] sm:$0xff] %v3837_v63  ;;  %v3839_v0 = vpop.f32.mrf.mxu1 }
  0xc8   :  { %v3841_v1 = vpop.f32.mrf.mxu0 }
  0xcc   :  { %v3867_v10 = vpop.f32.mrf.mxu2 }
  0xcd   :  { %v3869_v11 = vpop.f32.mrf.mxu3 }
  0xce   :  { %4933 = vst [vmem:[#allocation7_spill] sm:$0xff] %v3869_v11  ;;  %v3871_v14 = vpop.f32.mrf.mxu1 }
  0xd0   :  { %v3873_v17 = vpop.f32.mrf.mxu0 }
  0xd1   :  { %1550 = vmatmul.bf16.gmra.mxu1 %v2390_v12  ;;  %1719 = vmatmul.bf16.gmra.mxu2 %v2394_v13  ;;  %v2430_v12 = vor.u32 %v3188_v59, %v2427_v60  ;;  %v2434_v13 = vor.u32 %v3191_v3, %v2433_v2  ;;  %v2461_v59 = vld [vmem:[%s4925_s0 + $0x100] sm:$0xf]  ;;  %v3197_v60 = vld [vmem:[%s4925_s0 + $0x110] sm:$0xf0] }
  0xd2   :  { %1888 = vmatmul.bf16.gmra.mxu3 %v2398_v15 }
  0xd3   :  { %2057 = vmatmul.bf16.gmra.mxu0 %v2402_v16  ;;  %v2438_v16 = vor.u32 %v3189_v4, %v2435_v5  ;;  %v2450_v4 = vor.u32 %v3193_v36, %v2447_v37  ;;  %v3198_v36 = vld [vmem:[%s4925_s0 + $0x11c] sm:$0xf]  ;;  %v2467_v37 = vld [vmem:[%s4925_s0 + $0x12c] sm:$0xf0] }
  0xd4   :  { %v3875_v19 = vpop.f32.mrf.mxu2 }
  0xd5   :  { %v3877_v20 = vpop.f32.mrf.mxu3 }
  0xd6   :  { %4934 = vst [vmem:[#allocation8_spill] sm:$0xff] %v3877_v20  ;;  %v3879_v26 = vpop.f32.mrf.mxu1 }
  0xd8   :  { %v3881_v27 = vpop.f32.mrf.mxu0 }
  0xdc   :  { %v3907_v39 = vpop.f32.mrf.mxu2 }
  0xdd   :  { %v3909_v40 = vpop.f32.mrf.mxu3 }
  0xde   :  { %4935 = vst [vmem:[#allocation9_spill] sm:$0xff] %v3909_v40  ;;  %v3911_v48 = vpop.f32.mrf.mxu1 }
  0xe0   :  { %v3913_v51 = vpop.f32.mrf.mxu0 }
  0xe1   :  { %1555 = vmatmul.bf16.gmra.mxu1 %v2410_v46  ;;  %1724 = vmatmul.bf16.gmra.mxu2 %v2414_v47  ;;  %v2453_v46 = vld [vmem:[%s4925_s0 + $0xf8] sm:$0xf]  ;;  %v3196_v47 = vld [vmem:[%s4925_s0 + $0x108] sm:$0xf0] }
  0xe2   :  { %1893 = vmatmul.bf16.gmra.mxu3 %v2418_v49  ;;  %v3194_v49 = vld [vmem:[%s4925_s0 + $0xfc] sm:$0xf]  ;;  %v2454_v5 = vor.u32 %v3196_v47, %v2453_v46  ;;  %v2473_v46 = vld [vmem:[%s4925_s0 + $0x120] sm:$0xf]  ;;  %v3201_v47 = vld [vmem:[%s4925_s0 + $0x130] sm:$0xf0] }
  0xe3   :  { %2062 = vmatmul.bf16.gmra.mxu0 %v2422_v50  ;;  %v2455_v50 = vld [vmem:[%s4925_s0 + $0x10c] sm:$0xf0] }
  0xe4   :  { %v3915_v52 = vpop.f32.mrf.mxu2  ;;  %v2458_v7 = vor.u32 %v3194_v49, %v2455_v50  ;;  %v3199_v49 = vld [vmem:[%s4925_s0 + $0x124] sm:$0xf]  ;;  %v2475_v50 = vld [vmem:[%s4925_s0 + $0x134] sm:$0xf0] }
  0xe5   :  { %4936 = vst [vmem:[#allocation10_spill] sm:$0xff] %v3915_v52  ;;  %v3917_v53 = vpop.f32.mrf.mxu3 }
  0xe6   :  { %4937 = vst [vmem:[#allocation11_spill] sm:$0xff] %v3917_v53  ;;  %v3919_v56 = vpop.f32.mrf.mxu1 }
  0xe8   :  { %v3921_v57 = vpop.f32.mrf.mxu0 }
  0xec   :  { %v3947_v8 = vpop.f32.mrf.mxu2 }
  0xed   :  { %4938 = vst [vmem:[#allocation12_spill] sm:$0xff] %v3947_v8  ;;  %v3949_v9 = vpop.f32.mrf.mxu3 }
  0xee   :  { %4939 = vst [vmem:[#allocation13_spill] sm:$0xff] %v3949_v9  ;;  %v3951_v15 = vpop.f32.mrf.mxu1 }
  0xf0   :  { %v3953_v29 = vpop.f32.mrf.mxu0 }
  0xf1   :  { %1560 = vmatmul.bf16.gmra.mxu1 %v2430_v12  ;;  %1729 = vmatmul.bf16.gmra.mxu2 %v2434_v13  ;;  %v2462_v12 = vor.u32 %v3197_v60, %v2461_v59  ;;  %v2481_v59 = vld [vmem:[%s4925_s0 + $0x128] sm:$0xf]  ;;  %v3202_v60 = vld [vmem:[%s4925_s0 + $0x138] sm:$0xf0] }
  0xf2   :  { %1898 = vmatmul.bf16.gmra.mxu3 %v2438_v16  ;;  %v2482_v53 = vor.u32 %v3202_v60, %v2481_v59 }
  0xf3   :  { %2067 = vmatmul.bf16.gmra.mxu0 %v2442_v28 }
  0xf4   :  { %v3955_v30 = vpop.f32.mrf.mxu2 }
  0xf5   :  { %4940 = vst [vmem:[#allocation14_spill] sm:$0xff] %v3955_v30  ;;  %v3957_v31 = vpop.f32.mrf.mxu3 }
  0xf6   :  { %4941 = vst [vmem:[#allocation15_spill] sm:$0xff] %v3957_v31  ;;  %v3959_v32 = vpop.f32.mrf.mxu1 }
  0xf8   :  { %v3961_v33 = vpop.f32.mrf.mxu0 }
  0xfc   :  { %v3987_v2 = vpop.f32.mrf.mxu2 }
  0xfd   :  { %4942 = vst [vmem:[#allocation16_spill] sm:$0xff] %v3987_v2  ;;  %v3989_v3 = vpop.f32.mrf.mxu3 }
  0xfe   :  { %4943 = vst [vmem:[#allocation17_spill] sm:$0xff] %v3989_v3  ;;  %v3991_v6 = vpop.f32.mrf.mxu1  ;;  %v2478_v3 = vor.u32 %v3199_v49, %v2475_v50  ;;  %v2501_v49 = vld [vmem:[%s4925_s0 + $0x150] sm:$0xf]  ;;  %v3207_v50 = vld [vmem:[%s4925_s0 + $0x160] sm:$0xf0] }
  0xff   :  { %v2502_v43 = vor.u32 %v3207_v50, %v2501_v49 }
 0x100   :  { %v3993_v13 = vpop.f32.mrf.mxu0 }
 0x101   :  { %1565 = vmatmul.bf16.gmra.mxu1 %v2450_v4  ;;  %1734 = vmatmul.bf16.gmra.mxu2 %v2454_v5 }
 0x102   :  { %1903 = vmatmul.bf16.gmra.mxu3 %v2458_v7  ;;  %v2470_v7 = vor.u32 %v3198_v36, %v2467_v37  ;;  %v3203_v36 = vld [vmem:[%s4925_s0 + $0x144] sm:$0xf]  ;;  %v2487_v37 = vld [vmem:[%s4925_s0 + $0x154] sm:$0xf0] }
 0x103   :  { %2072 = vmatmul.bf16.gmra.mxu0 %v2462_v12  ;;  %v2474_v12 = vor.u32 %v3201_v47, %v2473_v46  ;;  %v3204_v46 = vld [vmem:[%s4925_s0 + $0x14c] sm:$0xf]  ;;  %v2495_v47 = vld [vmem:[%s4925_s0 + $0x15c] sm:$0xf0] }
 0x104   :  { %v3995_v16 = vpop.f32.mrf.mxu2 }
 0x105   :  { %4944 = vst [vmem:[#allocation18_spill] sm:$0xff] %v3995_v16  ;;  %v3997_v28 = vpop.f32.mrf.mxu3 }
 0x106   :  { %4945 = vst [vmem:[#allocation19_spill] sm:$0xff] %v3997_v28  ;;  %v3999_v31 = vpop.f32.mrf.mxu1 }
 0x108   :  { %v4001_v9 = vpop.f32.mrf.mxu0 }
 0x10c   :  { %v4027_v4 = vpop.f32.mrf.mxu2 }
 0x10d   :  { %4946 = vst [vmem:[#allocation20_spill] sm:$0xff] %v4027_v4  ;;  %v4029_v5 = vpop.f32.mrf.mxu3 }
 0x10e   :  { %4947 = vst [vmem:[#allocation21_spill] sm:$0xff] %v4029_v5  ;;  %v4031_v28 = vpop.f32.mrf.mxu1  ;;  %v2498_v5 = vor.u32 %v3204_v46, %v2495_v47 }
 0x110   :  { %v4033_v40 = vpop.f32.mrf.mxu0 }
 0x111   :  { %1570 = vmatmul.bf16.gmra.mxu1 %v2470_v7  ;;  %1739 = vmatmul.bf16.gmra.mxu2 %v2474_v12  ;;  %v2490_v7 = vor.u32 %v3203_v36, %v2487_v37  ;;  %v3208_v36 = vld [vmem:[%s4925_s0 + $0x16c] sm:$0xf]  ;;  %v2507_v37 = vld [vmem:[%s4925_s0 + $0x17c] sm:$0xf0] }
 0x112   :  { %1908 = vmatmul.bf16.gmra.mxu3 %v2478_v3  ;;  %v3206_v3 = vld [vmem:[%s4925_s0 + $0x158] sm:$0xf0] }
 0x113   :  { %2077 = vmatmul.bf16.gmra.mxu0 %v2482_v53  ;;  %v2493_v53 = vld [vmem:[%s4925_s0 + $0x148] sm:$0xf] }
 0x114   :  { %v4035_v20 = vpop.f32.mrf.mxu2  ;;  %v2494_v12 = vor.u32 %v3206_v3, %v2493_v53  ;;  %v2510_v53 = vor.u32 %v3208_v36, %v2507_v37 }
 0x115   :  { %4948 = vst [vmem:[#allocation22_spill] sm:$0xff] %v4035_v20  ;;  %v4037_v11 = vpop.f32.mrf.mxu3 }
 0x116   :  { %4949 = vst [vmem:[#allocation23_spill] sm:$0xff] %v4037_v11  ;;  %v4039_v63 = vpop.f32.mrf.mxu1 }
 0x118   :  { %v4041_v55 = vpop.f32.mrf.mxu0 }
 0x11c   :  { %v4067_v59 = vpop.f32.mrf.mxu2 }
 0x11d   :  { %4950 = vst [vmem:[#allocation24_spill] sm:$0xff] %v4067_v59  ;;  %v4069_v60 = vpop.f32.mrf.mxu3 }
 0x11e   :  { %4951 = vst [vmem:[#allocation25_spill] sm:$0xff] %v4069_v60  ;;  %v1536_v11 = vpop.f32.mrf.mxu1 }
 0x11f   :  { %v1537_v23 = vadd.f32 %v1536_v11, %v3753_v21  ;;  %v2513_v21 = vld [vmem:[%s4925_s0 + $0x170] sm:$0xf]  ;;  %v2515_v11 = vld [vmem:[%s4925_s0 + $0x184] sm:$0xf0] }
 0x120   :  { %v2043_v35 = vpop.f32.mrf.mxu0 }
 0x121   :  { %1575 = vmatmul.bf16.gmra.mxu1 %v2490_v7  ;;  %1744 = vmatmul.bf16.gmra.mxu2 %v2494_v12 }
 0x122   :  { %1913 = vmatmul.bf16.gmra.mxu3 %v2498_v5 }
 0x123   :  { %2082 = vmatmul.bf16.gmra.mxu0 %v2502_v43 }
 0x124   :  { %v1705_v20 = vpop.f32.mrf.mxu2 }
 0x125   :  { %v1706_v4 = vadd.f32 %v1705_v20, %v1537_v23  ;;  %v1874_v16 = vpop.f32.mrf.mxu3  ;;  %v3211_v23 = vld [vmem:[%s4925_s0 + $0x180] sm:$0xf0]  ;;  %v2521_v20 = vld [vmem:[%s4925_s0 + $0x178] sm:$0xf] }
 0x126   :  { %v1538_v2 = vpop.f32.mrf.mxu1  ;;  %v2514_v3 = vor.u32 %v3211_v23, %v2513_v21  ;;  %v3213_v21 = vld [vmem:[%s4925_s0 + $0x194] sm:$0xf]  ;;  %v3216_v23 = vld [vmem:[%s4925_s0 + $0x1a8] sm:$0xf0] }
 0x127   :  { %v1875_v30 = vadd.f32 %v1874_v16, %v1706_v4  ;;  %v1539_v43 = vadd.f32 %v1538_v2, %v3761_v25 }
 0x128   :  { %v2045_v59 = vpop.f32.mrf.mxu0 }
 0x129   :  { %v4072_v8 = vadd.f32 %v2043_v35, %v1875_v30  ;;  %v3209_v35 = vld [vmem:[%s4925_s0 + $0x174] sm:$0xf]  ;;  %v3212_v30 = vld [vmem:[%s4925_s0 + $0x188] sm:$0xf0] }
 0x12a   :  { %v2518_v47 = vor.u32 %v3209_v35, %v2515_v11  ;;  %v2522_v25 = vor.u32 %v3212_v30, %v2521_v20  ;;  %v2535_v35 = vld [vmem:[%s4925_s0 + $0x1ac] sm:$0xf0]  ;;  %v2541_v11 = vld [vmem:[%s4925_s0 + $0x1a0] sm:$0xf]  ;;  %v3217_v20 = vld [vmem:[%s4925_s0 + $0x1b0] sm:$0xf0] }
 0x12c   :  { %v1707_v16 = vpop.f32.mrf.mxu2 }
 0x12d   :  { %v1708_v4 = vadd.f32 %v1707_v16, %v1539_v43  ;;  %v1876_v5 = vpop.f32.mrf.mxu3 }
 0x12e   :  { %v1541_v46 = vpop.f32.mrf.mxu1 }
 0x12f   :  { %v1877_v2 = vadd.f32 %v1876_v5, %v1708_v4  ;;  %v1542_v7 = vadd.f32 %v1541_v46, %v3793_v41  ;;  %v2533_v41 = vld [vmem:[%s4925_s0 + $0x198] sm:$0xf] }
 0x130   :  { %v2048_v49 = vpop.f32.mrf.mxu0 }
 0x131   :  { %v4099_v50 = vadd.f32 %v2045_v59, %v1877_v2  ;;  %1580 = vmatmul.bf16.gmra.mxu1 %v2510_v53  ;;  %1749 = vmatmul.bf16.gmra.mxu2 %v2514_v3  ;;  %v2527_v59 = vld [vmem:[%s4925_s0 + $0x1a4] sm:$0xf0]  ;;  %v2534_v3 = vor.u32 %v3216_v23, %v2533_v41  ;;  %v3218_v41 = vld [vmem:[%s4925_s0 + $0x1bc] sm:$0xf]  ;;  %v3221_v23 = vld [vmem:[%s4925_s0 + $0x1d0] sm:$0xf0] }
 0x132   :  { %1918 = vmatmul.bf16.gmra.mxu3 %v2518_v47  ;;  %v2530_v53 = vor.u32 %v3213_v21, %v2527_v59 }
 0x133   :  { %2087 = vmatmul.bf16.gmra.mxu0 %v2522_v25 }
 0x134   :  { %v1710_v12 = vpop.f32.mrf.mxu2 }
 0x135   :  { %v1711_v60 = vadd.f32 %v1710_v12, %v1542_v7  ;;  %v1879_v52 = vpop.f32.mrf.mxu3 }
 0x136   :  { %v1543_v43 = vpop.f32.mrf.mxu1 }
 0x137   :  { %v1880_v16 = vadd.f32 %v1879_v52, %v1711_v60  ;;  %v3214_v52 = vld [vmem:[%s4925_s0 + $0x19c] sm:$0xf]  ;;  %v1544_v60 = vadd.f32 %v1543_v43, %v3801_v45  ;;  %v2542_v45 = vor.u32 %v3217_v20, %v2541_v11  ;;  %v2555_v11 = vld [vmem:[%s4925_s0 + $0x1d4] sm:$0xf0]  ;;  %v2561_v20 = vld [vmem:[%s4925_s0 + $0x1c8] sm:$0xf] }
 0x138   :  { %v2050_v36 = vpop.f32.mrf.mxu0  ;;  %v2538_v47 = vor.u32 %v3214_v52, %v2535_v35  ;;  %v3219_v52 = vld [vmem:[%s4925_s0 + $0x1c4] sm:$0xf] }
 0x139   :  { %v4102_v37 = vadd.f32 %v2048_v49, %v1880_v16 }
 0x13c   :  { %v1712_v30 = vpop.f32.mrf.mxu2 }
 0x13d   :  { %v1713_v4 = vadd.f32 %v1712_v30, %v1544_v60  ;;  %v1881_v5 = vpop.f32.mrf.mxu3 }
 0x13e   :  { %v1546_v46 = vpop.f32.mrf.mxu1 }
 0x13f   :  { %v1882_v25 = vadd.f32 %v1881_v5, %v1713_v4  ;;  %v1547_v7 = vadd.f32 %v1546_v46, %v3833_v61  ;;  %v2553_v61 = vld [vmem:[%s4925_s0 + $0x1c0] sm:$0xf]  ;;  %v3222_v4 = vld [vmem:[%s4925_s0 + $0x1d8] sm:$0xf0] }
 0x140   :  { %v2053_v2 = vpop.f32.mrf.mxu0 }
 0x141   :  { %v4129_v49 = vadd.f32 %v2050_v36, %v1882_v25  ;;  %1585 = vmatmul.bf16.gmra.mxu1 %v2530_v53  ;;  %1754 = vmatmul.bf16.gmra.mxu2 %v2534_v3  ;;  %v2547_v36 = vld [vmem:[%s4925_s0 + $0x1cc] sm:$0xf0]  ;;  %v2558_v25 = vor.u32 %v3219_v52, %v2555_v11  ;;  %v3224_v52 = vld [vmem:[%s4925_s0 + $0x1ec] sm:$0xf] }
 0x142   :  { %1923 = vmatmul.bf16.gmra.mxu3 %v2538_v47  ;;  %v2550_v46 = vor.u32 %v3218_v41, %v2547_v36  ;;  %v2554_v47 = vor.u32 %v3221_v23, %v2553_v61  ;;  %v3223_v61 = vld [vmem:[%s4925_s0 + $0x1e4] sm:$0xf]  ;;  %v3226_v23 = vld [vmem:[%s4925_s0 + $0x1f8] sm:$0xf0] }
 0x143   :  { %2092 = vmatmul.bf16.gmra.mxu0 %v2542_v45 }
 0x144   :  { %v1715_v12 = vpop.f32.mrf.mxu2 }
 0x145   :  { %v1716_v43 = vadd.f32 %v1715_v12, %v1547_v7  ;;  %v1884_v16 = vpop.f32.mrf.mxu3 }
 0x146   :  { %v1548_v60 = vpop.f32.mrf.mxu1 }
 0x147   :  { %v1885_v30 = vadd.f32 %v1884_v16, %v1716_v43  ;;  %v1549_v35 = vadd.f32 %v1548_v60, %v3841_v1  ;;  %v2562_v1 = vor.u32 %v3222_v4, %v2561_v20  ;;  %v2575_v20 = vld [vmem:[%s4925_s0 + $0x1fc] sm:$0xf0]  ;;  %v2581_v4 = vld [vmem:[%s4925_s0 + $0x1f0] sm:$0xf] }
 0x148   :  { %v2055_v21 = vpop.f32.mrf.mxu0 }
 0x149   :  { %v4132_v59 = vadd.f32 %v2053_v2, %v1885_v30 }
 0x14c   :  { %v1717_v5 = vpop.f32.mrf.mxu2 }
 0x14d   :  { %v1718_v53 = vadd.f32 %v1717_v5, %v1549_v35  ;;  %v1886_v3 = vpop.f32.mrf.mxu3 }
 0x14e   :  { %v1551_v45 = vpop.f32.mrf.mxu1 }
 0x14f   :  { %v1887_v2 = vadd.f32 %v1886_v3, %v1718_v53  ;;  %v1552_v43 = vadd.f32 %v1551_v45, %v3873_v17  ;;  %v2573_v17 = vld [vmem:[%s4925_s0 + $0x1e8] sm:$0xf]  ;;  %v3227_v53 = vld [vmem:[%s4925_s0 + $0x200] sm:$0xf0] }
 0x150   :  { %v2058_v7 = vpop.f32.mrf.mxu0 }
 0x151   :  { %v4159_v12 = vadd.f32 %v2055_v21, %v1887_v2  ;;  %1590 = vmatmul.bf16.gmra.mxu1 %v2550_v46  ;;  %1759 = vmatmul.bf16.gmra.mxu2 %v2554_v47  ;;  %v2567_v21 = vld [vmem:[%s4925_s0 + $0x1f4] sm:$0xf0]  ;;  %v2578_v2 = vor.u32 %v3224_v52, %v2575_v20  ;;  %v3229_v52 = vld [vmem:[%s4925_s0 + $0x214] sm:$0xf] }
 0x152   :  { %1928 = vmatmul.bf16.gmra.mxu3 %v2558_v25  ;;  %v2570_v45 = vor.u32 %v3223_v61, %v2567_v21  ;;  %v2574_v25 = vor.u32 %v3226_v23, %v2573_v17  ;;  %v3228_v17 = vld [vmem:[%s4925_s0 + $0x20c] sm:$0xf]  ;;  %v3231_v23 = vld [vmem:[%s4925_s0 + $0x220] sm:$0xf0] }
 0x153   :  { %2097 = vmatmul.bf16.gmra.mxu0 %v2562_v1 }
 0x154   :  { %v1720_v16 = vpop.f32.mrf.mxu2 }
 0x155   :  { %v1721_v60 = vadd.f32 %v1720_v16, %v1552_v43  ;;  %v1889_v30 = vpop.f32.mrf.mxu3 }
 0x156   :  { %v1553_v35 = vpop.f32.mrf.mxu1 }
 0x157   :  { %v1890_v5 = vadd.f32 %v1889_v30, %v1721_v60  ;;  %v1554_v11 = vadd.f32 %v1553_v35, %v3881_v27  ;;  %v2582_v27 = vor.u32 %v3227_v53, %v2581_v4  ;;  %v2595_v4 = vld [vmem:[%s4925_s0 + $0x224] sm:$0xf0]  ;;  %v2601_v53 = vld [vmem:[%s4925_s0 + $0x218] sm:$0xf] }
 0x158   :  { %v2060_v41 = vpop.f32.mrf.mxu0 }
 0x159   :  { %v4162_v36 = vadd.f32 %v2058_v7, %v1890_v5 }
 0x15c   :  { %v1722_v3 = vpop.f32.mrf.mxu2 }
 0x15d   :  { %v1723_v46 = vadd.f32 %v1722_v3, %v1554_v11  ;;  %v1891_v47 = vpop.f32.mrf.mxu3 }
 0x15e   :  { %v1556_v1 = vpop.f32.mrf.mxu1 }
 0x15f   :  { %v1892_v7 = vadd.f32 %v1891_v47, %v1723_v46  ;;  %v1557_v60 = vadd.f32 %v1556_v1, %v3913_v51  ;;  %v2593_v51 = vld [vmem:[%s4925_s0 + $0x210] sm:$0xf]  ;;  %v3232_v46 = vld [vmem:[%s4925_s0 + $0x228] sm:$0xf0] }
 0x160   :  { %v2063_v43 = vpop.f32.mrf.mxu0 }
 0x161   :  { %v4189_v16 = vadd.f32 %v2060_v41, %v1892_v7  ;;  %1595 = vmatmul.bf16.gmra.mxu1 %v2570_v45  ;;  %1764 = vmatmul.bf16.gmra.mxu2 %v2574_v25  ;;  %v2587_v41 = vld [vmem:[%s4925_s0 + $0x21c] sm:$0xf0]  ;;  %v2598_v7 = vor.u32 %v3229_v52, %v2595_v4  ;;  %v3234_v52 = vld [vmem:[%s4925_s0 + $0x23c] sm:$0xf] }
 0x162   :  { %1933 = vmatmul.bf16.gmra.mxu3 %v2578_v2  ;;  %v2590_v1 = vor.u32 %v3228_v17, %v2587_v41  ;;  %v2594_v2 = vor.u32 %v3231_v23, %v2593_v51  ;;  %v3233_v51 = vld [vmem:[%s4925_s0 + $0x234] sm:$0xf]  ;;  %v3236_v23 = vld [vmem:[%s4925_s0 + $0x248] sm:$0xf0] }
 0x163   :  { %2102 = vmatmul.bf16.gmra.mxu0 %v2582_v27 }
 0x164   :  { %v1725_v30 = vpop.f32.mrf.mxu2 }
 0x165   :  { %v1726_v35 = vadd.f32 %v1725_v30, %v1557_v60  ;;  %v1894_v5 = vpop.f32.mrf.mxu3 }
 0x166   :  { %v1558_v11 = vpop.f32.mrf.mxu1 }
 0x167   :  { %v1895_v3 = vadd.f32 %v1894_v5, %v1726_v35  ;;  %v1559_v20 = vadd.f32 %v1558_v11, %v3921_v57  ;;  %v2602_v57 = vor.u32 %v3232_v46, %v2601_v53  ;;  %v2615_v53 = vld [vmem:[%s4925_s0 + $0x24c] sm:$0xf0]  ;;  %v2621_v46 = vld [vmem:[%s4925_s0 + $0x240] sm:$0xf] }
 0x168   :  { %v2065_v61 = vpop.f32.mrf.mxu0 }
 0x169   :  { %v4192_v21 = vadd.f32 %v2063_v43, %v1895_v3 }
 0x16c   :  { %v1727_v47 = vpop.f32.mrf.mxu2 }
 0x16d   :  { %v1728_v45 = vadd.f32 %v1727_v47, %v1559_v20  ;;  %v1896_v25 = vpop.f32.mrf.mxu3 }
 0x16e   :  { %v1561_v27 = vpop.f32.mrf.mxu1 }
 0x16f   :  { %v1897_v43 = vadd.f32 %v1896_v25, %v1728_v45  ;;  %v1562_v35 = vadd.f32 %v1561_v27, %v3953_v29  ;;  %v2613_v29 = vld [vmem:[%s4925_s0 + $0x238] sm:$0xf]  ;;  %v3237_v45 = vld [vmem:[%s4925_s0 + $0x250] sm:$0xf0] }
 0x170   :  { %v2068_v60 = vpop.f32.mrf.mxu0 }
 0x171   :  { %v4219_v30 = vadd.f32 %v2065_v61, %v1897_v43  ;;  %1600 = vmatmul.bf16.gmra.mxu1 %v2590_v1  ;;  %1769 = vmatmul.bf16.gmra.mxu2 %v2594_v2  ;;  %v2607_v61 = vld [vmem:[%s4925_s0 + $0x244] sm:$0xf0]  ;;  %v2618_v43 = vor.u32 %v3234_v52, %v2615_v53  ;;  %v3239_v52 = vld [vmem:[%s4925_s0 + $0x264] sm:$0xf] }
 0x172   :  { %1938 = vmatmul.bf16.gmra.mxu3 %v2598_v7  ;;  %v2610_v27 = vor.u32 %v3233_v51, %v2607_v61  ;;  %v2614_v7 = vor.u32 %v3236_v23, %v2613_v29  ;;  %v3238_v29 = vld [vmem:[%s4925_s0 + $0x25c] sm:$0xf]  ;;  %v3241_v23 = vld [vmem:[%s4925_s0 + $0x270] sm:$0xf0] }
 0x173   :  { %2107 = vmatmul.bf16.gmra.mxu0 %v2602_v57 }
 0x174   :  { %v1730_v5 = vpop.f32.mrf.mxu2 }
 0x175   :  { %v1731_v11 = vadd.f32 %v1730_v5, %v1562_v35  ;;  %v1899_v3 = vpop.f32.mrf.mxu3 }
 0x176   :  { %v1563_v20 = vpop.f32.mrf.mxu1 }
 0x177   :  { %v1900_v47 = vadd.f32 %v1899_v3, %v1731_v11  ;;  %v1564_v4 = vadd.f32 %v1563_v20, %v3961_v33  ;;  %v2622_v33 = vor.u32 %v3237_v45, %v2621_v46  ;;  %v2635_v46 = vld [vmem:[%s4925_s0 + $0x274] sm:$0xf0]  ;;  %v2641_v45 = vld [vmem:[%s4925_s0 + $0x268] sm:$0xf] }
 0x178   :  { %v2070_v17 = vpop.f32.mrf.mxu0 }
 0x179   :  { %v4222_v41 = vadd.f32 %v2068_v60, %v1900_v47 }
 0x17c   :  { %v1732_v25 = vpop.f32.mrf.mxu2 }
 0x17d   :  { %v1733_v1 = vadd.f32 %v1732_v25, %v1564_v4  ;;  %v1901_v2 = vpop.f32.mrf.mxu3 }
 0x17e   :  { %v1566_v57 = vpop.f32.mrf.mxu1 }
 0x17f   :  { %v1902_v60 = vadd.f32 %v1901_v2, %v1733_v1  ;;  %v1567_v11 = vadd.f32 %v1566_v57, %v3993_v13  ;;  %v2633_v13 = vld [vmem:[%s4925_s0 + $0x260] sm:$0xf]  ;;  %v3242_v1 = vld [vmem:[%s4925_s0 + $0x278] sm:$0xf0] }
 0x180   :  { %v2073_v35 = vpop.f32.mrf.mxu0 }
 0x181   :  { %v4249_v5 = vadd.f32 %v2070_v17, %v1902_v60  ;;  %1605 = vmatmul.bf16.gmra.mxu1 %v2610_v27  ;;  %1774 = vmatmul.bf16.gmra.mxu2 %v2614_v7  ;;  %v2627_v17 = vld [vmem:[%s4925_s0 + $0x26c] sm:$0xf0]  ;;  %v2638_v60 = vor.u32 %v3239_v52, %v2635_v46  ;;  %v3244_v52 = vld [vmem:[%s4925_s0 + $0x28c] sm:$0xf] }
 0x182   :  { %1943 = vmatmul.bf16.gmra.mxu3 %v2618_v43  ;;  %v2630_v57 = vor.u32 %v3238_v29, %v2627_v17  ;;  %v2634_v43 = vor.u32 %v3241_v23, %v2633_v13  ;;  %v3243_v13 = vld [vmem:[%s4925_s0 + $0x284] sm:$0xf]  ;;  %v3246_v23 = vld [vmem:[%s4925_s0 + $0x298] sm:$0xf0] }
 0x183   :  { %2112 = vmatmul.bf16.gmra.mxu0 %v2622_v33 }
 0x184   :  { %v1735_v3 = vpop.f32.mrf.mxu2 }
 0x185   :  { %v1736_v20 = vadd.f32 %v1735_v3, %v1567_v11  ;;  %v1904_v47 = vpop.f32.mrf.mxu3 }
 0x186   :  { %v1568_v4 = vpop.f32.mrf.mxu1 }
 0x187   :  { %v1905_v25 = vadd.f32 %v1904_v47, %v1736_v20  ;;  %v1569_v53 = vadd.f32 %v1568_v4, %v4001_v9  ;;  %v2642_v9 = vor.u32 %v3242_v1, %v2641_v45  ;;  %v2655_v45 = vld [vmem:[%s4925_s0 + $0x29c] sm:$0xf0]  ;;  %v2661_v1 = vld [vmem:[%s4925_s0 + $0x290] sm:$0xf] }
 0x188   :  { %v2075_v51 = vpop.f32.mrf.mxu0 }
 0x189   :  { %v4252_v61 = vadd.f32 %v2073_v35, %v1905_v25 }
 0x18c   :  { %v1737_v2 = vpop.f32.mrf.mxu2 }
 0x18d   :  { %v1738_v27 = vadd.f32 %v1737_v2, %v1569_v53  ;;  %v1906_v7 = vpop.f32.mrf.mxu3 }
 0x18e   :  { %v1571_v33 = vpop.f32.mrf.mxu1 }
 0x18f   :  { %v1907_v35 = vadd.f32 %v1906_v7, %v1738_v27  ;;  %v1572_v20 = vadd.f32 %v1571_v33, %v4033_v40  ;;  %v2653_v40 = vld [vmem:[%s4925_s0 + $0x288] sm:$0xf]  ;;  %v3247_v27 = vld [vmem:[%s4925_s0 + $0x2a0] sm:$0xf0] }
 0x190   :  { %v2078_v11 = vpop.f32.mrf.mxu0 }
 0x191   :  { %v4279_v3 = vadd.f32 %v2075_v51, %v1907_v35  ;;  %1610 = vmatmul.bf16.gmra.mxu1 %v2630_v57  ;;  %1779 = vmatmul.bf16.gmra.mxu2 %v2634_v43  ;;  %v2647_v51 = vld [vmem:[%s4925_s0 + $0x294] sm:$0xf0]  ;;  %v2658_v35 = vor.u32 %v3244_v52, %v2655_v45  ;;  %v3249_v52 = vld [vmem:[%s4925_s0 + $0x2b4] sm:$0xf] }
 0x192   :  { %1948 = vmatmul.bf16.gmra.mxu3 %v2638_v60  ;;  %v2650_v33 = vor.u32 %v3243_v13, %v2647_v51  ;;  %v2654_v60 = vor.u32 %v3246_v23, %v2653_v40  ;;  %v3248_v40 = vld [vmem:[%s4925_s0 + $0x2ac] sm:$0xf]  ;;  %v3251_v23 = vld [vmem:[%s4925_s0 + $0x2c0] sm:$0xf0] }
 0x193   :  { %2117 = vmatmul.bf16.gmra.mxu0 %v2642_v9 }
 0x194   :  { %v1740_v47 = vpop.f32.mrf.mxu2 }
 0x195   :  { %v1741_v4 = vadd.f32 %v1740_v47, %v1572_v20  ;;  %v1909_v25 = vpop.f32.mrf.mxu3 }
 0x196   :  { %v1573_v53 = vpop.f32.mrf.mxu1 }
 0x197   :  { %v1910_v2 = vadd.f32 %v1909_v25, %v1741_v4  ;;  %v1574_v46 = vadd.f32 %v1573_v53, %v4041_v55  ;;  %v2662_v55 = vor.u32 %v3247_v27, %v2661_v1  ;;  %v2675_v27 = vld [vmem:[%s4925_s0 + $0x2c4] sm:$0xf0] }
 0x198   :  { %v2080_v29 = vpop.f32.mrf.mxu0 }
 0x199   :  { %v4282_v17 = vadd.f32 %v2078_v11, %v1910_v2 }
 0x19c   :  { %v1742_v7 = vpop.f32.mrf.mxu2 }
 0x19d   :  { %v1743_v57 = vadd.f32 %v1742_v7, %v1574_v46  ;;  %v1911_v43 = vpop.f32.mrf.mxu3 }
 0x19e   :  { %v1576_v9 = vpop.f32.mrf.mxu1 }
 0x19f   :  { %v1912_v11 = vadd.f32 %v1911_v43, %v1743_v57  ;;  %v1577_v4 = vadd.f32 %v1576_v9, %v3751_v18  ;;  %v2673_v18 = vld [vmem:[%s4925_s0 + $0x2b0] sm:$0xf]  ;;  %v2681_v57 = vld [vmem:[%s4925_s0 + $0x2b8] sm:$0xf]  ;;  %v3252_v43 = vld [vmem:[%s4925_s0 + $0x2c8] sm:$0xf0] }
 0x1a0   :  { %v2083_v20 = vpop.f32.mrf.mxu0 }
 0x1a1   :  { %v4309_v47 = vadd.f32 %v2080_v29, %v1912_v11  ;;  %1615 = vmatmul.bf16.gmra.mxu1 %v2650_v33  ;;  %1784 = vmatmul.bf16.gmra.mxu2 %v2654_v60  ;;  %v2667_v29 = vld [vmem:[%s4925_s0 + $0x2bc] sm:$0xf0] }
 0x1a2   :  { %1953 = vmatmul.bf16.gmra.mxu3 %v2658_v35  ;;  %v2670_v35 = vor.u32 %v3248_v40, %v2667_v29 }
 0x1a3   :  { %2122 = vmatmul.bf16.gmra.mxu0 %v2662_v55  ;;  %v2674_v55 = vor.u32 %v3251_v23, %v2673_v18 }
 0x1a4   :  { %v1745_v25 = vpop.f32.mrf.mxu2 }
 0x1a5   :  { %v1746_v53 = vadd.f32 %v1745_v25, %v1577_v4  ;;  %v1914_v2 = vpop.f32.mrf.mxu3 }
 0x1a6   :  { %v1578_v46 = vpop.f32.mrf.mxu1 }
 0x1a7   :  { %v1915_v7 = vadd.f32 %v1914_v2, %v1746_v53  ;;  %v1579_v1 = vadd.f32 %v1578_v46, %v3759_v24  ;;  %v2682_v24 = vor.u32 %v3252_v43, %v2681_v57  ;;  %v3256_v57 = vld [vmem:[%s4925_s0 + $0x2e8] sm:$0xf0]  ;;  %v3254_v43 = vld [vmem:[%s4925_s0 + $0x2dc] sm:$0xf] }
 0x1a8   :  { %v2085_v13 = vpop.f32.mrf.mxu0 }
 0x1a9   :  { %v4312_v51 = vadd.f32 %v2083_v20, %v1915_v7  ;;  %v2678_v20 = vor.u32 %v3249_v52, %v2675_v27  ;;  %v2687_v27 = vld [vmem:[%s4925_s0 + $0x2e4] sm:$0xf0] }
 0x1ab   :  { %v2203_v45 = vmax.f32 %v4072_v8, %v4312_v51 }
 0x1ac   :  { %v1747_v33 = vpop.f32.mrf.mxu2 }
 0x1ad   :  { %v1748_v60 = vadd.f32 %v1747_v33, %v1579_v1  ;;  %v1916_v9 = vpop.f32.mrf.mxu3 }
 0x1ae   :  { %v1581_v11 = vpop.f32.mrf.mxu1 }
 0x1af   :  { %v1917_v4 = vadd.f32 %v1916_v9, %v1748_v60  ;;  %v1582_v46 = vadd.f32 %v1581_v11, %v3791_v38  ;;  %v2693_v38 = vld [vmem:[%s4925_s0 + $0x2d8] sm:$0xf]  ;;  %v2695_v9 = vld [vmem:[%s4925_s0 + $0x2ec] sm:$0xf0] }
 0x1b0   :  { %v2088_v25 = vpop.f32.mrf.mxu0 }
 0x1b1   :  { %v4341_v53 = vadd.f32 %v2085_v13, %v1917_v4  ;;  %1620 = vmatmul.bf16.gmra.mxu1 %v2670_v35  ;;  %1789 = vmatmul.bf16.gmra.mxu2 %v2674_v55  ;;  %v3253_v13 = vld [vmem:[%s4925_s0 + $0x2d4] sm:$0xf]  ;;  %v2701_v35 = vld [vmem:[%s4925_s0 + $0x2e0] sm:$0xf] }
 0x1b2   :  { %1958 = vmatmul.bf16.gmra.mxu3 %v2678_v20  ;;  %v3257_v55 = vld [vmem:[%s4925_s0 + $0x2f0] sm:$0xf0]  ;;  %v2690_v4 = vor.u32 %v3253_v13, %v2687_v27 }
 0x1b3   :  { %2127 = vmatmul.bf16.gmra.mxu0 %v2682_v24  ;;  %v2206_v2 = vmax.f32 %v4099_v50, %v4341_v53  ;;  %v2853_v50 = vld [vmem:[%s4925_s0 + $0x418] sm:$0xf]  ;;  %v3294_v53 = vld [vmem:[%s4925_s0 + $0x41c] sm:$0xf] }
 0x1b4   :  { %v1750_v7 = vpop.f32.mrf.mxu2 }
 0x1b5   :  { %v1751_v1 = vadd.f32 %v1750_v7, %v1582_v46  ;;  %v1919_v40 = vpop.f32.mrf.mxu3  ;;  %v2698_v7 = vor.u32 %v3254_v43, %v2695_v9  ;;  %v2707_v9 = vld [vmem:[%s4925_s0 + $0x30c] sm:$0xf0] }
 0x1b6   :  { %v1583_v29 = vpop.f32.mrf.mxu1 }
 0x1b7   :  { %v1920_v18 = vadd.f32 %v1919_v40, %v1751_v1  ;;  %v1584_v60 = vadd.f32 %v1583_v29, %v3799_v44  ;;  %v2702_v44 = vor.u32 %v3257_v55, %v2701_v35  ;;  %v3259_v35 = vld [vmem:[%s4925_s0 + $0x304] sm:$0xf] }
 0x1b8   :  { %v2090_v23 = vpop.f32.mrf.mxu0 }
 0x1b9   :  { %v4346_v52 = vadd.f32 %v2088_v25, %v1920_v18  ;;  %v2694_v25 = vor.u32 %v3256_v57, %v2693_v38 }
 0x1bc   :  { %v1752_v11 = vpop.f32.mrf.mxu2 }
 0x1bd   :  { %v1753_v20 = vadd.f32 %v1752_v11, %v1584_v60  ;;  %v1921_v24 = vpop.f32.mrf.mxu3 }
 0x1be   :  { %v1586_v46 = vpop.f32.mrf.mxu1 }
 0x1bf   :  { %v1922_v1 = vadd.f32 %v1921_v24, %v1753_v20  ;;  %v1587_v33 = vadd.f32 %v1586_v46, %v3831_v58  ;;  %v2713_v58 = vld [vmem:[%s4925_s0 + $0x300] sm:$0xf]  ;;  %v2715_v24 = vld [vmem:[%s4925_s0 + $0x314] sm:$0xf0] }
 0x1c0   :  { %v2093_v40 = vpop.f32.mrf.mxu0 }
 0x1c1   :  { %v4375_v29 = vadd.f32 %v2090_v23, %v1922_v1  ;;  %1625 = vmatmul.bf16.gmra.mxu1 %v2690_v4  ;;  %1794 = vmatmul.bf16.gmra.mxu2 %v2694_v25  ;;  %v3258_v23 = vld [vmem:[%s4925_s0 + $0x2fc] sm:$0xf]  ;;  %v2721_v4 = vld [vmem:[%s4925_s0 + $0x308] sm:$0xf] }
 0x1c2   :  { %1963 = vmatmul.bf16.gmra.mxu3 %v2698_v7  ;;  %v3262_v25 = vld [vmem:[%s4925_s0 + $0x318] sm:$0xf0]  ;;  %v2710_v1 = vor.u32 %v3258_v23, %v2707_v9 }
 0x1c3   :  { %2132 = vmatmul.bf16.gmra.mxu0 %v2702_v44 }
 0x1c4   :  { %v1755_v60 = vpop.f32.mrf.mxu2 }
 0x1c5   :  { %v1756_v11 = vadd.f32 %v1755_v60, %v1587_v33  ;;  %v1924_v13 = vpop.f32.mrf.mxu3  ;;  %v3261_v33 = vld [vmem:[%s4925_s0 + $0x310] sm:$0xf0] }
 0x1c6   :  { %v1588_v27 = vpop.f32.mrf.mxu1 }
 0x1c7   :  { %v1925_v38 = vadd.f32 %v1924_v13, %v1756_v11  ;;  %v1589_v20 = vadd.f32 %v1588_v27, %v3839_v0  ;;  %v2718_v11 = vor.u32 %v3259_v35, %v2715_v24  ;;  %v2722_v0 = vor.u32 %v3262_v25, %v2721_v4  ;;  %v2727_v24 = vld [vmem:[%s4925_s0 + $0x334] sm:$0xf0]  ;;  %v3264_v4 = vld [vmem:[%s4925_s0 + $0x32c] sm:$0xf] }
 0x1c8   :  { %v2095_v57 = vpop.f32.mrf.mxu0 }
 0x1c9   :  { %v4380_v43 = vadd.f32 %v2093_v40, %v1925_v38  ;;  %v2714_v40 = vor.u32 %v3261_v33, %v2713_v58 }
 0x1cc   :  { %v1757_v46 = vpop.f32.mrf.mxu2 }
 0x1cd   :  { %v1758_v7 = vadd.f32 %v1757_v46, %v1589_v20  ;;  %v1926_v44 = vpop.f32.mrf.mxu3 }
 0x1ce   :  { %v1591_v60 = vpop.f32.mrf.mxu1 }
 0x1cf   :  { %v1927_v13 = vadd.f32 %v1926_v44, %v1758_v7  ;;  %v1592_v18 = vadd.f32 %v1591_v60, %v3871_v14  ;;  %v2733_v14 = vld [vmem:[%s4925_s0 + $0x328] sm:$0xf]  ;;  %v2735_v44 = vld [vmem:[%s4925_s0 + $0x33c] sm:$0xf0] }
 0x1d0   :  { %v2098_v27 = vpop.f32.mrf.mxu0 }
 0x1d1   :  { %v4409_v38 = vadd.f32 %v2095_v57, %v1927_v13  ;;  %1630 = vmatmul.bf16.gmra.mxu1 %v2710_v1  ;;  %1799 = vmatmul.bf16.gmra.mxu2 %v2714_v40  ;;  %v3263_v57 = vld [vmem:[%s4925_s0 + $0x324] sm:$0xf]  ;;  %v2741_v1 = vld [vmem:[%s4925_s0 + $0x330] sm:$0xf] }
 0x1d2   :  { %1968 = vmatmul.bf16.gmra.mxu3 %v2718_v11  ;;  %v3267_v40 = vld [vmem:[%s4925_s0 + $0x340] sm:$0xf0]  ;;  %v2730_v13 = vor.u32 %v3263_v57, %v2727_v24 }
 0x1d3   :  { %2137 = vmatmul.bf16.gmra.mxu0 %v2722_v0 }
 0x1d4   :  { %v1760_v20 = vpop.f32.mrf.mxu2 }
 0x1d5   :  { %v1761_v46 = vadd.f32 %v1760_v20, %v1592_v18  ;;  %v1929_v23 = vpop.f32.mrf.mxu3  ;;  %v3266_v18 = vld [vmem:[%s4925_s0 + $0x338] sm:$0xf0] }
 0x1d6   :  { %v1593_v9 = vpop.f32.mrf.mxu1 }
 0x1d7   :  { %v1930_v58 = vadd.f32 %v1929_v23, %v1761_v46  ;;  %v1594_v7 = vadd.f32 %v1593_v9, %v3879_v26  ;;  %v2738_v46 = vor.u32 %v3264_v4, %v2735_v44  ;;  %v2742_v26 = vor.u32 %v3267_v40, %v2741_v1  ;;  %v2747_v44 = vld [vmem:[%s4925_s0 + $0x35c] sm:$0xf0]  ;;  %v3269_v1 = vld [vmem:[%s4925_s0 + $0x354] sm:$0xf] }
 0x1d8   :  { %v2100_v33 = vpop.f32.mrf.mxu0 }
 0x1d9   :  { %v4414_v35 = vadd.f32 %v2098_v27, %v1930_v58  ;;  %v2734_v27 = vor.u32 %v3266_v18, %v2733_v14 }
 0x1dc   :  { %v1762_v60 = vpop.f32.mrf.mxu2 }
 0x1dd   :  { %v1763_v11 = vadd.f32 %v1762_v60, %v1594_v7  ;;  %v1931_v0 = vpop.f32.mrf.mxu3 }
 0x1de   :  { %v1596_v20 = vpop.f32.mrf.mxu1 }
 0x1df   :  { %v1932_v23 = vadd.f32 %v1931_v0, %v1763_v11  ;;  %v1597_v55 = vadd.f32 %v1596_v20, %v3911_v48  ;;  %v2753_v48 = vld [vmem:[%s4925_s0 + $0x350] sm:$0xf]  ;;  %v2755_v0 = vld [vmem:[%s4925_s0 + $0x364] sm:$0xf0] }
 0x1e0   :  { %v2103_v9 = vpop.f32.mrf.mxu0 }
 0x1e1   :  { %v4443_v58 = vadd.f32 %v2100_v33, %v1932_v23  ;;  %1635 = vmatmul.bf16.gmra.mxu1 %v2730_v13  ;;  %1804 = vmatmul.bf16.gmra.mxu2 %v2734_v27  ;;  %v3268_v33 = vld [vmem:[%s4925_s0 + $0x34c] sm:$0xf]  ;;  %v2761_v13 = vld [vmem:[%s4925_s0 + $0x358] sm:$0xf] }
 0x1e2   :  { %1973 = vmatmul.bf16.gmra.mxu3 %v2738_v46  ;;  %v3272_v27 = vld [vmem:[%s4925_s0 + $0x368] sm:$0xf0]  ;;  %v2750_v23 = vor.u32 %v3268_v33, %v2747_v44 }
 0x1e3   :  { %2142 = vmatmul.bf16.gmra.mxu0 %v2742_v26 }
 0x1e4   :  { %v1765_v7 = vpop.f32.mrf.mxu2 }
 0x1e5   :  { %v1766_v60 = vadd.f32 %v1765_v7, %v1597_v55  ;;  %v1934_v57 = vpop.f32.mrf.mxu3  ;;  %v3271_v55 = vld [vmem:[%s4925_s0 + $0x360] sm:$0xf0] }
 0x1e6   :  { %v1598_v24 = vpop.f32.mrf.mxu1 }
 0x1e7   :  { %v1935_v14 = vadd.f32 %v1934_v57, %v1766_v60  ;;  %v1599_v11 = vadd.f32 %v1598_v24, %v3919_v56  ;;  %v2758_v60 = vor.u32 %v3269_v1, %v2755_v0  ;;  %v2762_v56 = vor.u32 %v3272_v27, %v2761_v13  ;;  %v2767_v0 = vld [vmem:[%s4925_s0 + $0x384] sm:$0xf0]  ;;  %v3274_v13 = vld [vmem:[%s4925_s0 + $0x37c] sm:$0xf] }
 0x1e8   :  { %v2105_v18 = vpop.f32.mrf.mxu0 }
 0x1e9   :  { %v4448_v4 = vadd.f32 %v2103_v9, %v1935_v14  ;;  %v2754_v9 = vor.u32 %v3271_v55, %v2753_v48 }
 0x1ec   :  { %v1767_v20 = vpop.f32.mrf.mxu2 }
 0x1ed   :  { %v1768_v46 = vadd.f32 %v1767_v20, %v1599_v11  ;;  %v1936_v26 = vpop.f32.mrf.mxu3 }
 0x1ee   :  { %v1601_v7 = vpop.f32.mrf.mxu1 }
 0x1ef   :  { %v1937_v57 = vadd.f32 %v1936_v26, %v1768_v46  ;;  %v1602_v25 = vadd.f32 %v1601_v7, %v3951_v15  ;;  %v2773_v15 = vld [vmem:[%s4925_s0 + $0x378] sm:$0xf]  ;;  %v2775_v26 = vld [vmem:[%s4925_s0 + $0x38c] sm:$0xf0] }
 0x1f0   :  { %v2108_v24 = vpop.f32.mrf.mxu0 }
 0x1f1   :  { %v4477_v14 = vadd.f32 %v2105_v18, %v1937_v57  ;;  %1640 = vmatmul.bf16.gmra.mxu1 %v2750_v23  ;;  %1809 = vmatmul.bf16.gmra.mxu2 %v2754_v9  ;;  %v3273_v18 = vld [vmem:[%s4925_s0 + $0x374] sm:$0xf]  ;;  %v2781_v23 = vld [vmem:[%s4925_s0 + $0x380] sm:$0xf] }
 0x1f2   :  { %1978 = vmatmul.bf16.gmra.mxu3 %v2758_v60  ;;  %v3277_v9 = vld [vmem:[%s4925_s0 + $0x390] sm:$0xf0]  ;;  %v2770_v57 = vor.u32 %v3273_v18, %v2767_v0 }
 0x1f3   :  { %2147 = vmatmul.bf16.gmra.mxu0 %v2762_v56 }
 0x1f4   :  { %v1770_v11 = vpop.f32.mrf.mxu2 }
 0x1f5   :  { %v1771_v20 = vadd.f32 %v1770_v11, %v1602_v25  ;;  %v1939_v33 = vpop.f32.mrf.mxu3  ;;  %v3276_v25 = vld [vmem:[%s4925_s0 + $0x388] sm:$0xf0] }
 0x1f6   :  { %v1603_v44 = vpop.f32.mrf.mxu1 }
 0x1f7   :  { %v1940_v48 = vadd.f32 %v1939_v33, %v1771_v20  ;;  %v1604_v46 = vadd.f32 %v1603_v44, %v3959_v32  ;;  %v2778_v20 = vor.u32 %v3274_v13, %v2775_v26  ;;  %v2782_v32 = vor.u32 %v3277_v9, %v2781_v23  ;;  %v2787_v26 = vld [vmem:[%s4925_s0 + $0x3ac] sm:$0xf0]  ;;  %v3279_v23 = vld [vmem:[%s4925_s0 + $0x3a4] sm:$0xf] }
 0x1f8   :  { %v2110_v55 = vpop.f32.mrf.mxu0 }
 0x1f9   :  { %v4482_v1 = vadd.f32 %v2108_v24, %v1940_v48  ;;  %v2774_v24 = vor.u32 %v3276_v25, %v2773_v15 }
 0x1fc   :  { %v1772_v7 = vpop.f32.mrf.mxu2 }
 0x1fd   :  { %v1773_v60 = vadd.f32 %v1772_v7, %v1604_v46  ;;  %v1941_v56 = vpop.f32.mrf.mxu3 }
 0x1fe   :  { %v1606_v11 = vpop.f32.mrf.mxu1 }
 0x1ff   :  { %v1942_v33 = vadd.f32 %v1941_v56, %v1773_v60  ;;  %v1607_v40 = vadd.f32 %v1606_v11, %v3991_v6  ;;  %v2793_v6 = vld [vmem:[%s4925_s0 + $0x3a0] sm:$0xf]  ;;  %v2795_v56 = vld [vmem:[%s4925_s0 + $0x3b4] sm:$0xf0] }
 0x200   :  { %v2113_v44 = vpop.f32.mrf.mxu0 }
 0x201   :  { %v4511_v48 = vadd.f32 %v2110_v55, %v1942_v33  ;;  %1645 = vmatmul.bf16.gmra.mxu1 %v2770_v57  ;;  %1814 = vmatmul.bf16.gmra.mxu2 %v2774_v24  ;;  %v3278_v55 = vld [vmem:[%s4925_s0 + $0x39c] sm:$0xf]  ;;  %v2801_v57 = vld [vmem:[%s4925_s0 + $0x3a8] sm:$0xf] }
 0x202   :  { %1983 = vmatmul.bf16.gmra.mxu3 %v2778_v20  ;;  %v3282_v24 = vld [vmem:[%s4925_s0 + $0x3b8] sm:$0xf0]  ;;  %v2790_v33 = vor.u32 %v3278_v55, %v2787_v26 }
 0x203   :  { %2152 = vmatmul.bf16.gmra.mxu0 %v2782_v32 }
 0x204   :  { %v1775_v46 = vpop.f32.mrf.mxu2 }
 0x205   :  { %v1776_v7 = vadd.f32 %v1775_v46, %v1607_v40  ;;  %v1944_v18 = vpop.f32.mrf.mxu3  ;;  %v3281_v40 = vld [vmem:[%s4925_s0 + $0x3b0] sm:$0xf0] }
 0x206   :  { %v1608_v0 = vpop.f32.mrf.mxu1 }
 0x207   :  { %v1945_v15 = vadd.f32 %v1944_v18, %v1776_v7  ;;  %v1609_v60 = vadd.f32 %v1608_v0, %v3999_v31  ;;  %v2798_v7 = vor.u32 %v3279_v23, %v2795_v56  ;;  %v2802_v31 = vor.u32 %v3282_v24, %v2801_v57  ;;  %v2807_v56 = vld [vmem:[%s4925_s0 + $0x3d4] sm:$0xf0]  ;;  %v3284_v57 = vld [vmem:[%s4925_s0 + $0x3cc] sm:$0xf] }
 0x208   :  { %v2115_v25 = vpop.f32.mrf.mxu0 }
 0x209   :  { %v4516_v13 = vadd.f32 %v2113_v44, %v1945_v15  ;;  %v2794_v44 = vor.u32 %v3281_v40, %v2793_v6 }
 0x20c   :  { %v1777_v11 = vpop.f32.mrf.mxu2 }
 0x20d   :  { %v1778_v20 = vadd.f32 %v1777_v11, %v1609_v60  ;;  %v1946_v32 = vpop.f32.mrf.mxu3 }
 0x20e   :  { %v1611_v46 = vpop.f32.mrf.mxu1 }
 0x20f   :  { %v1947_v18 = vadd.f32 %v1946_v32, %v1778_v20  ;;  %v1612_v27 = vadd.f32 %v1611_v46, %v4031_v28  ;;  %v2813_v28 = vld [vmem:[%s4925_s0 + $0x3c8] sm:$0xf]  ;;  %v2815_v32 = vld [vmem:[%s4925_s0 + $0x3dc] sm:$0xf0] }
 0x210   :  { %v2118_v0 = vpop.f32.mrf.mxu0 }
 0x211   :  { %v4545_v15 = vadd.f32 %v2115_v25, %v1947_v18  ;;  %1650 = vmatmul.bf16.gmra.mxu1 %v2790_v33  ;;  %1819 = vmatmul.bf16.gmra.mxu2 %v2794_v44  ;;  %v3283_v25 = vld [vmem:[%s4925_s0 + $0x3c4] sm:$0xf]  ;;  %v2821_v33 = vld [vmem:[%s4925_s0 + $0x3d0] sm:$0xf] }
 0x212   :  { %1988 = vmatmul.bf16.gmra.mxu3 %v2798_v7  ;;  %v3287_v44 = vld [vmem:[%s4925_s0 + $0x3e0] sm:$0xf0]  ;;  %v2810_v18 = vor.u32 %v3283_v25, %v2807_v56 }
 0x213   :  { %2157 = vmatmul.bf16.gmra.mxu0 %v2802_v31 }
 0x214   :  { %v1780_v60 = vpop.f32.mrf.mxu2 }
 0x215   :  { %v1781_v11 = vadd.f32 %v1780_v60, %v1612_v27  ;;  %v1949_v55 = vpop.f32.mrf.mxu3  ;;  %v3286_v27 = vld [vmem:[%s4925_s0 + $0x3d8] sm:$0xf0] }
 0x216   :  { %v1613_v26 = vpop.f32.mrf.mxu1 }
 0x217   :  { %v1950_v6 = vadd.f32 %v1949_v55, %v1781_v11  ;;  %v1614_v20 = vadd.f32 %v1613_v26, %v4039_v63  ;;  %v2818_v11 = vor.u32 %v3284_v57, %v2815_v32  ;;  %v2822_v63 = vor.u32 %v3287_v44, %v2821_v33  ;;  %v2827_v32 = vld [vmem:[%s4925_s0 + $0x3fc] sm:$0xf0]  ;;  %v2833_v33 = vld [vmem:[%s4925_s0 + $0x3f0] sm:$0xf] }
 0x218   :  { %v2120_v40 = vpop.f32.mrf.mxu0 }
 0x219   :  { %v4550_v23 = vadd.f32 %v2118_v0, %v1950_v6  ;;  %v2814_v0 = vor.u32 %v3286_v27, %v2813_v28 }
 0x21c   :  { %v1782_v46 = vpop.f32.mrf.mxu2 }
 0x21d   :  { %v1783_v7 = vadd.f32 %v1782_v46, %v1614_v20  ;;  %v1951_v31 = vpop.f32.mrf.mxu3 }
 0x21e   :  { %v1616_v60 = vpop.f32.mrf.mxu1 }
 0x21f   :  { %v1952_v55 = vadd.f32 %v1951_v31, %v1783_v7  ;;  %v1617_v9 = vadd.f32 %v1616_v60, %v3755_v22  ;;  %v3291_v22 = vld [vmem:[%s4925_s0 + $0x400] sm:$0xf0]  ;;  %v2835_v31 = vld [vmem:[%s4925_s0 + $0x404] sm:$0xf0] }
 0x220   :  { %v2123_v26 = vpop.f32.mrf.mxu0  ;;  %v2834_v51 = vor.u32 %v3291_v22, %v2833_v33 }
 0x221   :  { %v4579_v6 = vadd.f32 %v2120_v40, %v1952_v55  ;;  %1655 = vmatmul.bf16.gmra.mxu1 %v2810_v18  ;;  %1824 = vmatmul.bf16.gmra.mxu2 %v2814_v0  ;;  %v3288_v40 = vld [vmem:[%s4925_s0 + $0x3ec] sm:$0xf]  ;;  %v2841_v18 = vld [vmem:[%s4925_s0 + $0x3f8] sm:$0xf] }
 0x222   :  { %1993 = vmatmul.bf16.gmra.mxu3 %v2818_v11  ;;  %v3292_v0 = vld [vmem:[%s4925_s0 + $0x408] sm:$0xf0]  ;;  %v2830_v8 = vor.u32 %v3288_v40, %v2827_v32 }
 0x223   :  { %2162 = vmatmul.bf16.gmra.mxu0 %v2822_v63  ;;  %v2248_v24 = vmax.f32 %v4309_v47, %v4579_v6  ;;  %v4853_v47 = vld [vmem:[%s4926_s2] ss:$0 sm:$0xff] }
 0x224   :  { %v1785_v20 = vpop.f32.mrf.mxu2 }
 0x225   :  { %v1786_v46 = vadd.f32 %v1785_v20, %v1617_v9  ;;  %v1954_v25 = vpop.f32.mrf.mxu3  ;;  %v3289_v9 = vld [vmem:[%s4925_s0 + $0x3f4] sm:$0xf] }
 0x226   :  { %v1618_v56 = vpop.f32.mrf.mxu1  ;;  %v2838_v55 = vor.u32 %v3289_v9, %v2835_v31 }
 0x227   :  { %v1955_v28 = vadd.f32 %v1954_v25, %v1786_v46  ;;  %v1619_v7 = vadd.f32 %v1618_v56, %v3787_v34  ;;  %v2842_v34 = vor.u32 %v3292_v0, %v2841_v18  ;;  %v2855_v0 = vld [vmem:[%s4925_s0 + $0x42c] sm:$0xf0] }
 0x228   :  { %v2125_v27 = vpop.f32.mrf.mxu0 }
 0x229   :  { %v2124_v57 = vadd.f32 %v2123_v26, %v1955_v28 }
 0x22b   :  { %v4602_v44 = vmax.f32 %v2203_v45, %v2124_v57 }
 0x22c   :  { %v1787_v60 = vpop.f32.mrf.mxu2 }
 0x22d   :  { %v1788_v11 = vadd.f32 %v1787_v60, %v1619_v7  ;;  %v1956_v63 = vpop.f32.mrf.mxu3  ;;  %v2847_v7 = vld [vmem:[%s4925_s0 + $0x424] sm:$0xf0]  ;;  %v2861_v60 = vld [vmem:[%s4925_s0 + $0x420] sm:$0xf] }
 0x22e   :  { %v1621_v45 = vpop.f32.mrf.mxu1 }
 0x22f   :  { %v1957_v26 = vadd.f32 %v1956_v63, %v1788_v11  ;;  %v1622_v56 = vadd.f32 %v1621_v45, %v3795_v42  ;;  %v3296_v42 = vld [vmem:[%s4925_s0 + $0x428] sm:$0xf0]  ;;  %v3297_v11 = vld [vmem:[%s4925_s0 + $0x430] sm:$0xf0] }
 0x230   :  { %v2128_v20 = vpop.f32.mrf.mxu0 }
 0x231   :  { %v2126_v46 = vadd.f32 %v2125_v27, %v1957_v26  ;;  %1660 = vmatmul.bf16.gmra.mxu1 %v2830_v8  ;;  %1829 = vmatmul.bf16.gmra.mxu2 %v2834_v51  ;;  %v3293_v27 = vld [vmem:[%s4925_s0 + $0x414] sm:$0xf] }
 0x232   :  { %1998 = vmatmul.bf16.gmra.mxu3 %v2838_v55  ;;  %v2858_v55 = vor.u32 %v3294_v53, %v2855_v0  ;;  %v2881_v0 = vld [vmem:[%s4925_s0 + $0x448] sm:$0xf] }
 0x233   :  { %2167 = vmatmul.bf16.gmra.mxu0 %v2842_v34  ;;  %v4617_v25 = vmax.f32 %v2206_v2, %v2126_v46  ;;  %v4952_v2 = vmax.f32 %v4102_v37, %v4346_v52  ;;  %v2850_v37 = vor.u32 %v3293_v27, %v2847_v7  ;;  %v2854_v52 = vor.u32 %v3296_v42, %v2853_v50  ;;  %v2867_v50 = vld [vmem:[%s4925_s0 + $0x44c] sm:$0xf0] }
 0x234   :  { %v1790_v28 = vpop.f32.mrf.mxu2  ;;  %v4953_v46 = vmax.f32 %v4129_v49, %v4375_v29  ;;  %v2873_v49 = vld [vmem:[%s4925_s0 + $0x440] sm:$0xf]  ;;  %v3299_v29 = vld [vmem:[%s4925_s0 + $0x444] sm:$0xf]  ;;  %v4954_v42 = vmax.f32 %v4132_v59, %v4380_v43 }
 0x235   :  { %v1791_v57 = vadd.f32 %v1790_v28, %v1622_v56  ;;  %v1959_v40 = vpop.f32.mrf.mxu3 }
 0x236   :  { %v1623_v32 = vpop.f32.mrf.mxu1 }
 0x237   :  { %v1960_v33 = vadd.f32 %v1959_v40, %v1791_v57  ;;  %v1624_v18 = vadd.f32 %v1623_v32, %v3827_v54  ;;  %v2862_v54 = vor.u32 %v3297_v11, %v2861_v60  ;;  %v3302_v60 = vld [vmem:[%s4925_s0 + $0x458] sm:$0xf0] }
 0x238   :  { %v2130_v22 = vpop.f32.mrf.mxu0 }
 0x239   :  { %v2129_v9 = vadd.f32 %v2128_v20, %v1960_v33 }
 0x23b   :  { %v4638_v31 = vmax.f32 %v4952_v2, %v2129_v9 }
 0x23c   :  { %v1792_v63 = vpop.f32.mrf.mxu2 }
 0x23d   :  { %v1793_v8 = vadd.f32 %v1792_v63, %v1624_v18  ;;  %v1961_v51 = vpop.f32.mrf.mxu3  ;;  %v2875_v18 = vld [vmem:[%s4925_s0 + $0x454] sm:$0xf0] }
 0x23e   :  { %v1626_v45 = vpop.f32.mrf.mxu1 }
 0x23f   :  { %v1962_v34 = vadd.f32 %v1961_v51, %v1793_v8  ;;  %v1627_v28 = vadd.f32 %v1626_v45, %v3835_v62  ;;  %v3301_v62 = vld [vmem:[%s4925_s0 + $0x450] sm:$0xf0] }
 0x240   :  { %v2133_v26 = vpop.f32.mrf.mxu0  ;;  %v2874_v43 = vor.u32 %v3301_v62, %v2873_v49  ;;  %v2895_v49 = vld [vmem:[%s4925_s0 + $0x47c] sm:$0xf0]  ;;  %v2901_v62 = vld [vmem:[%s4925_s0 + $0x470] sm:$0xf] }
 0x241   :  { %v2131_v20 = vadd.f32 %v2130_v22, %v1962_v34  ;;  %1665 = vmatmul.bf16.gmra.mxu1 %v2850_v37  ;;  %1834 = vmatmul.bf16.gmra.mxu2 %v2854_v52  ;;  %v3298_v22 = vld [vmem:[%s4925_s0 + $0x43c] sm:$0xf]  ;;  %v2878_v37 = vor.u32 %v3299_v29, %v2875_v18  ;;  %v3307_v29 = vld [vmem:[%s4925_s0 + $0x480] sm:$0xf0] }
 0x242   :  { %2003 = vmatmul.bf16.gmra.mxu3 %v2858_v55  ;;  %v2870_v59 = vor.u32 %v3298_v22, %v2867_v50 }
 0x243   :  { %2172 = vmatmul.bf16.gmra.mxu0 %v2862_v54  ;;  %v4653_v56 = vmax.f32 %v4953_v46, %v2131_v20  ;;  %v4955_v54 = vmax.f32 %v4159_v12, %v4409_v38  ;;  %v2893_v12 = vld [vmem:[%s4925_s0 + $0x468] sm:$0xf]  ;;  %v3304_v38 = vld [vmem:[%s4925_s0 + $0x46c] sm:$0xf] }
 0x244   :  { %v1795_v57 = vpop.f32.mrf.mxu2 }
 0x245   :  { %v1796_v40 = vadd.f32 %v1795_v57, %v1627_v28  ;;  %v1964_v32 = vpop.f32.mrf.mxu3 }
 0x246   :  { %v1628_v33 = vpop.f32.mrf.mxu1 }
 0x247   :  { %v1965_v9 = vadd.f32 %v1964_v32, %v1796_v40  ;;  %v1629_v2 = vadd.f32 %v1628_v33, %v3867_v10  ;;  %v2882_v10 = vor.u32 %v3302_v60, %v2881_v0  ;;  %v2898_v60 = vor.u32 %v3304_v38, %v2895_v49 }
 0x248   :  { %v2135_v27 = vpop.f32.mrf.mxu0 }
 0x249   :  { %v2134_v7 = vadd.f32 %v2133_v26, %v1965_v9  ;;  %v3303_v9 = vld [vmem:[%s4925_s0 + $0x464] sm:$0xf] }
 0x24b   :  { %v4674_v53 = vmax.f32 %v4954_v42, %v2134_v7  ;;  %v4956_v7 = vmax.f32 %v4162_v36, %v4414_v35 }
 0x24c   :  { %v1797_v11 = vpop.f32.mrf.mxu2 }
 0x24d   :  { %v1798_v63 = vadd.f32 %v1797_v11, %v1629_v2  ;;  %v1966_v8 = vpop.f32.mrf.mxu3 }
 0x24e   :  { %v1631_v51 = vpop.f32.mrf.mxu1 }
 0x24f   :  { %v1967_v52 = vadd.f32 %v1966_v8, %v1798_v63  ;;  %v1632_v26 = vadd.f32 %v1631_v51, %v3875_v19  ;;  %v3306_v19 = vld [vmem:[%s4925_s0 + $0x478] sm:$0xf0]  ;;  %v4958_v51 = vld [vmem:[#allocation10_spill] sm:$0xff] }
 0x250   :  { %v2138_v45 = vpop.f32.mrf.mxu0  ;;  %v2894_v35 = vor.u32 %v3306_v19, %v2893_v12  ;;  %v2921_v12 = vld [vmem:[%s4925_s0 + $0x498] sm:$0xf]  ;;  %v3312_v19 = vld [vmem:[%s4925_s0 + $0x4a8] sm:$0xf0] }
 0x251   :  { %v2136_v55 = vadd.f32 %v2135_v27, %v1967_v52  ;;  %1670 = vmatmul.bf16.gmra.mxu1 %v2870_v59  ;;  %1839 = vmatmul.bf16.gmra.mxu2 %v2874_v43  ;;  %v2887_v27 = vld [vmem:[%s4925_s0 + $0x474] sm:$0xf0]  ;;  %v4957_v59 = vmax.f32 %v4189_v16, %v4443_v58  ;;  %v2913_v16 = vld [vmem:[%s4925_s0 + $0x490] sm:$0xf]  ;;  %v3311_v58 = vld [vmem:[%s4925_s0 + $0x4a0] sm:$0xf0] }
 0x252   :  { %2008 = vmatmul.bf16.gmra.mxu3 %v2878_v37  ;;  %v2890_v36 = vor.u32 %v3303_v9, %v2887_v27  ;;  %v2915_v27 = vld [vmem:[%s4925_s0 + $0x4a4] sm:$0xf0] }
 0x253   :  { %2177 = vmatmul.bf16.gmra.mxu0 %v2882_v10  ;;  %v4689_v34 = vmax.f32 %v4955_v54, %v2136_v55 }
 0x254   :  { %v1800_v20 = vpop.f32.mrf.mxu2 }
 0x255   :  { %v1801_v46 = vadd.f32 %v1800_v20, %v1632_v26  ;;  %v1969_v28 = vpop.f32.mrf.mxu3 }
 0x256   :  { %v1633_v57 = vpop.f32.mrf.mxu1 }
 0x257   :  { %v1970_v40 = vadd.f32 %v1969_v28, %v1801_v46  ;;  %v1634_v50 = vadd.f32 %v1633_v57, %v3907_v39  ;;  %v2902_v39 = vor.u32 %v3307_v29, %v2901_v62  ;;  %v3308_v46 = vld [vmem:[%s4925_s0 + $0x48c] sm:$0xf]  ;;  %v2907_v28 = vld [vmem:[%s4925_s0 + $0x49c] sm:$0xf0]  ;;  %v3309_v57 = vld [vmem:[%s4925_s0 + $0x494] sm:$0xf]  ;;  %v2922_v29 = vor.u32 %v3312_v19, %v2921_v12 }
 0x258   :  { %v2140_v32 = vpop.f32.mrf.mxu0  ;;  %v2918_v62 = vor.u32 %v3309_v57, %v2915_v27 }
 0x259   :  { %v2139_v33 = vadd.f32 %v2138_v45, %v1970_v40  ;;  %v4959_v40 = vmax.f32 %v4192_v21, %v4448_v4  ;;  %v2910_v21 = vor.u32 %v3308_v46, %v2907_v28  ;;  %v2914_v4 = vor.u32 %v3311_v58, %v2913_v16  ;;  %v2935_v46 = vld [vmem:[%s4925_s0 + $0x4cc] sm:$0xf0]  ;;  %v2941_v28 = vld [vmem:[%s4925_s0 + $0x4c0] sm:$0xf]  ;;  %v3317_v16 = vld [vmem:[%s4925_s0 + $0x4d0] sm:$0xf0] }
 0x25a   :  { %v2942_v27 = vor.u32 %v3317_v16, %v2941_v28  ;;  %v4969_v16 = vmax.f32 %v4279_v3, %v4545_v15 }
 0x25b   :  { %v4710_v22 = vmax.f32 %v4956_v7, %v2139_v33  ;;  %v4960_v33 = vld [vmem:[#allocation12_spill] sm:$0xff] }
 0x25c   :  { %v1802_v42 = vpop.f32.mrf.mxu2 }
 0x25d   :  { %v1803_v2 = vadd.f32 %v1802_v42, %v1634_v50  ;;  %v1971_v18 = vpop.f32.mrf.mxu3 }
 0x25e   :  { %v1636_v0 = vpop.f32.mrf.mxu1 }
 0x25f   :  { %v1972_v11 = vadd.f32 %v1971_v18, %v1803_v2  ;;  %v1637_v37 = vadd.f32 %v1636_v0, %v4958_v51  ;;  %v4962_v0 = vld [vmem:[#allocation14_spill] sm:$0xff] }
 0x260   :  { %v2143_v63 = vpop.f32.mrf.mxu0 }
 0x261   :  { %v2141_v8 = vadd.f32 %v2140_v32, %v1972_v11  ;;  %1675 = vmatmul.bf16.gmra.mxu1 %v2890_v36  ;;  %1844 = vmatmul.bf16.gmra.mxu2 %v2894_v35  ;;  %v4961_v36 = vmax.f32 %v4219_v30, %v4477_v14  ;;  %v2933_v30 = vld [vmem:[%s4925_s0 + $0x4b8] sm:$0xf]  ;;  %v3316_v14 = vld [vmem:[%s4925_s0 + $0x4c8] sm:$0xf0] }
 0x262   :  { %2013 = vmatmul.bf16.gmra.mxu3 %v2898_v60 }
 0x263   :  { %2182 = vmatmul.bf16.gmra.mxu0 %v2902_v39  ;;  %v4725_v43 = vmax.f32 %v4957_v59, %v2141_v8 }
 0x264   :  { %v1805_v10 = vpop.f32.mrf.mxu2 }
 0x265   :  { %v1806_v52 = vadd.f32 %v1805_v10, %v1637_v37  ;;  %v1974_v45 = vpop.f32.mrf.mxu3  ;;  %v3313_v10 = vld [vmem:[%s4925_s0 + $0x4b4] sm:$0xf] }
 0x266   :  { %v1638_v55 = vpop.f32.mrf.mxu1 }
 0x267   :  { %v1975_v54 = vadd.f32 %v1974_v45, %v1806_v52  ;;  %v1639_v9 = vadd.f32 %v1638_v55, %v4960_v33  ;;  %v2927_v52 = vld [vmem:[%s4925_s0 + $0x4c4] sm:$0xf0]  ;;  %v3314_v45 = vld [vmem:[%s4925_s0 + $0x4bc] sm:$0xf]  ;;  %v4963_v55 = vmax.f32 %v4222_v41, %v4482_v1  ;;  %v2934_v1 = vor.u32 %v3316_v14, %v2933_v30 }
 0x268   :  { %v2145_v26 = vpop.f32.mrf.mxu0  ;;  %v2930_v41 = vor.u32 %v3313_v10, %v2927_v52  ;;  %v3322_v10 = vld [vmem:[%s4925_s0 + $0x4f8] sm:$0xf0] }
 0x269   :  { %v2144_v20 = vadd.f32 %v2143_v63, %v1975_v54 }
 0x26b   :  { %v4746_v32 = vmax.f32 %v4959_v40, %v2144_v20 }
 0x26c   :  { %v1807_v38 = vpop.f32.mrf.mxu2 }
 0x26d   :  { %v1808_v7 = vadd.f32 %v1807_v38, %v1639_v9  ;;  %v1976_v50 = vpop.f32.mrf.mxu3  ;;  %v2938_v9 = vor.u32 %v3314_v45, %v2935_v46 }
 0x26e   :  { %v1641_v49 = vpop.f32.mrf.mxu1 }
 0x26f   :  { %v1977_v42 = vadd.f32 %v1976_v50, %v1808_v7  ;;  %v1642_v60 = vadd.f32 %v1641_v49, %v4962_v0  ;;  %v4965_v7 = vmax.f32 %v4249_v5, %v4511_v48  ;;  %v3318_v0 = vld [vmem:[%s4925_s0 + $0x4dc] sm:$0xf]  ;;  %v2953_v5 = vld [vmem:[%s4925_s0 + $0x4e0] sm:$0xf]  ;;  %v3321_v48 = vld [vmem:[%s4925_s0 + $0x4f0] sm:$0xf0] }
 0x270   :  { %v2148_v2 = vpop.f32.mrf.mxu0 }
 0x271   :  { %v2146_v18 = vadd.f32 %v2145_v26, %v1977_v42  ;;  %1680 = vmatmul.bf16.gmra.mxu1 %v2910_v21  ;;  %1849 = vmatmul.bf16.gmra.mxu2 %v2914_v4  ;;  %v4964_v26 = vld [vmem:[#allocation16_spill] sm:$0xff]  ;;  %v4966_v21 = vld [vmem:[#allocation18_spill] sm:$0xff] }
 0x272   :  { %2018 = vmatmul.bf16.gmra.mxu3 %v2918_v62 }
 0x273   :  { %2187 = vmatmul.bf16.gmra.mxu0 %v2922_v29  ;;  %v4761_v35 = vmax.f32 %v4961_v36, %v2146_v18 }
 0x274   :  { %v1810_v39 = vpop.f32.mrf.mxu2 }
 0x275   :  { %v1811_v11 = vadd.f32 %v1810_v39, %v1642_v60  ;;  %v1979_v63 = vpop.f32.mrf.mxu3  ;;  %v2947_v60 = vld [vmem:[%s4925_s0 + $0x4ec] sm:$0xf0]  ;;  %v3319_v39 = vld [vmem:[%s4925_s0 + $0x4e4] sm:$0xf] }
 0x276   :  { %v1643_v8 = vpop.f32.mrf.mxu1 }
 0x277   :  { %v1980_v59 = vadd.f32 %v1979_v63, %v1811_v11  ;;  %v1644_v20 = vadd.f32 %v1643_v8, %v4964_v26  ;;  %v4967_v11 = vmax.f32 %v4252_v61, %v4516_v13  ;;  %v4968_v8 = vld [vmem:[#allocation20_spill] sm:$0xff]  ;;  %v2950_v61 = vor.u32 %v3318_v0, %v2947_v60 }
 0x278   :  { %v2150_v51 = vpop.f32.mrf.mxu0  ;;  %v2954_v13 = vor.u32 %v3321_v48, %v2953_v5 }
 0x279   :  { %v2149_v37 = vadd.f32 %v2148_v2, %v1980_v59 }
 0x27b   :  { %v4782_v54 = vmax.f32 %v4963_v55, %v2149_v37  ;;  %v2961_v37 = vld [vmem:[%s4925_s0 + $0x4e8] sm:$0xf] }
 0x27c   :  { %v1812_v58 = vpop.f32.mrf.mxu2  ;;  %v2962_v26 = vor.u32 %v3322_v10, %v2961_v37 }
 0x27d   :  { %v1813_v57 = vadd.f32 %v1812_v58, %v1644_v20  ;;  %v1981_v40 = vpop.f32.mrf.mxu3 }
 0x27e   :  { %v1646_v33 = vpop.f32.mrf.mxu1 }
 0x27f   :  { %v1982_v12 = vadd.f32 %v1981_v40, %v1813_v57  ;;  %v1647_v4 = vadd.f32 %v1646_v33, %v4966_v21  ;;  %v4970_v57 = vld [vmem:[#allocation22_spill] sm:$0xff]  ;;  %v4972_v21 = vld [vmem:[#allocation24_spill] sm:$0xff] }
 0x280   :  { %v2153_v19 = vpop.f32.mrf.mxu0 }
 0x281   :  { %v2151_v38 = vadd.f32 %v2150_v51, %v1982_v12  ;;  %1685 = vmatmul.bf16.gmra.mxu1 %v2930_v41  ;;  %1854 = vmatmul.bf16.gmra.mxu2 %v2934_v1  ;;  %v2955_v51 = vld [vmem:[%s4925_s0 + $0x4f4] sm:$0xf0] }
 0x282   :  { %2023 = vmatmul.bf16.gmra.mxu3 %v2938_v9  ;;  %v2958_v55 = vor.u32 %v3319_v39, %v2955_v51 }
 0x283   :  { %2192 = vmatmul.bf16.gmra.mxu0 %v2942_v27  ;;  %v4797_v50 = vmax.f32 %v4965_v7, %v2151_v38  ;;  %v4971_v38 = vmax.f32 %v4282_v17, %v4550_v23 }
 0x284   :  { %v1815_v49 = vpop.f32.mrf.mxu2 }
 0x285   :  { %v1816_v62 = vadd.f32 %v1815_v49, %v1647_v4  ;;  %v1984_v29 = vpop.f32.mrf.mxu3 }
 0x286   :  { %v1648_v42 = vpop.f32.mrf.mxu1 }
 0x287   :  { %v1985_v2 = vadd.f32 %v1984_v29, %v1816_v62  ;;  %v1649_v59 = vadd.f32 %v1648_v42, %v4968_v8  ;;  %v4974_v8 = vld [vmem:[#allocation3_spill] sm:$0xff] }
 0x288   :  { %v2155_v18 = vpop.f32.mrf.mxu0 }
 0x289   :  { %v2154_v36 = vadd.f32 %v2153_v19, %v1985_v2 }
 0x28b   :  { %v4818_v63 = vmax.f32 %v4967_v11, %v2154_v36  ;;  %v4973_v36 = vld [vmem:[#allocation2_spill] sm:$0xff] }
 0x28c   :  { %v1817_v52 = vpop.f32.mrf.mxu2 }
 0x28d   :  { %v1818_v30 = vadd.f32 %v1817_v52, %v1649_v59  ;;  %v1986_v14 = vpop.f32.mrf.mxu3 }
 0x28e   :  { %v1651_v45 = vpop.f32.mrf.mxu1 }
 0x28f   :  { %v1987_v20 = vadd.f32 %v1986_v14, %v1818_v30  ;;  %v1652_v40 = vadd.f32 %v1651_v45, %v4970_v57  ;;  %v4975_v45 = vld [vmem:[#allocation4_spill] sm:$0xff] }
 0x290   :  { %v2158_v46 = vpop.f32.mrf.mxu0 }
 0x291   :  { %v2156_v28 = vadd.f32 %v2155_v18, %v1987_v20  ;;  %1690 = vmatmul.bf16.gmra.mxu1 %v2950_v61  ;;  %1859 = vmatmul.bf16.gmra.mxu2 %v2954_v13 }
 0x292   :  { %2028 = vmatmul.bf16.gmra.mxu3 %v2958_v55 }
 0x293   :  { %2197 = vmatmul.bf16.gmra.mxu0 %v2962_v26  ;;  %v4833_v58 = vmax.f32 %v4969_v16, %v2156_v28 }
 0x294   :  { %v1820_v41 = vpop.f32.mrf.mxu2 }
 0x295   :  { %v1821_v1 = vadd.f32 %v1820_v41, %v1652_v40  ;;  %v1989_v33 = vpop.f32.mrf.mxu3 }
 0x296   :  { %v1653_v9 = vpop.f32.mrf.mxu1 }
 0x297   :  { %v1990_v27 = vadd.f32 %v1989_v33, %v1821_v1  ;;  %v1654_v4 = vadd.f32 %v1653_v9, %v4972_v21  ;;  %v4976_v9 = vld [vmem:[#allocation5_spill] sm:$0xff] }
 0x298   :  { %v2160_v12 = vpop.f32.mrf.mxu0 }
 0x299   :  { %v2159_v19 = vadd.f32 %v2158_v46, %v1990_v27 }
 0x29b   :  { %v4839_v7 = vmax.f32 %v4971_v38, %v2159_v19 }
 0x29c   :  { %v1822_v49 = vpop.f32.mrf.mxu2 }
 0x29d   :  { %v1823_v3 = vadd.f32 %v1822_v49, %v1654_v4  ;;  %v1991_v15 = vpop.f32.mrf.mxu3 }
 0x29e   :  { %v1656_v62 = vpop.f32.mrf.mxu1 }
 0x29f   :  { %v1992_v29 = vadd.f32 %v1991_v15, %v1823_v3  ;;  %v1657_v0 = vadd.f32 %v1656_v62, %v4973_v36 }
 0x2a0   :  { %v2163_v42 = vpop.f32.mrf.mxu0 }
 0x2a1   :  { %v2161_v2 = vadd.f32 %v2160_v12, %v1992_v29  ;;  %v4977_v29 = vld [vmem:[#allocation6_spill] sm:$0xff] }
 0x2a3   :  { %v4845_v18 = vmax.f32 %v2248_v24, %v2161_v2 }
 0x2a4   :  { %v1825_v60 = vpop.f32.mrf.mxu2 }
 0x2a5   :  { %v1826_v17 = vadd.f32 %v1825_v60, %v1657_v0  ;;  %v1994_v23 = vpop.f32.mrf.mxu3 }
 0x2a6   :  { %v1658_v5 = vpop.f32.mrf.mxu1 }
 0x2a7   :  { %v1995_v48 = vadd.f32 %v1994_v23, %v1826_v17  ;;  %v1659_v59 = vadd.f32 %v1658_v5, %v4974_v8  ;;  %v4978_v8 = vld [vmem:[#allocation7_spill] sm:$0xff] }
 0x2a8   :  { %v2165_v39 = vpop.f32.mrf.mxu0 }
 0x2a9   :  { %v2164_v11 = vadd.f32 %v2163_v42, %v1995_v48 }
 0x2ab   :  { %v2205_v30 = vmax.f32 %v4602_v44, %v2164_v11 }
 0x2ac   :  { %v1827_v51 = vpop.f32.mrf.mxu2 }
 0x2ad   :  { %v1828_v37 = vadd.f32 %v1827_v51, %v1659_v59  ;;  %v1996_v10 = vpop.f32.mrf.mxu3  ;;  %v2255_v61 = vadd.f32 %v4853_v47, %v2205_v30 }
 0x2ae   :  { %v1661_v52 = vpop.f32.mrf.mxu1 }
 0x2af   :  { %v1997_v24 = vadd.f32 %v1996_v10, %v1828_v37  ;;  %v1662_v55 = vadd.f32 %v1661_v52, %v4975_v45  ;;  %v2271_v16 = vmax.f32 %v2255_v61, 0.0 }
 0x2b0   :  { %v2168_v6 = vpop.f32.mrf.mxu0 }
 0x2b1   :  { %v2166_v14 = vadd.f32 %v2165_v39, %v1997_v24 }
 0x2b3   :  { %v2208_v13 = vmax.f32 %v4617_v25, %v2166_v14 }
 0x2b4   :  { %v1830_v26 = vpop.f32.mrf.mxu2 }
 0x2b5   :  { %v2256_v20 = vadd.f32 %v4853_v47, %v2208_v13  ;;  %v1831_v46 = vadd.f32 %v1830_v26, %v1662_v55  ;;  %v1999_v28 = vpop.f32.mrf.mxu3  ;;  %v4979_v13 = vld [vmem:[#allocation8_spill] sm:$0xff] }
 0x2b6   :  { %v1663_v44 = vpop.f32.mrf.mxu1 }
 0x2b7   :  { %v2272_v57 = vmax.f32 %v2256_v20, 0.0  ;;  %v2000_v40 = vadd.f32 %v1999_v28, %v1831_v46  ;;  %v1664_v25 = vadd.f32 %v1663_v44, %v4976_v9 }
 0x2b8   :  { %v2170_v41 = vpop.f32.mrf.mxu0 }
 0x2b9   :  { %v3326_v1 = vpack.c.bf16 %v2272_v57, %v2271_v16  ;;  %v2169_v33 = vadd.f32 %v2168_v6, %v2000_v40 }
 0x2bb   :  { %3327 = vst [vmem:[%s4927_s3] sm:$0xff] %v3326_v1   ;;  %v2211_v21 = vmax.f32 %v4638_v31, %v2169_v33  ;;  %v4980_v1 = vld [vmem:[#allocation9_spill] sm:$0xff] }
 0x2bc   :  { %v1832_v27 = vpop.f32.mrf.mxu2 }
 0x2bd   :  { %v1833_v12 = vadd.f32 %v1832_v27, %v1664_v25  ;;  %v2001_v19 = vpop.f32.mrf.mxu3  ;;  %v2257_v15 = vadd.f32 %v4853_v47, %v2211_v21 }
 0x2be   :  { %v1666_v38 = vpop.f32.mrf.mxu1 }
 0x2bf   :  { %v2002_v4 = vadd.f32 %v2001_v19, %v1833_v12  ;;  %v1667_v42 = vadd.f32 %v1666_v38, %v4977_v29  ;;  %v2273_v23 = vmax.f32 %v2257_v15, 0.0 }
 0x2c0   :  { %v2173_v49 = vpop.f32.mrf.mxu0 }
 0x2c1   :  { %v2171_v3 = vadd.f32 %v2170_v41, %v2002_v4 }
 0x2c3   :  { %v2214_v62 = vmax.f32 %v4653_v56, %v2171_v3  ;;  %v4981_v3 = vld [vmem:[#allocation11_spill] sm:$0xff] }
 0x2c4   :  { %v1835_v2 = vpop.f32.mrf.mxu2 }
 0x2c5   :  { %v2258_v36 = vadd.f32 %v4853_v47, %v2214_v62  ;;  %v1836_v0 = vadd.f32 %v1835_v2, %v1667_v42  ;;  %v2004_v60 = vpop.f32.mrf.mxu3 }
 0x2c6   :  { %v1668_v17 = vpop.f32.mrf.mxu1 }
 0x2c7   :  { %v2274_v5 = vmax.f32 %v2258_v36, 0.0  ;;  %v2005_v48 = vadd.f32 %v2004_v60, %v1836_v0  ;;  %v1669_v56 = vadd.f32 %v1668_v17, %v4978_v8 }
 0x2c8   :  { %v2175_v39 = vpop.f32.mrf.mxu0 }
 0x2c9   :  { %v3331_v31 = vpack.c.bf16 %v2274_v5, %v2273_v23  ;;  %v2174_v11 = vadd.f32 %v2173_v49, %v2005_v48  ;;  %v4982_v48 = vld [vmem:[#allocation13_spill] sm:$0xff] }
 0x2cb   :  { %3363 = vst [vmem:[%s4927_s3 + $0x8] sm:$0xff] %v3331_v31   ;;  %v2217_v52 = vmax.f32 %v4674_v53, %v2174_v11 }
 0x2cc   :  { %v1837_v59 = vpop.f32.mrf.mxu2 }
 0x2cd   :  { %v1838_v51 = vadd.f32 %v1837_v59, %v1669_v56  ;;  %v2006_v37 = vpop.f32.mrf.mxu3  ;;  %v2259_v14 = vadd.f32 %v4853_v47, %v2217_v52 }
 0x2ce   :  { %v1671_v10 = vpop.f32.mrf.mxu1 }
 0x2cf   :  { %v2007_v30 = vadd.f32 %v2006_v37, %v1838_v51  ;;  %v1672_v45 = vadd.f32 %v1671_v10, %v4979_v13  ;;  %v2275_v44 = vmax.f32 %v2259_v14, 0.0 }
 0x2d0   :  { %v2178_v24 = vpop.f32.mrf.mxu0 }
 0x2d1   :  { %v2176_v6 = vadd.f32 %v2175_v39, %v2007_v30  ;;  %v4983_v30 = vld [vmem:[#allocation15_spill] sm:$0xff] }
 0x2d3   :  { %v2220_v61 = vmax.f32 %v4689_v34, %v2176_v6 }
 0x2d4   :  { %v1840_v55 = vpop.f32.mrf.mxu2 }
 0x2d5   :  { %v2260_v26 = vadd.f32 %v4853_v47, %v2220_v61  ;;  %v1841_v20 = vadd.f32 %v1840_v55, %v1672_v45  ;;  %v2009_v46 = vpop.f32.mrf.mxu3 }
 0x2d6   :  { %v1673_v28 = vpop.f32.mrf.mxu1 }
 0x2d7   :  { %v2276_v16 = vmax.f32 %v2260_v26, 0.0  ;;  %v2010_v57 = vadd.f32 %v2009_v46, %v1841_v20  ;;  %v1674_v34 = vadd.f32 %v1673_v28, %v4980_v1 }
 0x2d8   :  { %v2180_v40 = vpop.f32.mrf.mxu0 }
 0x2d9   :  { %v3336_v53 = vpack.c.bf16 %v2276_v16, %v2275_v44  ;;  %v2179_v41 = vadd.f32 %v2178_v24, %v2010_v57  ;;  %v4984_v44 = vld [vmem:[#allocation17_spill] sm:$0xff] }
 0x2db   :  { %3364 = vst [vmem:[%s4927_s3 + $0x10] sm:$0xff] %v3336_v53   ;;  %v2223_v12 = vmax.f32 %v4710_v22, %v2179_v41 }
 0x2dc   :  { %v1842_v33 = vpop.f32.mrf.mxu2 }
 0x2dd   :  { %v1843_v9 = vadd.f32 %v1842_v33, %v1674_v34  ;;  %v2011_v25 = vpop.f32.mrf.mxu3  ;;  %v2261_v4 = vadd.f32 %v4853_v47, %v2223_v12 }
 0x2de   :  { %v1676_v27 = vpop.f32.mrf.mxu1 }
 0x2df   :  { %v2012_v19 = vadd.f32 %v2011_v25, %v1843_v9  ;;  %v1677_v15 = vadd.f32 %v1676_v27, %v4981_v3  ;;  %v2277_v0 = vmax.f32 %v2261_v4, 0.0  ;;  %v4985_v27 = vld [vmem:[#allocation19_spill] sm:$0xff] }
 0x2e0   :  { %v2183_v38 = vpop.f32.mrf.mxu0 }
 0x2e1   :  { %v2181_v21 = vadd.f32 %v2180_v40, %v2012_v19 }
 0x2e3   :  { %v2226_v49 = vmax.f32 %v4725_v43, %v2181_v21 }
 0x2e4   :  { %v1845_v62 = vpop.f32.mrf.mxu2 }
 0x2e5   :  { %v2262_v29 = vadd.f32 %v4853_v47, %v2226_v49  ;;  %v1846_v42 = vadd.f32 %v1845_v62, %v1677_v15  ;;  %v2014_v2 = vpop.f32.mrf.mxu3 }
 0x2e6   :  { %v1678_v36 = vpop.f32.mrf.mxu1 }
 0x2e7   :  { %v2278_v60 = vmax.f32 %v2262_v29, 0.0  ;;  %v2015_v17 = vadd.f32 %v2014_v2, %v1846_v42  ;;  %v1679_v43 = vadd.f32 %v1678_v36, %v4982_v48  ;;  %v4986_v42 = vld [vmem:[#allocation21_spill] sm:$0xff] }
 0x2e8   :  { %v2185_v23 = vpop.f32.mrf.mxu0 }
 0x2e9   :  { %v3341_v22 = vpack.c.bf16 %v2278_v60, %v2277_v0  ;;  %v2184_v5 = vadd.f32 %v2183_v38, %v2015_v17 }
 0x2eb   :  { %3365 = vst [vmem:[%s4927_s3 + $0x18] sm:$0xff] %v3341_v22   ;;  %v2229_v56 = vmax.f32 %v4746_v32, %v2184_v5 }
 0x2ec   :  { %v1847_v39 = vpop.f32.mrf.mxu2 }
 0x2ed   :  { %v1848_v31 = vadd.f32 %v1847_v39, %v1679_v43  ;;  %v2016_v11 = vpop.f32.mrf.mxu3  ;;  %v2263_v10 = vadd.f32 %v4853_v47, %v2229_v56  ;;  %v4987_v39 = vld [vmem:[#allocation23_spill] sm:$0xff] }
 0x2ee   :  { %v1681_v8 = vpop.f32.mrf.mxu1 }
 0x2ef   :  { %v2017_v59 = vadd.f32 %v2016_v11, %v1848_v31  ;;  %v1682_v24 = vadd.f32 %v1681_v8, %v4983_v30  ;;  %v2279_v55 = vmax.f32 %v2263_v10, 0.0 }
 0x2f0   :  { %v2188_v51 = vpop.f32.mrf.mxu0 }
 0x2f1   :  { %v2186_v37 = vadd.f32 %v2185_v23, %v2017_v59 }
 0x2f3   :  { %v2232_v52 = vmax.f32 %v4761_v35, %v2186_v37 }
 0x2f4   :  { %v1850_v6 = vpop.f32.mrf.mxu2 }
 0x2f5   :  { %v2264_v14 = vadd.f32 %v4853_v47, %v2232_v52  ;;  %v1851_v61 = vadd.f32 %v1850_v6, %v1682_v24  ;;  %v2019_v13 = vpop.f32.mrf.mxu3  ;;  %v4988_v6 = vld [vmem:[#allocation25_spill] sm:$0xff] }
 0x2f6   :  { %v1683_v45 = vpop.f32.mrf.mxu1 }
 0x2f7   :  { %v2280_v26 = vmax.f32 %v2264_v14, 0.0  ;;  %v2020_v20 = vadd.f32 %v2019_v13, %v1851_v61  ;;  %v1684_v35 = vadd.f32 %v1683_v45, %v4984_v44 }
 0x2f8   :  { %v2190_v46 = vpop.f32.mrf.mxu0 }
 0x2f9   :  { %v3346_v32 = vpack.c.bf16 %v2280_v26, %v2279_v55  ;;  %v2189_v28 = vadd.f32 %v2188_v51, %v2020_v20 }
 0x2fb   :  { %3366 = vst [vmem:[%s4927_s3 + $0x20] sm:$0xff] %v3346_v32   ;;  %v2235_v41 = vmax.f32 %v4782_v54, %v2189_v28 }
 0x2fc   :  { %v1852_v16 = vpop.f32.mrf.mxu2 }
 0x2fd   :  { %v1853_v57 = vadd.f32 %v1852_v16, %v1684_v35  ;;  %v2021_v40 = vpop.f32.mrf.mxu3  ;;  %v2265_v9 = vadd.f32 %v4853_v47, %v2235_v41 }
 0x2fe   :  { %v1686_v53 = vpop.f32.mrf.mxu1 }
 0x2ff   :  { %v2022_v1 = vadd.f32 %v2021_v40, %v1853_v57  ;;  %v1687_v12 = vadd.f32 %v1686_v53, %v4985_v27  ;;  %v2281_v3 = vmax.f32 %v2265_v9, 0.0 }
 0x300   :  { %v2193_v33 = vpop.f32.mrf.mxu0 }
 0x301   :  { %v2191_v34 = vadd.f32 %v2190_v46, %v2022_v1 }
 0x303   :  { %v2238_v25 = vmax.f32 %v4797_v50, %v2191_v34 }
 0x304   :  { %v1855_v19 = vpop.f32.mrf.mxu2 }
 0x305   :  { %v2266_v38 = vadd.f32 %v4853_v47, %v2238_v25  ;;  %v1856_v21 = vadd.f32 %v1855_v19, %v1687_v12  ;;  %v2024_v4 = vpop.f32.mrf.mxu3 }
 0x306   :  { %v1688_v49 = vpop.f32.mrf.mxu1 }
 0x307   :  { %v2282_v15 = vmax.f32 %v2266_v38, 0.0  ;;  %v2025_v62 = vadd.f32 %v2024_v4, %v1856_v21  ;;  %v1689_v2 = vadd.f32 %v1688_v49, %v4986_v42 }
 0x308   :  { %v2195_v50 = vpop.f32.mrf.mxu0 }
 0x309   :  { %v3351_v29 = vpack.c.bf16 %v2282_v15, %v2281_v3  ;;  %v2194_v54 = vadd.f32 %v2193_v33, %v2025_v62 }
 0x30b   :  { %3367 = vst [vmem:[%s4927_s3 + $0x28] sm:$0xff] %v3351_v29   ;;  %v2241_v23 = vmax.f32 %v4818_v63, %v2194_v54 }
 0x30c   :  { %v1857_v36 = vpop.f32.mrf.mxu2 }
 0x30d   :  { %v1858_v0 = vadd.f32 %v1857_v36, %v1689_v2  ;;  %v2026_v60 = vpop.f32.mrf.mxu3  ;;  %v2267_v48 = vadd.f32 %v4853_v47, %v2241_v23 }
 0x30e   :  { %v1691_v17 = vpop.f32.mrf.mxu1 }
 0x30f   :  { %v2027_v22 = vadd.f32 %v2026_v60, %v1858_v0  ;;  %v1692_v31 = vadd.f32 %v1691_v17, %v4987_v39  ;;  %v2283_v37 = vmax.f32 %v2267_v48, 0.0 }
 0x310   :  { %v2198_v51 = vpop.f32.mrf.mxu0 }
 0x311   :  { %v2196_v5 = vadd.f32 %v2195_v50, %v2027_v22 }
 0x313   :  { %v2244_v43 = vmax.f32 %v4833_v58, %v2196_v5 }
 0x314   :  { %v1860_v11 = vpop.f32.mrf.mxu2 }
 0x315   :  { %v2268_v8 = vadd.f32 %v4853_v47, %v2244_v43  ;;  %v1861_v56 = vadd.f32 %v1860_v11, %v1692_v31  ;;  %v2029_v59 = vpop.f32.mrf.mxu3 }
 0x316   :  { %v1693_v30 = vpop.f32.mrf.mxu1 }
 0x317   :  { %v2284_v10 = vmax.f32 %v2268_v8, 0.0  ;;  %v2030_v52 = vadd.f32 %v2029_v59, %v1861_v56  ;;  %v1694_v58 = vadd.f32 %v1693_v30, %v4988_v6 }
 0x318   :  { %v2200_v26 = vpop.f32.mrf.mxu0 }
 0x319   :  { %v3356_v24 = vpack.c.bf16 %v2284_v10, %v2283_v37  ;;  %v2199_v63 = vadd.f32 %v2198_v51, %v2030_v52 }
 0x31b   :  { %3368 = vst [vmem:[%s4927_s3 + $0x30] sm:$0xff] %v3356_v24   ;;  %v2247_v45 = vmax.f32 %v4839_v7, %v2199_v63 }
 0x31c   :  { %v1862_v14 = vpop.f32.mrf.mxu2 }
 0x31d   :  { %v1863_v61 = vadd.f32 %v1862_v14, %v1694_v58  ;;  %v2031_v13 = vpop.f32.mrf.mxu3  ;;  %v2269_v46 = vadd.f32 %v4853_v47, %v2247_v45 }
 0x31f   :  { %v2032_v55 = vadd.f32 %v2031_v13, %v1863_v61  ;;  %v2285_v44 = vmax.f32 %v2269_v46, 0.0 }
 0x321   :  { %v2201_v20 = vadd.f32 %v2200_v26, %v2032_v55 }
 0x323   :  { %v2250_v32 = vmax.f32 %v4845_v18, %v2201_v20 }
 0x325   :  { %v2270_v28 = vadd.f32 %v4853_v47, %v2250_v32 }
 0x327   :  { %v2286_v35 = vmax.f32 %v2270_v28, 0.0 }
 0x329   :  { %v3361_v16 = vpack.c.bf16 %v2286_v35, %v2285_v44 }
 0x32b   :  { %3369 = vst [vmem:[%s4927_s3 + $0x38] sm:$0xff] %v3361_v16  }

// kernel: tile.13
= control target key start
LH: loop header
LB: loop body
LE: loop exit
PB: predicated region body
PF: predicated region fallthrough
CT: control target
= control target key end

     0   :  { %s22_s0 = inlined_call_operand.vmem [shape: f32[128], index: 0, kind: input, shape index: {}]   ;;  %s23_s1 = inlined_call_operand.vmem [shape: f32[4,128], index: 1, kind: output, shape index: {}]  }
   0x1   :  { %v4_v0 = vld [vmem:[%s22_s0] ss:$0 sm:$0xff] }
   0x2   :  { %5 = vst [vmem:[%s23_s1] sm:$0xf] %v4_v0 }

// kernel: cnn_backbone.5
= control target key start
LH: loop header
LB: loop body
LE: loop exit
PB: predicated region body
PF: predicated region fallthrough
CT: control target
= control target key end

     0   :  { %s6637_s0 = inlined_call_operand.vmem [shape: bf16[4,8,1024], index: 0, kind: input, shape index: {}]   ;;  %s6638_s1 = inlined_call_operand.vmem [shape: bf16[1024,128], index: 1, kind: input, shape index: {}]   ;;  %s6639_s2 = inlined_call_operand.vmem [shape: f32[1,128], index: 2, kind: input, shape index: {}]   ;;  %s6640_s3 = inlined_call_operand.vmem [shape: bf16[4,128,512], index: 3, kind: input, shape index: {}]   ;;  %s6641_s4 = inlined_call_operand.vmem [shape: f32[1,512], index: 4, kind: input, shape index: {}]   ;;  %s6642_s5 = inlined_call_operand.vmem [shape: bf16[512,512], index: 5, kind: input, shape index: {}]   ;;  %s6643_s6 = inlined_call_operand.vmem [shape: f32[1,512], index: 6, kind: input, shape index: {}]   ;;  %s6644_s7 = inlined_call_operand.hbm [shape: f32[2,128], index: 7, kind: output, shape index: {}]  }
   0x1   :  { %v4283_v0 = vld [vmem:[%s6638_s1 + $0x38] sm:$0xff]  ;;  %v4282_v4 = vld [vmem:[%s6638_s1 + $0x30] sm:$0xff]  ;;  %v4281_v8 = vld [vmem:[%s6638_s1 + $0x28] sm:$0xff] }
   0x2   :  { %v4291_v1 = vld [vmem:[%s6638_s1 + $0x78] sm:$0xff]  ;;  %635 = vmatpush.bf16.msra.mxu0 %v4283_v0  ;;  %v4290_v5 = vld [vmem:[%s6638_s1 + $0x70] sm:$0xff]  ;;  %v4289_v9 = vld [vmem:[%s6638_s1 + $0x68] sm:$0xff] }
   0x3   :  { %v4299_v2 = vld [vmem:[%s6638_s1 + $0xb8] sm:$0xff]  ;;  %654 = vmatpush.bf16.msra.mxu1 %v4291_v1  ;;  %v4298_v6 = vld [vmem:[%s6638_s1 + $0xb0] sm:$0xff]  ;;  %v4297_v10 = vld [vmem:[%s6638_s1 + $0xa8] sm:$0xff] }
   0x4   :  { %v4307_v3 = vld [vmem:[%s6638_s1 + $0xf8] sm:$0xff]  ;;  %673 = vmatpush.bf16.msra.mxu2 %v4299_v2  ;;  %v4306_v7 = vld [vmem:[%s6638_s1 + $0xf0] sm:$0xff]  ;;  %v4305_v11 = vld [vmem:[%s6638_s1 + $0xe8] sm:$0xff] }
   0x5   :  { %692 = vmatpush.bf16.msra.mxu3 %v4307_v3  ;;  %v4280_v12 = vld [vmem:[%s6638_s1 + $0x20] sm:$0xff]  ;;  %v4279_v16 = vld [vmem:[%s6638_s1 + $0x18] sm:$0xff]  ;;  %v4278_v20 = vld [vmem:[%s6638_s1 + $0x10] sm:$0xff] }
   0x6   :  { %636 = vmatpush.bf16.msra.mxu0 %v4282_v4  ;;  %v4288_v13 = vld [vmem:[%s6638_s1 + $0x60] sm:$0xff]  ;;  %v4287_v17 = vld [vmem:[%s6638_s1 + $0x58] sm:$0xff]  ;;  %v4286_v21 = vld [vmem:[%s6638_s1 + $0x50] sm:$0xff] }
   0x7   :  { %655 = vmatpush.bf16.msra.mxu1 %v4290_v5  ;;  %v4296_v14 = vld [vmem:[%s6638_s1 + $0xa0] sm:$0xff]  ;;  %v4295_v18 = vld [vmem:[%s6638_s1 + $0x98] sm:$0xff]  ;;  %v4294_v22 = vld [vmem:[%s6638_s1 + $0x90] sm:$0xff] }
   0x8   :  { %674 = vmatpush.bf16.msra.mxu2 %v4298_v6  ;;  %v4304_v15 = vld [vmem:[%s6638_s1 + $0xe0] sm:$0xff]  ;;  %v4303_v19 = vld [vmem:[%s6638_s1 + $0xd8] sm:$0xff]  ;;  %v4302_v23 = vld [vmem:[%s6638_s1 + $0xd0] sm:$0xff] }
   0x9   :  { %693 = vmatpush.bf16.msra.mxu3 %v4306_v7  ;;  %v4277_v24 = vld [vmem:[%s6638_s1 + $0x8] sm:$0xff]  ;;  %v4276_v28 = vld [vmem:[%s6638_s1] sm:$0xff] }
   0xa   :  { %637 = vmatpush.bf16.msra.mxu0 %v4281_v8  ;;  %v4285_v25 = vld [vmem:[%s6638_s1 + $0x48] sm:$0xff]  ;;  %v4284_v29 = vld [vmem:[%s6638_s1 + $0x40] sm:$0xff] }
   0xb   :  { %656 = vmatpush.bf16.msra.mxu1 %v4289_v9  ;;  %v4293_v26 = vld [vmem:[%s6638_s1 + $0x88] sm:$0xff]  ;;  %v2838_v30 = vld [vmem:[%s6637_s0] sm:$0xf] }
   0xc   :  { %675 = vmatpush.bf16.msra.mxu2 %v4297_v10  ;;  %v4301_v27 = vld [vmem:[%s6638_s1 + $0xc8] sm:$0xff]  ;;  %v4292_v31 = vld [vmem:[%s6638_s1 + $0x80] sm:$0xff] }
   0xd   :  { %694 = vmatpush.bf16.msra.mxu3 %v4305_v11  ;;  %v4300_v32 = vld [vmem:[%s6638_s1 + $0xc0] sm:$0xff] }
   0xe   :  { %638 = vmatpush.bf16.msra.mxu0 %v4280_v12  ;;  %v4344_v33 = vld [vmem:[%s6637_s0 + $0x1c] sm:$0xf0] }
   0xf   :  { %657 = vmatpush.bf16.msra.mxu1 %v4288_v13 }
  0x10   :  { %676 = vmatpush.bf16.msra.mxu2 %v4296_v14 }
  0x11   :  { %695 = vmatpush.bf16.msra.mxu3 %v4304_v15 }
  0x12   :  { %639 = vmatpush.bf16.msra.mxu0 %v4279_v16 }
  0x13   :  { %658 = vmatpush.bf16.msra.mxu1 %v4287_v17 }
  0x14   :  { %677 = vmatpush.bf16.msra.mxu2 %v4295_v18 }
  0x15   :  { %696 = vmatpush.bf16.msra.mxu3 %v4303_v19 }
  0x16   :  { %640 = vmatpush.bf16.msra.mxu0 %v4278_v20 }
  0x17   :  { %659 = vmatpush.bf16.msra.mxu1 %v4286_v21 }
  0x18   :  { %678 = vmatpush.bf16.msra.mxu2 %v4294_v22 }
  0x19   :  { %697 = vmatpush.bf16.msra.mxu3 %v4302_v23 }
  0x1a   :  { %12 = vsyncpa [#allocation4], 0  ;;  %641 = vmatpush.bf16.msra.mxu0 %v4277_v24  ;;  %v4340_v34 = vld [vmem:[%s6637_s0 + $0x4] sm:$0xf]  ;;  %v2846_v36 = vld [vmem:[%s6637_s0 + $0x8] sm:$0xf]  ;;  %v2839_v42 = vor.u32 %v4344_v33, %v2838_v30 }
  0x1b   :  { %660 = vmatpush.bf16.msra.mxu1 %v4285_v25  ;;  %v2840_v35 = vld [vmem:[%s6637_s0 + $0x20] sm:$0xf0]  ;;  %v4345_v37 = vld [vmem:[%s6637_s0 + $0x24] sm:$0xf0]  ;;  %v4341_v38 = vld [vmem:[%s6637_s0 + $0xc] sm:$0xf] }
  0x1c   :  { %679 = vmatpush.bf16.msra.mxu2 %v4293_v26  ;;  %v2848_v39 = vld [vmem:[%s6637_s0 + $0x28] sm:$0xf0]  ;;  %v4315_v40 = vld [vmem:[%s6638_s1 + $0x138] sm:$0xff]  ;;  %v2843_v43 = vor.u32 %v4340_v34, %v2840_v35  ;;  %v2847_v44 = vor.u32 %v4345_v37, %v2846_v36  ;;  %v4314_v48 = vld [vmem:[%s6638_s1 + $0x130] sm:$0xff]  ;;  %s2827_s30 = sshll.u32 %s6644_s7, 4  ;;  %s2828_s30 = int_to_ptr.hbm [resolvable:$true] %s2827_s30 }
  0x1d   :  { %698 = vmatpush.bf16.msra.mxu3 %v4301_v27  ;;  %v4323_v41 = vld [vmem:[%s6638_s1 + $0x178] sm:$0xff]  ;;  %v2851_v45 = vor.u32 %v4341_v38, %v2848_v39  ;;  %v4322_v49 = vld [vmem:[%s6638_s1 + $0x170] sm:$0xff]  ;;  %v4313_v52 = vld [vmem:[%s6638_s1 + $0x128] sm:$0xff] }
  0x1e   :  { %642 = vmatpush.bf16.msra.mxu0 %v4276_v28  ;;  %v4331_v46 = vld [vmem:[%s6638_s1 + $0x1b8] sm:$0xff]  ;;  %v4330_v50 = vld [vmem:[%s6638_s1 + $0x1b0] sm:$0xff]  ;;  %v4321_v53 = vld [vmem:[%s6638_s1 + $0x168] sm:$0xff] }
  0x1f   :  { %661 = vmatpush.bf16.msra.mxu1 %v4284_v29  ;;  %v4339_v47 = vld [vmem:[%s6638_s1 + $0x1f8] sm:$0xff]  ;;  %v4338_v51 = vld [vmem:[%s6638_s1 + $0x1f0] sm:$0xff]  ;;  %v4329_v54 = vld [vmem:[%s6638_s1 + $0x1a8] sm:$0xff] }
  0x20   :  { %680 = vmatpush.bf16.msra.mxu2 %v4292_v31  ;;  %v4337_v55 = vld [vmem:[%s6638_s1 + $0x1e8] sm:$0xff]  ;;  %v4312_v56 = vld [vmem:[%s6638_s1 + $0x120] sm:$0xff]  ;;  %v4311_v4 = vld [vmem:[%s6638_s1 + $0x118] sm:$0xff] }
  0x21   :  { %699 = vmatpush.bf16.msra.mxu3 %v4300_v32  ;;  %643 = vmatmul.bf16.vlgmr.msra.gmra.mxu0 %v2839_v42  ;;  %v4320_v57 = vld [vmem:[%s6638_s1 + $0x160] sm:$0xff]  ;;  %v2878_v0 = vld [vmem:[%s6637_s0 + $0x48] sm:$0xf]  ;;  %v4349_v2 = vld [vmem:[%s6637_s0 + $0x4c] sm:$0xf] }
  0x22   :  { %711 = vmatpush.bf16.msrb.mxu0 %v4315_v40  ;;  %662 = vmatmul.bf16.vlgmr.msra.gmra.mxu1 %v2843_v43  ;;  %v4328_v58 = vld [vmem:[%s6638_s1 + $0x1a0] sm:$0xff]  ;;  %v4353_v1 = vld [vmem:[%s6637_s0 + $0x64] sm:$0xf0]  ;;  %v2880_v3 = vld [vmem:[%s6637_s0 + $0x68] sm:$0xf0] }
  0x23   :  { %730 = vmatpush.bf16.msrb.mxu1 %v4323_v41  ;;  %681 = vmatmul.bf16.vlgmr.msra.gmra.mxu2 %v2847_v44  ;;  %v4336_v59 = vld [vmem:[%s6638_s1 + $0x1e0] sm:$0xff]  ;;  %v4319_v5 = vld [vmem:[%s6638_s1 + $0x158] sm:$0xff]  ;;  %v2879_v8 = vor.u32 %v4353_v1, %v2878_v0  ;;  %v2883_v9 = vor.u32 %v4349_v2, %v2880_v3  ;;  %v4310_v12 = vld [vmem:[%s6638_s1 + $0x110] sm:$0xff] }
  0x24   :  { %700 = vmatmul.bf16.vlgmr.msra.gmra.mxu3 %v2851_v45  ;;  %749 = vmatpush.bf16.msrb.mxu2 %v4331_v46  ;;  %v2870_v60 = vld [vmem:[%s6637_s0 + $0x40] sm:$0xf]  ;;  %v4348_v62 = vld [vmem:[%s6637_s0 + $0x44] sm:$0xf]  ;;  %v4327_v10 = vld [vmem:[%s6638_s1 + $0x198] sm:$0xff] }
  0x25   :  { %768 = vmatpush.bf16.msrb.mxu3 %v4339_v47  ;;  %v4352_v61 = vld [vmem:[%s6637_s0 + $0x5c] sm:$0xf0]  ;;  %v2872_v63 = vld [vmem:[%s6637_s0 + $0x60] sm:$0xf0]  ;;  %v4335_v11 = vld [vmem:[%s6638_s1 + $0x1d8] sm:$0xff] }
  0x26   :  { %712 = vmatpush.bf16.msrb.mxu0 %v4314_v48  ;;  %v2871_v6 = vor.u32 %v4352_v61, %v2870_v60  ;;  %v2875_v7 = vor.u32 %v4348_v62, %v2872_v63  ;;  %v4318_v13 = vld [vmem:[%s6638_s1 + $0x150] sm:$0xff]  ;;  %v4309_v16 = vld [vmem:[%s6638_s1 + $0x108] sm:$0xff]  ;;  %v4308_v20 = vld [vmem:[%s6638_s1 + $0x100] sm:$0xff] }
  0x27   :  { %731 = vmatpush.bf16.msrb.mxu1 %v4322_v49  ;;  %v4326_v14 = vld [vmem:[%s6638_s1 + $0x190] sm:$0xff]  ;;  %v4317_v17 = vld [vmem:[%s6638_s1 + $0x148] sm:$0xff]  ;;  %v4316_v21 = vld [vmem:[%s6638_s1 + $0x140] sm:$0xff] }
  0x28   :  { %750 = vmatpush.bf16.msrb.mxu2 %v4330_v50  ;;  %v4334_v15 = vld [vmem:[%s6638_s1 + $0x1d0] sm:$0xff]  ;;  %v4325_v18 = vld [vmem:[%s6638_s1 + $0x188] sm:$0xff]  ;;  %v4324_v22 = vld [vmem:[%s6638_s1 + $0x180] sm:$0xff] }
  0x29   :  { %769 = vmatpush.bf16.msrb.mxu3 %v4338_v51  ;;  %v4333_v19 = vld [vmem:[%s6638_s1 + $0x1c8] sm:$0xff]  ;;  %v4332_v23 = vld [vmem:[%s6638_s1 + $0x1c0] sm:$0xff]  ;;  %v2854_v24 = vld [vmem:[%s6637_s0 + $0x10] sm:$0xf] }
  0x2a   :  { %713 = vmatpush.bf16.msrb.mxu0 %v4313_v52  ;;  %v4346_v25 = vld [vmem:[%s6637_s0 + $0x2c] sm:$0xf0]  ;;  %v4342_v26 = vld [vmem:[%s6637_s0 + $0x14] sm:$0xf]  ;;  %v2862_v28 = vld [vmem:[%s6637_s0 + $0x18] sm:$0xf] }
  0x2b   :  { %732 = vmatpush.bf16.msrb.mxu1 %v4321_v53  ;;  %v2856_v27 = vld [vmem:[%s6637_s0 + $0x30] sm:$0xf0]  ;;  %v4347_v29 = vld [vmem:[%s6637_s0 + $0x34] sm:$0xf0]  ;;  %v4343_v30 = vld [vmem:[%s6637_s0 + $0x1c] sm:$0xf]  ;;  %v2855_v32 = vor.u32 %v4346_v25, %v2854_v24 }
  0x2c   :  { %751 = vmatpush.bf16.msrb.mxu2 %v4329_v54  ;;  %v2864_v31 = vld [vmem:[%s6637_s0 + $0x38] sm:$0xf0]  ;;  %v2859_v33 = vor.u32 %v4342_v26, %v2856_v27  ;;  %v2863_v34 = vor.u32 %v4347_v29, %v2862_v28  ;;  %v2886_v36 = vld [vmem:[%s6637_s0 + $0x50] sm:$0xf]  ;;  %v4350_v38 = vld [vmem:[%s6637_s0 + $0x54] sm:$0xf] }
  0x2d   :  { %770 = vmatpush.bf16.msrb.mxu3 %v4337_v55  ;;  %v2867_v35 = vor.u32 %v4343_v30, %v2864_v31  ;;  %v4354_v37 = vld [vmem:[%s6637_s0 + $0x6c] sm:$0xf0]  ;;  %v2888_v39 = vld [vmem:[%s6637_s0 + $0x70] sm:$0xf0]  ;;  %v2894_v40 = vld [vmem:[%s6637_s0 + $0x58] sm:$0xf] }
  0x2e   :  { %714 = vmatpush.bf16.msrb.mxu0 %v4312_v56  ;;  %v4355_v41 = vld [vmem:[%s6637_s0 + $0x74] sm:$0xf0]  ;;  %v4351_v42 = vld [vmem:[%s6637_s0 + $0x5c] sm:$0xf]  ;;  %v2887_v44 = vor.u32 %v4354_v37, %v2886_v36  ;;  %v2891_v45 = vor.u32 %v4350_v38, %v2888_v39  ;;  %v3302_v48 = vld [vmem:[%s6640_s3 + $0x1e0] sm:$0xf] }
  0x2f   :  { %733 = vmatpush.bf16.msrb.mxu1 %v4320_v57  ;;  %v2896_v43 = vld [vmem:[%s6637_s0 + $0x78] sm:$0xf0]  ;;  %v2895_v46 = vor.u32 %v4355_v41, %v2894_v40  ;;  %v4418_v49 = vld [vmem:[%s6640_s3 + $0x1ec] sm:$0xf0]  ;;  %v4416_v50 = vld [vmem:[%s6640_s3 + $0x1e4] sm:$0xf] }
  0x30   :  { %752 = vmatpush.bf16.msrb.mxu2 %v4328_v58  ;;  %v2899_v47 = vor.u32 %v4351_v42, %v2896_v43  ;;  %v3303_v53 = vor.u32 %v4418_v49, %v3302_v48  ;;  %v3304_v54 = vld [vmem:[%s6640_s3 + $0x1f0] sm:$0xf0]  ;;  %v3310_v55 = vld [vmem:[%s6640_s3 + $0x1e8] sm:$0xf]  ;;  %v4419_v56 = vld [vmem:[%s6640_s3 + $0x1f4] sm:$0xf0] }
  0x31   :  { %771 = vmatpush.bf16.msrb.mxu3 %v4336_v59  ;;  %648 = vmatmul.bf16.gmra.mxu0 %v2871_v6  ;;  %v3307_v57 = vor.u32 %v4416_v50, %v3304_v54  ;;  %v3311_v58 = vor.u32 %v4419_v56, %v3310_v55  ;;  %v4417_v59 = vld [vmem:[%s6640_s3 + $0x1ec] sm:$0xf]  ;;  %v3312_v60 = vld [vmem:[%s6640_s3 + $0x1f8] sm:$0xf0]  ;;  %v3286_v62 = vld [vmem:[%s6640_s3 + $0x1c0] sm:$0xf] }
  0x32   :  { %715 = vmatpush.bf16.msrb.mxu0 %v4311_v4  ;;  %667 = vmatmul.bf16.gmra.mxu1 %v2875_v7  ;;  %v3315_v61 = vor.u32 %v4417_v59, %v3312_v60  ;;  %v4414_v63 = vld [vmem:[%s6640_s3 + $0x1cc] sm:$0xf0]  ;;  %v4412_v0 = vld [vmem:[%s6640_s3 + $0x1c4] sm:$0xf]  ;;  %v3288_v2 = vld [vmem:[%s6640_s3 + $0x1d0] sm:$0xf0] }
  0x33   :  { %734 = vmatpush.bf16.msrb.mxu1 %v4319_v5  ;;  %686 = vmatmul.bf16.gmra.mxu2 %v2879_v8  ;;  %v3287_v1 = vor.u32 %v4414_v63, %v3286_v62  ;;  %v3294_v3 = vld [vmem:[%s6640_s3 + $0x1c8] sm:$0xf]  ;;  %v4415_v4 = vld [vmem:[%s6640_s3 + $0x1d4] sm:$0xf0]  ;;  %v3291_v5 = vor.u32 %v4412_v0, %v3288_v2  ;;  %v4413_v7 = vld [vmem:[%s6640_s3 + $0x1cc] sm:$0xf] }
  0x34   :  { %705 = vmatmul.bf16.gmra.mxu3 %v2883_v9  ;;  %753 = vmatpush.bf16.msrb.mxu2 %v4327_v10  ;;  %v3295_v6 = vor.u32 %v4415_v4, %v3294_v3  ;;  %v3296_v8 = vld [vmem:[%s6640_s3 + $0x1d8] sm:$0xf0]  ;;  %v3254_v26 = vld [vmem:[%s6640_s3 + $0x180] sm:$0xf]  ;;  %v4406_v27 = vld [vmem:[%s6640_s3 + $0x18c] sm:$0xf0] }
  0x35   :  { %772 = vmatpush.bf16.msrb.mxu3 %v4335_v11  ;;  %v3299_v9 = vor.u32 %v4413_v7, %v3296_v8  ;;  %v3280_v24 = vld [vmem:[%s6640_s3 + $0x1b8] sm:$0xf0]  ;;  %v4404_v28 = vld [vmem:[%s6640_s3 + $0x184] sm:$0xf]  ;;  %v3255_v29 = vor.u32 %v4406_v27, %v3254_v26  ;;  %v3256_v30 = vld [vmem:[%s6640_s3 + $0x190] sm:$0xf0] }
  0x36   :  { %716 = vmatpush.bf16.msrb.mxu0 %v4310_v12  ;;  %v3270_v12 = vld [vmem:[%s6640_s3 + $0x1a0] sm:$0xf]  ;;  %v3262_v31 = vld [vmem:[%s6640_s3 + $0x188] sm:$0xf]  ;;  %v3264_v36 = vld [vmem:[%s6640_s3 + $0x198] sm:$0xf0] }
  0x37   :  { %735 = vmatpush.bf16.msrb.mxu1 %v4318_v13  ;;  %v4410_v13 = vld [vmem:[%s6640_s3 + $0x1ac] sm:$0xf0]  ;;  %v3238_v40 = vld [vmem:[%s6640_s3 + $0x160] sm:$0xf]  ;;  %v4400_v42 = vld [vmem:[%s6640_s3 + $0x164] sm:$0xf] }
  0x38   :  { %754 = vmatpush.bf16.msrb.mxu2 %v4326_v14  ;;  %v4408_v14 = vld [vmem:[%s6640_s3 + $0x1a4] sm:$0xf]  ;;  %v4402_v41 = vld [vmem:[%s6640_s3 + $0x16c] sm:$0xf0]  ;;  %v4403_v48 = vld [vmem:[%s6640_s3 + $0x174] sm:$0xf0] }
  0x39   :  { %773 = vmatpush.bf16.msrb.mxu3 %v4334_v15  ;;  %v3248_v54 = vld [vmem:[%s6640_s3 + $0x178] sm:$0xf0]  ;;  %v3222_v56 = vld [vmem:[%s6640_s3 + $0x140] sm:$0xf]  ;;  %v3224_v60 = vld [vmem:[%s6640_s3 + $0x150] sm:$0xf0] }
  0x3a   :  { %717 = vmatpush.bf16.msrb.mxu0 %v4309_v16  ;;  %v4399_v62 = vld [vmem:[%s6640_s3 + $0x154] sm:$0xf0]  ;;  %v3232_v2 = vld [vmem:[%s6640_s3 + $0x158] sm:$0xf0]  ;;  %v4394_v7 = vld [vmem:[%s6640_s3 + $0x12c] sm:$0xf0] }
  0x3b   :  { %736 = vmatpush.bf16.msrb.mxu1 %v4317_v17  ;;  %v3271_v17 = vor.u32 %v4410_v13, %v3270_v12  ;;  %v4392_v8 = vld [vmem:[%s6640_s3 + $0x124] sm:$0xf] }
  0x3c   :  { %755 = vmatpush.bf16.msrb.mxu2 %v4325_v18  ;;  %v3272_v18 = vld [vmem:[%s6640_s3 + $0x1b0] sm:$0xf0]  ;;  %v4388_v26 = vld [vmem:[%s6640_s3 + $0x104] sm:$0xf] }
  0x3d   :  { %774 = vmatpush.bf16.msrb.mxu3 %v4333_v19  ;;  %v3278_v19 = vld [vmem:[%s6640_s3 + $0x1a8] sm:$0xf] }
  0x3e   :  { %718 = vmatpush.bf16.msrb.mxu0 %v4308_v20  ;;  %v4411_v20 = vld [vmem:[%s6640_s3 + $0x1b4] sm:$0xf0] }
  0x3f   :  { %737 = vmatpush.bf16.msrb.mxu1 %v4316_v21  ;;  %v3275_v21 = vor.u32 %v4408_v14, %v3272_v18  ;;  %v3208_v14 = vld [vmem:[%s6640_s3 + $0x130] sm:$0xf0]  ;;  %v4395_v18 = vld [vmem:[%s6640_s3 + $0x134] sm:$0xf0] }
  0x40   :  { %756 = vmatpush.bf16.msrb.mxu2 %v4324_v22  ;;  %v3279_v22 = vor.u32 %v4411_v20, %v3278_v19  ;;  %v3211_v19 = vor.u32 %v4392_v8, %v3208_v14  ;;  %v3398_v8 = vld [vmem:[%s6640_s3 + $0xa0] sm:$0xf]  ;;  %v4376_v14 = vld [vmem:[%s6640_s3 + $0xa4] sm:$0xf] }
  0x41   :  { %775 = vmatpush.bf16.msrb.mxu3 %v4332_v23  ;;  %719 = vmatmul.bf16.vlgmr.msrb.gmra.mxu0 %v2855_v32  ;;  %v4409_v23 = vld [vmem:[%s6640_s3 + $0x1ac] sm:$0xf]  ;;  %v4407_v32 = vld [vmem:[%s6640_s3 + $0x194] sm:$0xf0] }
  0x42   :  { %738 = vmatmul.bf16.vlgmr.msrb.gmra.mxu1 %v2859_v33  ;;  %1030 = vmatpush.bf16.msra.mxu0 %v3303_v53  ;;  %v3283_v25 = vor.u32 %v4409_v23, %v3280_v24  ;;  %v3259_v33 = vor.u32 %v4404_v28, %v3256_v30  ;;  %v4401_v53 = vld [vmem:[%s6640_s3 + $0x16c] sm:$0xf]  ;;  %v3190_v24 = vld [vmem:[%s6640_s3 + $0x100] sm:$0xf]  ;;  %v3192_v28 = vld [vmem:[%s6640_s3 + $0x110] sm:$0xf0] }
  0x43   :  { %757 = vmatmul.bf16.vlgmr.msrb.gmra.mxu2 %v2863_v34  ;;  %1043 = vmatpush.bf16.msra.mxu1 %v3307_v57  ;;  %v3263_v34 = vor.u32 %v4407_v32, %v3262_v31  ;;  %v3251_v55 = vor.u32 %v4401_v53, %v3248_v54  ;;  %v4398_v57 = vld [vmem:[%s6640_s3 + $0x14c] sm:$0xf0]  ;;  %v4391_v30 = vld [vmem:[%s6640_s3 + $0x114] sm:$0xf0]  ;;  %v3195_v31 = vor.u32 %v4388_v26, %v3192_v28 }
  0x44   :  { %776 = vmatmul.bf16.vlgmr.msrb.gmra.mxu3 %v2867_v35  ;;  %1056 = vmatpush.bf16.msra.mxu2 %v3311_v58  ;;  %v4405_v35 = vld [vmem:[%s6640_s3 + $0x18c] sm:$0xf]  ;;  %v4396_v58 = vld [vmem:[%s6640_s3 + $0x144] sm:$0xf]  ;;  %v3223_v59 = vor.u32 %v4398_v57, %v3222_v56  ;;  %v3440_v56 = vld [vmem:[%s6640_s3 + $0xf8] sm:$0xf0] }
  0x45   :  { %1069 = vmatpush.bf16.msra.mxu3 %v3315_v61  ;;  %v3267_v37 = vor.u32 %v4405_v35, %v3264_v36  ;;  %v3230_v61 = vld [vmem:[%s6640_s3 + $0x148] sm:$0xf]  ;;  %v3227_v63 = vor.u32 %v4396_v58, %v3224_v60  ;;  %v3430_v35 = vld [vmem:[%s6640_s3 + $0xe0] sm:$0xf]  ;;  %v4382_v58 = vld [vmem:[%s6640_s3 + $0xcc] sm:$0xf0] }
  0x46   :  { %1031 = vmatpush.bf16.msra.mxu0 %v3287_v1  ;;  %v3231_v0 = vor.u32 %v4399_v62, %v3230_v61  ;;  %v4397_v1 = vld [vmem:[%s6640_s3 + $0x14c] sm:$0xf]  ;;  %v3414_v57 = vld [vmem:[%s6640_s3 + $0xc0] sm:$0xf]  ;;  %v4380_v61 = vld [vmem:[%s6640_s3 + $0xc4] sm:$0xf] }
  0x47   :  { %1044 = vmatpush.bf16.msra.mxu1 %v3291_v5  ;;  %v3235_v3 = vor.u32 %v4397_v1, %v3232_v2  ;;  %v3415_v60 = vor.u32 %v4382_v58, %v3414_v57  ;;  %v3416_v62 = vld [vmem:[%s6640_s3 + $0xd0] sm:$0xf0]  ;;  %v4383_v1 = vld [vmem:[%s6640_s3 + $0xd4] sm:$0xf0]  ;;  %v4381_v2 = vld [vmem:[%s6640_s3 + $0xcc] sm:$0xf] }
  0x48   :  { %1057 = vmatpush.bf16.msra.mxu2 %v3295_v6  ;;  %v3206_v6 = vld [vmem:[%s6640_s3 + $0x120] sm:$0xf]  ;;  %v3374_v57 = vld [vmem:[%s6640_s3 + $0x68] sm:$0xf]  ;;  %v4371_v58 = vld [vmem:[%s6640_s3 + $0x74] sm:$0xf0] }
  0x49   :  { %1070 = vmatpush.bf16.msra.mxu3 %v3299_v9  ;;  %v3207_v13 = vor.u32 %v4394_v7, %v3206_v6 }
  0x4a   :  { %1032 = vmatpush.bf16.msra.mxu0 %v3271_v17  ;;  %v3214_v17 = vld [vmem:[%s6640_s3 + $0x128] sm:$0xf] }
  0x4b   :  { %1045 = vmatpush.bf16.msra.mxu1 %v3275_v21  ;;  %v3215_v20 = vor.u32 %v4395_v18, %v3214_v17  ;;  %v4393_v21 = vld [vmem:[%s6640_s3 + $0x12c] sm:$0xf]  ;;  %v3400_v18 = vld [vmem:[%s6640_s3 + $0xb0] sm:$0xf0] }
  0x4c   :  { %1058 = vmatpush.bf16.msra.mxu2 %v3279_v22  ;;  %v3216_v22 = vld [vmem:[%s6640_s3 + $0x138] sm:$0xf0] }
  0x4d   :  { %1071 = vmatpush.bf16.msra.mxu3 %v3283_v25  ;;  %v3219_v23 = vor.u32 %v4393_v21, %v3216_v22  ;;  %v4390_v25 = vld [vmem:[%s6640_s3 + $0x10c] sm:$0xf0]  ;;  %v3403_v21 = vor.u32 %v4376_v14, %v3400_v18  ;;  %v4367_v18 = vld [vmem:[%s6640_s3 + $0x54] sm:$0xf0] }
  0x4e   :  { %1033 = vmatpush.bf16.msra.mxu0 %v3255_v29  ;;  %v3191_v27 = vor.u32 %v4390_v25, %v3190_v24  ;;  %v3198_v29 = vld [vmem:[%s6640_s3 + $0x108] sm:$0xf]  ;;  %v3408_v24 = vld [vmem:[%s6640_s3 + $0xb8] sm:$0xf0] }
  0x4f   :  { %1046 = vmatpush.bf16.msra.mxu1 %v3259_v33  ;;  %v3199_v32 = vor.u32 %v4391_v30, %v3198_v29  ;;  %v4389_v33 = vld [vmem:[%s6640_s3 + $0x10c] sm:$0xf]  ;;  %v3382_v29 = vld [vmem:[%s6640_s3 + $0x80] sm:$0xf]  ;;  %v4374_v30 = vld [vmem:[%s6640_s3 + $0x8c] sm:$0xf0] }
  0x50   :  { %1059 = vmatpush.bf16.msra.mxu2 %v3263_v34  ;;  %v3200_v34 = vld [vmem:[%s6640_s3 + $0x118] sm:$0xf0] }
  0x51   :  { %724 = vmatmul.bf16.gmra.mxu0 %v2887_v44  ;;  %1072 = vmatpush.bf16.msra.mxu3 %v3267_v37  ;;  %v3203_v36 = vor.u32 %v4389_v33, %v3200_v34  ;;  %v4386_v37 = vld [vmem:[%s6640_s3 + $0xec] sm:$0xf0]  ;;  %v3383_v33 = vor.u32 %v4374_v30, %v3382_v29  ;;  %v3384_v34 = vld [vmem:[%s6640_s3 + $0x90] sm:$0xf0] }
  0x52   :  { %743 = vmatmul.bf16.gmra.mxu1 %v2891_v45  ;;  %v3239_v45 = vor.u32 %v4402_v41, %v3238_v40  ;;  %v4384_v40 = vld [vmem:[%s6640_s3 + $0xe4] sm:$0xf]  ;;  %v3432_v41 = vld [vmem:[%s6640_s3 + $0xf0] sm:$0xf0] }
  0x53   :  { %762 = vmatmul.bf16.gmra.mxu2 %v2895_v46  ;;  %v3240_v46 = vld [vmem:[%s6640_s3 + $0x170] sm:$0xf0] }
  0x54   :  { %781 = vmatmul.bf16.gmra.mxu3 %v2899_v47  ;;  %v3246_v47 = vld [vmem:[%s6640_s3 + $0x168] sm:$0xf]  ;;  %v3243_v49 = vor.u32 %v4400_v42, %v3240_v46  ;;  %1034 = vmatpush.bf16.msra.mxu0 %v3239_v45  ;;  %v3431_v46 = vor.u32 %v4386_v37, %v3430_v35 }
  0x55   :  { %v3247_v50 = vor.u32 %v4403_v48, %v3246_v47  ;;  %1073 = vmatpush.bf16.msra.mxu3 %v3251_v55  ;;  %v3435_v47 = vor.u32 %v4384_v40, %v3432_v41  ;;  %v3438_v48 = vld [vmem:[%s6640_s3 + $0xe8] sm:$0xf]  ;;  %v4373_v41 = vld [vmem:[%s6640_s3 + $0x8c] sm:$0xf] }
  0x56   :  { %1047 = vmatpush.bf16.msra.mxu1 %v3243_v49  ;;  %v4387_v49 = vld [vmem:[%s6640_s3 + $0xf4] sm:$0xf0]  ;;  %v3390_v35 = vld [vmem:[%s6640_s3 + $0x88] sm:$0xf] }
  0x57   :  { %1060 = vmatpush.bf16.msra.mxu2 %v3247_v50  ;;  %v4385_v50 = vld [vmem:[%s6640_s3 + $0xec] sm:$0xf]  ;;  %v3439_v55 = vor.u32 %v4387_v49, %v3438_v48  ;;  %v3366_v48 = vld [vmem:[%s6640_s3 + $0x60] sm:$0xf]  ;;  %v4370_v49 = vld [vmem:[%s6640_s3 + $0x6c] sm:$0xf0] }
  0x58   :  { %1035 = vmatpush.bf16.msra.mxu0 %v3223_v59  ;;  %v3443_v59 = vor.u32 %v4385_v50, %v3440_v56  ;;  %v4368_v50 = vld [vmem:[%s6640_s3 + $0x64] sm:$0xf]  ;;  %v3368_v56 = vld [vmem:[%s6640_s3 + $0x70] sm:$0xf0] }
  0x59   :  { %1074 = vmatpush.bf16.msra.mxu3 %v3235_v3  ;;  %v3424_v3 = vld [vmem:[%s6640_s3 + $0xd8] sm:$0xf0] }
  0x5a   :  { %1048 = vmatpush.bf16.msra.mxu1 %v3227_v63  ;;  %v3422_v63 = vld [vmem:[%s6640_s3 + $0xc8] sm:$0xf]  ;;  %v3427_v7 = vor.u32 %v4381_v2, %v3424_v3  ;;  %v4364_v3 = vld [vmem:[%s6640_s3 + $0x44] sm:$0xf] }
  0x5b   :  { %1061 = vmatpush.bf16.msra.mxu2 %v3231_v0  ;;  %v3419_v0 = vor.u32 %v4380_v61, %v3416_v62  ;;  %v3423_v6 = vor.u32 %v4383_v1, %v3422_v63  ;;  %v3375_v61 = vor.u32 %v4371_v58, %v3374_v57  ;;  %v4369_v62 = vld [vmem:[%s6640_s3 + $0x6c] sm:$0xf]  ;;  %v3376_v63 = vld [vmem:[%s6640_s3 + $0x78] sm:$0xf0] }
  0x5c   :  { %1036 = vmatpush.bf16.msra.mxu0 %v3207_v13  ;;  %v4378_v13 = vld [vmem:[%s6640_s3 + $0xac] sm:$0xf0]  ;;  %v4357_v58 = vld [vmem:[%s6640_s3 + $0xc] sm:$0xf] }
  0x5d   :  { %1075 = vmatpush.bf16.msra.mxu3 %v3219_v23  ;;  %v3399_v17 = vor.u32 %v4378_v13, %v3398_v8  ;;  %v4377_v23 = vld [vmem:[%s6640_s3 + $0xac] sm:$0xf] }
  0x5e   :  { %1049 = vmatpush.bf16.msra.mxu1 %v3211_v19  ;;  %v3406_v19 = vld [vmem:[%s6640_s3 + $0xa8] sm:$0xf] }
  0x5f   :  { %1062 = vmatpush.bf16.msra.mxu2 %v3215_v20  ;;  %v4379_v20 = vld [vmem:[%s6640_s3 + $0xb4] sm:$0xf0] }
  0x60   :  { %1037 = vmatpush.bf16.msra.mxu0 %v3191_v27  ;;  %v3407_v22 = vor.u32 %v4379_v20, %v3406_v19  ;;  %v3411_v27 = vor.u32 %v4377_v23, %v3408_v24  ;;  %v4365_v19 = vld [vmem:[%s6640_s3 + $0x4c] sm:$0xf]  ;;  %v4362_v23 = vld [vmem:[%s6640_s3 + $0x2c] sm:$0xf0]  ;;  %v4360_v24 = vld [vmem:[%s6640_s3 + $0x24] sm:$0xf] }
  0x61   :  { %1076 = vmatpush.bf16.msra.mxu3 %v3203_v36  ;;  %v4375_v36 = vld [vmem:[%s6640_s3 + $0x94] sm:$0xf0] }
  0x62   :  { %1050 = vmatpush.bf16.msra.mxu1 %v3195_v31  ;;  %v4372_v31 = vld [vmem:[%s6640_s3 + $0x84] sm:$0xf]  ;;  %v3391_v40 = vor.u32 %v4375_v36, %v3390_v35  ;;  %v3318_v36 = vld [vmem:[%s6640_s3] sm:$0xf] }
  0x63   :  { %1063 = vmatpush.bf16.msra.mxu2 %v3199_v32  ;;  %v3387_v37 = vor.u32 %v4372_v31, %v3384_v34  ;;  %v4361_v31 = vld [vmem:[%s6640_s3 + $0x2c] sm:$0xf] }
  0x64   :  { %1242 = vmatpush.bf16.msrb.mxu0 %v3431_v46  ;;  %v3392_v46 = vld [vmem:[%s6640_s3 + $0x98] sm:$0xf0] }
  0x65   :  { %1281 = vmatpush.bf16.msrb.mxu3 %v3443_v59 }
  0x66   :  { %1255 = vmatpush.bf16.msrb.mxu1 %v3435_v47  ;;  %v3395_v47 = vor.u32 %v4373_v41, %v3392_v46  ;;  %v4358_v41 = vld [vmem:[%s6640_s3 + $0xc] sm:$0xf0]  ;;  %v4356_v46 = vld [vmem:[%s6640_s3 + $0x4] sm:$0xf] }
  0x67   :  { %1268 = vmatpush.bf16.msrb.mxu2 %v3439_v55  ;;  %v3367_v55 = vor.u32 %v4370_v49, %v3366_v48  ;;  %v4359_v49 = vld [vmem:[%s6640_s3 + $0x14] sm:$0xf0] }
  0x68   :  { %1243 = vmatpush.bf16.msrb.mxu0 %v3415_v60  ;;  %v3371_v60 = vor.u32 %v4368_v50, %v3368_v56 }
  0x69   :  { %1282 = vmatpush.bf16.msrb.mxu3 %v3427_v7 }
  0x6a   :  { %1256 = vmatpush.bf16.msrb.mxu1 %v3419_v0  ;;  %v3350_v0 = vld [vmem:[%s6640_s3 + $0x40] sm:$0xf] }
  0x6b   :  { %1269 = vmatpush.bf16.msrb.mxu2 %v3423_v6  ;;  %v3352_v6 = vld [vmem:[%s6640_s3 + $0x50] sm:$0xf0] }
  0x6c   :  { %1244 = vmatpush.bf16.msrb.mxu0 %v3399_v17  ;;  %v3358_v17 = vld [vmem:[%s6640_s3 + $0x48] sm:$0xf] }
  0x6d   :  { %1283 = vmatpush.bf16.msrb.mxu3 %v3411_v27  ;;  %v3336_v27 = vld [vmem:[%s6640_s3 + $0x30] sm:$0xf0] }
  0x6e   :  { %1257 = vmatpush.bf16.msrb.mxu1 %v3403_v21  ;;  %v3339_v35 = vor.u32 %v4360_v24, %v3336_v27  ;;  %v3598_v24 = vld [vmem:[%s6640_s3 + $0x2e8] sm:$0xf] }
  0x6f   :  { %1270 = vmatpush.bf16.msrb.mxu2 %v3407_v22  ;;  %v3359_v22 = vor.u32 %v4367_v18, %v3358_v17 }
  0x70   :  { %1245 = vmatpush.bf16.msrb.mxu0 %v3383_v33  ;;  %v3344_v33 = vld [vmem:[%s6640_s3 + $0x38] sm:$0xf0] }
  0x71   :  { %1284 = vmatpush.bf16.msrb.mxu3 %v3395_v47  ;;  %v3320_v47 = vld [vmem:[%s6640_s3 + $0x10] sm:$0xf0] }
  0x72   :  { %1258 = vmatpush.bf16.msrb.mxu1 %v3387_v37 }
  0x73   :  { %1271 = vmatpush.bf16.msrb.mxu2 %v3391_v40 }
  0x74   :  { %1246 = vmatpush.bf16.msrb.mxu0 %v3367_v55 }
  0x76   :  { %1259 = vmatpush.bf16.msrb.mxu1 %v3371_v60  ;;  %v3319_v60 = vor.u32 %v4358_v41, %v3318_v36  ;;  %v4444_v36 = vld [vmem:[%s6640_s3 + $0x2c4] sm:$0xf]  ;;  %v3584_v41 = vld [vmem:[%s6640_s3 + $0x2d8] sm:$0xf0] }
  0x77   :  { %1272 = vmatpush.bf16.msrb.mxu2 %v3375_v61  ;;  %v3323_v61 = vor.u32 %v4356_v46, %v3320_v47 }
  0x7b   :  { %1273 = vmatpush.bf16.msrb.mxu2 %v3359_v22  ;;  %v4448_v22 = vld [vmem:[%s6640_s3 + $0x2e4] sm:$0xf] }
  0x9e   :  { %v4978_v51 = vpop.f32.mrf.mxu0 }
  0x9f   :  { %v4980_v52 = vpop.f32.mrf.mxu1 }
  0xa0   :  { %v664_v7 = vadd.f32 %v4980_v52, %v4978_v51  ;;  %v3355_v52 = vor.u32 %v4364_v3, %v3352_v6 }
  0xa2   :  { %1260 = vmatpush.bf16.msrb.mxu1 %v3355_v52  ;;  %v4613_v52 = vld [vmem:[%s6639_s2] ss:$0 sm:$0xff] }
  0xa6   :  { %v5021_v10 = vpop.f32.mrf.mxu2  ;;  %v5034_v15 = vpop.f32.mrf.mxu0  ;;  %1261 = vmatpush.bf16.msrb.mxu1 %v3339_v35 }
  0xa7   :  { %v5023_v11 = vpop.f32.mrf.mxu3  ;;  %v5036_v16 = vpop.f32.mrf.mxu1 }
  0xa8   :  { %v666_v59 = vadd.f32 %v5036_v16, %v5034_v15  ;;  %v3379_v15 = vor.u32 %v4369_v62, %v3376_v63  ;;  %v4366_v16 = vld [vmem:[%s6640_s3 + $0x4c] sm:$0xf0] }
  0xa9   :  { %v3351_v51 = vor.u32 %v4366_v16, %v3350_v0 }
  0xaa   :  { %1285 = vmatpush.bf16.msrb.mxu3 %v3379_v15  ;;  %1262 = vmatpush.bf16.msrb.mxu1 %v3323_v61  ;;  %v3542_v61 = vld [vmem:[%s6640_s3 + $0x280] sm:$0xf] }
  0xab   :  { %1247 = vmatpush.bf16.msrb.mxu0 %v3351_v51 }
  0xae   :  { %v5077_v38 = vpop.f32.mrf.mxu2  ;;  %v5090_v43 = vpop.f32.mrf.mxu0 }
  0xaf   :  { %v5079_v39 = vpop.f32.mrf.mxu3  ;;  %v5092_v44 = vpop.f32.mrf.mxu1  ;;  %v685_v8 = vadd.f32 %v5077_v38, %v666_v59  ;;  %v3360_v38 = vld [vmem:[%s6640_s3 + $0x58] sm:$0xf0] }
  0xb0   :  { %v669_v13 = vadd.f32 %v5092_v44, %v5090_v43  ;;  %v3334_v43 = vld [vmem:[%s6640_s3 + $0x20] sm:$0xf]  ;;  %v683_v44 = vadd.f32 %v5021_v10, %v664_v7  ;;  %v3328_v59 = vld [vmem:[%s6640_s3 + $0x18] sm:$0xf0] }
  0xb1   :  { %v704_v29 = vadd.f32 %v5079_v39, %v685_v8  ;;  %v3335_v34 = vor.u32 %v4362_v23, %v3334_v43  ;;  %v3592_v23 = vld [vmem:[%s6640_s3 + $0x2f0] sm:$0xf0] }
  0xb2   :  { %v702_v39 = vadd.f32 %v5023_v11, %v683_v44 }
  0xb3   :  { %1248 = vmatpush.bf16.msrb.mxu0 %v3335_v34 }
  0xb6   :  { %v5133_v4 = vpop.f32.mrf.mxu2  ;;  %v5146_v9 = vpop.f32.mrf.mxu0 }
  0xb7   :  { %v5135_v5 = vpop.f32.mrf.mxu3  ;;  %v5148_v12 = vpop.f32.mrf.mxu1  ;;  %v688_v20 = vadd.f32 %v5133_v4, %v669_v13  ;;  %v3363_v4 = vor.u32 %v4365_v19, %v3360_v38  ;;  %1249 = vmatpush.bf16.msrb.mxu0 %v3319_v60 }
  0xb8   :  { %v671_v21 = vadd.f32 %v5148_v12, %v5146_v9  ;;  %v3342_v9 = vld [vmem:[%s6640_s3 + $0x28] sm:$0xf]  ;;  %v4363_v12 = vld [vmem:[%s6640_s3 + $0x34] sm:$0xf0] }
  0xb9   :  { %v3343_v40 = vor.u32 %v4363_v12, %v3342_v9  ;;  %1286 = vmatpush.bf16.msrb.mxu3 %v3363_v4  ;;  %v4449_v4 = vld [vmem:[%s6640_s3 + $0x2ec] sm:$0xf]  ;;  %v3600_v9 = vld [vmem:[%s6640_s3 + $0x2f8] sm:$0xf0] }
  0xba   :  { %v3603_v35 = vor.u32 %v4449_v4, %v3600_v9 }
  0xbb   :  { %1274 = vmatpush.bf16.msrb.mxu2 %v3343_v40  ;;  %v4445_v40 = vld [vmem:[%s6640_s3 + $0x2cc] sm:$0xf] }
  0xbe   :  { %v5201_v42 = vpop.f32.mrf.mxu2  ;;  %v5214_v53 = vpop.f32.mrf.mxu0 }
  0xbf   :  { %v5203_v45 = vpop.f32.mrf.mxu3  ;;  %v5216_v54 = vpop.f32.mrf.mxu1  ;;  %v690_v30 = vadd.f32 %v5201_v42, %v671_v21  ;;  %v707_v42 = vadd.f32 %v5135_v5, %v688_v20  ;;  %v3347_v5 = vor.u32 %v4361_v31, %v3344_v33  ;;  %v721_v55 = vadd.f32 %v5214_v53, %v702_v39  ;;  %v3574_v31 = vld [vmem:[%s6640_s3 + $0x2c0] sm:$0xf]  ;;  %v4446_v33 = vld [vmem:[%s6640_s3 + $0x2cc] sm:$0xf0]  ;;  %v3576_v39 = vld [vmem:[%s6640_s3 + $0x2d0] sm:$0xf0] }
  0xc0   :  { %v3331_v53 = vor.u32 %v4357_v58, %v3328_v59  ;;  %v3575_v46 = vor.u32 %v4446_v33, %v3574_v31  ;;  %v3579_v47 = vor.u32 %v4444_v36, %v3576_v39  ;;  %v3568_v58 = vld [vmem:[%s6640_s3 + $0x2b8] sm:$0xf0]  ;;  %v4424_v33 = vld [vmem:[%s6640_s3 + $0x224] sm:$0xf]  ;;  %v4427_v36 = vld [vmem:[%s6640_s3 + $0x234] sm:$0xf0] }
  0xc1   :  { %v709_v50 = vadd.f32 %v5203_v45, %v690_v30  ;;  %1287 = vmatpush.bf16.msrb.mxu3 %v3347_v5  ;;  %v740_v0 = vadd.f32 %v5216_v54, %v721_v55  ;;  %v3595_v30 = vor.u32 %v4448_v22, %v3592_v23  ;;  %v3566_v55 = vld [vmem:[%s6640_s3 + $0x2a8] sm:$0xf]  ;;  %v3512_v22 = vld [vmem:[%s6640_s3 + $0x250] sm:$0xf0]  ;;  %v4425_v39 = vld [vmem:[%s6640_s3 + $0x22c] sm:$0xf] }
  0xc2   :  { %v3518_v23 = vld [vmem:[%s6640_s3 + $0x248] sm:$0xf] }
  0xc5   :  { %1288 = vmatpush.bf16.msrb.mxu3 %v3331_v53  ;;  %v4436_v53 = vld [vmem:[%s6640_s3 + $0x284] sm:$0xf] }
  0xc6   :  { %v5269_v25 = vpop.f32.mrf.mxu2  ;;  %v5273_v28 = vpop.f32.mrf.mxu0 }
  0xc7   :  { %v5271_v26 = vpop.f32.mrf.mxu3  ;;  %v5284_v32 = vpop.f32.mrf.mxu1  ;;  %v723_v37 = vadd.f32 %v5273_v28, %v704_v29  ;;  %v3326_v28 = vld [vmem:[%s6640_s3 + $0x8] sm:$0xf]  ;;  %v759_v6 = vadd.f32 %v5269_v25, %v740_v0  ;;  %v3544_v0 = vld [vmem:[%s6640_s3 + $0x290] sm:$0xf0] }
  0xc8   :  { %v3327_v45 = vor.u32 %v4359_v49, %v3326_v28  ;;  %v3587_v28 = vor.u32 %v4445_v40, %v3584_v41  ;;  %v4440_v49 = vld [vmem:[%s6640_s3 + $0x2a4] sm:$0xf] }
  0xc9   :  { %v742_v62 = vadd.f32 %v5284_v32, %v723_v37  ;;  %v778_v18 = vadd.f32 %v5271_v26, %v759_v6  ;;  %v4450_v26 = vld [vmem:[%s6640_s3 + $0x2ec] sm:$0xf0]  ;;  %v4447_v37 = vld [vmem:[%s6640_s3 + $0x2d4] sm:$0xf0]  ;;  %v3552_v6 = vld [vmem:[%s6640_s3 + $0x298] sm:$0xf0] }
  0xca   :  { %1275 = vmatpush.bf16.msrb.mxu2 %v3327_v45 }
  0xce   :  { %v5330_v1 = vpop.f32.mrf.mxu2  ;;  %v725_v14 = vpop.f32.mrf.mxu0 }
  0xcf   :  { %v5332_v2 = vpop.f32.mrf.mxu3  ;;  %v744_v10 = vpop.f32.mrf.mxu1  ;;  %v726_v56 = vadd.f32 %v725_v14, %v707_v42  ;;  %v761_v15 = vadd.f32 %v5330_v1, %v742_v62  ;;  %v3582_v42 = vld [vmem:[%s6640_s3 + $0x2c8] sm:$0xf]  ;;  %v4438_v62 = vld [vmem:[%s6640_s3 + $0x28c] sm:$0xf0] }
  0xd0   :  { %v3583_v5 = vor.u32 %v4447_v37, %v3582_v42  ;;  %v3504_v42 = vld [vmem:[%s6640_s3 + $0x238] sm:$0xf0]  ;;  %v3478_v37 = vld [vmem:[%s6640_s3 + $0x200] sm:$0xf] }
  0xd1   :  { %v745_v16 = vadd.f32 %v744_v10, %v726_v56  ;;  %v780_v32 = vadd.f32 %v5332_v2, %v761_v15  ;;  %v3590_v2 = vld [vmem:[%s6640_s3 + $0x2e0] sm:$0xf]  ;;  %v4451_v10 = vld [vmem:[%s6640_s3 + $0x2f4] sm:$0xf0]  ;;  %v3550_v15 = vld [vmem:[%s6640_s3 + $0x288] sm:$0xf] }
  0xd2   :  { %v3591_v29 = vor.u32 %v4450_v26, %v3590_v2  ;;  %v3599_v34 = vor.u32 %v4451_v10, %v3598_v24  ;;  %v4443_v56 = vld [vmem:[%s6640_s3 + $0x2b4] sm:$0xf0]  ;;  %v3520_v10 = vld [vmem:[%s6640_s3 + $0x258] sm:$0xf0] }
  0xd3   :  { %v787_v1 = vmax.f32 %v778_v18, %v780_v32  ;;  %v4434_v32 = vld [vmem:[%s6640_s3 + $0x26c] sm:$0xf0]  ;;  %v4432_v18 = vld [vmem:[%s6640_s3 + $0x264] sm:$0xf]  ;;  %v4431_v24 = vld [vmem:[%s6640_s3 + $0x254] sm:$0xf0] }
  0xd6   :  { %v763_v48 = vpop.f32.mrf.mxu2  ;;  %v727_v57 = vpop.f32.mrf.mxu0 }
  0xd7   :  { %v782_v11 = vpop.f32.mrf.mxu3  ;;  %v728_v63 = vadd.f32 %v727_v57, %v709_v50  ;;  %v746_v3 = vpop.f32.mrf.mxu1  ;;  %v764_v7 = vadd.f32 %v763_v48, %v745_v16  ;;  %v3558_v48 = vld [vmem:[%s6640_s3 + $0x2a0] sm:$0xf]  ;;  %v3560_v50 = vld [vmem:[%s6640_s3 + $0x2b0] sm:$0xf0]  ;;  %v4441_v57 = vld [vmem:[%s6640_s3 + $0x2ac] sm:$0xf] }
  0xd8   :  { %v3563_v60 = vor.u32 %v4440_v49, %v3560_v50  ;;  %v3571_v45 = vor.u32 %v4441_v57, %v3568_v58  ;;  %v4439_v16 = vld [vmem:[%s6640_s3 + $0x294] sm:$0xf0]  ;;  %v3486_v49 = vld [vmem:[%s6640_s3 + $0x208] sm:$0xf]  ;;  %v3750_v57 = vld [vmem:[%s6640_s3 + $0x3e0] sm:$0xf] }
  0xd9   :  { %v747_v8 = vadd.f32 %v746_v3, %v728_v63  ;;  %v783_v54 = vadd.f32 %v782_v11, %v764_v7  ;;  %v4442_v11 = vld [vmem:[%s6640_s3 + $0x2ac] sm:$0xf0]  ;;  %v3567_v63 = vor.u32 %v4443_v56, %v3566_v55  ;;  %v4437_v3 = vld [vmem:[%s6640_s3 + $0x28c] sm:$0xf]  ;;  %v3543_v7 = vor.u32 %v4438_v62, %v3542_v61  ;;  %v4423_v50 = vld [vmem:[%s6640_s3 + $0x214] sm:$0xf0] }
  0xda   :  { %v3559_v59 = vor.u32 %v4442_v11, %v3558_v48  ;;  %v4420_v48 = vld [vmem:[%s6640_s3 + $0x204] sm:$0xf]  ;;  %v3480_v11 = vld [vmem:[%s6640_s3 + $0x210] sm:$0xf0]  ;;  %v4421_v55 = vld [vmem:[%s6640_s3 + $0x20c] sm:$0xf] }
  0xdb   :  { %v3488_v56 = vld [vmem:[%s6640_s3 + $0x218] sm:$0xf0]  ;;  %v4482_v58 = vld [vmem:[%s6640_s3 + $0x3ec] sm:$0xf0]  ;;  %v3752_v61 = vld [vmem:[%s6640_s3 + $0x3f0] sm:$0xf0] }
  0xdc   :  { %v3758_v62 = vld [vmem:[%s6640_s3 + $0x3e8] sm:$0xf] }
  0xde   :  { %v765_v13 = vpop.f32.mrf.mxu2 }
  0xdf   :  { %v766_v14 = vadd.f32 %v765_v13, %v747_v8  ;;  %v784_v17 = vpop.f32.mrf.mxu3  ;;  %v3547_v8 = vor.u32 %v4436_v53, %v3544_v0  ;;  %v3526_v13 = vld [vmem:[%s6640_s3 + $0x260] sm:$0xf]  ;;  %v4483_v53 = vld [vmem:[%s6640_s3 + $0x3f4] sm:$0xf0]  ;;  %v4481_v0 = vld [vmem:[%s6640_s3 + $0x3ec] sm:$0xf] }
  0xe1   :  { %v785_v19 = vadd.f32 %v784_v17, %v766_v14  ;;  %v3551_v14 = vor.u32 %v4439_v16, %v3550_v15  ;;  %v3555_v17 = vor.u32 %v4437_v3, %v3552_v6  ;;  %v3760_v15 = vld [vmem:[%s6640_s3 + $0x3f8] sm:$0xf0]  ;;  %v3487_v16 = vor.u32 %v4423_v50, %v3486_v49  ;;  %v4467_v49 = vld [vmem:[%s6640_s3 + $0x374] sm:$0xf0]  ;;  %v4465_v50 = vld [vmem:[%s6640_s3 + $0x36c] sm:$0xf] }
  0xe2   :  { %v3491_v3 = vor.u32 %v4421_v55, %v3488_v56  ;;  %v3751_v6 = vor.u32 %v4482_v58, %v3750_v57  ;;  %v3696_v55 = vld [vmem:[%s6640_s3 + $0x378] sm:$0xf0]  ;;  %v3670_v58 = vld [vmem:[%s6640_s3 + $0x340] sm:$0xf] }
  0xe3   :  { %v788_v51 = vmax.f32 %v783_v54, %v785_v19  ;;  %v3528_v54 = vld [vmem:[%s6640_s3 + $0x270] sm:$0xf0]  ;;  %v3534_v19 = vld [vmem:[%s6640_s3 + $0x268] sm:$0xf] }
  0xe5   :  { %v789_v25 = vmax.f32 %v787_v1, %v788_v51  ;;  %v4435_v1 = vld [vmem:[%s6640_s3 + $0x274] sm:$0xf0]  ;;  %v4433_v51 = vld [vmem:[%s6640_s3 + $0x26c] sm:$0xf] }
  0xe6   :  { %v3535_v2 = vor.u32 %v4435_v1, %v3534_v19  ;;  %v3742_v19 = vld [vmem:[%s6640_s3 + $0x3c8] sm:$0xf]  ;;  %v4479_v1 = vld [vmem:[%s6640_s3 + $0x3d4] sm:$0xf0] }
  0xe7   :  { %v794_v38 = vadd.f32 %v4613_v52, %v789_v25  ;;  %v3536_v52 = vld [vmem:[%s6640_s3 + $0x278] sm:$0xf0]  ;;  %v3527_v25 = vor.u32 %v4434_v32, %v3526_v13  ;;  %v3734_v13 = vld [vmem:[%s6640_s3 + $0x3c0] sm:$0xf]  ;;  %v4478_v32 = vld [vmem:[%s6640_s3 + $0x3cc] sm:$0xf0] }
  0xe8   :  { %v3539_v26 = vor.u32 %v4433_v51, %v3536_v52  ;;  %v4477_v51 = vld [vmem:[%s6640_s3 + $0x3cc] sm:$0xf]  ;;  %v3744_v52 = vld [vmem:[%s6640_s3 + $0x3d8] sm:$0xf0] }
  0xe9   :  { %v795_v43 = vmax.f32 %v794_v38, 0.0  ;;  %v3531_v38 = vor.u32 %v4432_v18, %v3528_v54  ;;  %v4476_v18 = vld [vmem:[%s6640_s3 + $0x3c4] sm:$0xf]  ;;  %v3736_v54 = vld [vmem:[%s6640_s3 + $0x3d0] sm:$0xf0] }
  0xeb   :  { %v796_v44 = vpack.c.bf16 %v795_v43, %v795_v43  ;;  %v3510_v43 = vld [vmem:[%s6640_s3 + $0x240] sm:$0xf] }
  0xed   :  { %797 = vst [vmem:[#allocation2] sm:$0xf] %v796_v44  ;;  %v4430_v44 = vld [vmem:[%s6640_s3 + $0x24c] sm:$0xf0] }
  0xee   :  { %v3511_v4 = vor.u32 %v4430_v44, %v3510_v43  ;;  %v3739_v43 = vor.u32 %v4476_v18, %v3736_v54  ;;  %v3718_v44 = vld [vmem:[%s6640_s3 + $0x3a0] sm:$0xf]  ;;  %v3662_v18 = vld [vmem:[%s6640_s3 + $0x328] sm:$0xf]  ;;  %v4459_v54 = vld [vmem:[%s6640_s3 + $0x334] sm:$0xf0] }
  0xf4   :  { %v831_v20 = vld [vmem:[#allocation2] sm:$0x2]  ;;  %v1294_v40 = vld [vmem:[#allocation2] sm:$0x4] }
  0xf5   :  { %v866_v21 = vunpack.c.l.b16 %v831_v20  ;;  %v4428_v20 = vld [vmem:[%s6640_s3 + $0x244] sm:$0xf] }
  0xf6   :  { %v3515_v9 = vor.u32 %v4428_v20, %v3512_v22  ;;  %v4474_v20 = vld [vmem:[%s6640_s3 + $0x3ac] sm:$0xf0]  ;;  %v3720_v22 = vld [vmem:[%s6640_s3 + $0x3b0] sm:$0xf0] }
  0xf7   :  { %v867_v27 = vpack.c.b16 %v866_v21, %v866_v21  ;;  %v798_v21 = vld [vmem:[#allocation2] sm:$0x1] }
  0xf9   :  { %v868_v12 = vrot.slane %v867_v27, 1  ;;  %v4429_v27 = vld [vmem:[%s6640_s3 + $0x24c] sm:$0xf] }
  0xfa   :  { %v3523_v31 = vor.u32 %v4429_v27, %v3520_v10  ;;  %v4473_v27 = vld [vmem:[%s6640_s3 + $0x3ac] sm:$0xf]  ;;  %v3728_v10 = vld [vmem:[%s6640_s3 + $0x3b8] sm:$0xf0] }
  0xfb   :  { %1038 = vmatmul.bf16.vlgmr.msra.gmra.mxu0 %v868_v12  ;;  %1051 = vmatmul.bf16.vlgmr.msra.gmra.mxu1 %v868_v12 }
  0xfc   :  { %1064 = vmatmul.bf16.vlgmr.msra.gmra.mxu2 %v868_v12  ;;  %1077 = vmatmul.bf16.vlgmr.msra.gmra.mxu3 %v868_v12  ;;  %v3494_v12 = vld [vmem:[%s6640_s3 + $0x220] sm:$0xf] }
  0xfd   :  { %1493 = vmatpush.bf16.msra.mxu0 %v3591_v29  ;;  %1506 = vmatpush.bf16.msra.mxu1 %v3595_v30  ;;  %v4426_v29 = vld [vmem:[%s6640_s3 + $0x22c] sm:$0xf0]  ;;  %v3519_v30 = vor.u32 %v4431_v24, %v3518_v23  ;;  %v3726_v23 = vld [vmem:[%s6640_s3 + $0x3a8] sm:$0xf]  ;;  %v4475_v24 = vld [vmem:[%s6640_s3 + $0x3b4] sm:$0xf0] }
  0xfe   :  { %1519 = vmatpush.bf16.msra.mxu2 %v3599_v34  ;;  %1532 = vmatpush.bf16.msra.mxu3 %v3603_v35  ;;  %v3496_v34 = vld [vmem:[%s6640_s3 + $0x230] sm:$0xf0]  ;;  %v3502_v35 = vld [vmem:[%s6640_s3 + $0x228] sm:$0xf]  ;;  %v3495_v41 = vor.u32 %v4426_v29, %v3494_v12  ;;  %v3702_v12 = vld [vmem:[%s6640_s3 + $0x380] sm:$0xf] }
  0xff   :  { %v4470_v29 = vld [vmem:[%s6640_s3 + $0x38c] sm:$0xf0] }
 0x101   :  { %1494 = vmatpush.bf16.msra.mxu0 %v3575_v46  ;;  %1507 = vmatpush.bf16.msra.mxu1 %v3579_v47  ;;  %v3499_v46 = vor.u32 %v4424_v33, %v3496_v34  ;;  %v4422_v47 = vld [vmem:[%s6640_s3 + $0x20c] sm:$0xf0]  ;;  %v4468_v33 = vld [vmem:[%s6640_s3 + $0x384] sm:$0xf]  ;;  %v3704_v34 = vld [vmem:[%s6640_s3 + $0x390] sm:$0xf0] }
 0x102   :  { %1520 = vmatpush.bf16.msra.mxu2 %v3583_v5  ;;  %1533 = vmatpush.bf16.msra.mxu3 %v3587_v28  ;;  %v3503_v5 = vor.u32 %v4427_v36, %v3502_v35  ;;  %v3507_v28 = vor.u32 %v4425_v39, %v3504_v42  ;;  %v3710_v35 = vld [vmem:[%s6640_s3 + $0x388] sm:$0xf]  ;;  %v4471_v36 = vld [vmem:[%s6640_s3 + $0x394] sm:$0xf0]  ;;  %v4469_v39 = vld [vmem:[%s6640_s3 + $0x38c] sm:$0xf] }
 0x103   :  { %v3712_v42 = vld [vmem:[%s6640_s3 + $0x398] sm:$0xf0] }
 0x105   :  { %1495 = vmatpush.bf16.msra.mxu0 %v3559_v59  ;;  %1508 = vmatpush.bf16.msra.mxu1 %v3563_v60  ;;  %v1329_v59 = vunpack.c.l.b16 %v1294_v40  ;;  %v4480_v60 = vld [vmem:[%s6640_s3 + $0x3e4] sm:$0xf]  ;;  %v3707_v40 = vor.u32 %v4468_v33, %v3704_v34  ;;  %v4006_v33 = vld [vmem:[%s6642_s5 + $0x1e0] sm:$0xf] }
 0x106   :  { %1521 = vmatpush.bf16.msra.mxu2 %v3567_v63  ;;  %1534 = vmatpush.bf16.msra.mxu3 %v3571_v45  ;;  %v3479_v63 = vor.u32 %v4422_v47, %v3478_v37  ;;  %v3483_v45 = vor.u32 %v4420_v48, %v3480_v11  ;;  %v3703_v37 = vor.u32 %v4470_v29, %v3702_v12  ;;  %v4464_v11 = vld [vmem:[%s6640_s3 + $0x364] sm:$0xf] }
 0x107   :  { %v3711_v47 = vor.u32 %v4471_v36, %v3710_v35  ;;  %v3715_v48 = vor.u32 %v4469_v39, %v3712_v42  ;;  %v4546_v35 = vld [vmem:[%s6642_s5 + $0x1ec] sm:$0xf0]  ;;  %v3862_v39 = vld [vmem:[%s6642_s5 + $0xc0] sm:$0xf] }
 0x108   :  { %v4007_v36 = vor.u32 %v4546_v35, %v4006_v33  ;;  %v4510_v42 = vld [vmem:[%s6642_s5 + $0xcc] sm:$0xf0] }
 0x109   :  { %1496 = vmatpush.bf16.msra.mxu0 %v3543_v7  ;;  %1509 = vmatpush.bf16.msra.mxu1 %v3547_v8  ;;  %v3755_v7 = vor.u32 %v4480_v60, %v3752_v61  ;;  %v1330_v8 = vpack.c.b16 %v1329_v59, %v1329_v59  ;;  %v4462_v59 = vld [vmem:[%s6640_s3 + $0x34c] sm:$0xf0]  ;;  %v3699_v61 = vor.u32 %v4465_v50, %v3696_v55 }
 0x10a   :  { %1522 = vmatpush.bf16.msra.mxu2 %v3551_v14  ;;  %1535 = vmatpush.bf16.msra.mxu3 %v3555_v17  ;;  %v3759_v14 = vor.u32 %v4483_v53, %v3758_v62  ;;  %v3763_v17 = vor.u32 %v4481_v0, %v3760_v15  ;;  %v4460_v62 = vld [vmem:[%s6640_s3 + $0x344] sm:$0xf]  ;;  %v4463_v53 = vld [vmem:[%s6640_s3 + $0x354] sm:$0xf0]  ;;  %v4461_v0 = vld [vmem:[%s6640_s3 + $0x34c] sm:$0xf] }
 0x10b   :  { %1250 = vmatmul.bf16.vlgmr.msrb.gmra.mxu0 %v798_v21  ;;  %1263 = vmatmul.bf16.vlgmr.msrb.gmra.mxu1 %v798_v21  ;;  %v3680_v15 = vld [vmem:[%s6640_s3 + $0x358] sm:$0xf0]  ;;  %v4506_v50 = vld [vmem:[%s6642_s5 + $0xac] sm:$0xf0] }
 0x10c   :  { %1276 = vmatmul.bf16.vlgmr.msrb.gmra.mxu2 %v798_v21  ;;  %1289 = vmatmul.bf16.vlgmr.msrb.gmra.mxu3 %v798_v21  ;;  %v3743_v21 = vor.u32 %v4479_v1, %v3742_v19  ;;  %v4457_v19 = vld [vmem:[%s6640_s3 + $0x32c] sm:$0xf]  ;;  %v3664_v1 = vld [vmem:[%s6640_s3 + $0x338] sm:$0xf0]  ;;  %v4594_v33 = vld [vmem:[%s6642_s5 + $0x36c] sm:$0xf0] }
 0x10d   :  { %1497 = vmatpush.bf16.msra.mxu0 %v3527_v25  ;;  %1510 = vmatpush.bf16.msra.mxu1 %v3531_v38  ;;  %v1331_v25 = vrot.slane %v1330_v8, 2  ;;  %v3735_v38 = vor.u32 %v4478_v32, %v3734_v13  ;;  %v1549_v8 = vld [vmem:[#allocation2] sm:$0x8]  ;;  %v3683_v32 = vor.u32 %v4461_v0, %v3680_v15  ;;  %v4502_v15 = vld [vmem:[%s6642_s5 + $0x8c] sm:$0xf0] }
 0x10e   :  { %1523 = vmatpush.bf16.msra.mxu2 %v3535_v2  ;;  %1536 = vmatpush.bf16.msra.mxu3 %v3539_v26  ;;  %v3747_v2 = vor.u32 %v4477_v51, %v3744_v52  ;;  %v4472_v26 = vld [vmem:[%s6640_s3 + $0x3a4] sm:$0xf]  ;;  %v3830_v0 = vld [vmem:[%s6642_s5 + $0x80] sm:$0xf]  ;;  %v4490_v35 = vld [vmem:[%s6642_s5 + $0x2c] sm:$0xf0] }
 0x111   :  { %1498 = vmatpush.bf16.msra.mxu0 %v3511_v4  ;;  %1511 = vmatpush.bf16.msra.mxu1 %v3515_v9  ;;  %v3719_v4 = vor.u32 %v4474_v20, %v3718_v44  ;;  %v3723_v9 = vor.u32 %v4472_v26, %v3720_v22  ;;  %v3667_v44 = vor.u32 %v4457_v19, %v3664_v1  ;;  %v4452_v20 = vld [vmem:[%s6640_s3 + $0x304] sm:$0xf]  ;;  %v1584_v26 = vunpack.c.l.b16 %v1549_v8  ;;  %v4455_v22 = vld [vmem:[%s6640_s3 + $0x314] sm:$0xf0]  ;;  %v4570_v8 = vld [vmem:[%s6642_s5 + $0x2ac] sm:$0xf0] }
 0x112   :  { %1524 = vmatpush.bf16.msra.mxu2 %v3519_v30  ;;  %1537 = vmatpush.bf16.msra.mxu3 %v3523_v31  ;;  %v3727_v30 = vor.u32 %v4475_v24, %v3726_v23  ;;  %v3731_v31 = vor.u32 %v4473_v27, %v3728_v10  ;;  %v4453_v23 = vld [vmem:[%s6640_s3 + $0x30c] sm:$0xf]  ;;  %v3648_v24 = vld [vmem:[%s6640_s3 + $0x318] sm:$0xf0]  ;;  %v4498_v19 = vld [vmem:[%s6642_s5 + $0x6c] sm:$0xf0] }
 0x113   :  { %v1585_v12 = vpack.c.b16 %v1584_v26, %v1584_v26  ;;  %v3942_v1 = vld [vmem:[%s6642_s5 + $0x160] sm:$0xf] }
 0x114   :  { %v3798_v26 = vld [vmem:[%s6642_s5 + $0x40] sm:$0xf] }
 0x115   :  { %1499 = vmatpush.bf16.msra.mxu0 %v3495_v41  ;;  %1512 = vmatpush.bf16.msra.mxu1 %v3499_v46  ;;  %v3686_v41 = vld [vmem:[%s6640_s3 + $0x360] sm:$0xf]  ;;  %v4466_v46 = vld [vmem:[%s6640_s3 + $0x36c] sm:$0xf0]  ;;  %v1586_v29 = vrot.slane %v1585_v12, 3 }
 0x116   :  { %1525 = vmatpush.bf16.msra.mxu2 %v3503_v5  ;;  %1538 = vmatpush.bf16.msra.mxu3 %v3507_v28  ;;  %v3688_v5 = vld [vmem:[%s6640_s3 + $0x370] sm:$0xf0]  ;;  %v3694_v28 = vld [vmem:[%s6640_s3 + $0x368] sm:$0xf]  ;;  %v3687_v56 = vor.u32 %v4466_v46, %v3686_v41  ;;  %v4542_v41 = vld [vmem:[%s6642_s5 + $0x1cc] sm:$0xf0] }
 0x117   :  { %v3691_v57 = vor.u32 %v4464_v11, %v3688_v5  ;;  %v3695_v60 = vor.u32 %v4467_v49, %v3694_v28  ;;  %v4262_v11 = vld [vmem:[%s6642_s5 + $0x3e0] sm:$0xf]  ;;  %v4610_v28 = vld [vmem:[%s6642_s5 + $0x3ec] sm:$0xf0] }
 0x118   :  { %v3846_v49 = vld [vmem:[%s6642_s5 + $0xa0] sm:$0xf]  ;;  %v4263_v55 = vor.u32 %v4610_v28, %v4262_v11 }
 0x119   :  { %1500 = vmatpush.bf16.msra.mxu0 %v3479_v63  ;;  %1513 = vmatpush.bf16.msra.mxu1 %v3483_v45  ;;  %v3672_v63 = vld [vmem:[%s6640_s3 + $0x350] sm:$0xf0]  ;;  %v3678_v45 = vld [vmem:[%s6640_s3 + $0x348] sm:$0xf]  ;;  %v4070_v12 = vld [vmem:[%s6642_s5 + $0x260] sm:$0xf] }
 0x11a   :  { %1526 = vmatpush.bf16.msra.mxu2 %v3487_v16  ;;  %1539 = vmatpush.bf16.msra.mxu3 %v3491_v3  ;;  %v3671_v16 = vor.u32 %v4462_v59, %v3670_v58  ;;  %v3675_v3 = vor.u32 %v4460_v62, %v3672_v63  ;;  %v3679_v13 = vor.u32 %v4463_v53, %v3678_v45  ;;  %v4538_v58 = vld [vmem:[%s6642_s5 + $0x1ac] sm:$0xf0]  ;;  %v4118_v59 = vld [vmem:[%s6642_s5 + $0x2c0] sm:$0xf] }
 0x11b   :  { %v4246_v62 = vld [vmem:[%s6642_s5 + $0x3c0] sm:$0xf]  ;;  %v4606_v63 = vld [vmem:[%s6642_s5 + $0x3cc] sm:$0xf0] }
 0x11c   :  { %1501 = vmatmul.bf16.vlgmr.msra.gmra.mxu0 %v1331_v25  ;;  %1514 = vmatmul.bf16.vlgmr.msra.gmra.mxu1 %v1331_v25  ;;  %v4247_v53 = vor.u32 %v4606_v63, %v4246_v62  ;;  %v3880_v62 = vld [vmem:[%s6642_s5 + $0xf0] sm:$0xf0] }
 0x11d   :  { %1748 = vmatpush.bf16.msrb.mxu0 %v3751_v6  ;;  %1761 = vmatpush.bf16.msrb.mxu1 %v3755_v7  ;;  %v3654_v6 = vld [vmem:[%s6640_s3 + $0x320] sm:$0xf]  ;;  %v4458_v7 = vld [vmem:[%s6640_s3 + $0x32c] sm:$0xf0] }
 0x11e   :  { %1774 = vmatpush.bf16.msrb.mxu2 %v3759_v14  ;;  %1787 = vmatpush.bf16.msrb.mxu3 %v3763_v17  ;;  %v4456_v14 = vld [vmem:[%s6640_s3 + $0x324] sm:$0xf]  ;;  %v3656_v17 = vld [vmem:[%s6640_s3 + $0x330] sm:$0xf0]  ;;  %v3655_v51 = vor.u32 %v4458_v7, %v3654_v6  ;;  %v4534_v6 = vld [vmem:[%s6642_s5 + $0x18c] sm:$0xf0] }
 0x11f   :  { %1527 = vmatmul.bf16.vlgmr.msra.gmra.mxu2 %v1331_v25  ;;  %1540 = vmatmul.bf16.vlgmr.msra.gmra.mxu3 %v1331_v25  ;;  %v3659_v52 = vor.u32 %v4456_v14, %v3656_v17  ;;  %v3638_v25 = vld [vmem:[%s6640_s3 + $0x300] sm:$0xf]  ;;  %v4602_v17 = vld [vmem:[%s6642_s5 + $0x3ac] sm:$0xf0] }
 0x120   :  { %v4102_v7 = vld [vmem:[%s6642_s5 + $0x2a0] sm:$0xf] }
 0x121   :  { %1749 = vmatpush.bf16.msrb.mxu0 %v3735_v38  ;;  %1762 = vmatpush.bf16.msrb.mxu1 %v3739_v43  ;;  %v4454_v38 = vld [vmem:[%s6640_s3 + $0x30c] sm:$0xf0]  ;;  %v3663_v43 = vor.u32 %v4459_v54, %v3662_v18  ;;  %v4230_v14 = vld [vmem:[%s6642_s5 + $0x3a0] sm:$0xf] }
 0x122   :  { %1775 = vmatpush.bf16.msrb.mxu2 %v3743_v21  ;;  %1788 = vmatpush.bf16.msrb.mxu3 %v3747_v2  ;;  %v3640_v21 = vld [vmem:[%s6640_s3 + $0x310] sm:$0xf0]  ;;  %v3646_v2 = vld [vmem:[%s6640_s3 + $0x308] sm:$0xf]  ;;  %v3639_v27 = vor.u32 %v4454_v38, %v3638_v25  ;;  %v3814_v18 = vld [vmem:[%s6642_s5 + $0x60] sm:$0xf]  ;;  %v4231_v54 = vor.u32 %v4602_v17, %v4230_v14 }
 0x123   :  { %v3643_v10 = vor.u32 %v4452_v20, %v3640_v21  ;;  %v4086_v38 = vld [vmem:[%s6642_s5 + $0x280] sm:$0xf]  ;;  %v4598_v21 = vld [vmem:[%s6642_s5 + $0x38c] sm:$0xf0]  ;;  %v3864_v14 = vld [vmem:[%s6642_s5 + $0xd0] sm:$0xf0] }
 0x124   :  { %v4540_v17 = vld [vmem:[%s6642_s5 + $0x1c4] sm:$0xf] }
 0x125   :  { %1750 = vmatpush.bf16.msrb.mxu0 %v3719_v4  ;;  %1763 = vmatpush.bf16.msrb.mxu1 %v3723_v9  ;;  %v3647_v4 = vor.u32 %v4455_v22, %v3646_v2  ;;  %v3651_v9 = vor.u32 %v4453_v23, %v3648_v24  ;;  %v4494_v22 = vld [vmem:[%s6642_s5 + $0x4c] sm:$0xf0]  ;;  %v3926_v23 = vld [vmem:[%s6642_s5 + $0x140] sm:$0xf] }
 0x126   :  { %1776 = vmatpush.bf16.msrb.mxu2 %v3727_v30  ;;  %1789 = vmatpush.bf16.msrb.mxu3 %v3731_v31  ;;  %v3878_v30 = vld [vmem:[%s6642_s5 + $0xe0] sm:$0xf]  ;;  %v4514_v31 = vld [vmem:[%s6642_s5 + $0xec] sm:$0xf0] }
 0x127   :  { %v3879_v34 = vor.u32 %v4514_v31, %v3878_v30  ;;  %v4198_v30 = vld [vmem:[%s6642_s5 + $0x360] sm:$0xf] }
 0x129   :  { %1751 = vmatpush.bf16.msrb.mxu0 %v3703_v37  ;;  %1764 = vmatpush.bf16.msrb.mxu1 %v3707_v40  ;;  %v3990_v37 = vld [vmem:[%s6642_s5 + $0x1c0] sm:$0xf]  ;;  %v3863_v40 = vor.u32 %v4510_v42, %v3862_v39 }
 0x12a   :  { %1777 = vmatpush.bf16.msrb.mxu2 %v3711_v47  ;;  %1790 = vmatpush.bf16.msrb.mxu3 %v3715_v48  ;;  %v3991_v46 = vor.u32 %v4542_v41, %v3990_v37  ;;  %v4134_v47 = vld [vmem:[%s6642_s5 + $0x2e0] sm:$0xf]  ;;  %v4578_v48 = vld [vmem:[%s6642_s5 + $0x2ec] sm:$0xf0] }
 0x12b   :  { %v4135_v5 = vor.u32 %v4578_v48, %v4134_v47  ;;  %v3910_v42 = vld [vmem:[%s6642_s5 + $0x120] sm:$0xf]  ;;  %v4522_v37 = vld [vmem:[%s6642_s5 + $0x12c] sm:$0xf0] }
 0x12c   :  { %v3911_v41 = vor.u32 %v4522_v37, %v3910_v42  ;;  %v4182_v47 = vld [vmem:[%s6642_s5 + $0x340] sm:$0xf]  ;;  %v4590_v48 = vld [vmem:[%s6642_s5 + $0x34c] sm:$0xf0]  ;;  %v4604_v42 = vld [vmem:[%s6642_s5 + $0x3c4] sm:$0xf] }
 0x12d   :  { %1752 = vmatpush.bf16.msrb.mxu0 %v3687_v56  ;;  %1765 = vmatpush.bf16.msrb.mxu1 %v3691_v57  ;;  %v3847_v56 = vor.u32 %v4506_v50, %v3846_v49  ;;  %v3974_v57 = vld [vmem:[%s6642_s5 + $0x1a0] sm:$0xf]  ;;  %v4248_v37 = vld [vmem:[%s6642_s5 + $0x3d0] sm:$0xf0] }
 0x12e   :  { %1778 = vmatpush.bf16.msrb.mxu2 %v3695_v60  ;;  %1791 = vmatpush.bf16.msrb.mxu3 %v3699_v61  ;;  %v3975_v60 = vor.u32 %v4538_v58, %v3974_v57  ;;  %v4574_v61 = vld [vmem:[%s6642_s5 + $0x2cc] sm:$0xf0]  ;;  %v3894_v58 = vld [vmem:[%s6642_s5 + $0x100] sm:$0xf] }
 0x12f   :  { %v4119_v45 = vor.u32 %v4574_v61, %v4118_v59  ;;  %v4486_v57 = vld [vmem:[%s6642_s5 + $0xc] sm:$0xf0]  ;;  %v4512_v61 = vld [vmem:[%s6642_s5 + $0xe4] sm:$0xf] }
 0x131   :  { %1753 = vmatpush.bf16.msrb.mxu0 %v3671_v16  ;;  %1766 = vmatpush.bf16.msrb.mxu1 %v3675_v3  ;;  %v3958_v16 = vld [vmem:[%s6642_s5 + $0x180] sm:$0xf]  ;;  %v3831_v3 = vor.u32 %v4502_v15, %v3830_v0  ;;  %v4008_v0 = vld [vmem:[%s6642_s5 + $0x1f0] sm:$0xf0] }
 0x132   :  { %1779 = vmatpush.bf16.msrb.mxu2 %v3679_v13  ;;  %1792 = vmatpush.bf16.msrb.mxu3 %v3683_v32  ;;  %v3959_v13 = vor.u32 %v4534_v6, %v3958_v16  ;;  %v4103_v32 = vor.u32 %v4570_v8, %v4102_v7  ;;  %v4038_v15 = vld [vmem:[%s6642_s5 + $0x220] sm:$0xf]  ;;  %v4586_v7 = vld [vmem:[%s6642_s5 + $0x32c] sm:$0xf0] }
 0x133   :  { %v4166_v6 = vld [vmem:[%s6642_s5 + $0x320] sm:$0xf] }
 0x135   :  { %1754 = vmatpush.bf16.msrb.mxu0 %v3655_v51  ;;  %1767 = vmatpush.bf16.msrb.mxu1 %v3659_v52  ;;  %v4530_v51 = vld [vmem:[%s6642_s5 + $0x16c] sm:$0xf0]  ;;  %v3815_v52 = vor.u32 %v4498_v19, %v3814_v18  ;;  %v4022_v19 = vld [vmem:[%s6642_s5 + $0x200] sm:$0xf] }
 0x136   :  { %1780 = vmatpush.bf16.msrb.mxu2 %v3663_v43  ;;  %1793 = vmatpush.bf16.msrb.mxu3 %v3667_v44  ;;  %v3943_v25 = vor.u32 %v4530_v51, %v3942_v1  ;;  %v4566_v43 = vld [vmem:[%s6642_s5 + $0x28c] sm:$0xf0]  ;;  %v4214_v44 = vld [vmem:[%s6642_s5 + $0x380] sm:$0xf] }
 0x137   :  { %v4087_v20 = vor.u32 %v4566_v43, %v4086_v38  ;;  %v4215_v2 = vor.u32 %v4598_v21, %v4214_v44  ;;  %v4550_v1 = vld [vmem:[%s6642_s5 + $0x20c] sm:$0xf0]  ;;  %v4576_v21 = vld [vmem:[%s6642_s5 + $0x2e4] sm:$0xf] }
 0x138   :  { %v4582_v38 = vld [vmem:[%s6642_s5 + $0x30c] sm:$0xf0] }
 0x139   :  { %1755 = vmatpush.bf16.msrb.mxu0 %v3639_v27  ;;  %1768 = vmatpush.bf16.msrb.mxu1 %v3643_v10  ;;  %v3799_v10 = vor.u32 %v4494_v22, %v3798_v26  ;;  %v4608_v26 = vld [vmem:[%s6642_s5 + $0x3e4] sm:$0xf] }
 0x13a   :  { %1781 = vmatpush.bf16.msrb.mxu2 %v3647_v4  ;;  %1794 = vmatpush.bf16.msrb.mxu3 %v3651_v9  ;;  %v4526_v4 = vld [vmem:[%s6642_s5 + $0x14c] sm:$0xf0] }
 0x13b   :  { %v3927_v9 = vor.u32 %v4526_v4, %v3926_v23  ;;  %v4264_v4 = vld [vmem:[%s6642_s5 + $0x3f0] sm:$0xf0] }
 0x13c   :  { %1756 = vmatmul.bf16.vlgmr.msrb.gmra.mxu0 %v1586_v29  ;;  %1769 = vmatmul.bf16.vlgmr.msrb.gmra.mxu1 %v1586_v29 }
 0x13d   :  { %1782 = vmatmul.bf16.vlgmr.msrb.gmra.mxu2 %v1586_v29  ;;  %1795 = vmatmul.bf16.vlgmr.msrb.gmra.mxu3 %v1586_v29  ;;  %v4562_v29 = vld [vmem:[%s6642_s5 + $0x26c] sm:$0xf0] }
 0x13e   :  { %2604 = vmatpush.bf16.msra.mxu0 %v3879_v34  ;;  %2617 = vmatpush.bf16.msra.mxu1 %v4007_v36  ;;  %v4071_v31 = vor.u32 %v4562_v29, %v4070_v12  ;;  %v3782_v34 = vld [vmem:[%s6642_s5 + $0x20] sm:$0xf]  ;;  %v4199_v36 = vor.u32 %v4594_v33, %v4198_v30  ;;  %v4504_v12 = vld [vmem:[%s6642_s5 + $0xa4] sm:$0xf]  ;;  %v3848_v29 = vld [vmem:[%s6642_s5 + $0xb0] sm:$0xf0] }
 0x13f   :  { %2630 = vmatpush.bf16.msra.mxu2 %v4135_v5  ;;  %2643 = vmatpush.bf16.msra.mxu3 %v4263_v55  ;;  %v3783_v39 = vor.u32 %v4490_v35, %v3782_v34  ;;  %v4183_v5 = vor.u32 %v4590_v48, %v4182_v47  ;;  %v4536_v30 = vld [vmem:[%s6642_s5 + $0x1a4] sm:$0xf]  ;;  %v3976_v33 = vld [vmem:[%s6642_s5 + $0x1b0] sm:$0xf0] }
 0x140   :  { %v4572_v34 = vld [vmem:[%s6642_s5 + $0x2c4] sm:$0xf]  ;;  %v4120_v35 = vld [vmem:[%s6642_s5 + $0x2d0] sm:$0xf0] }
 0x141   :  { %v4532_v47 = vld [vmem:[%s6642_s5 + $0x184] sm:$0xf]  ;;  %v3960_v48 = vld [vmem:[%s6642_s5 + $0x190] sm:$0xf0] }
 0x142   :  { %2605 = vmatpush.bf16.msra.mxu0 %v3863_v40  ;;  %2618 = vmatpush.bf16.msra.mxu1 %v3991_v46  ;;  %v4054_v40 = vld [vmem:[%s6642_s5 + $0x240] sm:$0xf]  ;;  %v4558_v46 = vld [vmem:[%s6642_s5 + $0x24c] sm:$0xf0] }
 0x143   :  { %2631 = vmatpush.bf16.msra.mxu2 %v4119_v45  ;;  %2644 = vmatpush.bf16.msra.mxu3 %v4247_v53  ;;  %v4055_v11 = vor.u32 %v4558_v46, %v4054_v40  ;;  %v3883_v45 = vor.u32 %v4512_v61, %v3880_v62  ;;  %v4544_v53 = vld [vmem:[%s6642_s5 + $0x1e4] sm:$0xf]  ;;  %v3832_v46 = vld [vmem:[%s6642_s5 + $0x90] sm:$0xf0] }
 0x144   :  { %v4011_v16 = vor.u32 %v4544_v53, %v4008_v0  ;;  %v4500_v40 = vld [vmem:[%s6642_s5 + $0x84] sm:$0xf]  ;;  %v3944_v53 = vld [vmem:[%s6642_s5 + $0x170] sm:$0xf0] }
 0x145   :  { %v4564_v0 = vld [vmem:[%s6642_s5 + $0x284] sm:$0xf] }
 0x146   :  { %2606 = vmatpush.bf16.msra.mxu0 %v3847_v56  ;;  %2619 = vmatpush.bf16.msra.mxu1 %v3975_v60  ;;  %v3766_v56 = vld [vmem:[%s6642_s5] sm:$0xf]  ;;  %v4518_v60 = vld [vmem:[%s6642_s5 + $0x10c] sm:$0xf0] }
 0x147   :  { %2632 = vmatpush.bf16.msra.mxu2 %v4103_v32  ;;  %2645 = vmatpush.bf16.msra.mxu3 %v4231_v54  ;;  %v3767_v59 = vor.u32 %v4486_v57, %v3766_v56  ;;  %v3895_v63 = vor.u32 %v4518_v60, %v3894_v58  ;;  %v4508_v32 = vld [vmem:[%s6642_s5 + $0xc4] sm:$0xf]  ;;  %v3992_v54 = vld [vmem:[%s6642_s5 + $0x1d0] sm:$0xf0] }
 0x148   :  { %v3867_v18 = vor.u32 %v4508_v32, %v3864_v14  ;;  %v3995_v51 = vor.u32 %v4540_v17, %v3992_v54  ;;  %v4600_v56 = vld [vmem:[%s6642_s5 + $0x3a4] sm:$0xf]  ;;  %v4232_v57 = vld [vmem:[%s6642_s5 + $0x3b0] sm:$0xf0] }
 0x149   :  { %v4496_v58 = vld [vmem:[%s6642_s5 + $0x64] sm:$0xf] }
 0x14a   :  { %2607 = vmatpush.bf16.msra.mxu0 %v3831_v3  ;;  %2620 = vmatpush.bf16.msra.mxu1 %v3959_v13  ;;  %v4554_v3 = vld [vmem:[%s6642_s5 + $0x22c] sm:$0xf0]  ;;  %v4167_v13 = vor.u32 %v4586_v7, %v4166_v6  ;;  %v4088_v6 = vld [vmem:[%s6642_s5 + $0x290] sm:$0xf0]  ;;  %v4596_v7 = vld [vmem:[%s6642_s5 + $0x384] sm:$0xf] }
 0x14b   :  { %2633 = vmatpush.bf16.msra.mxu2 %v4087_v20  ;;  %2646 = vmatpush.bf16.msra.mxu3 %v4215_v2  ;;  %v4039_v8 = vor.u32 %v4554_v3, %v4038_v15  ;;  %v4136_v2 = vld [vmem:[%s6642_s5 + $0x2f0] sm:$0xf0]  ;;  %v4091_v32 = vor.u32 %v4564_v0, %v4088_v6  ;;  %v4492_v17 = vld [vmem:[%s6642_s5 + $0x44] sm:$0xf] }
 0x14c   :  { %v4524_v54 = vld [vmem:[%s6642_s5 + $0x144] sm:$0xf] }
 0x14e   :  { %2608 = vmatpush.bf16.msra.mxu0 %v3815_v52  ;;  %2621 = vmatpush.bf16.msra.mxu1 %v3943_v25  ;;  %v4023_v52 = vor.u32 %v4550_v1, %v4022_v19  ;;  %v4150_v25 = vld [vmem:[%s6642_s5 + $0x300] sm:$0xf]  ;;  %v3928_v1 = vld [vmem:[%s6642_s5 + $0x150] sm:$0xf0] }
 0x14f   :  { %2634 = vmatpush.bf16.msra.mxu2 %v4071_v31  ;;  %2647 = vmatpush.bf16.msra.mxu3 %v4199_v36  ;;  %v4151_v20 = vor.u32 %v4582_v38, %v4150_v25  ;;  %v3851_v31 = vor.u32 %v4504_v12, %v3848_v29  ;;  %v3979_v36 = vor.u32 %v4536_v30, %v3976_v33  ;;  %v4560_v38 = vld [vmem:[%s6642_s5 + $0x264] sm:$0xf]  ;;  %v3912_v30 = vld [vmem:[%s6642_s5 + $0x130] sm:$0xf0] }
 0x150   :  { %v3931_v25 = vor.u32 %v4524_v54, %v3928_v1  ;;  %v4520_v29 = vld [vmem:[%s6642_s5 + $0x124] sm:$0xf] }
 0x151   :  { %v4556_v33 = vld [vmem:[%s6642_s5 + $0x244] sm:$0xf] }
 0x152   :  { %2609 = vmatpush.bf16.msra.mxu0 %v3799_v10  ;;  %2622 = vmatpush.bf16.msra.mxu1 %v3927_v9  ;;  %v4139_v10 = vor.u32 %v4576_v21, %v4136_v2  ;;  %v4267_v9 = vor.u32 %v4608_v26, %v4264_v4  ;;  %v4200_v21 = vld [vmem:[%s6642_s5 + $0x370] sm:$0xf0]  ;;  %v4488_v26 = vld [vmem:[%s6642_s5 + $0x24] sm:$0xf] }
 0x153   :  { %2635 = vmatpush.bf16.msra.mxu2 %v4055_v11  ;;  %2648 = vmatpush.bf16.msra.mxu3 %v4183_v5  ;;  %v3835_v11 = vor.u32 %v4500_v40, %v3832_v46  ;;  %v3963_v5 = vor.u32 %v4532_v47, %v3960_v48  ;;  %v3768_v40 = vld [vmem:[%s6642_s5 + $0x10] sm:$0xf0] }
 0x154   :  { %v3896_v47 = vld [vmem:[%s6642_s5 + $0x110] sm:$0xf0] }
 0x156   :  { %2610 = vmatpush.bf16.msra.mxu0 %v3783_v39  ;;  %2623 = vmatpush.bf16.msra.mxu1 %v3911_v41  ;;  %v4123_v39 = vor.u32 %v4572_v34, %v4120_v35  ;;  %v4251_v41 = vor.u32 %v4604_v42, %v4248_v37  ;;  %v4056_v34 = vld [vmem:[%s6642_s5 + $0x250] sm:$0xf0]  ;;  %v4588_v35 = vld [vmem:[%s6642_s5 + $0x344] sm:$0xf] }
 0x157   :  { %2636 = vmatpush.bf16.msra.mxu2 %v4039_v8  ;;  %2649 = vmatpush.bf16.msra.mxu3 %v4167_v13  ;;  %v4216_v8 = vld [vmem:[%s6642_s5 + $0x390] sm:$0xf0]  ;;  %v4484_v37 = vld [vmem:[%s6642_s5 + $0x4] sm:$0xf] }
 0x158   :  { %v4219_v14 = vor.u32 %v4596_v7, %v4216_v8  ;;  %v3771_v46 = vor.u32 %v4484_v37, %v3768_v40  ;;  %v1804_v8 = vld [vmem:[%s6641_s4] sm:$0xf]  ;;  %v4142_v37 = vld [vmem:[%s6642_s5 + $0x2e8] sm:$0xf]  ;;  %v4579_v40 = vld [vmem:[%s6642_s5 + $0x2f4] sm:$0xf0] }
 0x159   :  { %v1807_v54 = vperm.slane %v1804_v8, 1 }
 0x15a   :  { %2611 = vmatpush.bf16.msra.mxu0 %v3767_v59  ;;  %2624 = vmatpush.bf16.msra.mxu1 %v3895_v63  ;;  %v3816_v59 = vld [vmem:[%s6642_s5 + $0x70] sm:$0xf0]  ;;  %v4235_v63 = vor.u32 %v4600_v56, %v4232_v57 }
 0x15b   :  { %2637 = vmatpush.bf16.msra.mxu2 %v4023_v52  ;;  %2650 = vmatpush.bf16.msra.mxu3 %v4151_v20  ;;  %v3819_v3 = vor.u32 %v4496_v58, %v3816_v59  ;;  %v4168_v58 = vld [vmem:[%s6642_s5 + $0x330] sm:$0xf0] }
 0x15e   :  { %2656 = vmatpush.bf16.msrb.mxu0 %v3883_v45  ;;  %2669 = vmatpush.bf16.msrb.mxu1 %v4011_v16  ;;  %v4528_v45 = vld [vmem:[%s6642_s5 + $0x164] sm:$0xf] }
 0x15f   :  { %2682 = vmatpush.bf16.msrb.mxu2 %v4139_v10  ;;  %2695 = vmatpush.bf16.msrb.mxu3 %v4267_v9  ;;  %v3947_v13 = vor.u32 %v4528_v45, %v3944_v53  ;;  %v3784_v10 = vld [vmem:[%s6642_s5 + $0x30] sm:$0xf0]  ;;  %v4548_v45 = vld [vmem:[%s6642_s5 + $0x204] sm:$0xf] }
 0x160   :  { %v3787_v12 = vor.u32 %v4488_v26, %v3784_v10  ;;  %v4024_v53 = vld [vmem:[%s6642_s5 + $0x210] sm:$0xf0]  ;;  %v1809_v26 = vperm.slane %v1804_v8, 3 }
 0x161   :  { %v4027_v0 = vor.u32 %v4548_v45, %v4024_v53  ;;  %v4126_v45 = vld [vmem:[%s6642_s5 + $0x2c8] sm:$0xf]  ;;  %v4575_v53 = vld [vmem:[%s6642_s5 + $0x2d4] sm:$0xf0] }
 0x162   :  { %2657 = vmatpush.bf16.msrb.mxu0 %v3867_v18  ;;  %2670 = vmatpush.bf16.msrb.mxu1 %v3995_v51  ;;  %v3800_v18 = vld [vmem:[%s6642_s5 + $0x50] sm:$0xf0] }
 0x163   :  { %2683 = vmatpush.bf16.msrb.mxu2 %v4123_v39  ;;  %2696 = vmatpush.bf16.msrb.mxu3 %v4251_v41  ;;  %v3803_v19 = vor.u32 %v4492_v17, %v3800_v18  ;;  %v4184_v39 = vld [vmem:[%s6642_s5 + $0x350] sm:$0xf0]  ;;  %v4516_v41 = vld [vmem:[%s6642_s5 + $0x104] sm:$0xf]  ;;  %v1806_v18 = vperm.slane %v1804_v8, 0 }
 0x164   :  { %v4187_v42 = vor.u32 %v4588_v35, %v4184_v39  ;;  %v3899_v48 = vor.u32 %v4516_v41, %v3896_v47  ;;  %v4270_v41 = vld [vmem:[%s6642_s5 + $0x3e8] sm:$0xf] }
 0x166   :  { %2658 = vmatpush.bf16.msrb.mxu0 %v3851_v31  ;;  %2671 = vmatpush.bf16.msrb.mxu1 %v3979_v36  ;;  %v3915_v31 = vor.u32 %v4520_v29, %v3912_v30  ;;  %v4059_v36 = vor.u32 %v4556_v33, %v4056_v34  ;;  %v3870_v29 = vld [vmem:[%s6642_s5 + $0xc8] sm:$0xf]  ;;  %v4511_v30 = vld [vmem:[%s6642_s5 + $0xd4] sm:$0xf0] }
 0x167   :  { %2697 = vmatpush.bf16.msrb.mxu3 %v4235_v63  ;;  %v4543_v33 = vld [vmem:[%s6642_s5 + $0x1d4] sm:$0xf0] }
 0x16a   :  { %2659 = vmatpush.bf16.msrb.mxu0 %v3835_v11  ;;  %2672 = vmatpush.bf16.msrb.mxu1 %v3963_v5  ;;  %v4552_v11 = vld [vmem:[%s6642_s5 + $0x224] sm:$0xf]  ;;  %v4040_v5 = vld [vmem:[%s6642_s5 + $0x230] sm:$0xf0] }
 0x16b   :  { %2698 = vmatpush.bf16.msrb.mxu3 %v4219_v14  ;;  %v4043_v57 = vor.u32 %v4552_v11, %v4040_v5  ;;  %v4611_v11 = vld [vmem:[%s6642_s5 + $0x3f4] sm:$0xf0]  ;;  %v3854_v5 = vld [vmem:[%s6642_s5 + $0xa8] sm:$0xf] }
 0x16e   :  { %2660 = vmatpush.bf16.msrb.mxu0 %v3819_v3  ;;  %2673 = vmatpush.bf16.msrb.mxu1 %v3947_v13 }
 0x172   :  { %2661 = vmatpush.bf16.msrb.mxu0 %v3803_v19  ;;  %2674 = vmatpush.bf16.msrb.mxu1 %v3931_v25  ;;  %v3886_v25 = vld [vmem:[%s6642_s5 + $0xe8] sm:$0xf] }
 0x176   :  { %2662 = vmatpush.bf16.msrb.mxu0 %v3787_v12  ;;  %2675 = vmatpush.bf16.msrb.mxu1 %v3915_v31  ;;  %v3998_v31 = vld [vmem:[%s6642_s5 + $0x1c8] sm:$0xf] }
 0x178   :  { %v5929_v24 = vpop.f32.mrf.mxu0  ;;  %v5931_v27 = vpop.f32.mrf.mxu1 }
 0x17a   :  { %2663 = vmatpush.bf16.msrb.mxu0 %v3771_v46  ;;  %2676 = vmatpush.bf16.msrb.mxu1 %v3899_v48  ;;  %v3999_v48 = vor.u32 %v4543_v33, %v3998_v31  ;;  %v4078_v31 = vld [vmem:[%s6642_s5 + $0x268] sm:$0xf]  ;;  %v4563_v33 = vld [vmem:[%s6642_s5 + $0x274] sm:$0xf0] }
 0x17f   :  { %v5972_v28 = vpop.f32.mrf.mxu2  ;;  %v5974_v49 = vpop.f32.mrf.mxu3 }
 0x180   :  { %v1041_v50 = vpop.f32.mrf.mxu0  ;;  %v1054_v55 = vpop.f32.mrf.mxu1 }
 0x181   :  { %v4568_v50 = vld [vmem:[%s6642_s5 + $0x2a4] sm:$0xf]  ;;  %v4104_v55 = vld [vmem:[%s6642_s5 + $0x2b0] sm:$0xf0] }
 0x182   :  { %v4107_v62 = vor.u32 %v4568_v50, %v4104_v55  ;;  %v4584_v50 = vld [vmem:[%s6642_s5 + $0x324] sm:$0xf] }
 0x183   :  { %v4171_v63 = vor.u32 %v4584_v50, %v4168_v58  ;;  %v4507_v50 = vld [vmem:[%s6642_s5 + $0xb4] sm:$0xf0] }
 0x184   :  { %2684 = vmatpush.bf16.msrb.mxu2 %v4107_v62 }
 0x187   :  { %v1067_v43 = vpop.f32.mrf.mxu2  ;;  %v1080_v44 = vpop.f32.mrf.mxu3 }
 0x188   :  { %v6045_v22 = vpop.f32.mrf.mxu0  ;;  %v6047_v23 = vpop.f32.mrf.mxu1  ;;  %2685 = vmatpush.bf16.msrb.mxu2 %v4091_v32  ;;  %v4072_v43 = vld [vmem:[%s6642_s5 + $0x270] sm:$0xf0]  ;;  %v4592_v44 = vld [vmem:[%s6642_s5 + $0x364] sm:$0xf] }
 0x189   :  { %v4075_v20 = vor.u32 %v4560_v38, %v4072_v43  ;;  %v4203_v2 = vor.u32 %v4592_v44, %v4200_v21  ;;  %v1252_v13 = vadd.f32 %v6045_v22, %v5929_v24  ;;  %v1265_v32 = vadd.f32 %v6047_v23, %v5931_v27  ;;  %v4515_v24 = vld [vmem:[%s6642_s5 + $0xf4] sm:$0xf0]  ;;  %v4014_v27 = vld [vmem:[%s6642_s5 + $0x1e8] sm:$0xf] }
 0x18a   :  { %v4547_v22 = vld [vmem:[%s6642_s5 + $0x1f4] sm:$0xf0] }
 0x18b   :  { %2699 = vmatpush.bf16.msrb.mxu3 %v4203_v2  ;;  %v1808_v2 = vperm.slane %v1804_v8, 2  ;;  %v4015_v12 = vor.u32 %v4547_v22, %v4014_v27  ;;  %v3950_v27 = vld [vmem:[%s6642_s5 + $0x168] sm:$0xf]  ;;  %v4531_v22 = vld [vmem:[%s6642_s5 + $0x174] sm:$0xf0] }
 0x18c   :  { %2686 = vmatpush.bf16.msrb.mxu2 %v4075_v20 }
 0x18f   :  { %v6106_v60 = vpop.f32.mrf.mxu2  ;;  %v6108_v61 = vpop.f32.mrf.mxu3  ;;  %2700 = vmatpush.bf16.msrb.mxu3 %v4187_v42  ;;  %v3871_v42 = vor.u32 %v4511_v30, %v3870_v29  ;;  %v3934_v29 = vld [vmem:[%s6642_s5 + $0x148] sm:$0xf]  ;;  %v4527_v30 = vld [vmem:[%s6642_s5 + $0x154] sm:$0xf0] }
 0x190   :  { %v1253_v15 = vpop.f32.mrf.mxu0  ;;  %v1266_v16 = vpop.f32.mrf.mxu1  ;;  %2687 = vmatpush.bf16.msrb.mxu2 %v4059_v36  ;;  %v1278_v23 = vadd.f32 %v6106_v60, %v5972_v28  ;;  %v1291_v44 = vadd.f32 %v6108_v61, %v5974_v49 }
 0x191   :  { %v4580_v15 = vld [vmem:[%s6642_s5 + $0x304] sm:$0xf]  ;;  %v4152_v16 = vld [vmem:[%s6642_s5 + $0x310] sm:$0xf0] }
 0x192   :  { %v4155_v3 = vor.u32 %v4580_v15, %v4152_v16 }
 0x193   :  { %2701 = vmatpush.bf16.msrb.mxu3 %v4171_v63  ;;  %v3855_v63 = vor.u32 %v4507_v50, %v3854_v5  ;;  %v4190_v5 = vld [vmem:[%s6642_s5 + $0x348] sm:$0xf]  ;;  %v4591_v50 = vld [vmem:[%s6642_s5 + $0x354] sm:$0xf0] }
 0x194   :  { %2688 = vmatpush.bf16.msrb.mxu2 %v4043_v57 }
 0x197   :  { %v1279_v51 = vpop.f32.mrf.mxu2  ;;  %v1292_v52 = vpop.f32.mrf.mxu3  ;;  %2702 = vmatpush.bf16.msrb.mxu3 %v4155_v3  ;;  %v4254_v3 = vld [vmem:[%s6642_s5 + $0x3c8] sm:$0xf] }
 0x198   :  { %2689 = vmatpush.bf16.msrb.mxu2 %v4027_v0 }
 0x199   :  { %v1502_v4 = vpop.f32.mrf.mxu0  ;;  %v1515_v9 = vpop.f32.mrf.mxu1 }
 0x19a   :  { %v1545_v14 = vadd.f32 %v1502_v4, %v1252_v13  ;;  %v1546_v17 = vadd.f32 %v1515_v9, %v1265_v32  ;;  %v3887_v9 = vor.u32 %v4515_v24, %v3886_v25  ;;  %v4503_v32 = vld [vmem:[%s6642_s5 + $0x94] sm:$0xf0]  ;;  %v4238_v25 = vld [vmem:[%s6642_s5 + $0x3a8] sm:$0xf] }
 0x19b   :  { %v4499_v24 = vld [vmem:[%s6642_s5 + $0x74] sm:$0xf0] }
 0x1a1   :  { %v1504_v59 = vpop.f32.mrf.mxu0  ;;  %v1517_v62 = vpop.f32.mrf.mxu1 }
 0x1a2   :  { %v1528_v55 = vpop.f32.mrf.mxu2  ;;  %v1541_v56 = vpop.f32.mrf.mxu3  ;;  %v4143_v59 = vor.u32 %v4579_v40, %v4142_v37  ;;  %v4271_v62 = vor.u32 %v4611_v11, %v4270_v41  ;;  %v4491_v37 = vld [vmem:[%s6642_s5 + $0x34] sm:$0xf0]  ;;  %v3918_v40 = vld [vmem:[%s6642_s5 + $0x128] sm:$0xf] }
 0x1a3   :  { %v1547_v10 = vadd.f32 %v1528_v55, %v1278_v23  ;;  %v1548_v4 = vadd.f32 %v1541_v56, %v1291_v44  ;;  %v3982_v55 = vld [vmem:[%s6642_s5 + $0x1a8] sm:$0xf]  ;;  %v4539_v56 = vld [vmem:[%s6642_s5 + $0x1b4] sm:$0xf0] }
 0x1a4   :  { %v3983_v16 = vor.u32 %v4539_v56, %v3982_v55  ;;  %v4523_v41 = vld [vmem:[%s6642_s5 + $0x134] sm:$0xf0] }
 0x1a5   :  { %v4559_v11 = vld [vmem:[%s6642_s5 + $0x254] sm:$0xf0]  ;;  %v3919_v56 = vor.u32 %v4523_v41, %v3918_v40  ;;  %v4533_v40 = vld [vmem:[%s6642_s5 + $0x18c] sm:$0xf]  ;;  %v3968_v41 = vld [vmem:[%s6642_s5 + $0x198] sm:$0xf0] }
 0x1aa   :  { %v1530_v6 = vpop.f32.mrf.mxu2  ;;  %v1543_v7 = vpop.f32.mrf.mxu3 }
 0x1ab   :  { %v4607_v6 = vld [vmem:[%s6642_s5 + $0x3d4] sm:$0xf0]  ;;  %v3838_v7 = vld [vmem:[%s6642_s5 + $0x88] sm:$0xf] }
 0x1b9   :  { %v1757_v19 = vpop.f32.mrf.mxu0  ;;  %v1770_v1 = vpop.f32.mrf.mxu1 }
 0x1ba   :  { %v1800_v51 = vadd.f32 %v1757_v19, %v1545_v14  ;;  %v1801_v52 = vadd.f32 %v1770_v1, %v1546_v17  ;;  %v3966_v14 = vld [vmem:[%s6642_s5 + $0x188] sm:$0xf]  ;;  %v4535_v17 = vld [vmem:[%s6642_s5 + $0x194] sm:$0xf0]  ;;  %v3839_v1 = vor.u32 %v4503_v32, %v3838_v7 }
 0x1bb   :  { %v4110_v19 = vld [vmem:[%s6642_s5 + $0x2a8] sm:$0xf]  ;;  %v4587_v32 = vld [vmem:[%s6642_s5 + $0x334] sm:$0xf0] }
 0x1bc   :  { %v1814_v38 = vadd.f32 %v1806_v18, %v1800_v51  ;;  %v1815_v43 = vadd.f32 %v1807_v54, %v1801_v52  ;;  %v4127_v18 = vor.u32 %v4575_v53, %v4126_v45  ;;  %v4255_v54 = vor.u32 %v4607_v6, %v4254_v3  ;;  %v4571_v52 = vld [vmem:[%s6642_s5 + $0x2b4] sm:$0xf0]  ;;  %v3888_v45 = vld [vmem:[%s6642_s5 + $0xf8] sm:$0xf0]  ;;  %v4545_v3 = vld [vmem:[%s6642_s5 + $0x1ec] sm:$0xf] }
 0x1bd   :  { %v3967_v51 = vor.u32 %v4535_v17, %v3966_v14  ;;  %v4111_v23 = vor.u32 %v4571_v52, %v4110_v19  ;;  %v4016_v6 = vld [vmem:[%s6642_s5 + $0x1f8] sm:$0xf0]  ;;  %v4046_v7 = vld [vmem:[%s6642_s5 + $0x228] sm:$0xf]  ;;  %v4509_v19 = vld [vmem:[%s6642_s5 + $0xcc] sm:$0xf] }
 0x1be   :  { %v1818_v20 = vmax.f32 %v1814_v38, 0.0  ;;  %v1819_v21 = vmax.f32 %v1815_v43, 0.0  ;;  %v4603_v38 = vld [vmem:[%s6642_s5 + $0x3b4] sm:$0xf0]  ;;  %v3822_v43 = vld [vmem:[%s6642_s5 + $0x68] sm:$0xf] }
 0x1bf   :  { %v4239_v44 = vor.u32 %v4603_v38, %v4238_v25  ;;  %v4000_v38 = vld [vmem:[%s6642_s5 + $0x1d8] sm:$0xf0] }
 0x1c0   :  { %v6241_v28 = vpack.c.bf16 %v1818_v20, %v1818_v20  ;;  %v6243_v60 = vpack.c.bf16 %v1819_v21, %v1819_v21  ;;  %v1783_v49 = vpop.f32.mrf.mxu2  ;;  %v1796_v61 = vpop.f32.mrf.mxu3  ;;  %v4094_v20 = vld [vmem:[%s6642_s5 + $0x288] sm:$0xf]  ;;  %v4567_v21 = vld [vmem:[%s6642_s5 + $0x294] sm:$0xf0] }
 0x1c1   :  { %v1802_v34 = vadd.f32 %v1783_v49, %v1547_v10  ;;  %v1803_v35 = vadd.f32 %v1796_v61, %v1548_v4  ;;  %v1759_v36 = vpop.f32.mrf.mxu0  ;;  %v1772_v39 = vpop.f32.mrf.mxu1  ;;  %v3823_v10 = vor.u32 %v4499_v24, %v3822_v43  ;;  %v3951_v4 = vor.u32 %v4531_v22, %v3950_v27  ;;  %v4030_v43 = vld [vmem:[%s6642_s5 + $0x208] sm:$0xf]  ;;  %v4551_v24 = vld [vmem:[%s6642_s5 + $0x214] sm:$0xf0] }
 0x1c2   :  { %2612 = vmatmul.bf16.vlgmr.msra.gmra.mxu0 %v6241_v28  ;;  %2625 = vmatmul.bf16.vlgmr.msra.gmra.mxu1 %v6243_v60  ;;  %v4095_v49 = vor.u32 %v4567_v21, %v4094_v20  ;;  %v3935_v39 = vor.u32 %v4527_v30, %v3934_v29  ;;  %v4158_v27 = vld [vmem:[%s6642_s5 + $0x308] sm:$0xf]  ;;  %v4583_v22 = vld [vmem:[%s6642_s5 + $0x314] sm:$0xf0]  ;;  %v4609_v20 = vld [vmem:[%s6642_s5 + $0x3ec] sm:$0xf] }
 0x1c3   :  { %v1816_v46 = vadd.f32 %v1808_v2, %v1802_v34  ;;  %v1817_v47 = vadd.f32 %v1809_v26, %v1803_v35  ;;  %2708 = vmatpush.bf16.msra.mxu0 %v3887_v9  ;;  %2721 = vmatpush.bf16.msra.mxu1 %v4015_v12  ;;  %v4222_v2 = vld [vmem:[%s6642_s5 + $0x388] sm:$0xf]  ;;  %v4599_v26 = vld [vmem:[%s6642_s5 + $0x394] sm:$0xf0]  ;;  %v4272_v21 = vld [vmem:[%s6642_s5 + $0x3f8] sm:$0xf0] }
 0x1c4   :  { %v3806_v9 = vld [vmem:[%s6642_s5 + $0x48] sm:$0xf]  ;;  %v4495_v12 = vld [vmem:[%s6642_s5 + $0x54] sm:$0xf0]  ;;  %v4223_v61 = vor.u32 %v4599_v26, %v4222_v2  ;;  %v4537_v29 = vld [vmem:[%s6642_s5 + $0x1ac] sm:$0xf] }
 0x1c5   :  { %v1820_v57 = vmax.f32 %v1816_v46, 0.0  ;;  %v1821_v58 = vmax.f32 %v1817_v47, 0.0  ;;  %v4206_v34 = vld [vmem:[%s6642_s5 + $0x368] sm:$0xf]  ;;  %v4595_v35 = vld [vmem:[%s6642_s5 + $0x374] sm:$0xf0]  ;;  %v3807_v36 = vor.u32 %v4495_v12, %v3806_v9  ;;  %v4079_v46 = vor.u32 %v4563_v33, %v4078_v31 }
 0x1c6   :  { %v4207_v47 = vor.u32 %v4595_v35, %v4206_v34  ;;  %v4159_v9 = vor.u32 %v4583_v22, %v4158_v27  ;;  %v3856_v12 = vld [vmem:[%s6642_s5 + $0xb8] sm:$0xf0]  ;;  %v4573_v31 = vld [vmem:[%s6642_s5 + $0x2cc] sm:$0xf] }
 0x1c7   :  { %v6283_v0 = vpack.c.bf16 %v1820_v57, %v1820_v57  ;;  %v6285_v15 = vpack.c.bf16 %v1821_v58, %v1821_v58  ;;  %2709 = vmatpush.bf16.msra.mxu0 %v3871_v42  ;;  %2722 = vmatpush.bf16.msra.mxu1 %v3999_v48  ;;  %v3790_v42 = vld [vmem:[%s6642_s5 + $0x28] sm:$0xf]  ;;  %v4487_v58 = vld [vmem:[%s6642_s5 + $0x14] sm:$0xf0]  ;;  %v3984_v30 = vld [vmem:[%s6642_s5 + $0x1b8] sm:$0xf0] }
 0x1c8   :  { %v1785_v8 = vpop.f32.mrf.mxu2  ;;  %v1798_v13 = vpop.f32.mrf.mxu3  ;;  %v4062_v48 = vld [vmem:[%s6642_s5 + $0x248] sm:$0xf]  ;;  %v3791_v55 = vor.u32 %v4491_v37, %v3790_v42  ;;  %v4128_v33 = vld [vmem:[%s6642_s5 + $0x2d8] sm:$0xf0]  ;;  %v4605_v34 = vld [vmem:[%s6642_s5 + $0x3cc] sm:$0xf] }
 0x1c9   :  { %2638 = vmatmul.bf16.vlgmr.msra.gmra.mxu2 %v6283_v0  ;;  %2651 = vmatmul.bf16.vlgmr.msra.gmra.mxu3 %v6285_v15  ;;  %v3774_v57 = vld [vmem:[%s6642_s5 + $0x8] sm:$0xf]  ;;  %v4063_v53 = vor.u32 %v4559_v11, %v4062_v48  ;;  %v4555_v8 = vld [vmem:[%s6642_s5 + $0x234] sm:$0xf0]  ;;  %v4256_v35 = vld [vmem:[%s6642_s5 + $0x3d8] sm:$0xf0] }
 0x1ca   :  { %2734 = vmatpush.bf16.msra.mxu2 %v4143_v59  ;;  %2747 = vmatpush.bf16.msra.mxu3 %v4271_v62  ;;  %v3902_v59 = vld [vmem:[%s6642_s5 + $0x108] sm:$0xf]  ;;  %v4519_v62 = vld [vmem:[%s6642_s5 + $0x114] sm:$0xf0]  ;;  %v3775_v14 = vor.u32 %v4487_v58, %v3774_v57  ;;  %v4047_v52 = vor.u32 %v4555_v8, %v4046_v7  ;;  %v4501_v42 = vld [vmem:[%s6642_s5 + $0x8c] sm:$0xf] }
 0x1cb   :  { %2710 = vmatpush.bf16.msra.mxu0 %v3855_v63  ;;  %2723 = vmatpush.bf16.msra.mxu1 %v3983_v16  ;;  %v4513_v63 = vld [vmem:[%s6642_s5 + $0xec] sm:$0xf]  ;;  %v4191_v16 = vor.u32 %v4591_v50, %v4190_v5  ;;  %v4174_v13 = vld [vmem:[%s6642_s5 + $0x328] sm:$0xf]  ;;  %v3903_v17 = vor.u32 %v4519_v62, %v3902_v59  ;;  %v3840_v37 = vld [vmem:[%s6642_s5 + $0x98] sm:$0xf0] }
 0x1cc   :  { %v4175_v25 = vor.u32 %v4587_v32, %v4174_v13  ;;  %v4569_v48 = vld [vmem:[%s6642_s5 + $0x2ac] sm:$0xf]  ;;  %v4112_v11 = vld [vmem:[%s6642_s5 + $0x2b8] sm:$0xf0] }
 0x1cd   :  { %v4601_v5 = vld [vmem:[%s6642_s5 + $0x3ac] sm:$0xf]  ;;  %v4240_v50 = vld [vmem:[%s6642_s5 + $0x3b8] sm:$0xf0] }
 0x1ce   :  { %2735 = vmatpush.bf16.msra.mxu2 %v4127_v18  ;;  %2748 = vmatpush.bf16.msra.mxu3 %v4255_v54  ;;  %v3891_v18 = vor.u32 %v4513_v63, %v3888_v45  ;;  %v4019_v54 = vor.u32 %v4545_v3, %v4016_v6  ;;  %v4497_v57 = vld [vmem:[%s6642_s5 + $0x6c] sm:$0xf]  ;;  %v3824_v58 = vld [vmem:[%s6642_s5 + $0x78] sm:$0xf0]  ;;  %v4115_v63 = vor.u32 %v4569_v48, %v4112_v11 }
 0x1cf   :  { %2711 = vmatpush.bf16.msra.mxu0 %v3839_v1  ;;  %2724 = vmatpush.bf16.msra.mxu1 %v3967_v51  ;;  %v3872_v1 = vld [vmem:[%s6642_s5 + $0xd8] sm:$0xf0]  ;;  %v4541_v51 = vld [vmem:[%s6642_s5 + $0x1cc] sm:$0xf]  ;;  %v4243_v45 = vor.u32 %v4601_v5, %v4240_v50  ;;  %v3827_v7 = vor.u32 %v4497_v57, %v3824_v58  ;;  %v1954_v5 = vld [vmem:[%s6643_s6] sm:$0xf] }
 0x1d0   :  { %v3875_v2 = vor.u32 %v4509_v19, %v3872_v1  ;;  %v4003_v26 = vor.u32 %v4541_v51, %v4000_v38  ;;  %v4529_v59 = vld [vmem:[%s6642_s5 + $0x16c] sm:$0xf]  ;;  %v3952_v62 = vld [vmem:[%s6642_s5 + $0x178] sm:$0xf0]  ;;  %v1956_v50 = vperm.slane %v1954_v5, 0 }
 0x1d1   :  { %v4597_v3 = vld [vmem:[%s6642_s5 + $0x38c] sm:$0xf]  ;;  %v4224_v6 = vld [vmem:[%s6642_s5 + $0x398] sm:$0xf0]  ;;  %v3955_v8 = vor.u32 %v4529_v59, %v3952_v62 }
 0x1d2   :  { %2736 = vmatpush.bf16.msra.mxu2 %v4111_v23  ;;  %2749 = vmatpush.bf16.msra.mxu3 %v4239_v44  ;;  %v4577_v23 = vld [vmem:[%s6642_s5 + $0x2ec] sm:$0xf]  ;;  %v4144_v44 = vld [vmem:[%s6642_s5 + $0x2f8] sm:$0xf0] }
 0x1d3   :  { %2664 = vmatmul.bf16.vlgmr.msrb.gmra.mxu0 %v6241_v28  ;;  %2677 = vmatmul.bf16.vlgmr.msrb.gmra.mxu1 %v6243_v60  ;;  %v4493_v13 = vld [vmem:[%s6642_s5 + $0x4c] sm:$0xf]  ;;  %v3808_v32 = vld [vmem:[%s6642_s5 + $0x58] sm:$0xf0] }
 0x1d4   :  { %2712 = vmatpush.bf16.msra.mxu0 %v3823_v10  ;;  %2725 = vmatpush.bf16.msra.mxu1 %v3951_v4  ;;  %v4505_v10 = vld [vmem:[%s6642_s5 + $0xac] sm:$0xf]  ;;  %v4031_v4 = vor.u32 %v4551_v24, %v4030_v43  ;;  %v4080_v1 = vld [vmem:[%s6642_s5 + $0x278] sm:$0xf0] }
 0x1d5   :  { %v4561_v19 = vld [vmem:[%s6642_s5 + $0x26c] sm:$0xf]  ;;  %v3792_v24 = vld [vmem:[%s6642_s5 + $0x38] sm:$0xf0] }
 0x1d6   :  { %2737 = vmatpush.bf16.msra.mxu2 %v4095_v49  ;;  %2750 = vmatpush.bf16.msra.mxu3 %v4223_v61  ;;  %v4147_v49 = vor.u32 %v4577_v23, %v4144_v44  ;;  %v4275_v61 = vor.u32 %v4609_v20, %v4272_v21  ;;  %v4593_v51 = vld [vmem:[%s6642_s5 + $0x36c] sm:$0xf]  ;;  %v3920_v22 = vld [vmem:[%s6642_s5 + $0x138] sm:$0xf0]  ;;  %v4083_v23 = vor.u32 %v4561_v19, %v4080_v1 }
 0x1d7   :  { %v4489_v43 = vld [vmem:[%s6642_s5 + $0x2c] sm:$0xf]  ;;  %v4064_v21 = vld [vmem:[%s6642_s5 + $0x258] sm:$0xf0] }
 0x1d8   :  { %2713 = vmatpush.bf16.msra.mxu0 %v3807_v36  ;;  %2726 = vmatpush.bf16.msra.mxu1 %v3935_v39  ;;  %v3859_v36 = vor.u32 %v4505_v10, %v3856_v12  ;;  %v3987_v39 = vor.u32 %v4537_v29, %v3984_v30  ;;  %v4521_v27 = vld [vmem:[%s6642_s5 + $0x12c] sm:$0xf]  ;;  %v3795_v10 = vor.u32 %v4489_v43, %v3792_v24  ;;  %v3776_v12 = vld [vmem:[%s6642_s5 + $0x18] sm:$0xf0] }
 0x1d9   :  { %2690 = vmatmul.bf16.vlgmr.msrb.gmra.mxu2 %v6283_v0  ;;  %2703 = vmatmul.bf16.vlgmr.msrb.gmra.mxu3 %v6285_v15  ;;  %v4557_v20 = vld [vmem:[%s6642_s5 + $0x24c] sm:$0xf]  ;;  %v3904_v30 = vld [vmem:[%s6642_s5 + $0x118] sm:$0xf0] }
 0x1da   :  { %2738 = vmatpush.bf16.msra.mxu2 %v4079_v46  ;;  %2751 = vmatpush.bf16.msra.mxu3 %v4207_v47  ;;  %v4131_v46 = vor.u32 %v4573_v31, %v4128_v33  ;;  %v4259_v47 = vor.u32 %v4605_v34, %v4256_v35  ;;  %v4517_v29 = vld [vmem:[%s6642_s5 + $0x10c] sm:$0xf]  ;;  %v4048_v33 = vld [vmem:[%s6642_s5 + $0x238] sm:$0xf0] }
 0x1db   :  { %v4553_v31 = vld [vmem:[%s6642_s5 + $0x22c] sm:$0xf]  ;;  %v4176_v35 = vld [vmem:[%s6642_s5 + $0x338] sm:$0xf0] }
 0x1dc   :  { %2714 = vmatpush.bf16.msra.mxu0 %v3791_v55  ;;  %2727 = vmatpush.bf16.msra.mxu1 %v3919_v56  ;;  %v3843_v55 = vor.u32 %v4501_v42, %v3840_v37  ;;  %v3971_v56 = vor.u32 %v4533_v40, %v3968_v41  ;;  %v4585_v34 = vld [vmem:[%s6642_s5 + $0x32c] sm:$0xf]  ;;  %v4051_v42 = vor.u32 %v4553_v31, %v4048_v33  ;;  %v4032_v41 = vld [vmem:[%s6642_s5 + $0x218] sm:$0xf0] }
 0x1dd   :  { %v4179_v37 = vor.u32 %v4585_v34, %v4176_v35  ;;  %v4549_v40 = vld [vmem:[%s6642_s5 + $0x20c] sm:$0xf] }
 0x1de   :  { %2739 = vmatpush.bf16.msra.mxu2 %v4063_v53  ;;  %2752 = vmatpush.bf16.msra.mxu3 %v4191_v16  ;;  %v4565_v53 = vld [vmem:[%s6642_s5 + $0x28c] sm:$0xf]  ;;  %v4096_v16 = vld [vmem:[%s6642_s5 + $0x298] sm:$0xf0]  ;;  %v4035_v48 = vor.u32 %v4549_v40, %v4032_v41 }
 0x1e0   :  { %2715 = vmatpush.bf16.msra.mxu0 %v3775_v14  ;;  %2728 = vmatpush.bf16.msra.mxu1 %v3903_v17  ;;  %v4525_v14 = vld [vmem:[%s6642_s5 + $0x14c] sm:$0xf]  ;;  %v3936_v17 = vld [vmem:[%s6642_s5 + $0x158] sm:$0xf0] }
 0x1e1   :  { %v3939_v38 = vor.u32 %v4525_v14, %v3936_v17 }
 0x1e2   :  { %2740 = vmatpush.bf16.msra.mxu2 %v4047_v52  ;;  %2753 = vmatpush.bf16.msra.mxu3 %v4175_v25  ;;  %v4208_v52 = vld [vmem:[%s6642_s5 + $0x378] sm:$0xf0]  ;;  %v3811_v25 = vor.u32 %v4493_v13, %v3808_v32 }
 0x1e3   :  { %2716 = vmatmul.bf16.vlgmr.msra.gmra.mxu0 %v6241_v28  ;;  %2729 = vmatmul.bf16.vlgmr.msra.gmra.mxu1 %v6243_v60  ;;  %v4211_v44 = vor.u32 %v4593_v51, %v4208_v52  ;;  %v1957_v51 = vperm.slane %v1954_v5, 1  ;;  %v1958_v52 = vperm.slane %v1954_v5, 2 }
 0x1e4   :  { %2760 = vmatpush.bf16.msrb.mxu0 %v3891_v18  ;;  %2773 = vmatpush.bf16.msrb.mxu1 %v4019_v54  ;;  %v4099_v18 = vor.u32 %v4565_v53, %v4096_v16  ;;  %v4227_v54 = vor.u32 %v4597_v3, %v4224_v6 }
 0x1e6   :  { %2741 = vmatpush.bf16.msra.mxu2 %v4031_v4  ;;  %2754 = vmatpush.bf16.msra.mxu3 %v4159_v9  ;;  %v3923_v4 = vor.u32 %v4521_v27, %v3920_v22  ;;  %v4485_v9 = vld [vmem:[%s6642_s5 + $0xc] sm:$0xf]  ;;  %v1959_v27 = vperm.slane %v1954_v5, 3 }
 0x1e8   :  { %2761 = vmatpush.bf16.msrb.mxu0 %v3875_v2  ;;  %2774 = vmatpush.bf16.msrb.mxu1 %v4003_v26  ;;  %v4589_v2 = vld [vmem:[%s6642_s5 + $0x34c] sm:$0xf]  ;;  %v4192_v26 = vld [vmem:[%s6642_s5 + $0x358] sm:$0xf0] }
 0x1e9   :  { %2742 = vmatmul.bf16.vlgmr.msra.gmra.mxu2 %v6283_v0  ;;  %2755 = vmatmul.bf16.vlgmr.msra.gmra.mxu3 %v6285_v15 }
 0x1ea   :  { %2786 = vmatpush.bf16.msrb.mxu2 %v4147_v49  ;;  %2799 = vmatpush.bf16.msrb.mxu3 %v4275_v61  ;;  %v4067_v49 = vor.u32 %v4557_v20, %v4064_v21  ;;  %v4195_v61 = vor.u32 %v4589_v2, %v4192_v26 }
 0x1ec   :  { %2762 = vmatpush.bf16.msrb.mxu0 %v3859_v36  ;;  %2775 = vmatpush.bf16.msrb.mxu1 %v3987_v39  ;;  %v3779_v36 = vor.u32 %v4485_v9, %v3776_v12  ;;  %v3907_v39 = vor.u32 %v4517_v29, %v3904_v30 }
 0x1ee   :  { %2787 = vmatpush.bf16.msrb.mxu2 %v4131_v46  ;;  %2800 = vmatpush.bf16.msrb.mxu3 %v4259_v47  ;;  %v4581_v46 = vld [vmem:[%s6642_s5 + $0x30c] sm:$0xf]  ;;  %v4160_v47 = vld [vmem:[%s6642_s5 + $0x318] sm:$0xf0]  ;;  %s4640_s5 = smov [#allocation3]  }
 0x1ef   :  { %v4163_v11 = vor.u32 %v4581_v46, %v4160_v47  ;;  %s2825_s6 = sshll.u32 %s4640_s5, 4  ;;  %s2826_s6 = int_to_ptr.vmem [resolvable:$true] %s2825_s6 }
 0x1f0   :  { %2763 = vmatpush.bf16.msrb.mxu0 %v3843_v55  ;;  %2776 = vmatpush.bf16.msrb.mxu1 %v3971_v56 }
 0x1f2   :  { %2788 = vmatpush.bf16.msrb.mxu2 %v4115_v63  ;;  %2801 = vmatpush.bf16.msrb.mxu3 %v4243_v45 }
 0x1f4   :  { %2764 = vmatpush.bf16.msrb.mxu0 %v3827_v7  ;;  %2777 = vmatpush.bf16.msrb.mxu1 %v3955_v8 }
 0x1f6   :  { %2789 = vmatpush.bf16.msrb.mxu2 %v4099_v18  ;;  %2802 = vmatpush.bf16.msrb.mxu3 %v4227_v54 }
 0x1f8   :  { %2765 = vmatpush.bf16.msrb.mxu0 %v3811_v25  ;;  %2778 = vmatpush.bf16.msrb.mxu1 %v3939_v38 }
 0x1fa   :  { %2790 = vmatpush.bf16.msrb.mxu2 %v4083_v23  ;;  %2803 = vmatpush.bf16.msrb.mxu3 %v4211_v44 }
 0x1fc   :  { %2766 = vmatpush.bf16.msrb.mxu0 %v3795_v10  ;;  %2779 = vmatpush.bf16.msrb.mxu1 %v3923_v4 }
 0x1fe   :  { %2791 = vmatpush.bf16.msrb.mxu2 %v4067_v49  ;;  %2804 = vmatpush.bf16.msrb.mxu3 %v4195_v61 }
 0x200   :  { %2767 = vmatpush.bf16.msrb.mxu0 %v3779_v36  ;;  %2780 = vmatpush.bf16.msrb.mxu1 %v3907_v39 }
 0x202   :  { %2792 = vmatpush.bf16.msrb.mxu2 %v4051_v42  ;;  %2805 = vmatpush.bf16.msrb.mxu3 %v4179_v37 }
 0x203   :  { %2768 = vmatmul.bf16.vlgmr.msrb.gmra.mxu0 %v6241_v28  ;;  %2781 = vmatmul.bf16.vlgmr.msrb.gmra.mxu1 %v6243_v60 }
 0x206   :  { %2793 = vmatpush.bf16.msrb.mxu2 %v4035_v48  ;;  %2806 = vmatpush.bf16.msrb.mxu3 %v4163_v11 }
 0x209   :  { %2794 = vmatmul.bf16.vlgmr.msrb.gmra.mxu2 %v6283_v0  ;;  %2807 = vmatmul.bf16.vlgmr.msrb.gmra.mxu3 %v6285_v15 }
 0x23f   :  { %v2613_v55 = vpop.f32.mrf.mxu0  ;;  %v2626_v56 = vpop.f32.mrf.mxu1 }
 0x240   :  { %v2614_v57 = vadd.f32 %v2613_v55, %v1956_v50 }
 0x242   :  { %v2627_v58 = vadd.f32 %v2626_v56, %v2614_v57 }
 0x247   :  { %v2615_v59 = vpop.f32.mrf.mxu0  ;;  %v2628_v62 = vpop.f32.mrf.mxu1 }
 0x24c   :  { %v2639_v28 = vpop.f32.mrf.mxu2  ;;  %v2652_v63 = vpop.f32.mrf.mxu3 }
 0x24d   :  { %v2640_v26 = vadd.f32 %v2639_v28, %v2627_v58 }
 0x24f   :  { %v2653_v30 = vadd.f32 %v2652_v63, %v2640_v26 }
 0x250   :  { %v2665_v60 = vpop.f32.mrf.mxu0  ;;  %v2678_v45 = vpop.f32.mrf.mxu1 }
 0x251   :  { %v2666_v43 = vadd.f32 %v2665_v60, %v1957_v51  ;;  %v2812_v34 = vmax.f32 %v2653_v30, 0.0 }
 0x253   :  { %v2679_v22 = vadd.f32 %v2678_v45, %v2666_v43 }
 0x254   :  { %v2641_v53 = vpop.f32.mrf.mxu2  ;;  %v2654_v16 = vpop.f32.mrf.mxu3 }
 0x258   :  { %v2667_v0 = vpop.f32.mrf.mxu0  ;;  %v2680_v3 = vpop.f32.mrf.mxu1 }
 0x25c   :  { %v2691_v15 = vpop.f32.mrf.mxu2  ;;  %v2704_v6 = vpop.f32.mrf.mxu3 }
 0x25d   :  { %v2692_v23 = vadd.f32 %v2691_v15, %v2679_v22 }
 0x25f   :  { %v2705_v4 = vadd.f32 %v2704_v6, %v2692_v23 }
 0x260   :  { %v2717_v7 = vpop.f32.mrf.mxu0  ;;  %v2730_v8 = vpop.f32.mrf.mxu1 }
 0x261   :  { %v2718_v24 = vadd.f32 %v2717_v7, %v1958_v52  ;;  %v2813_v31 = vmax.f32 %v2705_v4, 0.0 }
 0x263   :  { %v2731_v44 = vadd.f32 %v2730_v8, %v2718_v24  ;;  %v2816_v39 = vmax.f32 %v2812_v34, %v2813_v31 }
 0x264   :  { %v2693_v13 = vpop.f32.mrf.mxu2  ;;  %v2706_v32 = vpop.f32.mrf.mxu3 }
 0x268   :  { %v2719_v14 = vpop.f32.mrf.mxu0  ;;  %v2732_v17 = vpop.f32.mrf.mxu1 }
 0x26c   :  { %v2743_v18 = vpop.f32.mrf.mxu2  ;;  %v2756_v54 = vpop.f32.mrf.mxu3 }
 0x26d   :  { %v2744_v10 = vadd.f32 %v2743_v18, %v2731_v44 }
 0x26f   :  { %v2757_v49 = vadd.f32 %v2756_v54, %v2744_v10 }
 0x271   :  { %v2814_v35 = vmax.f32 %v2757_v49, 0.0 }
 0x274   :  { %v2745_v19 = vpop.f32.mrf.mxu2  ;;  %v2758_v1 = vpop.f32.mrf.mxu3 }
 0x280   :  { %v2769_v25 = vpop.f32.mrf.mxu0  ;;  %v2782_v38 = vpop.f32.mrf.mxu1 }
 0x281   :  { %v2770_v20 = vadd.f32 %v2769_v25, %v1959_v27 }
 0x283   :  { %v2783_v9 = vadd.f32 %v2782_v38, %v2770_v20 }
 0x288   :  { %v2771_v21 = vpop.f32.mrf.mxu0  ;;  %v2784_v2 = vpop.f32.mrf.mxu1 }
 0x28c   :  { %v2795_v12 = vpop.f32.mrf.mxu2  ;;  %v2808_v29 = vpop.f32.mrf.mxu3 }
 0x28d   :  { %v2796_v61 = vadd.f32 %v2795_v12, %v2783_v9 }
 0x28f   :  { %v2809_v33 = vadd.f32 %v2808_v29, %v2796_v61 }
 0x291   :  { %v2815_v36 = vmax.f32 %v2809_v33, 0.0 }
 0x293   :  { %v2817_v42 = vmax.f32 %v2814_v35, %v2815_v36 }
 0x294   :  { %v2797_v37 = vpop.f32.mrf.mxu2  ;;  %v2810_v40 = vpop.f32.mrf.mxu3 }
 0x295   :  { %v2818_v41 = vmax.f32 %v2816_v39, %v2817_v42 }
 0x297   :  { %2819 = vst [vmem:[#allocation3] sm:$0x3] %v2818_v41 }
 0x298   :  { %2830 = dma.vmem_to_hbm [thread:$0]  %s2826_s6, 32, %s2828_s30, [#allocation4]  }
 0x299   :  { %4638 = dma.done.wait [#allocation4], 32  }
 0x29a   :  { %4639 = vsyncadd [#allocation4], 4294967264 }
 0x29b   :  { %2835 = vsyncpa [#allocation4], 1 }

</bundles_post_ra>
